<compile_context>
chip_gen: v5e
topology: v5e:2x2
jax: 0.10.0
libtpu: 0.0.40
codegen_flags: <defaults>
</compile_context>

<pallas_src>
import functools
import math

import jax
import jax.numpy as jnp
from jax import lax
from jax.experimental import pallas as pl
from jax.experimental.pallas import tpu as pltpu

_NEG_INF = -1e9  # same mask-fill value as the reference (fully-masked rows -> uniform)
_VMEM_LIMIT = 64 * 1024 * 1024


def _full_spec(x):
    nd = x.ndim
    return pl.BlockSpec(x.shape, lambda *_, _nd=nd: (0,) * _nd)


# ----------------------------------------------------------------------------
# Fused MHA + residual + LayerNorm kernel (flash-style over KV tiles)
# ----------------------------------------------------------------------------
def mha_ln_kernel(*refs, num_head, key_dim, value_dim, eps, has_mask, causal,
                  block_q, block_kv):
    if has_mask:
        (xq_ref, xkv_ref, mask_ref,
         wq_ref, bq_ref, wk_ref, bk_ref, wv_ref, bv_ref, wo_ref, bo_ref,
         g_ref, bln_ref, o_ref,
         q_scr, k_scr, v_scr, m_scr, l_scr, acc_scr, ctx_scr) = refs
    else:
        (xq_ref, xkv_ref,
         wq_ref, bq_ref, wk_ref, bk_ref, wv_ref, bv_ref, wo_ref, bo_ref,
         g_ref, bln_ref, o_ref,
         q_scr, k_scr, v_scr, m_scr, l_scr, acc_scr, ctx_scr) = refs
        mask_ref = None

    ki = pl.program_id(2)
    f32 = jnp.float32
    cdt = q_scr.dtype  # MXU operand dtype (bf16 in the perf config)
    scale = 1.0 / math.sqrt(key_dim)

    @pl.when(ki == 0)
    def _init():
        m_scr[...] = jnp.full(m_scr.shape, -jnp.inf, f32)
        l_scr[...] = jnp.zeros(l_scr.shape, f32)
        acc_scr[...] = jnp.zeros(acc_scr.shape, f32)
        # One lane-dense [tq, D] @ [D, H*dk] projection on the MXU, then packed
        # per head into VMEM scratch slices (no concatenate / per-head matmuls).
        q = jnp.dot(xq_ref[0], wq_ref[...], preferred_element_type=f32) + bq_ref[...]
        for h in range(num_head):
            q_scr[h] = (q[:, h * key_dim:(h + 1) * key_dim] * scale).astype(cdt)

    # K / V projections for this KV tile (lane-dense MXU matmuls), packed per head.
    xkv = xkv_ref[0]
    k = jnp.dot(xkv, wk_ref[...], preferred_element_type=f32) + bk_ref[...]
    v = jnp.dot(xkv, wv_ref[...], preferred_element_type=f32) + bv_ref[...]
    for h in range(num_head):
        k_scr[h] = k[:, h * key_dim:(h + 1) * key_dim].astype(cdt)
        v_scr[h] = v[:, h * value_dim:(h + 1) * value_dim].astype(cdt)

    # Head-batched scores on the MXU (scale already folded into q).
    s = jnp.einsum('hqd,hkd->hqk', q_scr[...], k_scr[...],
                   preferred_element_type=f32)

    if has_mask:
        s = jnp.where(mask_ref[0] == 0, _NEG_INF, s)
    elif causal:
        qi = pl.program_id(1)
        row = lax.broadcasted_iota(jnp.int32, (block_q, block_kv), 0) + qi * block_q
        col = lax.broadcasted_iota(jnp.int32, (block_q, block_kv), 1) + ki * block_kv
        s = jnp.where(col > row, _NEG_INF, s)

    # Online (flash-style) softmax across KV tiles, all in f32.
    m_prev = m_scr[...]
    m_new = jnp.maximum(m_prev, jnp.max(s, axis=-1, keepdims=True))
    alpha = jnp.exp(m_prev - m_new)
    p = jnp.exp(s - m_new)
    l_scr[...] = alpha * l_scr[...] + jnp.sum(p, axis=-1, keepdims=True)
    acc_scr[...] = alpha * acc_scr[...] + jnp.einsum(
        'hqk,hkd->hqd', p.astype(cdt), v_scr[...], preferred_element_type=f32)
    m_scr[...] = m_new

    @pl.when(ki == pl.num_programs(2) - 1)
    def _epilogue():
        # Normalize with the EUP reciprocal (approx path -> essentially free slot).
        ctx = acc_scr[...] * pl.reciprocal(l_scr[...], approx=True)  # [H, tq, dv]
        for h in range(num_head):
            ctx_scr[:, h * value_dim:(h + 1) * value_dim] = ctx[h].astype(cdt)
        attn = jnp.dot(ctx_scr[...], wo_ref[...],
                       preferred_element_type=f32) + bo_ref[...]
        # Fused residual add + LayerNorm epilogue (query block == residual).
        z = attn + xq_ref[0].astype(f32)
        mean = jnp.mean(z, axis=-1, keepdims=True)
        var = jnp.mean((z - mean) ** 2, axis=-1, keepdims=True)
        zn = (z - mean) * lax.rsqrt(var + eps)
        o_ref[0] = (zn * g_ref[...] + bln_ref[...]).astype(o_ref.dtype)
        # TODO(synk): dropout after LayerNorm omitted (identity in eval mode).


def mha_ln_pallas(x_q, x_kv, mask, p, gamma, beta, *, num_head, key_dim, value_dim,
                  causal=False, eps=1e-5, block_q=128, block_kv=128):
    B, S, D = x_q.shape
    Skv = x_kv.shape[1]
    HV = num_head * value_dim
    tq = min(block_q, S)
    tk = min(block_kv, Skv)
    assert S % tq == 0 and Skv % tk == 0
    cdt = x_q.dtype
    has_mask = mask is not None

    kernel = functools.partial(
        mha_ln_kernel, num_head=num_head, key_dim=key_dim, value_dim=value_dim,
        eps=eps, has_mask=has_mask, causal=causal, block_q=tq, block_kv=tk)

    in_specs = [
        pl.BlockSpec((1, tq, D), lambda b, qi, ki: (b, qi, 0)),
        pl.BlockSpec((1, tk, D), lambda b, qi, ki: (b, ki, 0)),
    ]
    args = [x_q, x_kv]
    if has_mask:
        in_specs.append(pl.BlockSpec((1, tq, tk), lambda b, qi, ki: (b, qi, ki)))
        args.append(mask)
    weights = [p['wq'], p['bq'], p['wk'], p['bk'], p['wv'], p['bv'],
               p['wo'], p['bo'], gamma, beta]
    # NOTE: weights stay resident (constant index map); for very large model_dim
    # a K-tile axis over D could be added the same way as in ffn_ln_pallas.
    in_specs += [_full_spec(w) for w in weights]
    args += weights

    return pl.pallas_call(
        kernel,
        out_shape=jax.ShapeDtypeStruct((B, S, D), cdt),
        grid=(B, S // tq, Skv // tk),
        in_specs=in_specs,
        out_specs=pl.BlockSpec((1, tq, D), lambda b, qi, ki: (b, qi, 0)),
        scratch_shapes=[
            pltpu.VMEM((num_head, tq, key_dim), cdt),        # scaled Q, head-packed
            pltpu.VMEM((num_head, tk, key_dim), cdt),        # K tile, head-packed
            pltpu.VMEM((num_head, tk, value_dim), cdt),      # V tile, head-packed
            pltpu.VMEM((num_head, tq, 1), jnp.float32),      # running max
            pltpu.VMEM((num_head, tq, 1), jnp.float32),      # running denom
            pltpu.VMEM((num_head, tq, value_dim), jnp.float32),  # context accum
            pltpu.VMEM((tq, HV), cdt),                       # packed ctx for Wo
        ],
        compiler_params=pltpu.CompilerParams(
            dimension_semantics=("parallel", "parallel", "arbitrary"),
            vmem_limit_bytes=_VMEM_LIMIT),
    )(*args)


# ----------------------------------------------------------------------------
# Fused FFN (hidden-dim K-tiled) + residual + LayerNorm kernel
# ----------------------------------------------------------------------------
def ffn_ln_kernel(x_ref, w1_ref, b1_ref, w2_ref, b2_ref, g_ref, bln_ref,
                  o_ref, acc_ref, *, eps):
    kh = pl.program_id(2)

    @pl.when(kh == 0)
    def _init():
        acc_ref[...] = jnp.zeros(acc_ref.shape, jnp.float32)

    x = x_ref[0]                                                # [tm, D]
    h = jnp.dot(x, w1_ref[...], preferred_element_type=jnp.float32) + b1_ref[...]
    h = jnp.maximum(h, 0.0).astype(x.dtype)
    # TODO(synk): FeedForward's internal dropout omitted (identity in eval mode).
    acc_ref[...] += jnp.dot(h, w2_ref[...], preferred_element_type=jnp.float32)

    @pl.when(kh == pl.num_programs(2) - 1)
    def _epilogue():
        y = acc_ref[...] + b2_ref[...]
        z = y + x_ref[0].astype(jnp.float32)                    # fused residual
        mean = jnp.mean(z, axis=-1, keepdims=True)
        var = jnp.mean((z - mean) ** 2, axis=-1, keepdims=True)
        zn = (z - mean) * lax.rsqrt(var + eps)
        o_ref[0] = (zn * g_ref[...] + bln_ref[...]).astype(o_ref.dtype)


def ffn_ln_pallas(x, p, gamma, beta, *, eps=1e-5, block_rows=128, block_hidden=128):
    B, S, D = x.shape
    Dh = p['w1'].shape[1]
    tm = min(block_rows, S)
    th = min(block_hidden, Dh)
    assert S % tm == 0 and Dh % th == 0
    cdt = x.dtype

    return pl.pallas_call(
        functools.partial(ffn_ln_kernel, eps=eps),
        out_shape=jax.ShapeDtypeStruct((B, S, D), cdt),
        grid=(B, S // tm, Dh // th),
        in_specs=[
            pl.BlockSpec((1, tm, D), lambda b, r, k: (b, r, 0)),
            pl.BlockSpec((D, th), lambda b, r, k: (0, k)),
            pl.BlockSpec((1, th), lambda b, r, k: (0, k)),
            pl.BlockSpec((th, D), lambda b, r, k: (k, 0)),
            _full_spec(p['b2']), _full_spec(gamma), _full_spec(beta),
        ],
        out_specs=pl.BlockSpec((1, tm, D), lambda b, r, k: (b, r, 0)),
        scratch_shapes=[pltpu.VMEM((tm, D), jnp.float32)],
        compiler_params=pltpu.CompilerParams(
            dimension_semantics=("parallel", "parallel", "arbitrary"),
            vmem_limit_bytes=_VMEM_LIMIT),
    )(x, p['w1'], p['b1'], p['w2'], p['b2'], gamma, beta)


# ----------------------------------------------------------------------------
# DecoderLayer forward (all heavy lifting inside the two fused kernels)
# ----------------------------------------------------------------------------
def decoder_layer(dec, enc, src_mask, tgt_mask, params, *, num_head, key_dim,
                  value_dim, eps=1e-5, causal_target_mask=False):
    # self attention + residual + LN (dropout1 = identity, eval mode)
    t = mha_ln_pallas(dec, dec,
                      None if causal_target_mask else tgt_mask,
                      params['self_attn'], params['ln1_g'], params['ln1_b'],
                      num_head=num_head, key_dim=key_dim, value_dim=value_dim,
                      causal=causal_target_mask, eps=eps)
    if enc is not None:
        # enc-dec attention + residual + LN; pass src_mask=None for all-visible
        # sources so the kernel skips masking entirely.
        t = mha_ln_pallas(t, enc, src_mask, params['enc_dec_attn'],
                          params['ln2_g'], params['ln2_b'],
                          num_head=num_head, key_dim=key_dim, value_dim=value_dim,
                          causal=False, eps=eps)
    # FFN + residual + LN
    t = ffn_ln_pallas(t, params['ffn'], params['ln3_g'], params['ln3_b'], eps=eps)
    return t


# ----------------------------------------------------------------------------
# Pure-JAX reference (mirrors the kernel's mixed-precision cast points)
# ----------------------------------------------------------------------------
def _mha_ref(x_q, x_kv, mask, p, num_head, key_dim, value_dim):
    cdt = x_q.dtype
    f32 = jnp.float32
    q = jnp.einsum('bsd,df->bsf', x_q, p['wq'], preferred_element_type=f32) + p['bq']
    k = jnp.einsum('bsd,df->bsf', x_kv, p['wk'], preferred_element_type=f32) + p['bk']
    v = jnp.einsum('bsd,df->bsf', x_kv, p['wv'], preferred_element_type=f32) + p['bv']
    B, S, _ = q.shape
    Skv = k.shape[1]
    scale = 1.0 / math.sqrt(key_dim)
    qh = (q.reshape(B, S, num_head, key_dim) * scale).astype(cdt)
    kh = k.reshape(B, Skv, num_head, key_dim).astype(cdt)
    vh = v.reshape(B, Skv, num_head, value_dim).astype(cdt)
    s = jnp.einsum('bqhd,bkhd->bhqk', qh, kh, preferred_element_type=f32)
    if mask is not None:
        s = jnp.where(mask[:, None] == 0, _NEG_INF, s)
    s = s - jnp.max(s, axis=-1, keepdims=True)
    pr = jnp.exp(s)
    pr = pr / jnp.sum(pr, axis=-1, keepdims=True)
    ctx = jnp.einsum('bhqk,bkhd->bqhd', pr.astype(cdt), vh,
                     preferred_element_type=f32)
    ctx = ctx.reshape(B, S, num_head * value_dim).astype(cdt)
    return jnp.einsum('bsf,fd->bsd', ctx, p['wo'], preferred_element_type=f32) + p['bo']


def _ln_ref(x, g, b, eps=1e-5):
    mean = jnp.mean(x, axis=-1, keepdims=True)
    var = jnp.mean((x - mean) ** 2, axis=-1, keepdims=True)
    return (x - mean) * lax.rsqrt(var + eps) * g + b


def _ffn_ref(x, p):
    cdt = x.dtype
    f32 = jnp.float32
    h = jnp.einsum('bsd,dh->bsh', x, p['w1'], preferred_element_type=f32) + p['b1']
    h = jnp.maximum(h, 0.0).astype(cdt)
    return jnp.einsum('bsh,hd->bsd', h, p['w2'], preferred_element_type=f32) + p['b2']


def _decoder_ref(dec, enc, src_mask, tgt_mask, params, num_head, key_dim,
                 value_dim, eps=1e-5):
    cdt = dec.dtype
    f32 = jnp.float32
    a = _mha_ref(dec, dec, tgt_mask, params['self_attn'], num_head, key_dim, value_dim)
    t = _ln_ref(a + dec.astype(f32), params['ln1_g'], params['ln1_b'], eps).astype(cdt)
    if enc is not None:
        a = _mha_ref(t, enc, src_mask, params['enc_dec_attn'], num_head, key_dim,
                     value_dim)
        t = _ln_ref(a + t.astype(f32), params['ln2_g'], params['ln2_b'], eps).astype(cdt)
    f = _ffn_ref(t, params['ffn'])
    t = _ln_ref(f + t.astype(f32), params['ln3_g'], params['ln3_b'], eps).astype(cdt)
    return t


# ----------------------------------------------------------------------------
# Deterministic parameter init (matmul weights in `dtype`, bias/LN params in f32)
# ----------------------------------------------------------------------------
def init_params(key, model_dim, key_dim, value_dim, hidden_dim, num_head, dtype):
    ks = iter(jax.random.split(key, 32))

    def dense(din, dout):
        w = (0.02 * jax.random.normal(next(ks), (din, dout), jnp.float32)).astype(dtype)
        b = 0.01 * jax.random.normal(next(ks), (1, dout), jnp.float32)
        return w, b

    def mha_params():
        wq, bq = dense(model_dim, num_head * key_dim)
        wk, bk = dense(model_dim, num_head * key_dim)
        wv, bv = dense(model_dim, num_head * value_dim)
        wo, bo = dense(num_head * value_dim, model_dim)
        return dict(wq=wq, bq=bq, wk=wk, bk=bk, wv=wv, bv=bv, wo=wo, bo=bo)

    def ln_params():
        g = 1.0 + 0.05 * jax.random.normal(next(ks), (1, model_dim), jnp.float32)
        b = 0.02 * jax.random.normal(next(ks), (1, model_dim), jnp.float32)
        return g, b

    self_attn = mha_params()
    enc_dec = mha_params()
    w1, b1 = dense(model_dim, hidden_dim)
    w2, b2 = dense(hidden_dim, model_dim)
    ln1_g, ln1_b = ln_params()
    ln2_g, ln2_b = ln_params()
    ln3_g, ln3_b = ln_params()
    return dict(self_attn=self_attn, enc_dec_attn=enc_dec,
                ffn=dict(w1=w1, b1=b1, w2=w2, b2=b2),
                ln1_g=ln1_g, ln1_b=ln1_b,
                ln2_g=ln2_g, ln2_b=ln2_b,
                ln3_g=ln3_g, ln3_b=ln3_b)


# ----------------------------------------------------------------------------
if __name__ == "__main__":
    # Lane-dense toy config: D = H*dk = 128, S multiple of the 128-wide tiles.
    B, S, model_dim = 2, 256, 128
    num_head, key_dim, value_dim, hidden_dim = 4, 32, 32, 256

    key = jax.random.PRNGKey(0)
    k_dec, k_enc, k_par = jax.random.split(key, 3)
    dec32 = jax.random.normal(k_dec, (B, S, model_dim), jnp.float32)
    enc32 = jax.random.normal(k_enc, (B, S, model_dim), jnp.float32)
    # target mask: causal; source mask: all visible -> pass None (kernel skips it).
    tgt_mask = jnp.broadcast_to(jnp.tril(jnp.ones((S, S), jnp.float32)), (B, S, S))
    src_mask = None

    # (dtype, use in-kernel causal mask instead of the dense DMA'd mask, tolerance)
    run_cfgs = [
        (jnp.float32, False, 5e-3),    # strict-ish check, dense mask path
        (jnp.bfloat16, True, 2e-2),    # perf config: bf16 operands, iota causal mask
    ]
    for dtype, causal, tol in run_cfgs:
        params = init_params(k_par, model_dim, key_dim, value_dim, hidden_dim,
                             num_head, dtype)
        dec = dec32.astype(dtype)
        enc = enc32.astype(dtype)

        out = decoder_layer(dec, enc, src_mask, tgt_mask, params,
                            num_head=num_head, key_dim=key_dim,
                            value_dim=value_dim, causal_target_mask=causal)
        out = jax.block_until_ready(out)

        ref = _decoder_ref(dec, enc, src_mask, tgt_mask, params,
                           num_head, key_dim, value_dim)
        assert out.shape == (B, S, model_dim)
        o32 = out.astype(jnp.float32)
        r32 = ref.astype(jnp.float32)
        max_err = float(jnp.max(jnp.abs(o32 - r32)))
        assert jnp.allclose(o32, r32, rtol=tol, atol=tol), (
            f"mismatch vs JAX reference (dtype={dtype}, max_err={max_err})")

    print("KERNEL_OK")
</pallas_src>

<mosaic_0001>
module attributes {stable_mosaic.version = 11 : i64} {
  func.func @mha_ln_kernel(%arg0: i32, %arg1: i32, %arg2: i32, %arg3: memref<1x128x128xf32, #tpu.memory_space<vmem>>, %arg4: memref<1x128x128xf32, #tpu.memory_space<vmem>>, %arg5: memref<1x128x128xf32, #tpu.memory_space<vmem>>, %arg6: memref<128x128xf32, #tpu.memory_space<vmem>>, %arg7: memref<1x128xf32, #tpu.memory_space<vmem>>, %arg8: memref<128x128xf32, #tpu.memory_space<vmem>>, %arg9: memref<1x128xf32, #tpu.memory_space<vmem>>, %arg10: memref<128x128xf32, #tpu.memory_space<vmem>>, %arg11: memref<1x128xf32, #tpu.memory_space<vmem>>, %arg12: memref<128x128xf32, #tpu.memory_space<vmem>>, %arg13: memref<1x128xf32, #tpu.memory_space<vmem>>, %arg14: memref<1x128xf32, #tpu.memory_space<vmem>>, %arg15: memref<1x128xf32, #tpu.memory_space<vmem>>, %arg16: memref<1x128x128xf32, #tpu.memory_space<vmem>>, %arg17: memref<4x128x32xf32, #tpu.memory_space<vmem>>, %arg18: memref<4x128x32xf32, #tpu.memory_space<vmem>>, %arg19: memref<4x128x32xf32, #tpu.memory_space<vmem>>, %arg20: memref<4x128x1xf32, #tpu.memory_space<vmem>>, %arg21: memref<4x128x1xf32, #tpu.memory_space<vmem>>, %arg22: memref<4x128x32xf32, #tpu.memory_space<vmem>>, %arg23: memref<128x128xf32, #tpu.memory_space<vmem>>) attributes {dimension_semantics = [#tpu.dimension_semantics<parallel>, #tpu.dimension_semantics<parallel>, #tpu.dimension_semantics<arbitrary>], iteration_bounds = array<i64: 2, 2, 2>, scalar_prefetch = 0 : i64, scratch_operands = 7 : i64, tpu.core_type = #tpu.core_type<tc>, window_params = [{transform_indices = @transform_0, window_bounds = array<i64: 1, 128, 128>}, {transform_indices = @transform_1, window_bounds = array<i64: 1, 128, 128>}, {transform_indices = @transform_2, window_bounds = array<i64: 1, 128, 128>}, {pipeline_mode = #tpu.pipeline_mode<synchronous>, transform_indices = @transform_3, window_bounds = array<i64: 128, 128>}, {pipeline_mode = #tpu.pipeline_mode<synchronous>, transform_indices = @transform_4, window_bounds = array<i64: 1, 128>}, {pipeline_mode = #tpu.pipeline_mode<synchronous>, transform_indices = @transform_5, window_bounds = array<i64: 128, 128>}, {pipeline_mode = #tpu.pipeline_mode<synchronous>, transform_indices = @transform_6, window_bounds = array<i64: 1, 128>}, {pipeline_mode = #tpu.pipeline_mode<synchronous>, transform_indices = @transform_7, window_bounds = array<i64: 128, 128>}, {pipeline_mode = #tpu.pipeline_mode<synchronous>, transform_indices = @transform_8, window_bounds = array<i64: 1, 128>}, {pipeline_mode = #tpu.pipeline_mode<synchronous>, transform_indices = @transform_9, window_bounds = array<i64: 128, 128>}, {pipeline_mode = #tpu.pipeline_mode<synchronous>, transform_indices = @transform_10, window_bounds = array<i64: 1, 128>}, {pipeline_mode = #tpu.pipeline_mode<synchronous>, transform_indices = @transform_11, window_bounds = array<i64: 1, 128>}, {pipeline_mode = #tpu.pipeline_mode<synchronous>, transform_indices = @transform_12, window_bounds = array<i64: 1, 128>}, {transform_indices = @transform_13, window_bounds = array<i64: 1, 128, 128>}]} {
    %c0_i32 = arith.constant 0 : i32
    %0 = arith.cmpi eq, %arg2, %c0_i32 : i32
    %1 = arith.extui %0 : i1 to i32
    %c0_i32_0 = arith.constant 0 : i32
    %2 = arith.cmpi ne, %1, %c0_i32_0 : i32
    scf.if %2 {
      %cst_70 = arith.constant 0xFF800000 : f32
      %84 = vector.broadcast %cst_70 : f32 to vector<4x128x1xf32>
      %c0_71 = arith.constant 0 : index
      %c0_72 = arith.constant 0 : index
      %c0_73 = arith.constant 0 : index
      %85 = vector.load %arg20[%c0_71, %c0_72, %c0_73] : memref<4x128x1xf32, #tpu.memory_space<vmem>>, vector<4x128x1xf32>
      tpu.vector_store %arg20[%c0_71, %c0_72, %c0_73], %84 {strides = array<i32>} : memref<4x128x1xf32, #tpu.memory_space<vmem>>, vector<4x128x1xf32>,
      %cst_74 = arith.constant 0.000000e+00 : f32
      %86 = vector.broadcast %cst_74 : f32 to vector<4x128x1xf32>
      %c0_75 = arith.constant 0 : index
      %c0_76 = arith.constant 0 : index
      %c0_77 = arith.constant 0 : index
      %87 = vector.load %arg21[%c0_75, %c0_76, %c0_77] : memref<4x128x1xf32, #tpu.memory_space<vmem>>, vector<4x128x1xf32>
      tpu.vector_store %arg21[%c0_75, %c0_76, %c0_77], %86 {strides = array<i32>} : memref<4x128x1xf32, #tpu.memory_space<vmem>>, vector<4x128x1xf32>,
      %cst_78 = arith.constant 0.000000e+00 : f32
      %88 = vector.broadcast %cst_78 : f32 to vector<4x128x32xf32>
      %c0_79 = arith.constant 0 : index
      %c0_80 = arith.constant 0 : index
      %c0_81 = arith.constant 0 : index
      %89 = vector.load %arg22[%c0_79, %c0_80, %c0_81] : memref<4x128x32xf32, #tpu.memory_space<vmem>>, vector<4x128x32xf32>
      tpu.vector_store %arg22[%c0_79, %c0_80, %c0_81], %88 {strides = array<i32>} : memref<4x128x32xf32, #tpu.memory_space<vmem>>, vector<4x128x32xf32>,
      %c0_82 = arith.constant 0 : index
      %c0_83 = arith.constant 0 : index
      %c0_84 = arith.constant 0 : index
      %90 = vector.load %arg3[%c0_82, %c0_83, %c0_84] : memref<1x128x128xf32, #tpu.memory_space<vmem>>, vector<1x128x128xf32>
      %91 = vector.shape_cast %90 : vector<1x128x128xf32> to vector<128x128xf32>
      %c0_85 = arith.constant 0 : index
      %c0_86 = arith.constant 0 : index
      %92 = vector.load %arg6[%c0_85, %c0_86] : memref<128x128xf32, #tpu.memory_space<vmem>>, vector<128x128xf32>
      %cst_87 = arith.constant dense<0.000000e+00> : vector<128x128xf32>
      %93 = tpu.matmul %91, %92, %cst_87 {dimension_numbers = #tpu.dot_dimension_numbers<[1], [0], [0], [1], [0, 0, 1, 1], [], []>} : vector<128x128xf32>, vector<128x128xf32>, vector<128x128xf32> -> vector<128x128xf32>
      %c0_88 = arith.constant 0 : index
      %c0_89 = arith.constant 0 : index
      %94 = vector.load %arg7[%c0_88, %c0_89] : memref<1x128xf32, #tpu.memory_space<vmem>>, vector<1x128xf32>
      %95 = vector.broadcast %94 : vector<1x128xf32> to vector<128x128xf32>
      %96 = arith.addf %93, %95 : vector<128x128xf32>
      %97 = vector.extract_strided_slice %96 {offsets = [0, 0], sizes = [128, 32], strides = [1, 1]} : vector<128x128xf32> to vector<128x32xf32>
      %cst_90 = arith.constant 0.176776692 : f32
      %98 = vector.broadcast %cst_90 : f32 to vector<128x32xf32>
      %99 = arith.mulf %97, %98 : vector<128x32xf32>
      %c0_91 = arith.constant 0 : index
      %c0_92 = arith.constant 0 : index
      %c0_93 = arith.constant 0 : index
      %100 = vector.load %arg17[%c0_91, %c0_92, %c0_93] : memref<4x128x32xf32, #tpu.memory_space<vmem>>, vector<1x128x32xf32>
      %101 = vector.shape_cast %100 : vector<1x128x32xf32> to vector<128x32xf32>
      %102 = vector.shape_cast %99 : vector<128x32xf32> to vector<1x128x32xf32>
      tpu.vector_store %arg17[%c0_91, %c0_92, %c0_93], %102 {strides = array<i32>} : memref<4x128x32xf32, #tpu.memory_space<vmem>>, vector<1x128x32xf32>,
      %103 = vector.extract_strided_slice %96 {offsets = [0, 32], sizes = [128, 32], strides = [1, 1]} : vector<128x128xf32> to vector<128x32xf32>
      %cst_94 = arith.constant 0.176776692 : f32
      %104 = vector.broadcast %cst_94 : f32 to vector<128x32xf32>
      %105 = arith.mulf %103, %104 : vector<128x32xf32>
      %c1_95 = arith.constant 1 : index
      %c0_96 = arith.constant 0 : index
      %c0_97 = arith.constant 0 : index
      %106 = vector.load %arg17[%c1_95, %c0_96, %c0_97] : memref<4x128x32xf32, #tpu.memory_space<vmem>>, vector<1x128x32xf32>
      %107 = vector.shape_cast %106 : vector<1x128x32xf32> to vector<128x32xf32>
      %108 = vector.shape_cast %105 : vector<128x32xf32> to vector<1x128x32xf32>
      tpu.vector_store %arg17[%c1_95, %c0_96, %c0_97], %108 {strides = array<i32>} : memref<4x128x32xf32, #tpu.memory_space<vmem>>, vector<1x128x32xf32>,
      %109 = vector.extract_strided_slice %96 {offsets = [0, 64], sizes = [128, 32], strides = [1, 1]} : vector<128x128xf32> to vector<128x32xf32>
      %cst_98 = arith.constant 0.176776692 : f32
      %110 = vector.broadcast %cst_98 : f32 to vector<128x32xf32>
      %111 = arith.mulf %109, %110 : vector<128x32xf32>
      %c2_99 = arith.constant 2 : index
      %c0_100 = arith.constant 0 : index
      %c0_101 = arith.constant 0 : index
      %112 = vector.load %arg17[%c2_99, %c0_100, %c0_101] : memref<4x128x32xf32, #tpu.memory_space<vmem>>, vector<1x128x32xf32>
      %113 = vector.shape_cast %112 : vector<1x128x32xf32> to vector<128x32xf32>
      %114 = vector.shape_cast %111 : vector<128x32xf32> to vector<1x128x32xf32>
      tpu.vector_store %arg17[%c2_99, %c0_100, %c0_101], %114 {strides = array<i32>} : memref<4x128x32xf32, #tpu.memory_space<vmem>>, vector<1x128x32xf32>,
      %115 = vector.extract_strided_slice %96 {offsets = [0, 96], sizes = [128, 32], strides = [1, 1]} : vector<128x128xf32> to vector<128x32xf32>
      %cst_102 = arith.constant 0.176776692 : f32
      %116 = vector.broadcast %cst_102 : f32 to vector<128x32xf32>
      %117 = arith.mulf %115, %116 : vector<128x32xf32>
      %c3_103 = arith.constant 3 : index
      %c0_104 = arith.constant 0 : index
      %c0_105 = arith.constant 0 : index
      %118 = vector.load %arg17[%c3_103, %c0_104, %c0_105] : memref<4x128x32xf32, #tpu.memory_space<vmem>>, vector<1x128x32xf32>
      %119 = vector.shape_cast %118 : vector<1x128x32xf32> to vector<128x32xf32>
      %120 = vector.shape_cast %117 : vector<128x32xf32> to vector<1x128x32xf32>
      tpu.vector_store %arg17[%c3_103, %c0_104, %c0_105], %120 {strides = array<i32>} : memref<4x128x32xf32, #tpu.memory_space<vmem>>, vector<1x128x32xf32>,
    } else {
    }
    %c0 = arith.constant 0 : index
    %c0_1 = arith.constant 0 : index
    %c0_2 = arith.constant 0 : index
    %3 = vector.load %arg4[%c0, %c0_1, %c0_2] : memref<1x128x128xf32, #tpu.memory_space<vmem>>, vector<1x128x128xf32>
    %4 = vector.shape_cast %3 : vector<1x128x128xf32> to vector<128x128xf32>
    %c0_3 = arith.constant 0 : index
    %c0_4 = arith.constant 0 : index
    %5 = vector.load %arg8[%c0_3, %c0_4] : memref<128x128xf32, #tpu.memory_space<vmem>>, vector<128x128xf32>
    %cst = arith.constant dense<0.000000e+00> : vector<128x128xf32>
    %6 = tpu.matmul %4, %5, %cst {dimension_numbers = #tpu.dot_dimension_numbers<[1], [0], [0], [1], [0, 0, 1, 1], [], []>} : vector<128x128xf32>, vector<128x128xf32>, vector<128x128xf32> -> vector<128x128xf32>
    %c0_5 = arith.constant 0 : index
    %c0_6 = arith.constant 0 : index
    %7 = vector.load %arg9[%c0_5, %c0_6] : memref<1x128xf32, #tpu.memory_space<vmem>>, vector<1x128xf32>
    %8 = vector.broadcast %7 : vector<1x128xf32> to vector<128x128xf32>
    %9 = arith.addf %6, %8 : vector<128x128xf32>
    %c0_7 = arith.constant 0 : index
    %c0_8 = arith.constant 0 : index
    %10 = vector.load %arg10[%c0_7, %c0_8] : memref<128x128xf32, #tpu.memory_space<vmem>>, vector<128x128xf32>
    %cst_9 = arith.constant dense<0.000000e+00> : vector<128x128xf32>
    %11 = tpu.matmul %4, %10, %cst_9 {dimension_numbers = #tpu.dot_dimension_numbers<[1], [0], [0], [1], [0, 0, 1, 1], [], []>} : vector<128x128xf32>, vector<128x128xf32>, vector<128x128xf32> -> vector<128x128xf32>
    %c0_10 = arith.constant 0 : index
    %c0_11 = arith.constant 0 : index
    %12 = vector.load %arg11[%c0_10, %c0_11] : memref<1x128xf32, #tpu.memory_space<vmem>>, vector<1x128xf32>
    %13 = vector.broadcast %12 : vector<1x128xf32> to vector<128x128xf32>
    %14 = arith.addf %11, %13 : vector<128x128xf32>
    %15 = vector.extract_strided_slice %9 {offsets = [0, 0], sizes = [128, 32], strides = [1, 1]} : vector<128x128xf32> to vector<128x32xf32>
    %c0_12 = arith.constant 0 : index
    %c0_13 = arith.constant 0 : index
    %c0_14 = arith.constant 0 : index
    %16 = vector.load %arg18[%c0_12, %c0_13, %c0_14] : memref<4x128x32xf32, #tpu.memory_space<vmem>>, vector<1x128x32xf32>
    %17 = vector.shape_cast %16 : vector<1x128x32xf32> to vector<128x32xf32>
    %18 = vector.shape_cast %15 : vector<128x32xf32> to vector<1x128x32xf32>
    tpu.vector_store %arg18[%c0_12, %c0_13, %c0_14], %18 {strides = array<i32>} : memref<4x128x32xf32, #tpu.memory_space<vmem>>, vector<1x128x32xf32>,
    %19 = vector.extract_strided_slice %14 {offsets = [0, 0], sizes = [128, 32], strides = [1, 1]} : vector<128x128xf32> to vector<128x32xf32>
    %c0_15 = arith.constant 0 : index
    %c0_16 = arith.constant 0 : index
    %c0_17 = arith.constant 0 : index
    %20 = vector.load %arg19[%c0_15, %c0_16, %c0_17] : memref<4x128x32xf32, #tpu.memory_space<vmem>>, vector<1x128x32xf32>
    %21 = vector.shape_cast %20 : vector<1x128x32xf32> to vector<128x32xf32>
    %22 = vector.shape_cast %19 : vector<128x32xf32> to vector<1x128x32xf32>
    tpu.vector_store %arg19[%c0_15, %c0_16, %c0_17], %22 {strides = array<i32>} : memref<4x128x32xf32, #tpu.memory_space<vmem>>, vector<1x128x32xf32>,
    %23 = vector.extract_strided_slice %9 {offsets = [0, 32], sizes = [128, 32], strides = [1, 1]} : vector<128x128xf32> to vector<128x32xf32>
    %c1 = arith.constant 1 : index
    %c0_18 = arith.constant 0 : index
    %c0_19 = arith.constant 0 : index
    %24 = vector.load %arg18[%c1, %c0_18, %c0_19] : memref<4x128x32xf32, #tpu.memory_space<vmem>>, vector<1x128x32xf32>
    %25 = vector.shape_cast %24 : vector<1x128x32xf32> to vector<128x32xf32>
    %26 = vector.shape_cast %23 : vector<128x32xf32> to vector<1x128x32xf32>
    tpu.vector_store %arg18[%c1, %c0_18, %c0_19], %26 {strides = array<i32>} : memref<4x128x32xf32, #tpu.memory_space<vmem>>, vector<1x128x32xf32>,
    %27 = vector.extract_strided_slice %14 {offsets = [0, 32], sizes = [128, 32], strides = [1, 1]} : vector<128x128xf32> to vector<128x32xf32>
    %c1_20 = arith.constant 1 : index
    %c0_21 = arith.constant 0 : index
    %c0_22 = arith.constant 0 : index
    %28 = vector.load %arg19[%c1_20, %c0_21, %c0_22] : memref<4x128x32xf32, #tpu.memory_space<vmem>>, vector<1x128x32xf32>
    %29 = vector.shape_cast %28 : vector<1x128x32xf32> to vector<128x32xf32>
    %30 = vector.shape_cast %27 : vector<128x32xf32> to vector<1x128x32xf32>
    tpu.vector_store %arg19[%c1_20, %c0_21, %c0_22], %30 {strides = array<i32>} : memref<4x128x32xf32, #tpu.memory_space<vmem>>, vector<1x128x32xf32>,
    %31 = vector.extract_strided_slice %9 {offsets = [0, 64], sizes = [128, 32], strides = [1, 1]} : vector<128x128xf32> to vector<128x32xf32>
    %c2 = arith.constant 2 : index
    %c0_23 = arith.constant 0 : index
    %c0_24 = arith.constant 0 : index
    %32 = vector.load %arg18[%c2, %c0_23, %c0_24] : memref<4x128x32xf32, #tpu.memory_space<vmem>>, vector<1x128x32xf32>
    %33 = vector.shape_cast %32 : vector<1x128x32xf32> to vector<128x32xf32>
    %34 = vector.shape_cast %31 : vector<128x32xf32> to vector<1x128x32xf32>
    tpu.vector_store %arg18[%c2, %c0_23, %c0_24], %34 {strides = array<i32>} : memref<4x128x32xf32, #tpu.memory_space<vmem>>, vector<1x128x32xf32>,
    %35 = vector.extract_strided_slice %14 {offsets = [0, 64], sizes = [128, 32], strides = [1, 1]} : vector<128x128xf32> to vector<128x32xf32>
    %c2_25 = arith.constant 2 : index
    %c0_26 = arith.constant 0 : index
    %c0_27 = arith.constant 0 : index
    %36 = vector.load %arg19[%c2_25, %c0_26, %c0_27] : memref<4x128x32xf32, #tpu.memory_space<vmem>>, vector<1x128x32xf32>
    %37 = vector.shape_cast %36 : vector<1x128x32xf32> to vector<128x32xf32>
    %38 = vector.shape_cast %35 : vector<128x32xf32> to vector<1x128x32xf32>
    tpu.vector_store %arg19[%c2_25, %c0_26, %c0_27], %38 {strides = array<i32>} : memref<4x128x32xf32, #tpu.memory_space<vmem>>, vector<1x128x32xf32>,
    %39 = vector.extract_strided_slice %9 {offsets = [0, 96], sizes = [128, 32], strides = [1, 1]} : vector<128x128xf32> to vector<128x32xf32>
    %c3 = arith.constant 3 : index
    %c0_28 = arith.constant 0 : index
    %c0_29 = arith.constant 0 : index
    %40 = vector.load %arg18[%c3, %c0_28, %c0_29] : memref<4x128x32xf32, #tpu.memory_space<vmem>>, vector<1x128x32xf32>
    %41 = vector.shape_cast %40 : vector<1x128x32xf32> to vector<128x32xf32>
    %42 = vector.shape_cast %39 : vector<128x32xf32> to vector<1x128x32xf32>
    tpu.vector_store %arg18[%c3, %c0_28, %c0_29], %42 {strides = array<i32>} : memref<4x128x32xf32, #tpu.memory_space<vmem>>, vector<1x128x32xf32>,
    %43 = vector.extract_strided_slice %14 {offsets = [0, 96], sizes = [128, 32], strides = [1, 1]} : vector<128x128xf32> to vector<128x32xf32>
    %c3_30 = arith.constant 3 : index
    %c0_31 = arith.constant 0 : index
    %c0_32 = arith.constant 0 : index
    %44 = vector.load %arg19[%c3_30, %c0_31, %c0_32] : memref<4x128x32xf32, #tpu.memory_space<vmem>>, vector<1x128x32xf32>
    %45 = vector.shape_cast %44 : vector<1x128x32xf32> to vector<128x32xf32>
    %46 = vector.shape_cast %43 : vector<128x32xf32> to vector<1x128x32xf32>
    tpu.vector_store %arg19[%c3_30, %c0_31, %c0_32], %46 {strides = array<i32>} : memref<4x128x32xf32, #tpu.memory_space<vmem>>, vector<1x128x32xf32>,
    %c0_33 = arith.constant 0 : index
    %c0_34 = arith.constant 0 : index
    %c0_35 = arith.constant 0 : index
    %47 = vector.load %arg17[%c0_33, %c0_34, %c0_35] : memref<4x128x32xf32, #tpu.memory_space<vmem>>, vector<4x128x32xf32>
    %c0_36 = arith.constant 0 : index
    %c0_37 = arith.constant 0 : index
    %c0_38 = arith.constant 0 : index
    %48 = vector.load %arg18[%c0_36, %c0_37, %c0_38] : memref<4x128x32xf32, #tpu.memory_space<vmem>>, vector<4x128x32xf32>
    "tpu.trace_start"() <{level = 10 : i32, message = "hqd,hkd->hqk"}> : () -> ()
    %cst_39 = arith.constant dense<0.000000e+00> : vector<4x128x128xf32>
    %49 = tpu.matmul %47, %48, %cst_39 {dimension_numbers = #tpu.dot_dimension_numbers<[2], [2], [1], [1], [0, 0, 0, 1, 1, 1], [0], [0]>} : vector<4x128x32xf32>, vector<4x128x32xf32>, vector<4x128x128xf32> -> vector<4x128x128xf32>
    "tpu.trace_stop"() : () -> ()
    %c0_40 = arith.constant 0 : index
    %c0_41 = arith.constant 0 : index
    %c0_42 = arith.constant 0 : index
    %50 = vector.load %arg5[%c0_40, %c0_41, %c0_42] : memref<1x128x128xf32, #tpu.memory_space<vmem>>, vector<1x128x128xf32>
    %51 = vector.shape_cast %50 : vector<1x128x128xf32> to vector<128x128xf32>
    %cst_43 = arith.constant 0.000000e+00 : f32
    %52 = vector.broadcast %cst_43 : f32 to vector<128x128xf32>
    %53 = arith.cmpf oeq, %51, %52 : vector<128x128xf32>
    %cst_44 = arith.constant -1.000000e+09 : f32
    %54 = vector.shape_cast %53 : vector<128x128xi1> to vector<1x128x128xi1>
    %55 = vector.broadcast %54 : vector<1x128x128xi1> to vector<4x128x128xi1>
    %56 = vector.broadcast %cst_44 : f32 to vector<4x128x128xf32>
    %57 = arith.select %55, %56, %49 : vector<4x128x128xi1>, vector<4x128x128xf32>
    %c0_45 = arith.constant 0 : index
    %c0_46 = arith.constant 0 : index
    %c0_47 = arith.constant 0 : index
    %58 = vector.load %arg20[%c0_45, %c0_46, %c0_47] : memref<4x128x1xf32, #tpu.memory_space<vmem>>, vector<4x128x1xf32>
    %cst_48 = arith.constant dense<0xFF800000> : vector<4x128xf32>
    %59 = vector.multi_reduction <maximumf>, %57, %cst_48 [2] : vector<4x128x128xf32> to vector<4x128xf32>
    %60 = vector.shape_cast %59 : vector<4x128xf32> to vector<4x128x1xf32>
    %61 = arith.maximumf %58, %60 : vector<4x128x1xf32>
    %62 = arith.subf %58, %61 : vector<4x128x1xf32>
    %63 = math.exp %62 : vector<4x128x1xf32>
    %64 = vector.broadcast %61 : vector<4x128x1xf32> to vector<4x128x128xf32>
    %65 = arith.subf %57, %64 : vector<4x128x128xf32>
    %66 = math.exp %65 : vector<4x128x128xf32>
    %c0_49 = arith.constant 0 : index
    %c0_50 = arith.constant 0 : index
    %c0_51 = arith.constant 0 : index
    %67 = vector.load %arg21[%c0_49, %c0_50, %c0_51] : memref<4x128x1xf32, #tpu.memory_space<vmem>>, vector<4x128x1xf32>
    %68 = arith.mulf %63, %67 : vector<4x128x1xf32>
    %cst_52 = arith.constant dense<0.000000e+00> : vector<4x128xf32>
    %69 = vector.multi_reduction <add>, %66, %cst_52 [2] : vector<4x128x128xf32> to vector<4x128xf32>
    %70 = vector.shape_cast %69 : vector<4x128xf32> to vector<4x128x1xf32>
    %71 = arith.addf %68, %70 : vector<4x128x1xf32>
    %c0_53 = arith.constant 0 : index
    %c0_54 = arith.constant 0 : index
    %c0_55 = arith.constant 0 : index
    %72 = vector.load %arg21[%c0_53, %c0_54, %c0_55] : memref<4x128x1xf32, #tpu.memory_space<vmem>>, vector<4x128x1xf32>
    tpu.vector_store %arg21[%c0_53, %c0_54, %c0_55], %71 {strides = array<i32>} : memref<4x128x1xf32, #tpu.memory_space<vmem>>, vector<4x128x1xf32>,
    %c0_56 = arith.constant 0 : index
    %c0_57 = arith.constant 0 : index
    %c0_58 = arith.constant 0 : index
    %73 = vector.load %arg22[%c0_56, %c0_57, %c0_58] : memref<4x128x32xf32, #tpu.memory_space<vmem>>, vector<4x128x32xf32>
    %74 = vector.broadcast %63 : vector<4x128x1xf32> to vector<4x128x32xf32>
    %75 = arith.mulf %74, %73 : vector<4x128x32xf32>
    %c0_59 = arith.constant 0 : index
    %c0_60 = arith.constant 0 : index
    %c0_61 = arith.constant 0 : index
    %76 = vector.load %arg19[%c0_59, %c0_60, %c0_61] : memref<4x128x32xf32, #tpu.memory_space<vmem>>, vector<4x128x32xf32>
    "tpu.trace_start"() <{level = 10 : i32, message = "hqk,hkd->hqd"}> : () -> ()
    %cst_62 = arith.constant dense<0.000000e+00> : vector<4x128x32xf32>
    %77 = tpu.matmul %66, %76, %cst_62 {dimension_numbers = #tpu.dot_dimension_numbers<[2], [1], [1], [2], [0, 0, 0, 1, 1, 2], [0], [0]>} : vector<4x128x128xf32>, vector<4x128x32xf32>, vector<4x128x32xf32> -> vector<4x128x32xf32>
    "tpu.trace_stop"() : () -> ()
    %78 = arith.addf %75, %77 : vector<4x128x32xf32>
    %c0_63 = arith.constant 0 : index
    %c0_64 = arith.constant 0 : index
    %c0_65 = arith.constant 0 : index
    %79 = vector.load %arg22[%c0_63, %c0_64, %c0_65] : memref<4x128x32xf32, #tpu.memory_space<vmem>>, vector<4x128x32xf32>
    tpu.vector_store %arg22[%c0_63, %c0_64, %c0_65], %78 {strides = array<i32>} : memref<4x128x32xf32, #tpu.memory_space<vmem>>, vector<4x128x32xf32>,
    %c0_66 = arith.constant 0 : index
    %c0_67 = arith.constant 0 : index
    %c0_68 = arith.constant 0 : index
    %80 = vector.load %arg20[%c0_66, %c0_67, %c0_68] : memref<4x128x1xf32, #tpu.memory_space<vmem>>, vector<4x128x1xf32>
    tpu.vector_store %arg20[%c0_66, %c0_67, %c0_68], %61 {strides = array<i32>} : memref<4x128x1xf32, #tpu.memory_space<vmem>>, vector<4x128x1xf32>,
    %c1_i32 = arith.constant 1 : i32
    %81 = arith.cmpi eq, %arg2, %c1_i32 : i32
    %82 = arith.extui %81 : i1 to i32
    %c0_i32_69 = arith.constant 0 : i32
    %83 = arith.cmpi ne, %82, %c0_i32_69 : i32
    scf.if %83 {
      %c0_70 = arith.constant 0 : index
      %c0_71 = arith.constant 0 : index
      %c0_72 = arith.constant 0 : index
      %84 = vector.load %arg22[%c0_70, %c0_71, %c0_72] : memref<4x128x32xf32, #tpu.memory_space<vmem>>, vector<4x128x32xf32>
      %c0_73 = arith.constant 0 : index
      %c0_74 = arith.constant 0 : index
      %c0_75 = arith.constant 0 : index
      %85 = vector.load %arg21[%c0_73, %c0_74, %c0_75] : memref<4x128x1xf32, #tpu.memory_space<vmem>>, vector<4x128x1xf32>
      %86 = tpu.reciprocal %85 {approx = true} : vector<4x128x1xf32> -> vector<4x128x1xf32>
      %87 = vector.broadcast %86 : vector<4x128x1xf32> to vector<4x128x32xf32>
      %88 = arith.mulf %84, %87 : vector<4x128x32xf32>
      %89 = vector.extract_strided_slice %88 {offsets = [0, 0, 0], sizes = [1, 128, 32], strides = [1, 1, 1]} : vector<4x128x32xf32> to vector<1x128x32xf32>
      %90 = vector.shape_cast %89 : vector<1x128x32xf32> to vector<128x32xf32>
      %c0_76 = arith.constant 0 : index
      %c0_77 = arith.constant 0 : index
      %91 = vector.load %arg23[%c0_76, %c0_77] : memref<128x128xf32, #tpu.memory_space<vmem>>, vector<128x32xf32>
      tpu.vector_store %arg23[%c0_76, %c0_77], %90 {strides = array<i32>} : memref<128x128xf32, #tpu.memory_space<vmem>>, vector<128x32xf32>,
      %92 = vector.extract_strided_slice %88 {offsets = [1, 0, 0], sizes = [1, 128, 32], strides = [1, 1, 1]} : vector<4x128x32xf32> to vector<1x128x32xf32>
      %93 = vector.shape_cast %92 : vector<1x128x32xf32> to vector<128x32xf32>
      %c0_78 = arith.constant 0 : index
      %c32 = arith.constant 32 : index
      %94 = vector.load %arg23[%c0_78, %c32] : memref<128x128xf32, #tpu.memory_space<vmem>>, vector<128x32xf32>
      tpu.vector_store %arg23[%c0_78, %c32], %93 {strides = array<i32>} : memref<128x128xf32, #tpu.memory_space<vmem>>, vector<128x32xf32>,
      %95 = vector.extract_strided_slice %88 {offsets = [2, 0, 0], sizes = [1, 128, 32], strides = [1, 1, 1]} : vector<4x128x32xf32> to vector<1x128x32xf32>
      %96 = vector.shape_cast %95 : vector<1x128x32xf32> to vector<128x32xf32>
      %c0_79 = arith.constant 0 : index
      %c64 = arith.constant 64 : index
      %97 = vector.load %arg23[%c0_79, %c64] : memref<128x128xf32, #tpu.memory_space<vmem>>, vector<128x32xf32>
      tpu.vector_store %arg23[%c0_79, %c64], %96 {strides = array<i32>} : memref<128x128xf32, #tpu.memory_space<vmem>>, vector<128x32xf32>,
      %98 = vector.extract_strided_slice %88 {offsets = [3, 0, 0], sizes = [1, 128, 32], strides = [1, 1, 1]} : vector<4x128x32xf32> to vector<1x128x32xf32>
      %99 = vector.shape_cast %98 : vector<1x128x32xf32> to vector<128x32xf32>
      %c0_80 = arith.constant 0 : index
      %c96 = arith.constant 96 : index
      %100 = vector.load %arg23[%c0_80, %c96] : memref<128x128xf32, #tpu.memory_space<vmem>>, vector<128x32xf32>
      tpu.vector_store %arg23[%c0_80, %c96], %99 {strides = array<i32>} : memref<128x128xf32, #tpu.memory_space<vmem>>, vector<128x32xf32>,
      %c0_81 = arith.constant 0 : index
      %c0_82 = arith.constant 0 : index
      %101 = vector.load %arg23[%c0_81, %c0_82] : memref<128x128xf32, #tpu.memory_space<vmem>>, vector<128x128xf32>
      %c0_83 = arith.constant 0 : index
      %c0_84 = arith.constant 0 : index
      %102 = vector.load %arg12[%c0_83, %c0_84] : memref<128x128xf32, #tpu.memory_space<vmem>>, vector<128x128xf32>
      %cst_85 = arith.constant dense<0.000000e+00> : vector<128x128xf32>
      %103 = tpu.matmul %101, %102, %cst_85 {dimension_numbers = #tpu.dot_dimension_numbers<[1], [0], [0], [1], [0, 0, 1, 1], [], []>} : vector<128x128xf32>, vector<128x128xf32>, vector<128x128xf32> -> vector<128x128xf32>
      %c0_86 = arith.constant 0 : index
      %c0_87 = arith.constant 0 : index
      %104 = vector.load %arg13[%c0_86, %c0_87] : memref<1x128xf32, #tpu.memory_space<vmem>>, vector<1x128xf32>
      %105 = vector.broadcast %104 : vector<1x128xf32> to vector<128x128xf32>
      %106 = arith.addf %103, %105 : vector<128x128xf32>
      %c0_88 = arith.constant 0 : index
      %c0_89 = arith.constant 0 : index
      %c0_90 = arith.constant 0 : index
      %107 = vector.load %arg3[%c0_88, %c0_89, %c0_90] : memref<1x128x128xf32, #tpu.memory_space<vmem>>, vector<1x128x128xf32>
      %108 = vector.shape_cast %107 : vector<1x128x128xf32> to vector<128x128xf32>
      %109 = arith.addf %106, %108 : vector<128x128xf32>
      %cst_91 = arith.constant dense<0.000000e+00> : vector<128xf32>
      %110 = vector.multi_reduction <add>, %109, %cst_91 [1] : vector<128x128xf32> to vector<128xf32>
      %111 = vector.shape_cast %110 : vector<128xf32> to vector<128x1xf32>
      %cst_92 = arith.constant 1.280000e+02 : f32
      %112 = vector.broadcast %cst_92 : f32 to vector<128x1xf32>
      %113 = arith.divf %111, %112 : vector<128x1xf32>
      %114 = vector.broadcast %113 : vector<128x1xf32> to vector<128x128xf32>
      %115 = arith.subf %109, %114 : vector<128x128xf32>
      %116 = arith.mulf %115, %115 : vector<128x128xf32>
      %cst_93 = arith.constant dense<0.000000e+00> : vector<128xf32>
      %117 = vector.multi_reduction <add>, %116, %cst_93 [1] : vector<128x128xf32> to vector<128xf32>
      %118 = vector.shape_cast %117 : vector<128xf32> to vector<128x1xf32>
      %cst_94 = arith.constant 1.280000e+02 : f32
      %119 = vector.broadcast %cst_94 : f32 to vector<128x1xf32>
      %120 = arith.divf %118, %119 : vector<128x1xf32>
      %121 = vector.broadcast %113 : vector<128x1xf32> to vector<128x128xf32>
      %122 = arith.subf %109, %121 : vector<128x128xf32>
      %cst_95 = arith.constant 9.99999974E-6 : f32
      %123 = vector.broadcast %cst_95 : f32 to vector<128x1xf32>
      %124 = arith.addf %120, %123 : vector<128x1xf32>
      %125 = math.rsqrt %124 : vector<128x1xf32>
      %126 = vector.broadcast %125 : vector<128x1xf32> to vector<128x128xf32>
      %127 = arith.mulf %122, %126 : vector<128x128xf32>
      %c0_96 = arith.constant 0 : index
      %c0_97 = arith.constant 0 : index
      %128 = vector.load %arg14[%c0_96, %c0_97] : memref<1x128xf32, #tpu.memory_space<vmem>>, vector<1x128xf32>
      %129 = vector.broadcast %128 : vector<1x128xf32> to vector<128x128xf32>
      %130 = arith.mulf %127, %129 : vector<128x128xf32>
      %c0_98 = arith.constant 0 : index
      %c0_99 = arith.constant 0 : index
      %131 = vector.load %arg15[%c0_98, %c0_99] : memref<1x128xf32, #tpu.memory_space<vmem>>, vector<1x128xf32>
      %132 = vector.broadcast %131 : vector<1x128xf32> to vector<128x128xf32>
      %133 = arith.addf %130, %132 : vector<128x128xf32>
      %c0_100 = arith.constant 0 : index
      %c0_101 = arith.constant 0 : index
      %c0_102 = arith.constant 0 : index
      %134 = vector.load %arg16[%c0_100, %c0_101, %c0_102] : memref<1x128x128xf32, #tpu.memory_space<vmem>>, vector<1x128x128xf32>
      %135 = vector.shape_cast %134 : vector<1x128x128xf32> to vector<128x128xf32>
      %136 = vector.shape_cast %133 : vector<128x128xf32> to vector<1x128x128xf32>
      tpu.vector_store %arg16[%c0_100, %c0_101, %c0_102], %136 {strides = array<i32>} : memref<1x128x128xf32, #tpu.memory_space<vmem>>, vector<1x128x128xf32>,
    } else {
    }
    return
  }
  func.func @transform_0(%arg0: i32, %arg1: i32, %arg2: i32) -> (i32, i32, i32) {
    %c0_i32 = arith.constant 0 : i32
    %c0_i32_0 = arith.constant 0 : i32
    return %arg0, %arg1, %c0_i32 : i32, i32, i32
  }
  func.func @transform_1(%arg0: i32, %arg1: i32, %arg2: i32) -> (i32, i32, i32) {
    %c0_i32 = arith.constant 0 : i32
    %c0_i32_0 = arith.constant 0 : i32
    return %arg0, %arg2, %c0_i32 : i32, i32, i32
  }
  func.func @transform_2(%arg0: i32, %arg1: i32, %arg2: i32) -> (i32, i32, i32) {
    %c0_i32 = arith.constant 0 : i32
    return %arg0, %arg1, %arg2 : i32, i32, i32
  }
  func.func @transform_3(%arg0: i32, %arg1: i32, %arg2: i32) -> (i32, i32) {
    %c0_i32 = arith.constant 0 : i32
    %c0_i32_0 = arith.constant 0 : i32
    %c0_i32_1 = arith.constant 0 : i32
    return %c0_i32, %c0_i32_0 : i32, i32
  }
  func.func @transform_4(%arg0: i32, %arg1: i32, %arg2: i32) -> (i32, i32) {
    %c0_i32 = arith.constant 0 : i32
    %c0_i32_0 = arith.constant 0 : i32
    %c0_i32_1 = arith.constant 0 : i32
    return %c0_i32, %c0_i32_0 : i32, i32
  }
  func.func @transform_5(%arg0: i32, %arg1: i32, %arg2: i32) -> (i32, i32) {
    %c0_i32 = arith.constant 0 : i32
    %c0_i32_0 = arith.constant 0 : i32
    %c0_i32_1 = arith.constant 0 : i32
    return %c0_i32, %c0_i32_0 : i32, i32
  }
  func.func @transform_6(%arg0: i32, %arg1: i32, %arg2: i32) -> (i32, i32) {
    %c0_i32 = arith.constant 0 : i32
    %c0_i32_0 = arith.constant 0 : i32
    %c0_i32_1 = arith.constant 0 : i32
    return %c0_i32, %c0_i32_0 : i32, i32
  }
  func.func @transform_7(%arg0: i32, %arg1: i32, %arg2: i32) -> (i32, i32) {
    %c0_i32 = arith.constant 0 : i32
    %c0_i32_0 = arith.constant 0 : i32
    %c0_i32_1 = arith.constant 0 : i32
    return %c0_i32, %c0_i32_0 : i32, i32
  }
  func.func @transform_8(%arg0: i32, %arg1: i32, %arg2: i32) -> (i32, i32) {
    %c0_i32 = arith.constant 0 : i32
    %c0_i32_0 = arith.constant 0 : i32
    %c0_i32_1 = arith.constant 0 : i32
    return %c0_i32, %c0_i32_0 : i32, i32
  }
  func.func @transform_9(%arg0: i32, %arg1: i32, %arg2: i32) -> (i32, i32) {
    %c0_i32 = arith.constant 0 : i32
    %c0_i32_0 = arith.constant 0 : i32
    %c0_i32_1 = arith.constant 0 : i32
    return %c0_i32, %c0_i32_0 : i32, i32
  }
  func.func @transform_10(%arg0: i32, %arg1: i32, %arg2: i32) -> (i32, i32) {
    %c0_i32 = arith.constant 0 : i32
    %c0_i32_0 = arith.constant 0 : i32
    %c0_i32_1 = arith.constant 0 : i32
    return %c0_i32, %c0_i32_0 : i32, i32
  }
  func.func @transform_11(%arg0: i32, %arg1: i32, %arg2: i32) -> (i32, i32) {
    %c0_i32 = arith.constant 0 : i32
    %c0_i32_0 = arith.constant 0 : i32
    %c0_i32_1 = arith.constant 0 : i32
    return %c0_i32, %c0_i32_0 : i32, i32
  }
  func.func @transform_12(%arg0: i32, %arg1: i32, %arg2: i32) -> (i32, i32) {
    %c0_i32 = arith.constant 0 : i32
    %c0_i32_0 = arith.constant 0 : i32
    %c0_i32_1 = arith.constant 0 : i32
    return %c0_i32, %c0_i32_0 : i32, i32
  }
  func.func @transform_13(%arg0: i32, %arg1: i32, %arg2: i32) -> (i32, i32, i32) {
    %c0_i32 = arith.constant 0 : i32
    %c0_i32_0 = arith.constant 0 : i32
    return %arg0, %arg1, %c0_i32 : i32, i32, i32
  }
}

</mosaic_0001>

<bundles_post_ra>
// kernel: tpu_custom_call.1
= control target key start
LH: loop header
LB: loop body
LE: loop exit
PB: predicated region body
PF: predicated region fallthrough
CT: control target
= control target key end

     0   :  { %s11958_s0 = inlined_call_operand.hbm [shape: f32[2,256,128], index: 0, kind: input, shape index: {}]   ;;  %s11959_s1 = inlined_call_operand.hbm [shape: f32[2,256,128], index: 1, kind: input, shape index: {}]   ;;  %s11960_s2 = inlined_call_operand.hbm [shape: f32[2,256,256], index: 2, kind: input, shape index: {}]   ;;  %s11961_s3 = inlined_call_operand.hbm [shape: f32[128,128], index: 3, kind: input, shape index: {}]   ;;  %s11962_s4 = inlined_call_operand.vmem [shape: f32[1,128], index: 4, kind: input, shape index: {}]   ;;  %s11963_s5 = inlined_call_operand.hbm [shape: f32[128,128], index: 5, kind: input, shape index: {}]   ;;  %s11964_s6 = inlined_call_operand.vmem [shape: f32[1,128], index: 6, kind: input, shape index: {}]   ;;  %s11965_s7 = inlined_call_operand.hbm [shape: f32[128,128], index: 7, kind: input, shape index: {}]   ;;  %s11966_s8 = inlined_call_operand.vmem [shape: f32[1,128], index: 8, kind: input, shape index: {}]   ;;  %s11967_s9 = inlined_call_operand.hbm [shape: f32[128,128], index: 9, kind: input, shape index: {}]   ;;  %s11968_s10 = inlined_call_operand.vmem [shape: f32[1,128], index: 10, kind: input, shape index: {}]   ;;  %s11969_s11 = inlined_call_operand.vmem [shape: f32[1,128], index: 11, kind: input, shape index: {}]   ;;  %s11970_s12 = inlined_call_operand.vmem [shape: f32[1,128], index: 12, kind: input, shape index: {}]   ;;  %s11971_s13 = inlined_call_operand.hbm [shape: f32[2,256,128], index: 13, kind: output, shape index: {}]  }
   0x1   :  { %12175 = sst [smem:[#allocation196_spill]] %s11958_s0 }
   0x2   :  { %12176 = sst [smem:[#allocation197_spill]] %s11959_s1 }
   0x3   :  { %12177 = sst [smem:[#allocation198_spill]] %s11960_s2 }
   0x4   :  { %12178 = sst [smem:[#allocation199_spill]] %s11961_s3 }
   0x5   :  { %12179 = sst [smem:[#allocation200_spill]] %s11962_s4 }
   0x6   :  { %12180 = sst [smem:[#allocation201_spill]] %s11963_s5 }
   0x7   :  { %12181 = sst [smem:[#allocation202_spill]] %s11964_s6 }
   0x8   :  { %12182 = sst [smem:[#allocation203_spill]] %s11965_s7 }
   0x9   :  { %12183 = sst [smem:[#allocation204_spill]] %s11966_s8 }
   0xa   :  { %12184 = sst [smem:[#allocation205_spill]] %s11967_s9 }
   0xb   :  { %12185 = sst [smem:[#allocation206_spill]] %s11968_s10 }
   0xc   :  { %12186 = sst [smem:[#allocation207_spill]] %s11969_s11 }
   0xd   :  { %12187 = sst [smem:[#allocation208_spill]] %s11970_s12 }
   0xe   :  { %12188 = sst [smem:[#allocation209_spill]] %s11971_s13 }
   0xf   :  { %18 = vsyncpa [#allocation10], 0 }
  0x10   :  { %20 = vsyncpa [#allocation10 + $0x1], 0 }
  0x11   :  { %21 = vsyncpa [#allocation13], 0 }
  0x12   :  { %23 = vsyncpa [#allocation13 + $0x1], 0 }
  0x13   :  { %24 = vsyncpa [#allocation16], 0 }
  0x14   :  { %25 = vsyncpa [#allocation19], 0 }
  0x15   :  { %26 = vsyncpa [#allocation11], 0 }
  0x16   :  { %28 = vsyncpa [#allocation11 + $0x1], 0  ;;  %s8018_s25 = smov 0   ;;  %s8020_s26 = smov 0  }
  0x17   :  { %s8022_s27 = smov 0   ;;  %s8024_s28 = smov 0  }
  0x18   :  { %s8026_s29 = smov 0   ;;  %s8028_s30 = smov 0  }
  0x19   :  { %s8030_s14 = smov 0   ;;  %s8032_s15 = smov 0  }
  0x1a   :  { %s8034_s16 = smov 0   ;;  %s8036_s17 = smov 0  }
  0x1b   :  { %s8038_s18 = smov 0   ;;  %s8040_s19 = smov 0  }
  0x1c   :  { %s8042_s20 = smov 0   ;;  %s8044_s21 = smov 0  }
  0x1d   :  { %s8046_s22 = smov 0   ;;  %s8048_s23 = smov 0  }
  0x1e LB: > { %12189 = sst [smem:[#allocation28_spill]] %s7863_s25  ;;  %s8099_s24 = sadd.s32 4294967295, %s7923_s23   ;;  %s7923_s23 = sphi %s8048_s23, %s34_s23   ;;  %s7919_s22 = sphi %s8046_s22, %s12646_s22   ;;  %s7915_s21 = sphi %s8044_s21, %s12645_s21   ;;  %s7911_s20 = sphi %s8042_s20, %s12644_s20   ;;  %s7907_s19 = sphi %s8040_s19, %s12643_s19   ;;  %s7903_s18 = sphi %s8038_s18, %s12642_s18   ;;  %s7899_s17 = sphi %s8036_s17, %s12641_s17   ;;  %s7895_s16 = sphi %s8034_s16, %s12631_s16   ;;  %s7891_s15 = sphi %s8032_s15, %s12640_s15   ;;  %s7887_s14 = sphi %s8030_s14, %s12639_s14   ;;  %s7883_s30 = sphi %s8028_s30, %s12638_s30   ;;  %s7879_s29 = sphi %s8026_s29, %s12637_s29   ;;  %s7875_s28 = sphi %s8024_s28, %s12628_s28   ;;  %s7871_s27 = sphi %s8022_s27, %s12636_s27   ;;  %s7867_s26 = sphi %s8020_s26, %s12627_s26   ;;  %s7863_s25 = sphi %s8018_s25, %s12626_s25  }
  0x1f   : > { %12190 = sst [smem:[#allocation29_spill]] %s7867_s26  ;;  %p6600_p0 = scmp.ge.s32.totalorder %s7923_s23, 1 }
  0x20   : > { %12191 = sst [smem:[#allocation30_spill]] %s7871_s27  ;;  %p11984_p1 = scmp.eq.s32.totalorder %s8099_s24, 0 }
  0x21   : > { %12192 = sst [smem:[#allocation31_spill]] %s7879_s29  ;;  %p382_p2 = scmp.lt.s32.totalorder %s7923_s23, 9 }
  0x22   : > { %12193 = sst [smem:[#allocation32_spill]] %s7887_s14  ;;  %s7925_s11 = smov [#allocation15]  }
  0x23   : > { %12194 = sst [smem:[#allocation33_spill]] %s7895_s16  ;;  %p8107_p3 = pnand %p6600_p0, %p382_p2 }
  0x24   : > { %12195 = sst [smem:[#allocation34_spill]] %s7899_s17  ;;  %s395_s10 = sshll.u32 %s7925_s11, 4  ;;  %s396_s10 = int_to_ptr.vmem [resolvable:$true] %s395_s10 }
  0x25   : > { %12196 = sst [smem:[#allocation35_spill]] %s7903_s18  ;;  %p6917_p4 = pneg %p8107_p3 }
  0x26   : > { %12197 = sst [smem:[#allocation36_spill]] %s7907_s19  ;;  %s11973_s11 = smov 128  }
  0x27   : > { %s12198_s3 = sld [smem:[#allocation199_spill]]  ;;  %p8115_p5 = pnand %p6917_p4, %p11984_p1 }
  0x28   : > { %s12199_s12 = scalar_select %p8107_p3, 1, 0 }
  0x29   : > { %s12202_s7 = sld [smem:[#allocation203_spill]]  ;;  %s11975_s6 = smov 8  }
  0x2a   : > { %12200 = sst [smem:[#allocation37_spill]] %s12199_s12  ;;  %s7928_s4 = smov [#allocation18]  }
  0x2b   : > { %s46_s19 = sadd.s32 1, %s7911_s20  ;;  %p70_p7 = scmp.eq.s32.totalorder %s7923_s23, 0 }
  0x2c   : > { %p8134_p6 = scmp.ge.s32.totalorder %s46_s19, 2  ;;  %p97_p8 = scmp.ne.s32.totalorder %s7883_s30, %s7879_s29 }
  0x2d   : > { %s393_s18 = sshll.u32 %s12198_s3, 4  ;;  %s429_s3 = sshll.u32 %s7928_s4, 4  ;;  %s394_s18 = int_to_ptr.hbm [resolvable:$true] %s393_s18  ;;  %s430_s3 = int_to_ptr.vmem [resolvable:$true] %s429_s3 }
  0x2e   : > { %6920 = dma.hbm_to_vmem [thread:$0]  (!%p8115_p5), %s394_s18, 2048, %s396_s10, [#allocation16], %s11973_s11, %s11973_s11, %s11975_s6  }
  0x2f   : > { %s427_s8 = sshll.u32 %s12202_s7, 4  ;;  %s12648_s19 = smov (%p8134_p6, %s46_s19), 0  ;;  %s428_s8 = int_to_ptr.hbm [resolvable:$true] %s427_s8 }
  0x30   : > { %6926 = dma.hbm_to_vmem [thread:$0]  (!%p8115_p5), %s428_s8, 2048, %s430_s3, [#allocation19], %s11973_s11, %s11973_s11, %s11975_s6  }
  0x31   : > { %12204 = sst [smem:[#allocation38_spill]] %s12648_s19  ;;  %p8148_p9 = por %p97_p8, %p70_p7 }
  0x32   : > { %p103_p10 = scmp.ne.s32.totalorder %s7879_s29, %s7875_s28  ;;  %s8156_s8 = ssub.s32 %s7911_s20, %s12648_s19 }
  0x33   : > { %p6948_p11 = scmp.lt.s32.totalorder %s7923_s23, 8  ;;  %s11985_s3 = sshll.u32 %s7919_s22, 5 }
  0x34   : > { %p8161_p12 = por %p103_p10, %p11984_p1  ;;  %s493_s10 = sand.u32 1, %s7923_s23  }
  0x35   : > { %s495_s7 = sand.u32 1, %s7883_s30   ;;  %s6611_s6 = sshll.u32 %s7911_s20, 4 }
  0x36   : > { %s12206_s18 = scalar_select %p8161_p12, 1, 0 }
  0x37   : > { %s6610_s11 = sshll.u32 %s495_s7, 7  ;;  %s502_s12 = sadd.s32 %s6611_s6, %s11985_s3 }
  0x38   : > { %12207 = sst [smem:[#allocation39_spill]] %s12206_s18  ;;  %s497_s2 = scalar_lea.vmem [#allocation12], %s6610_s11 }
  0x39   : > { %s507_s0 = sshll.u32 %s497_s2, 4  ;;  %s6613_s25 = sshll.u32 %s502_s12, 3  ;;  %s508_s0 = int_to_ptr.vmem [resolvable:$true] %s507_s0 }
  0x3a   : > { %s12208_s1 = sld [smem:[#allocation197_spill]]  ;;  %p6934_p13 = pnand %p6948_p11, %p8148_p9 }
  0x3b   : > { %s12209_s5 = sld [smem:[#allocation201_spill]]  ;;  %s8181_s2 = scalar_lea.sflag [#allocation13], %s493_s10 }
  0x3c   : > { %s12210_s6 = smov 8   ;;  %s12211_s12 = smov 128  }
  0x3d   : > { %s12212_s9 = sld [smem:[#allocation205_spill]]  ;;  %s6599_s10 = sadd.s32 4294967294, %s7923_s23  }
  0x3e   : > { %s49_s4 = sadd.s32 1, %s7915_s21  ;;  %p69_p0 = scmp.ne.s32.totalorder %s7895_s16, %s7891_s15 }
  0x3f   : > { %s12650_s4 = smov (!%p8134_p6, %s49_s4), %s7915_s21  ;;  %p75_p2 = scmp.ne.s32.totalorder %s7891_s15, %s7887_s14 }
  0x40   : > { %s504_s29 = scalar_lea.hbm %s12208_s1, %s6613_s25  ;;  %s7929_s25 = smov [#allocation17]  }
  0x41   : > { %s505_s18 = sshll.u32 %s504_s29, 4  ;;  %s410_s7 = sshll.u32 %s12209_s5, 4  ;;  %s506_s18 = int_to_ptr.hbm [resolvable:$true] %s505_s18  ;;  %s411_s7 = int_to_ptr.hbm [resolvable:$true] %s410_s7 }
  0x42   : > { %6936 = dma.hbm_to_vmem [thread:$0]  (!%p6934_p13), %s506_s18, 2048, %s508_s0, %s8181_s2, %s12211_s12, %s12211_s12, %s12210_s6  }
  0x43   : > { %s412_s26 = sshll.u32 %s7929_s25, 4  ;;  %s444_s11 = sshll.u32 %s12212_s9, 4  ;;  %s413_s26 = int_to_ptr.vmem [resolvable:$true] %s412_s26  ;;  %s445_s11 = int_to_ptr.hbm [resolvable:$true] %s444_s11 }
  0x44   : > { %6923 = dma.hbm_to_vmem [thread:$0]  (!%p8115_p5), %s411_s7, 2048, %s413_s26, [#allocation16], %s12211_s12, %s12211_s12, %s12210_s6  }
  0x45   : > { %s7930_s0 = smov [#allocation20]   ;;  %s62_s18 = sadd.s32 1, %s7895_s16 }
  0x46   : > { %s446_s19 = sshll.u32 %s7930_s0, 4  ;;  %p51_p4 = scmp.ge.s32.totalorder %s12650_s4, 2  ;;  %s447_s19 = int_to_ptr.vmem [resolvable:$true] %s446_s19 }
  0x47   : > { %6929 = dma.hbm_to_vmem [thread:$0]  (!%p8115_p5), %s445_s11, 2048, %s447_s19, [#allocation19], %s12211_s12, %s12211_s12, %s12210_s6  }
  0x48   : > { %p369_p8 = scmp.eq.s32.totalorder %s8099_s24, 7  ;;  %p8213_p9 = por %p70_p7, %p69_p0 }
  0x49   : > { %p8222_p5 = por %p11984_p1, %p75_p2  ;;  %s12652_s4 = smov (%p51_p4, %s12650_s4), 0 }
  0x4a   : > { %12215 = sst [smem:[#allocation40_spill]] %s12652_s4  ;;  %s12216_s17 = sadd.s32 1, %s7919_s22 }
  0x4b   : > { %s12654_s17 = smov (!%p51_p4, %s12216_s17), %s7919_s22  ;;  %s58_s7 = ssub.s32 %s7915_s21, %s12652_s4 }
  0x4c   : > { %p8233_p6 = por %p369_p8, %p69_p0  ;;  %p55_p10 = scmp.ge.s32.totalorder %s12654_s17, 2 }
  0x4d   : > { %p375_p13 = scmp.eq.s32.totalorder %s6599_s10, 7  ;;  %s469_s26 = sand.u32 1, %s7895_s16  }
  0x4e   : > { %s6607_s27 = sshll.u32 %s7915_s21, 4  ;;  %s12656_s17 = smov (%p55_p10, %s12654_s17), 0 }
  0x4f   : > { %12218 = sst [smem:[#allocation41_spill]] %s12656_s17  ;;  %p8244_p1 = por %p375_p13, %p75_p2 }
  0x50   : > { %s57_s11 = ssub.s32 %s7919_s22, %s12656_s17  ;;  %s6606_s0 = sshll.u32 %s469_s26, 7 }
  0x51   : > { %s12219_s29 = scalar_select %p8244_p1, 1, 0 }
  0x52   : > { %s59_s19 = sor.u32 %s58_s7, %s57_s11  ;;  %s87_s3 = sor.u32 %s8156_s8, %s57_s11 }
  0x53   : > { %12220 = sst [smem:[#allocation42_spill]] %s12219_s29  ;;  %p60_p0 = scmp.eq.s32.totalorder %s59_s19, 0 }
  0x54   : > { %p88_p4 = scmp.eq.s32.totalorder %s87_s3, 0  ;;  %s12221_s1 = sld [smem:[#allocation30_spill]] }
  0x55   : > { %s117_s10 = sor.u32 %s8156_s8, %s59_s19  ;;  %s12222_s5 = sld [smem:[#allocation29_spill]] }
  0x56   : > { %s8253_s9 = scalar_select %p60_p0, %s7895_s16, %s62_s18  }
  0x57   : > { %s12224_s4 = sadd.s32 1, %s7883_s30  ;;  %p8260_p2 = scmp.eq.s32.totalorder %s117_s10, 0 }
  0x58   : > { %12223 = sst [smem:[#allocation43_spill]] %s8253_s9  ;;  %s12227_s29 = sshll.u32 %s7919_s22, 5 }
  0x59   : > { %s8258_s14 = scalar_select %p88_p4, %s7883_s30, %s12224_s4  }
  0x5a   : > { %s12228_s7 = sld [smem:[#allocation28_spill]]  ;;  %s478_s3 = sadd.s32 %s12227_s29, %s6607_s27 }
  0x5b   : > { %12225 = sst [smem:[#allocation44_spill]] %s8258_s14  ;;  %s6609_s8 = sshll.u32 %s478_s3, 3 }
  0x5c   : > { %s473_s11 = scalar_lea.vmem [#allocation9], %s6606_s0  ;;  %s12229_s4 = sld [smem:[#allocation196_spill]] }
  0x5d   : > { %s483_s18 = sshll.u32 %s473_s11, 4  ;;  %p6931_p8 = pnand %p6948_p11, %p8213_p9  ;;  %s484_s18 = int_to_ptr.vmem [resolvable:$true] %s483_s18 }
  0x5e   : > { %s470_s14 = scalar_lea.sflag [#allocation10], %s469_s26  ;;  %s120_s27 = sadd.s32 1, %s12221_s1 }
  0x5f   : > { %p127_p10 = scmp.ne.s32.totalorder %s12221_s1, %s12222_s5  ;;  %s6764_s13 = sshll.u32 %s7915_s21, 5 }
  0x60   : > { %s8282_s29 = scalar_select %p8260_p2, %s12221_s1, %s120_s27  }
  0x61   : > { %p8286_p13 = por %p127_p10, %p70_p7  ;;  %p133_p0 = scmp.ne.s32.totalorder %s12222_s5, %s12228_s7 }
  0x62   : > { %s480_s16 = scalar_lea.hbm %s12229_s4, %s6609_s8  ;;  %p12231_p9 = scmp.eq.s32.totalorder %s8099_s24, 0 }
  0x63   : > { %s481_s10 = sshll.u32 %s480_s16, 4  ;;  %s519_s16 = sand.u32 1, %s12221_s1   ;;  %s482_s10 = int_to_ptr.hbm [resolvable:$true] %s481_s10 }
  0x64   : > { %6933 = dma.hbm_to_vmem [thread:$0]  (!%p6931_p8), %s482_s10, 2048, %s484_s18, %s470_s14, %s12211_s12, %s12211_s12, %s12210_s6  }
  0x65   : > { %p8296_p4 = por %p133_p0, %p12231_p9  ;;  %s6614_s14 = sshll.u32 %s519_s16, 7 }
  0x66   : > { %s526_s0 = sadd.s32 %s7911_s20, %s6764_s13  ;;  %s6617_s17 = sshll.u32 %s7919_s22, 6 }
  0x67   : > { %s521_s3 = scalar_lea.vmem [#allocation14], %s6614_s14  ;;  %s528_s11 = sadd.s32 %s6617_s17, %s526_s0 }
  0x68   : > { %s533_s8 = sshll.u32 %s521_s3, 4  ;;  %s6618_s18 = sshll.u32 %s528_s11, 3  ;;  %s534_s8 = int_to_ptr.vmem [resolvable:$true] %s533_s8 }
  0x69   : > { %p6937_p7 = pnand %p6948_p11, %p8286_p13  ;;  %s12233_s7 = sld [smem:[#allocation198_spill]] }
  0x6a   : > { %s7931_s10 = smov 256  }
  0x6d   : > { %545 = sbr.rel (%p8107_p3) target bundleno = 3694 (0xe6e), region = 72 }
  0x6f   : > { %s530_s19 = scalar_lea.hbm %s12233_s7, %s6618_s18 }
  0x70   : > { %s531_s4 = sshll.u32 %s530_s19, 4  ;;  %s532_s4 = int_to_ptr.hbm [resolvable:$true] %s531_s4 }
  0x71   : > { %6939 = dma.hbm_to_vmem [thread:$0]  (!%p6937_p7), %s532_s4, 2048, %s534_s8, %s8181_s2, %s7931_s10, %s12211_s12, %s12210_s6  }
  0x72   : > { %s8315_s16 = sand.u32 1, %s7891_s15  }
  0x73   : > { %s6620_s9 = sshll.u32 %s8315_s16, 7  ;;  %s548_s13 = scalar_lea.sflag [#allocation10], %s8315_s16 }
  0x74   : > { %s8319_s14 = scalar_lea.vmem [#allocation9], %s6620_s9 }
  0x75   : > { %7838 = dma.done.wait (%p8222_p5), %s548_s13, 2048  }
  0x76   : > { %7840 = vsyncadd (%p8222_p5), %s548_s13, 4294965248  ;;  %s12235_s2 = sld [smem:[#allocation31_spill]]  ;;  %s557_s12 = sand.u32 1, %s8099_s24  }
  0x77   : > { %s558_s3 = scalar_lea.sflag [#allocation13], %s557_s12 }
  0x7c   : > { %s559_s0 = sand.u32 1, %s12235_s2  }
  0x7d   : > { %s6621_s17 = sshll.u32 %s559_s0, 7 }
  0x7e   : > { %s8327_s8 = scalar_lea.vmem [#allocation12], %s6621_s17 }
  0x7f   : > { %7842 = dma.done.wait (%p8161_p12), %s558_s3, 2048  }
  0x80   : > { %7844 = vsyncadd (%p8161_p12), %s558_s3, 4294965248  ;;  %s12237_s11 = sld [smem:[#allocation29_spill]] }
  0x86   : > { %s569_s18 = sand.u32 1, %s12237_s11  }
  0x87   : > { %s6622_s5 = sshll.u32 %s569_s18, 7 }
  0x88   : > { %s8334_s28 = scalar_lea.vmem [#allocation14], %s6622_s5 }
  0x89   : > { %7846 = dma.done.wait (%p8296_p4), %s558_s3, 2048  }
  0x8a   : > { %7848 = vsyncadd (%p8296_p4), %s558_s3, 4294965248  ;;  %p12238_p3 = scmp.eq.s32.totalorder %s8099_s24, 0 }
  0x8c   : > { %7850 = dma.done.wait (%p12238_p3), [#allocation16], 4096   ;;  %p12239_p11 = pmov %p12238_p3 }
  0x8d   : > { %p12240_p5 = pmov %p12238_p3 }
  0x8e   : > { %7852 = vsyncadd (%p12239_p11), [#allocation16], 4294963200 }
  0x8f   : > { %7854 = dma.done.wait (%p12240_p5), [#allocation19], 4096   ;;  %p12241_p12 = pmov %p12238_p3 }
  0x90   : > { %s8348_s1 = scalar_lea.vmem [#allocation21], %s6620_s9  ;;  %s12242_s7 = sld [smem:[#allocation34_spill]] }
  0x91   : > { %7856 = vsyncadd (%p12241_p12), [#allocation19], 4294963200 }
  0x96   : > { %p6628_p2 = scmp.ne.s32.totalorder %s12242_s7, 0 }
  0x97   : > { %s12243_s19 = sld [smem:[#allocation200_spill]] (!%p6628_p2)  ;;  %s7934_s4 = smov (!%p6628_p2), 96  }
  0x98   : > { %652 = sbr.rel (%p6628_p2) target bundleno = 556 (0x22c), region = 104  ;;  %s7935_s10 = smov (!%p6628_p2), 64  }
  0x99   : > { %s7936_s27 = smov (!%p6628_p2), 32  }
  0x9d   : > { %vm653_vm0 = vcmask 7168   ;;  %v878_v0 = vld [vmem:[#allocation15 + $0x78] sm:$0xff]  ;;  %v877_v1 = vld [vmem:[#allocation15 + $0x70] sm:$0xff]  ;;  %v7932_v2 = vmov -inf   ;;  %v876_v3 = vld [vmem:[#allocation15 + $0x68] sm:$0xff]  ;;  %v7933_v27 = vmov 0.0  }
  0x9e   : > { %654 = vst.msk [vmem:[#allocation5] sm:$0xff] %vm653_vm0, %v7932_v2  ;;  %883 = vmatpush.msra.mxu0 %v878_v0  ;;  %6765 = vmatpush.msra.mxu1 %v878_v0  ;;  %v875_v4 = vld [vmem:[#allocation15 + $0x60] sm:$0xff]  ;;  %v874_v5 = vld [vmem:[#allocation15 + $0x58] sm:$0xff]  ;;  %v873_v6 = vld [vmem:[#allocation15 + $0x50] sm:$0xff]  ;;  %vm782_vm1 = vcmask 261120  }
  0x9f   : > { %655 = vst.msk [vmem:[#allocation5 + $0x8] sm:$0xff] %vm653_vm0, %v7932_v2  ;;  %6767 = vmatpush.msra.mxu3 %v878_v0  ;;  %6766 = vmatpush.msra.mxu2 %v878_v0  ;;  %v872_v7 = vld [vmem:[#allocation15 + $0x48] sm:$0xff]  ;;  %v871_v8 = vld [vmem:[#allocation15 + $0x40] sm:$0xff]  ;;  %v870_v9 = vld [vmem:[#allocation15 + $0x38] sm:$0xff] }
  0xa0   : > { %656 = vst.msk [vmem:[#allocation5 + $0x10] sm:$0xff] %vm653_vm0, %v7932_v2  ;;  %884 = vmatpush.msra.mxu0 %v877_v1  ;;  %6768 = vmatpush.msra.mxu1 %v877_v1  ;;  %v869_v10 = vld [vmem:[#allocation15 + $0x30] sm:$0xff]  ;;  %v868_v11 = vld [vmem:[#allocation15 + $0x28] sm:$0xff]  ;;  %v867_v12 = vld [vmem:[#allocation15 + $0x20] sm:$0xff] }
  0xa1   : > { %657 = vst.msk [vmem:[#allocation5 + $0x18] sm:$0xff] %vm653_vm0, %v7932_v2  ;;  %6770 = vmatpush.msra.mxu3 %v877_v1  ;;  %6769 = vmatpush.msra.mxu2 %v877_v1  ;;  %v866_v13 = vld [vmem:[#allocation15 + $0x18] sm:$0xff]  ;;  %v865_v14 = vld [vmem:[#allocation15 + $0x10] sm:$0xff]  ;;  %v864_v15 = vld [vmem:[#allocation15 + $0x8] sm:$0xff] }
  0xa2   : > { %658 = vst.msk [vmem:[#allocation5 + $0x20] sm:$0xff] %vm653_vm0, %v7932_v2  ;;  %885 = vmatpush.msra.mxu0 %v876_v3  ;;  %6771 = vmatpush.msra.mxu1 %v876_v3  ;;  %v863_v16 = vld [vmem:[#allocation15] sm:$0xff]  ;;  %v852_v21 = vld [vmem:[%s8319_s14 + $0x28] sm:$0xff]  ;;  %v849_v25 = vld [vmem:[%s8319_s14 + $0x10] sm:$0xff] }
  0xa3   : > { %659 = vst.msk [vmem:[#allocation5 + $0x28] sm:$0xff] %vm653_vm0, %v7932_v2  ;;  %6773 = vmatpush.msra.mxu3 %v876_v3  ;;  %6772 = vmatpush.msra.mxu2 %v876_v3  ;;  %v847_v17 = vld [vmem:[%s8319_s14] sm:$0xff]  ;;  %v848_v22 = vld [vmem:[%s8319_s14 + $0x8] sm:$0xff]  ;;  %v853_v26 = vld [vmem:[%s8319_s14 + $0x30] sm:$0xff] }
  0xa4   : > { %660 = vst.msk [vmem:[#allocation5 + $0x30] sm:$0xff] %vm653_vm0, %v7932_v2  ;;  %886 = vmatpush.msra.mxu0 %v875_v4  ;;  %6774 = vmatpush.msra.mxu1 %v875_v4  ;;  %v851_v18 = vld [vmem:[%s8319_s14 + $0x20] sm:$0xff]  ;;  %v860_v23 = vld [vmem:[%s8319_s14 + $0x68] sm:$0xff]  ;;  %v857_v28 = vld [vmem:[%s8319_s14 + $0x50] sm:$0xff] }
  0xa5   : > { %661 = vst.msk [vmem:[#allocation5 + $0x38] sm:$0xff] %vm653_vm0, %v7932_v2  ;;  %6776 = vmatpush.msra.mxu3 %v875_v4  ;;  %6775 = vmatpush.msra.mxu2 %v875_v4  ;;  %v859_v19 = vld [vmem:[%s8319_s14 + $0x60] sm:$0xff]  ;;  %v856_v24 = vld [vmem:[%s8319_s14 + $0x48] sm:$0xff]  ;;  %v861_v29 = vld [vmem:[%s8319_s14 + $0x70] sm:$0xff] }
  0xa6   : > { %662 = vst.msk [vmem:[#allocation5 + $0x40] sm:$0xff] %vm653_vm0, %v7932_v2  ;;  %887 = vmatpush.msra.mxu0 %v874_v5  ;;  %6777 = vmatpush.msra.mxu1 %v874_v5  ;;  %v855_v20 = vld [vmem:[%s8319_s14 + $0x40] sm:$0xff]  ;;  %v850_v30 = vld [vmem:[%s8319_s14 + $0x18] sm:$0xff] }
  0xa7   : > { %663 = vst.msk [vmem:[#allocation5 + $0x48] sm:$0xff] %vm653_vm0, %v7932_v2  ;;  %6779 = vmatpush.msra.mxu3 %v874_v5  ;;  %6778 = vmatpush.msra.mxu2 %v874_v5  ;;  %v854_v31 = vld [vmem:[%s8319_s14 + $0x38] sm:$0xff]  ;;  %v8678_v34 = vld [vmem:[%s12243_s19] ss:$0 sm:$0xff] }
  0xa8   : > { %664 = vst.msk [vmem:[#allocation5 + $0x50] sm:$0xff] %vm653_vm0, %v7932_v2  ;;  %888 = vmatpush.msra.mxu0 %v873_v6  ;;  %6780 = vmatpush.msra.mxu1 %v873_v6  ;;  %v862_v32 = vld [vmem:[%s8319_s14 + $0x78] sm:$0xff] }
  0xa9   : > { %665 = vst.msk [vmem:[#allocation5 + $0x58] sm:$0xff] %vm653_vm0, %v7932_v2  ;;  %6782 = vmatpush.msra.mxu3 %v873_v6  ;;  %6781 = vmatpush.msra.mxu2 %v873_v6  ;;  %v858_v33 = vld [vmem:[%s8319_s14 + $0x58] sm:$0xff] }
  0xaa   : > { %666 = vst.msk [vmem:[#allocation5 + $0x60] sm:$0xff] %vm653_vm0, %v7932_v2  ;;  %889 = vmatpush.msra.mxu0 %v872_v7  ;;  %6783 = vmatpush.msra.mxu1 %v872_v7 }
  0xab   : > { %667 = vst.msk [vmem:[#allocation5 + $0x68] sm:$0xff] %vm653_vm0, %v7932_v2  ;;  %6785 = vmatpush.msra.mxu3 %v872_v7  ;;  %6784 = vmatpush.msra.mxu2 %v872_v7 }
  0xac   : > { %668 = vst.msk [vmem:[#allocation5 + $0x70] sm:$0xff] %vm653_vm0, %v7932_v2  ;;  %890 = vmatpush.msra.mxu0 %v871_v8  ;;  %6786 = vmatpush.msra.mxu1 %v871_v8 }
  0xad   : > { %669 = vst.msk [vmem:[#allocation5 + $0x78] sm:$0xff] %vm653_vm0, %v7932_v2  ;;  %6788 = vmatpush.msra.mxu3 %v871_v8  ;;  %6787 = vmatpush.msra.mxu2 %v871_v8 }
  0xae   : > { %670 = vst.msk [vmem:[#allocation5 + $0x80] sm:$0xff] %vm653_vm0, %v7932_v2  ;;  %891 = vmatpush.msra.mxu0 %v870_v9  ;;  %6789 = vmatpush.msra.mxu1 %v870_v9 }
  0xaf   : > { %671 = vst.msk [vmem:[#allocation5 + $0x88] sm:$0xff] %vm653_vm0, %v7932_v2  ;;  %6791 = vmatpush.msra.mxu3 %v870_v9  ;;  %6790 = vmatpush.msra.mxu2 %v870_v9 }
  0xb0   : > { %672 = vst.msk [vmem:[#allocation5 + $0x90] sm:$0xff] %vm653_vm0, %v7932_v2  ;;  %892 = vmatpush.msra.mxu0 %v869_v10  ;;  %6792 = vmatpush.msra.mxu1 %v869_v10 }
  0xb1   : > { %673 = vst.msk [vmem:[#allocation5 + $0x98] sm:$0xff] %vm653_vm0, %v7932_v2  ;;  %6794 = vmatpush.msra.mxu3 %v869_v10  ;;  %6793 = vmatpush.msra.mxu2 %v869_v10 }
  0xb2   : > { %674 = vst.msk [vmem:[#allocation5 + $0xa0] sm:$0xff] %vm653_vm0, %v7932_v2  ;;  %893 = vmatpush.msra.mxu0 %v868_v11  ;;  %6795 = vmatpush.msra.mxu1 %v868_v11 }
  0xb3   : > { %675 = vst.msk [vmem:[#allocation5 + $0xa8] sm:$0xff] %vm653_vm0, %v7932_v2  ;;  %6797 = vmatpush.msra.mxu3 %v868_v11  ;;  %6796 = vmatpush.msra.mxu2 %v868_v11 }
  0xb4   : > { %676 = vst.msk [vmem:[#allocation5 + $0xb0] sm:$0xff] %vm653_vm0, %v7932_v2  ;;  %894 = vmatpush.msra.mxu0 %v867_v12  ;;  %6798 = vmatpush.msra.mxu1 %v867_v12 }
  0xb5   : > { %677 = vst.msk [vmem:[#allocation5 + $0xb8] sm:$0xff] %vm653_vm0, %v7932_v2  ;;  %6800 = vmatpush.msra.mxu3 %v867_v12  ;;  %6799 = vmatpush.msra.mxu2 %v867_v12 }
  0xb6   : > { %678 = vst.msk [vmem:[#allocation5 + $0xc0] sm:$0xff] %vm653_vm0, %v7932_v2  ;;  %895 = vmatpush.msra.mxu0 %v866_v13  ;;  %6801 = vmatpush.msra.mxu1 %v866_v13 }
  0xb7   : > { %679 = vst.msk [vmem:[#allocation5 + $0xc8] sm:$0xff] %vm653_vm0, %v7932_v2  ;;  %6803 = vmatpush.msra.mxu3 %v866_v13  ;;  %6802 = vmatpush.msra.mxu2 %v866_v13 }
  0xb8   : > { %680 = vst.msk [vmem:[#allocation5 + $0xd0] sm:$0xff] %vm653_vm0, %v7932_v2  ;;  %896 = vmatpush.msra.mxu0 %v865_v14  ;;  %6804 = vmatpush.msra.mxu1 %v865_v14 }
  0xb9   : > { %681 = vst.msk [vmem:[#allocation5 + $0xd8] sm:$0xff] %vm653_vm0, %v7932_v2  ;;  %6806 = vmatpush.msra.mxu3 %v865_v14  ;;  %6805 = vmatpush.msra.mxu2 %v865_v14 }
  0xba   : > { %682 = vst.msk [vmem:[#allocation5 + $0xe0] sm:$0xff] %vm653_vm0, %v7932_v2  ;;  %897 = vmatpush.msra.mxu0 %v864_v15  ;;  %6807 = vmatpush.msra.mxu1 %v864_v15 }
  0xbb   : > { %683 = vst.msk [vmem:[#allocation5 + $0xe8] sm:$0xff] %vm653_vm0, %v7932_v2  ;;  %6809 = vmatpush.msra.mxu3 %v864_v15  ;;  %6808 = vmatpush.msra.mxu2 %v864_v15 }
  0xbc   : > { %684 = vst.msk [vmem:[#allocation5 + $0xf0] sm:$0xff] %vm653_vm0, %v7932_v2  ;;  %898 = vmatpush.msra.mxu0 %v863_v16  ;;  %6810 = vmatpush.msra.mxu1 %v863_v16 }
  0xbd   : > { %685 = vst.msk [vmem:[#allocation5 + $0xf8] sm:$0xff] %vm653_vm0, %v7932_v2  ;;  %899 = vmatmul.f32.vlgmr.msra.gmra.mxu0 %v847_v17  ;;  %911 = vmatmul.f32.vlgmr.msra.gmra.mxu1 %v851_v18 }
  0xbe   : > { %686 = vst.msk [vmem:[#allocation5 + $0x100] sm:$0xff] %vm653_vm0, %v7932_v2  ;;  %6812 = vmatpush.msra.mxu3 %v863_v16  ;;  %6811 = vmatpush.msra.mxu2 %v863_v16 }
  0xbf   : > { %687 = vst.msk [vmem:[#allocation5 + $0x108] sm:$0xff] %vm653_vm0, %v7932_v2  ;;  %935 = vmatmul.f32.vlgmr.msra.gmra.mxu3 %v859_v19  ;;  %923 = vmatmul.f32.vlgmr.msra.gmra.mxu2 %v855_v20 }
  0xc0   : > { %688 = vst.msk [vmem:[#allocation5 + $0x110] sm:$0xff] %vm653_vm0, %v7932_v2 }
  0xc1   : > { %689 = vst.msk [vmem:[#allocation5 + $0x118] sm:$0xff] %vm653_vm0, %v7932_v2 }
  0xc2   : > { %690 = vst.msk [vmem:[#allocation5 + $0x120] sm:$0xff] %vm653_vm0, %v7932_v2 }
  0xc3   : > { %691 = vst.msk [vmem:[#allocation5 + $0x128] sm:$0xff] %vm653_vm0, %v7932_v2 }
  0xc4   : > { %692 = vst.msk [vmem:[#allocation5 + $0x130] sm:$0xff] %vm653_vm0, %v7932_v2 }
  0xc5   : > { %693 = vst.msk [vmem:[#allocation5 + $0x138] sm:$0xff] %vm653_vm0, %v7932_v2  ;;  %914 = vmatmul.f32.gmra.mxu1 %v852_v21  ;;  %902 = vmatmul.f32.gmra.mxu0 %v848_v22 }
  0xc6   : > { %694 = vst.msk [vmem:[#allocation5 + $0x140] sm:$0xff] %vm653_vm0, %v7932_v2 }
  0xc7   : > { %695 = vst.msk [vmem:[#allocation5 + $0x148] sm:$0xff] %vm653_vm0, %v7932_v2  ;;  %938 = vmatmul.f32.gmra.mxu3 %v860_v23  ;;  %926 = vmatmul.f32.gmra.mxu2 %v856_v24 }
  0xc8   : > { %696 = vst.msk [vmem:[#allocation5 + $0x150] sm:$0xff] %vm653_vm0, %v7932_v2 }
  0xc9   : > { %697 = vst.msk [vmem:[#allocation5 + $0x158] sm:$0xff] %vm653_vm0, %v7932_v2 }
  0xca   : > { %698 = vst.msk [vmem:[#allocation5 + $0x160] sm:$0xff] %vm653_vm0, %v7932_v2 }
  0xcb   : > { %699 = vst.msk [vmem:[#allocation5 + $0x168] sm:$0xff] %vm653_vm0, %v7932_v2 }
  0xcc   : > { %700 = vst.msk [vmem:[#allocation5 + $0x170] sm:$0xff] %vm653_vm0, %v7932_v2 }
  0xcd   : > { %701 = vst.msk [vmem:[#allocation5 + $0x178] sm:$0xff] %vm653_vm0, %v7932_v2  ;;  %905 = vmatmul.f32.gmra.mxu0 %v849_v25  ;;  %917 = vmatmul.f32.gmra.mxu1 %v853_v26 }
  0xce   : > { %702 = vst.msk [vmem:[#allocation5 + $0x180] sm:$0xff] %vm653_vm0, %v7932_v2 }
  0xcf   : > { %703 = vst.msk [vmem:[#allocation5 + $0x188] sm:$0xff] %vm653_vm0, %v7932_v2  ;;  %929 = vmatmul.f32.gmra.mxu2 %v857_v28  ;;  %941 = vmatmul.f32.gmra.mxu3 %v861_v29 }
  0xd0   : > { %704 = vst.msk [vmem:[#allocation5 + $0x190] sm:$0xff] %vm653_vm0, %v7932_v2 }
  0xd1   : > { %705 = vst.msk [vmem:[#allocation5 + $0x198] sm:$0xff] %vm653_vm0, %v7932_v2 }
  0xd2   : > { %706 = vst.msk [vmem:[#allocation5 + $0x1a0] sm:$0xff] %vm653_vm0, %v7932_v2 }
  0xd3   : > { %707 = vst.msk [vmem:[#allocation5 + $0x1a8] sm:$0xff] %vm653_vm0, %v7932_v2 }
  0xd4   : > { %708 = vst.msk [vmem:[#allocation5 + $0x1b0] sm:$0xff] %vm653_vm0, %v7932_v2 }
  0xd5   : > { %709 = vst.msk [vmem:[#allocation5 + $0x1b8] sm:$0xff] %vm653_vm0, %v7932_v2  ;;  %908 = vmatmul.f32.gmra.mxu0 %v850_v30  ;;  %920 = vmatmul.f32.gmra.mxu1 %v854_v31 }
  0xd6   : > { %710 = vst.msk [vmem:[#allocation5 + $0x1c0] sm:$0xff] %vm653_vm0, %v7932_v2 }
  0xd7   : > { %711 = vst.msk [vmem:[#allocation5 + $0x1c8] sm:$0xff] %vm653_vm0, %v7932_v2  ;;  %944 = vmatmul.f32.gmra.mxu3 %v862_v32  ;;  %932 = vmatmul.f32.gmra.mxu2 %v858_v33 }
  0xd8   : > { %712 = vst.msk [vmem:[#allocation5 + $0x1d0] sm:$0xff] %vm653_vm0, %v7932_v2 }
  0xd9   : > { %713 = vst.msk [vmem:[#allocation5 + $0x1d8] sm:$0xff] %vm653_vm0, %v7932_v2 }
  0xda   : > { %714 = vst.msk [vmem:[#allocation5 + $0x1e0] sm:$0xff] %vm653_vm0, %v7932_v2 }
  0xdb   : > { %715 = vst.msk [vmem:[#allocation5 + $0x1e8] sm:$0xff] %vm653_vm0, %v7932_v2 }
  0xdc   : > { %716 = vst.msk [vmem:[#allocation5 + $0x1f0] sm:$0xff] %vm653_vm0, %v7932_v2 }
  0xdd   : > { %717 = vst.msk [vmem:[#allocation5 + $0x1f8] sm:$0xff] %vm653_vm0, %v7932_v2 }
  0xde   : > { %718 = vst.msk [vmem:[#allocation6] sm:$0xff] %vm653_vm0, %v7933_v27 }
  0xdf   : > { %719 = vst.msk [vmem:[#allocation6 + $0x8] sm:$0xff] %vm653_vm0, %v7933_v27 }
  0xe0   : > { %720 = vst.msk [vmem:[#allocation6 + $0x10] sm:$0xff] %vm653_vm0, %v7933_v27 }
  0xe1   : > { %721 = vst.msk [vmem:[#allocation6 + $0x18] sm:$0xff] %vm653_vm0, %v7933_v27 }
  0xe2   : > { %722 = vst.msk [vmem:[#allocation6 + $0x20] sm:$0xff] %vm653_vm0, %v7933_v27 }
  0xe3   : > { %723 = vst.msk [vmem:[#allocation6 + $0x28] sm:$0xff] %vm653_vm0, %v7933_v27 }
  0xe4   : > { %724 = vst.msk [vmem:[#allocation6 + $0x30] sm:$0xff] %vm653_vm0, %v7933_v27 }
  0xe5   : > { %725 = vst.msk [vmem:[#allocation6 + $0x38] sm:$0xff] %vm653_vm0, %v7933_v27 }
  0xe6   : > { %726 = vst.msk [vmem:[#allocation6 + $0x40] sm:$0xff] %vm653_vm0, %v7933_v27 }
  0xe7   : > { %727 = vst.msk [vmem:[#allocation6 + $0x48] sm:$0xff] %vm653_vm0, %v7933_v27 }
  0xe8   : > { %728 = vst.msk [vmem:[#allocation6 + $0x50] sm:$0xff] %vm653_vm0, %v7933_v27 }
  0xe9   : > { %729 = vst.msk [vmem:[#allocation6 + $0x58] sm:$0xff] %vm653_vm0, %v7933_v27 }
  0xea   : > { %730 = vst.msk [vmem:[#allocation6 + $0x60] sm:$0xff] %vm653_vm0, %v7933_v27 }
  0xeb   : > { %731 = vst.msk [vmem:[#allocation6 + $0x68] sm:$0xff] %vm653_vm0, %v7933_v27 }
  0xec   : > { %732 = vst.msk [vmem:[#allocation6 + $0x70] sm:$0xff] %vm653_vm0, %v7933_v27 }
  0xed   : > { %733 = vst.msk [vmem:[#allocation6 + $0x78] sm:$0xff] %vm653_vm0, %v7933_v27 }
  0xee   : > { %734 = vst.msk [vmem:[#allocation6 + $0x80] sm:$0xff] %vm653_vm0, %v7933_v27 }
  0xef   : > { %735 = vst.msk [vmem:[#allocation6 + $0x88] sm:$0xff] %vm653_vm0, %v7933_v27 }
  0xf0   : > { %736 = vst.msk [vmem:[#allocation6 + $0x90] sm:$0xff] %vm653_vm0, %v7933_v27 }
  0xf1   : > { %737 = vst.msk [vmem:[#allocation6 + $0x98] sm:$0xff] %vm653_vm0, %v7933_v27 }
  0xf2   : > { %738 = vst.msk [vmem:[#allocation6 + $0xa0] sm:$0xff] %vm653_vm0, %v7933_v27 }
  0xf3   : > { %739 = vst.msk [vmem:[#allocation6 + $0xa8] sm:$0xff] %vm653_vm0, %v7933_v27 }
  0xf4   : > { %740 = vst.msk [vmem:[#allocation6 + $0xb0] sm:$0xff] %vm653_vm0, %v7933_v27 }
  0xf5   : > { %741 = vst.msk [vmem:[#allocation6 + $0xb8] sm:$0xff] %vm653_vm0, %v7933_v27 }
  0xf6   : > { %742 = vst.msk [vmem:[#allocation6 + $0xc0] sm:$0xff] %vm653_vm0, %v7933_v27 }
  0xf7   : > { %743 = vst.msk [vmem:[#allocation6 + $0xc8] sm:$0xff] %vm653_vm0, %v7933_v27 }
  0xf8   : > { %744 = vst.msk [vmem:[#allocation6 + $0xd0] sm:$0xff] %vm653_vm0, %v7933_v27 }
  0xf9   : > { %745 = vst.msk [vmem:[#allocation6 + $0xd8] sm:$0xff] %vm653_vm0, %v7933_v27 }
  0xfa   : > { %746 = vst.msk [vmem:[#allocation6 + $0xe0] sm:$0xff] %vm653_vm0, %v7933_v27 }
  0xfb   : > { %747 = vst.msk [vmem:[#allocation6 + $0xe8] sm:$0xff] %vm653_vm0, %v7933_v27 }
  0xfc   : > { %748 = vst.msk [vmem:[#allocation6 + $0xf0] sm:$0xff] %vm653_vm0, %v7933_v27 }
  0xfd   : > { %749 = vst.msk [vmem:[#allocation6 + $0xf8] sm:$0xff] %vm653_vm0, %v7933_v27 }
  0xfe   : > { %750 = vst.msk [vmem:[#allocation6 + $0x100] sm:$0xff] %vm653_vm0, %v7933_v27 }
  0xff   : > { %751 = vst.msk [vmem:[#allocation6 + $0x108] sm:$0xff] %vm653_vm0, %v7933_v27 }
 0x100   : > { %752 = vst.msk [vmem:[#allocation6 + $0x110] sm:$0xff] %vm653_vm0, %v7933_v27 }
 0x101   : > { %753 = vst.msk [vmem:[#allocation6 + $0x118] sm:$0xff] %vm653_vm0, %v7933_v27 }
 0x102   : > { %754 = vst.msk [vmem:[#allocation6 + $0x120] sm:$0xff] %vm653_vm0, %v7933_v27 }
 0x103   : > { %755 = vst.msk [vmem:[#allocation6 + $0x128] sm:$0xff] %vm653_vm0, %v7933_v27 }
 0x104   : > { %756 = vst.msk [vmem:[#allocation6 + $0x130] sm:$0xff] %vm653_vm0, %v7933_v27 }
 0x105   : > { %757 = vst.msk [vmem:[#allocation6 + $0x138] sm:$0xff] %vm653_vm0, %v7933_v27 }
 0x106   : > { %758 = vst.msk [vmem:[#allocation6 + $0x140] sm:$0xff] %vm653_vm0, %v7933_v27 }
 0x107   : > { %759 = vst.msk [vmem:[#allocation6 + $0x148] sm:$0xff] %vm653_vm0, %v7933_v27 }
 0x108   : > { %760 = vst.msk [vmem:[#allocation6 + $0x150] sm:$0xff] %vm653_vm0, %v7933_v27 }
 0x109   : > { %761 = vst.msk [vmem:[#allocation6 + $0x158] sm:$0xff] %vm653_vm0, %v7933_v27 }
 0x10a   : > { %762 = vst.msk [vmem:[#allocation6 + $0x160] sm:$0xff] %vm653_vm0, %v7933_v27 }
 0x10b   : > { %763 = vst.msk [vmem:[#allocation6 + $0x168] sm:$0xff] %vm653_vm0, %v7933_v27 }
 0x10c   : > { %764 = vst.msk [vmem:[#allocation6 + $0x170] sm:$0xff] %vm653_vm0, %v7933_v27 }
 0x10d   : > { %765 = vst.msk [vmem:[#allocation6 + $0x178] sm:$0xff] %vm653_vm0, %v7933_v27 }
 0x10e   : > { %766 = vst.msk [vmem:[#allocation6 + $0x180] sm:$0xff] %vm653_vm0, %v7933_v27 }
 0x10f   : > { %767 = vst.msk [vmem:[#allocation6 + $0x188] sm:$0xff] %vm653_vm0, %v7933_v27 }
 0x110   : > { %768 = vst.msk [vmem:[#allocation6 + $0x190] sm:$0xff] %vm653_vm0, %v7933_v27 }
 0x111   : > { %769 = vst.msk [vmem:[#allocation6 + $0x198] sm:$0xff] %vm653_vm0, %v7933_v27 }
 0x112   : > { %770 = vst.msk [vmem:[#allocation6 + $0x1a0] sm:$0xff] %vm653_vm0, %v7933_v27 }
 0x113   : > { %771 = vst.msk [vmem:[#allocation6 + $0x1a8] sm:$0xff] %vm653_vm0, %v7933_v27 }
 0x114   : > { %772 = vst.msk [vmem:[#allocation6 + $0x1b0] sm:$0xff] %vm653_vm0, %v7933_v27 }
 0x115   : > { %773 = vst.msk [vmem:[#allocation6 + $0x1b8] sm:$0xff] %vm653_vm0, %v7933_v27 }
 0x116   : > { %774 = vst.msk [vmem:[#allocation6 + $0x1c0] sm:$0xff] %vm653_vm0, %v7933_v27 }
 0x117   : > { %775 = vst.msk [vmem:[#allocation6 + $0x1c8] sm:$0xff] %vm653_vm0, %v7933_v27 }
 0x118   : > { %776 = vst.msk [vmem:[#allocation6 + $0x1d0] sm:$0xff] %vm653_vm0, %v7933_v27 }
 0x119   : > { %777 = vst.msk [vmem:[#allocation6 + $0x1d8] sm:$0xff] %vm653_vm0, %v7933_v27 }
 0x11a   : > { %778 = vst.msk [vmem:[#allocation6 + $0x1e0] sm:$0xff] %vm653_vm0, %v7933_v27 }
 0x11b   : > { %779 = vst.msk [vmem:[#allocation6 + $0x1e8] sm:$0xff] %vm653_vm0, %v7933_v27 }
 0x11c   : > { %780 = vst.msk [vmem:[#allocation6 + $0x1f0] sm:$0xff] %vm653_vm0, %v7933_v27 }
 0x11d   : > { %781 = vst.msk [vmem:[#allocation6 + $0x1f8] sm:$0xff] %vm653_vm0, %v7933_v27 }
 0x11e   : > { %783 = vst.msk [vmem:[#allocation7] sm:$0xff] %vm782_vm1, %v7933_v27 }
 0x11f   : > { %784 = vst.msk [vmem:[#allocation7 + $0x8] sm:$0xff] %vm782_vm1, %v7933_v27 }
 0x120   : > { %785 = vst.msk [vmem:[#allocation7 + $0x10] sm:$0xff] %vm782_vm1, %v7933_v27 }
 0x121   : > { %786 = vst.msk [vmem:[#allocation7 + $0x18] sm:$0xff] %vm782_vm1, %v7933_v27 }
 0x122   : > { %787 = vst.msk [vmem:[#allocation7 + $0x20] sm:$0xff] %vm782_vm1, %v7933_v27 }
 0x123   : > { %788 = vst.msk [vmem:[#allocation7 + $0x28] sm:$0xff] %vm782_vm1, %v7933_v27 }
 0x124   : > { %789 = vst.msk [vmem:[#allocation7 + $0x30] sm:$0xff] %vm782_vm1, %v7933_v27 }
 0x125   : > { %790 = vst.msk [vmem:[#allocation7 + $0x38] sm:$0xff] %vm782_vm1, %v7933_v27 }
 0x126   : > { %791 = vst.msk [vmem:[#allocation7 + $0x40] sm:$0xff] %vm782_vm1, %v7933_v27 }
 0x127   : > { %792 = vst.msk [vmem:[#allocation7 + $0x48] sm:$0xff] %vm782_vm1, %v7933_v27 }
 0x128   : > { %793 = vst.msk [vmem:[#allocation7 + $0x50] sm:$0xff] %vm782_vm1, %v7933_v27 }
 0x129   : > { %794 = vst.msk [vmem:[#allocation7 + $0x58] sm:$0xff] %vm782_vm1, %v7933_v27 }
 0x12a   : > { %795 = vst.msk [vmem:[#allocation7 + $0x60] sm:$0xff] %vm782_vm1, %v7933_v27 }
 0x12b   : > { %796 = vst.msk [vmem:[#allocation7 + $0x68] sm:$0xff] %vm782_vm1, %v7933_v27 }
 0x12c   : > { %797 = vst.msk [vmem:[#allocation7 + $0x70] sm:$0xff] %vm782_vm1, %v7933_v27 }
 0x12d   : > { %798 = vst.msk [vmem:[#allocation7 + $0x78] sm:$0xff] %vm782_vm1, %v7933_v27 }
 0x12e   : > { %799 = vst.msk [vmem:[#allocation7 + $0x80] sm:$0xff] %vm782_vm1, %v7933_v27 }
 0x12f   : > { %800 = vst.msk [vmem:[#allocation7 + $0x88] sm:$0xff] %vm782_vm1, %v7933_v27 }
 0x130   : > { %801 = vst.msk [vmem:[#allocation7 + $0x90] sm:$0xff] %vm782_vm1, %v7933_v27 }
 0x131   : > { %802 = vst.msk [vmem:[#allocation7 + $0x98] sm:$0xff] %vm782_vm1, %v7933_v27 }
 0x132   : > { %803 = vst.msk [vmem:[#allocation7 + $0xa0] sm:$0xff] %vm782_vm1, %v7933_v27 }
 0x133   : > { %804 = vst.msk [vmem:[#allocation7 + $0xa8] sm:$0xff] %vm782_vm1, %v7933_v27 }
 0x134   : > { %805 = vst.msk [vmem:[#allocation7 + $0xb0] sm:$0xff] %vm782_vm1, %v7933_v27 }
 0x135   : > { %806 = vst.msk [vmem:[#allocation7 + $0xb8] sm:$0xff] %vm782_vm1, %v7933_v27 }
 0x136   : > { %807 = vst.msk [vmem:[#allocation7 + $0xc0] sm:$0xff] %vm782_vm1, %v7933_v27 }
 0x137   : > { %808 = vst.msk [vmem:[#allocation7 + $0xc8] sm:$0xff] %vm782_vm1, %v7933_v27 }
 0x138   : > { %809 = vst.msk [vmem:[#allocation7 + $0xd0] sm:$0xff] %vm782_vm1, %v7933_v27 }
 0x139   : > { %810 = vst.msk [vmem:[#allocation7 + $0xd8] sm:$0xff] %vm782_vm1, %v7933_v27 }
 0x13a   : > { %811 = vst.msk [vmem:[#allocation7 + $0xe0] sm:$0xff] %vm782_vm1, %v7933_v27  ;;  %v900_v35 = vpop.f32.mrf.mxu0  ;;  %v912_v36 = vpop.f32.mrf.mxu1 }
 0x13b   : > { %812 = vst.msk [vmem:[#allocation7 + $0xe8] sm:$0xff] %vm782_vm1, %v7933_v27  ;;  %v901_v37 = vadd.f32 %v8678_v34, %v900_v35  ;;  %v913_v38 = vadd.f32 %v8678_v34, %v912_v36 }
 0x13c   : > { %813 = vst.msk [vmem:[#allocation7 + $0xf0] sm:$0xff] %vm782_vm1, %v7933_v27 }
 0x13d   : > { %814 = vst.msk [vmem:[#allocation7 + $0xf8] sm:$0xff] %vm782_vm1, %v7933_v27  ;;  %v8694_v39 = vmul.f32 0.17677669, %v901_v37  ;;  %v8696_v40 = vmul.f32 0.17677669, %v913_v38 }
 0x13e   : > { %815 = vst.msk [vmem:[#allocation7 + $0x100] sm:$0xff] %vm782_vm1, %v7933_v27 }
 0x13f   : > { %816 = vst.msk [vmem:[#allocation7 + $0x108] sm:$0xff] %vm782_vm1, %v7933_v27  ;;  %1004 = vrot.lane.b32.xlu2 %v8696_v40, %s7934_s4  ;;  %1061 = vrot.lane.b32.xlu1 %v8694_v39, %s7935_s10 }
 0x140   : > { %817 = vst.msk [vmem:[#allocation7 + $0x110] sm:$0xff] %vm782_vm1, %v7933_v27  ;;  %996 = vrot.lane.b32.xlu0 %v8694_v39, %s7934_s4 }
 0x141   : > { %818 = vst.msk [vmem:[#allocation7 + $0x118] sm:$0xff] %vm782_vm1, %v7933_v27 }
 0x142   : > { %819 = vst.msk [vmem:[#allocation7 + $0x120] sm:$0xff] %vm782_vm1, %v7933_v27  ;;  %v936_v41 = vpop.f32.mrf.mxu3  ;;  %v924_v43 = vpop.f32.mrf.mxu2 }
 0x143   : > { %820 = vst.msk [vmem:[#allocation7 + $0x128] sm:$0xff] %vm782_vm1, %v7933_v27  ;;  %v937_v42 = vadd.f32 %v8678_v34, %v936_v41  ;;  %v925_v45 = vadd.f32 %v8678_v34, %v924_v43  ;;  %v915_v47 = vpop.f32.mrf.mxu1  ;;  %v903_v50 = vpop.f32.mrf.mxu0 }
 0x144   : > { %821 = vst.msk [vmem:[#allocation7 + $0x130] sm:$0xff] %vm782_vm1, %v7933_v27  ;;  %v916_v48 = vadd.f32 %v8678_v34, %v915_v47  ;;  %v904_v53 = vadd.f32 %v8678_v34, %v903_v50 }
 0x145   : > { %822 = vst.msk [vmem:[#allocation7 + $0x138] sm:$0xff] %vm782_vm1, %v7933_v27  ;;  %v960_v44 = vmul.f32 0.17677669, %v937_v42  ;;  %v956_v46 = vmul.f32 0.17677669, %v925_v45 }
 0x146   : > { %823 = vst.msk [vmem:[#allocation7 + $0x140] sm:$0xff] %vm782_vm1, %v7933_v27  ;;  %v953_v49 = vmul.f32 0.17677669, %v916_v48  ;;  %v949_v57 = vmul.f32 0.17677669, %v904_v53 }
 0x147   : > { %824 = vst.msk [vmem:[#allocation7 + $0x148] sm:$0xff] %vm782_vm1, %v7933_v27  ;;  %1069 = vrot.lane.b32.xlu2 %v8696_v40, %s7935_s10  ;;  %1085 = vrot.lane.b32.xlu1 %v960_v44, %s7935_s10 }
 0x148   : > { %825 = vst.msk [vmem:[#allocation7 + $0x150] sm:$0xff] %vm782_vm1, %v7933_v27  ;;  %1134 = vrot.lane.b32.xlu0 %v8696_v40, %s7936_s27 }
 0x149   : > { %826 = vst.msk [vmem:[#allocation7 + $0x158] sm:$0xff] %vm782_vm1, %v7933_v27 }
 0x14a   : > { %827 = vst.msk [vmem:[#allocation7 + $0x160] sm:$0xff] %vm782_vm1, %v7933_v27  ;;  %v939_v51 = vpop.f32.mrf.mxu3  ;;  %v927_v54 = vpop.f32.mrf.mxu2 }
 0x14b   : > { %828 = vst.msk [vmem:[#allocation7 + $0x168] sm:$0xff] %vm782_vm1, %v7933_v27  ;;  %v940_v52 = vadd.f32 %v8678_v34, %v939_v51  ;;  %v906_v56 = vpop.f32.mrf.mxu0  ;;  %v918_v58 = vpop.f32.mrf.mxu1  ;;  %v928_v59 = vadd.f32 %v8678_v34, %v927_v54 }
 0x14c   : > { %829 = vst.msk [vmem:[#allocation7 + $0x170] sm:$0xff] %vm782_vm1, %v7933_v27  ;;  %v907_v60 = vadd.f32 %v8678_v34, %v906_v56  ;;  %v919_v61 = vadd.f32 %v8678_v34, %v918_v58 }
 0x14d   : > { %830 = vst.msk [vmem:[#allocation7 + $0x178] sm:$0xff] %vm782_vm1, %v7933_v27  ;;  %v8781_v55 = vmul.f32 0.17677669, %v940_v52  ;;  %v957_v62 = vmul.f32 0.17677669, %v928_v59 }
 0x14e   : > { %831 = vst.msk [vmem:[#allocation7 + $0x180] sm:$0xff] %vm782_vm1, %v7933_v27  ;;  %v950_v63 = vmul.f32 0.17677669, %v907_v60  ;;  %v954_v1 = vmul.f32 0.17677669, %v919_v61 }
 0x14f   : > { %832 = vst.msk [vmem:[#allocation7 + $0x188] sm:$0xff] %vm782_vm1, %v7933_v27  ;;  %1126 = vrot.lane.b32.xlu2 %v8694_v39, %s7936_s27  ;;  %1142 = vrot.lane.b32.xlu1 %v956_v46, %s7936_s27 }
 0x150   : > { %833 = vst.msk [vmem:[#allocation7 + $0x190] sm:$0xff] %vm782_vm1, %v7933_v27  ;;  %1020 = vrot.lane.b32.xlu0 %v960_v44, %s7934_s4 }
 0x151   : > { %834 = vst.msk [vmem:[#allocation7 + $0x198] sm:$0xff] %vm782_vm1, %v7933_v27 }
 0x152   : > { %835 = vst.msk [vmem:[#allocation7 + $0x1a0] sm:$0xff] %vm782_vm1, %v7933_v27  ;;  %v930_v0 = vpop.f32.mrf.mxu2  ;;  %v942_v5 = vpop.f32.mrf.mxu3 }
 0x153   : > { %836 = vst.msk [vmem:[#allocation7 + $0x1a8] sm:$0xff] %vm782_vm1, %v7933_v27  ;;  %v931_v2 = vadd.f32 %v8678_v34, %v930_v0  ;;  %v909_v4 = vpop.f32.mrf.mxu0  ;;  %v943_v7 = vadd.f32 %v8678_v34, %v942_v5  ;;  %v921_v10 = vpop.f32.mrf.mxu1 }
 0x154   : > { %837 = vst.msk [vmem:[#allocation7 + $0x1b0] sm:$0xff] %vm782_vm1, %v7933_v27  ;;  %v910_v6 = vadd.f32 %v8678_v34, %v909_v4  ;;  %v922_v11 = vadd.f32 %v8678_v34, %v921_v10 }
 0x155   : > { %838 = vst.msk [vmem:[#allocation7 + $0x1b8] sm:$0xff] %vm782_vm1, %v7933_v27  ;;  %v958_v3 = vmul.f32 0.17677669, %v931_v2  ;;  %v962_v9 = vmul.f32 0.17677669, %v943_v7 }
 0x156   : > { %839 = vst.msk [vmem:[#allocation7 + $0x1c0] sm:$0xff] %vm782_vm1, %v7933_v27  ;;  %v951_v8 = vmul.f32 0.17677669, %v910_v6  ;;  %v955_v12 = vmul.f32 0.17677669, %v922_v11 }
 0x157   : > { %840 = vst.msk [vmem:[#allocation7 + $0x1c8] sm:$0xff] %vm782_vm1, %v7933_v27  ;;  %1012 = vrot.lane.b32.xlu2 %v956_v46, %s7934_s4  ;;  %1136 = vrot.lane.b32.xlu1 %v953_v49, %s7936_s27 }
 0x158   : > { %841 = vst.msk [vmem:[#allocation7 + $0x1d0] sm:$0xff] %vm782_vm1, %v7933_v27  ;;  %1077 = vrot.lane.b32.xlu0 %v956_v46, %s7935_s10 }
 0x159   : > { %842 = vst.msk [vmem:[#allocation7 + $0x1d8] sm:$0xff] %vm782_vm1, %v7933_v27 }
 0x15a   : > { %843 = vst.msk [vmem:[#allocation7 + $0x1e0] sm:$0xff] %vm782_vm1, %v7933_v27  ;;  %v945_v13 = vpop.f32.mrf.mxu3  ;;  %v933_v16 = vpop.f32.mrf.mxu2 }
 0x15b   : > { %844 = vst.msk [vmem:[#allocation7 + $0x1e8] sm:$0xff] %vm782_vm1, %v7933_v27  ;;  %v946_v14 = vadd.f32 %v8678_v34, %v945_v13  ;;  %v934_v17 = vadd.f32 %v8678_v34, %v933_v16 }
 0x15c   : > { %845 = vst.msk [vmem:[#allocation7 + $0x1f0] sm:$0xff] %vm782_vm1, %v7933_v27 }
 0x15d   : > { %846 = vst.msk [vmem:[#allocation7 + $0x1f8] sm:$0xff] %vm782_vm1, %v7933_v27  ;;  %v963_v15 = vmul.f32 0.17677669, %v946_v14  ;;  %v959_v18 = vmul.f32 0.17677669, %v934_v17 }
 0x15e   : > { %964 = vst.msk [vmem:[#allocation2] sm:$0xff] %vm782_vm1, %v8694_v39 }
 0x15f   : > { %968 = vst.msk [vmem:[#allocation2 + $0x20] sm:$0xff] %vm782_vm1, %v8696_v40  ;;  %1150 = vrot.lane.b32.xlu2 %v960_v44, %s7936_s27  ;;  %1022 = vrot.lane.b32.xlu1 %v8781_v55, %s7934_s4 }
 0x160   : > { %976 = vst.msk [vmem:[#allocation2 + $0x60] sm:$0xff] %vm782_vm1, %v960_v44  ;;  %998 = vrot.lane.b32.xlu0 %v949_v57, %s7934_s4 }
 0x161   : > { %972 = vst.msk [vmem:[#allocation2 + $0x40] sm:$0xff] %vm782_vm1, %v956_v46 }
 0x162   : > { %969 = vst.msk [vmem:[#allocation2 + $0x28] sm:$0xff] %vm782_vm1, %v953_v49 }
 0x163   : > { %965 = vst.msk [vmem:[#allocation2 + $0x8] sm:$0xff] %vm782_vm1, %v949_v57 }
 0x164   : > { %977 = vst.msk [vmem:[#allocation2 + $0x68] sm:$0xff] %vm782_vm1, %v8781_v55 }
 0x165   : > { %973 = vst.msk [vmem:[#allocation2 + $0x48] sm:$0xff] %vm782_vm1, %v957_v62 }
 0x166   : > { %966 = vst.msk [vmem:[#allocation2 + $0x10] sm:$0xff] %vm782_vm1, %v950_v63 }
 0x167   : > { %1006 = vrot.lane.b32.xlu2 %v953_v49, %s7934_s4  ;;  %1079 = vrot.lane.b32.xlu1 %v957_v62, %s7935_s10  ;;  %970 = vst.msk [vmem:[#allocation2 + $0x30] sm:$0xff] %vm782_vm1, %v954_v1 }
 0x168   : > { %1071 = vrot.lane.b32.xlu0 %v953_v49, %s7935_s10  ;;  %974 = vst.msk [vmem:[#allocation2 + $0x50] sm:$0xff] %vm782_vm1, %v958_v3 }
 0x169   : > { %967 = vst.msk [vmem:[#allocation2 + $0x18] sm:$0xff] %vm782_vm1, %v951_v8 }
 0x16a   : > { %978 = vst.msk [vmem:[#allocation2 + $0x70] sm:$0xff] %vm782_vm1, %v962_v9 }
 0x16b   : > { %971 = vst.msk [vmem:[#allocation2 + $0x38] sm:$0xff] %vm782_vm1, %v955_v12 }
 0x16c   : > { %979 = vst.msk [vmem:[#allocation2 + $0x78] sm:$0xff] %vm782_vm1, %v963_v15 }
 0x16d   : > { %975 = vst.msk [vmem:[#allocation2 + $0x58] sm:$0xff] %vm782_vm1, %v959_v18 }
 0x16f   : > { %1063 = vrot.lane.b32.xlu2 %v949_v57, %s7935_s10  ;;  %1000 = vrot.lane.b32.xlu1 %v950_v63, %s7934_s4 }
 0x170   : > { %1128 = vrot.lane.b32.xlu0 %v949_v57, %s7936_s27 }
 0x177   : > { %1087 = vrot.lane.b32.xlu2 %v8781_v55, %s7935_s10  ;;  %1073 = vrot.lane.b32.xlu1 %v954_v1, %s7935_s10 }
 0x178   : > { %1014 = vrot.lane.b32.xlu0 %v957_v62, %s7934_s4 }
 0x17f   : > { %1144 = vrot.lane.b32.xlu2 %v957_v62, %s7936_s27  ;;  %1130 = vrot.lane.b32.xlu1 %v950_v63, %s7936_s27 }
 0x180   : > { %1008 = vrot.lane.b32.xlu0 %v954_v1, %s7934_s4 }
 0x187   : > { %1138 = vrot.lane.b32.xlu2 %v954_v1, %s7936_s27  ;;  %1016 = vrot.lane.b32.xlu1 %v958_v3, %s7934_s4 }
 0x188   : > { %1065 = vrot.lane.b32.xlu0 %v950_v63, %s7935_s10 }
 0x18f   : > { %1024 = vrot.lane.b32.xlu2 %v962_v9, %s7934_s4  ;;  %1002 = vrot.lane.b32.xlu1 %v951_v8, %s7934_s4 }
 0x190   : > { %1089 = vrot.lane.b32.xlu0 %v962_v9, %s7935_s10 }
 0x197   : > { %1081 = vrot.lane.b32.xlu2 %v958_v3, %s7935_s10  ;;  %1010 = vrot.lane.b32.xlu1 %v955_v12, %s7934_s4 }
 0x198   : > { %1146 = vrot.lane.b32.xlu0 %v958_v3, %s7936_s27 }
 0x199   : > { %v1005_v19 = vpop.permute.xlu2 %1004 }
 0x19a   : > { %1049 = vst.msk [vmem:[#allocation2 + $0xa0] sm:$0xff] %vm782_vm1, %v1005_v19 }
 0x19f   : > { %1075 = vrot.lane.b32.xlu2 %v955_v12, %s7935_s10  ;;  %1067 = vrot.lane.b32.xlu1 %v951_v8, %s7935_s10 }
 0x1a0   : > { %1140 = vrot.lane.b32.xlu0 %v955_v12, %s7936_s27 }
 0x1a1   : > { %v1070_v20 = vpop.permute.xlu2 %1069 }
 0x1a2   : > { %1114 = vst.msk [vmem:[#allocation2 + $0x120] sm:$0xff] %vm782_vm1, %v1070_v20 }
 0x1a7   : > { %1132 = vrot.lane.b32.xlu2 %v951_v8, %s7936_s27  ;;  %1091 = vrot.lane.b32.xlu1 %v963_v15, %s7935_s10 }
 0x1a8   : > { %1026 = vrot.lane.b32.xlu0 %v963_v15, %s7934_s4 }
 0x1a9   : > { %v1127_v21 = vpop.permute.xlu2 %1126 }
 0x1aa   : > { %1175 = vst.msk [vmem:[#allocation2 + $0x180] sm:$0xff] %vm782_vm1, %v1127_v21 }
 0x1af   : > { %1018 = vrot.lane.b32.xlu2 %v959_v18, %s7934_s4  ;;  %1148 = vrot.lane.b32.xlu1 %v959_v18, %s7936_s27 }
 0x1b0   : > { %1083 = vrot.lane.b32.xlu0 %v959_v18, %s7935_s10 }
 0x1b1   : > { %v1013_v22 = vpop.permute.xlu2 %1012  ;;  %v1062_v23 = vpop.permute.xlu1 %1061 }
 0x1b2   : > { %1053 = vst.msk [vmem:[#allocation2 + $0xc0] sm:$0xff] %vm782_vm1, %v1013_v22  ;;  %v997_v24 = vpop.permute.xlu0 %996 }
 0x1b3   : > { %1110 = vst.msk [vmem:[#allocation2 + $0x100] sm:$0xff] %vm782_vm1, %v1062_v23 }
 0x1b4   : > { %1045 = vst.msk [vmem:[#allocation2 + $0x80] sm:$0xff] %vm782_vm1, %v997_v24 }
 0x1b7   : > { %1156 = vrot.lane.b32.xlu2 %v963_v15, %s7936_s27  ;;  %1154 = vrot.lane.b32.xlu1 %v962_v9, %s7936_s27 }
 0x1b8   : > { %1152 = vrot.lane.b32.xlu0 %v8781_v55, %s7936_s27 }
 0x1b9   : > { %v1151_v25 = vpop.permute.xlu2 %1150  ;;  %v1086_v26 = vpop.permute.xlu1 %1085 }
 0x1ba   : > { %1187 = vst.msk [vmem:[#allocation2 + $0x1e0] sm:$0xff] %vm782_vm1, %v1151_v25  ;;  %v1135_v27 = vpop.permute.xlu0 %1134 }
 0x1bb   : > { %1122 = vst.msk [vmem:[#allocation2 + $0x160] sm:$0xff] %vm782_vm1, %v1086_v26 }
 0x1bc   : > { %1179 = vst.msk [vmem:[#allocation2 + $0x1a0] sm:$0xff] %vm782_vm1, %v1135_v27 }
 0x1c1   : > { %v1007_v28 = vpop.permute.xlu2 %1006  ;;  %v1143_v29 = vpop.permute.xlu1 %1142 }
 0x1c2   : > { %1050 = vst.msk [vmem:[#allocation2 + $0xa8] sm:$0xff] %vm782_vm1, %v1007_v28  ;;  %v1021_v30 = vpop.permute.xlu0 %1020 }
 0x1c3   : > { %1183 = vst.msk [vmem:[#allocation2 + $0x1c0] sm:$0xff] %vm782_vm1, %v1143_v29 }
 0x1c4   : > { %1057 = vst.msk [vmem:[#allocation2 + $0xe0] sm:$0xff] %vm782_vm1, %v1021_v30 }
 0x1c9   : > { %v1064_v31 = vpop.permute.xlu2 %1063  ;;  %v1137_v32 = vpop.permute.xlu1 %1136 }
 0x1ca   : > { %1111 = vst.msk [vmem:[#allocation2 + $0x108] sm:$0xff] %vm782_vm1, %v1064_v31  ;;  %v1078_v33 = vpop.permute.xlu0 %1077 }
 0x1cb   : > { %1180 = vst.msk [vmem:[#allocation2 + $0x1a8] sm:$0xff] %vm782_vm1, %v1137_v32 }
 0x1cc   : > { %1118 = vst.msk [vmem:[#allocation2 + $0x140] sm:$0xff] %vm782_vm1, %v1078_v33 }
 0x1d1   : > { %v1088_v34 = vpop.permute.xlu2 %1087  ;;  %v1023_v35 = vpop.permute.xlu1 %1022 }
 0x1d2   : > { %1123 = vst.msk [vmem:[#allocation2 + $0x168] sm:$0xff] %vm782_vm1, %v1088_v34  ;;  %v999_v36 = vpop.permute.xlu0 %998 }
 0x1d3   : > { %1058 = vst.msk [vmem:[#allocation2 + $0xe8] sm:$0xff] %vm782_vm1, %v1023_v35 }
 0x1d4   : > { %1046 = vst.msk [vmem:[#allocation2 + $0x88] sm:$0xff] %vm782_vm1, %v999_v36 }
 0x1d9   : > { %v1145_v37 = vpop.permute.xlu2 %1144  ;;  %v1080_v38 = vpop.permute.xlu1 %1079 }
 0x1da   : > { %1184 = vst.msk [vmem:[#allocation2 + $0x1c8] sm:$0xff] %vm782_vm1, %v1145_v37  ;;  %v1072_v39 = vpop.permute.xlu0 %1071 }
 0x1db   : > { %1119 = vst.msk [vmem:[#allocation2 + $0x148] sm:$0xff] %vm782_vm1, %v1080_v38 }
 0x1dc   : > { %1115 = vst.msk [vmem:[#allocation2 + $0x128] sm:$0xff] %vm782_vm1, %v1072_v39 }
 0x1e1   : > { %v1139_v40 = vpop.permute.xlu2 %1138  ;;  %v1001_v41 = vpop.permute.xlu1 %1000 }
 0x1e2   : > { %1181 = vst.msk [vmem:[#allocation2 + $0x1b0] sm:$0xff] %vm782_vm1, %v1139_v40  ;;  %v1129_v42 = vpop.permute.xlu0 %1128 }
 0x1e3   : > { %1047 = vst.msk [vmem:[#allocation2 + $0x90] sm:$0xff] %vm782_vm1, %v1001_v41 }
 0x1e4   : > { %1176 = vst.msk [vmem:[#allocation2 + $0x188] sm:$0xff] %vm782_vm1, %v1129_v42 }
 0x1e9   : > { %v1025_v43 = vpop.permute.xlu2 %1024  ;;  %v1074_v44 = vpop.permute.xlu1 %1073 }
 0x1ea   : > { %1059 = vst.msk [vmem:[#allocation2 + $0xf0] sm:$0xff] %vm782_vm1, %v1025_v43  ;;  %v1015_v45 = vpop.permute.xlu0 %1014 }
 0x1eb   : > { %1116 = vst.msk [vmem:[#allocation2 + $0x130] sm:$0xff] %vm782_vm1, %v1074_v44 }
 0x1ec   : > { %1054 = vst.msk [vmem:[#allocation2 + $0xc8] sm:$0xff] %vm782_vm1, %v1015_v45 }
 0x1f1   : > { %v1082_v46 = vpop.permute.xlu2 %1081  ;;  %v1131_v47 = vpop.permute.xlu1 %1130 }
 0x1f2   : > { %1120 = vst.msk [vmem:[#allocation2 + $0x150] sm:$0xff] %vm782_vm1, %v1082_v46  ;;  %v1009_v48 = vpop.permute.xlu0 %1008 }
 0x1f3   : > { %1177 = vst.msk [vmem:[#allocation2 + $0x190] sm:$0xff] %vm782_vm1, %v1131_v47 }
 0x1f4   : > { %1051 = vst.msk [vmem:[#allocation2 + $0xb0] sm:$0xff] %vm782_vm1, %v1009_v48 }
 0x1f9   : > { %v1076_v49 = vpop.permute.xlu2 %1075  ;;  %v1017_v50 = vpop.permute.xlu1 %1016 }
 0x1fa   : > { %1117 = vst.msk [vmem:[#allocation2 + $0x138] sm:$0xff] %vm782_vm1, %v1076_v49  ;;  %v1066_v51 = vpop.permute.xlu0 %1065 }
 0x1fb   : > { %1055 = vst.msk [vmem:[#allocation2 + $0xd0] sm:$0xff] %vm782_vm1, %v1017_v50 }
 0x1fc   : > { %1112 = vst.msk [vmem:[#allocation2 + $0x110] sm:$0xff] %vm782_vm1, %v1066_v51 }
 0x201   : > { %v1133_v52 = vpop.permute.xlu2 %1132  ;;  %v1003_v53 = vpop.permute.xlu1 %1002 }
 0x202   : > { %1178 = vst.msk [vmem:[#allocation2 + $0x198] sm:$0xff] %vm782_vm1, %v1133_v52  ;;  %v1090_v54 = vpop.permute.xlu0 %1089 }
 0x203   : > { %1048 = vst.msk [vmem:[#allocation2 + $0x98] sm:$0xff] %vm782_vm1, %v1003_v53 }
 0x204   : > { %1124 = vst.msk [vmem:[#allocation2 + $0x170] sm:$0xff] %vm782_vm1, %v1090_v54 }
 0x209   : > { %v1019_v55 = vpop.permute.xlu2 %1018  ;;  %v1011_v56 = vpop.permute.xlu1 %1010 }
 0x20a   : > { %1056 = vst.msk [vmem:[#allocation2 + $0xd8] sm:$0xff] %vm782_vm1, %v1019_v55  ;;  %v1147_v57 = vpop.permute.xlu0 %1146 }
 0x20b   : > { %1052 = vst.msk [vmem:[#allocation2 + $0xb8] sm:$0xff] %vm782_vm1, %v1011_v56 }
 0x20c   : > { %1185 = vst.msk [vmem:[#allocation2 + $0x1d0] sm:$0xff] %vm782_vm1, %v1147_v57 }
 0x211   : > { %v1157_v58 = vpop.permute.xlu2 %1156  ;;  %v1068_v59 = vpop.permute.xlu1 %1067 }
 0x212   : > { %1190 = vst.msk [vmem:[#allocation2 + $0x1f8] sm:$0xff] %vm782_vm1, %v1157_v58  ;;  %v1141_v60 = vpop.permute.xlu0 %1140 }
 0x213   : > { %1113 = vst.msk [vmem:[#allocation2 + $0x118] sm:$0xff] %vm782_vm1, %v1068_v59 }
 0x214   : > { %1182 = vst.msk [vmem:[#allocation2 + $0x1b8] sm:$0xff] %vm782_vm1, %v1141_v60 }
 0x219   : > { %v1092_v61 = vpop.permute.xlu1 %1091 }
 0x21a   : > { %1125 = vst.msk [vmem:[#allocation2 + $0x178] sm:$0xff] %vm782_vm1, %v1092_v61  ;;  %v1027_v62 = vpop.permute.xlu0 %1026 }
 0x21b   : > { %1060 = vst.msk [vmem:[#allocation2 + $0xf8] sm:$0xff] %vm782_vm1, %v1027_v62 }
 0x221   : > { %v1149_v63 = vpop.permute.xlu1 %1148 }
 0x222   : > { %1186 = vst.msk [vmem:[#allocation2 + $0x1d8] sm:$0xff] %vm782_vm1, %v1149_v63  ;;  %v1084_v0 = vpop.permute.xlu0 %1083 }
 0x223   : > { %1121 = vst.msk [vmem:[#allocation2 + $0x158] sm:$0xff] %vm782_vm1, %v1084_v0 }
 0x229   : > { %v1155_v1 = vpop.permute.xlu1 %1154 }
 0x22a   : > { %1189 = vst.msk [vmem:[#allocation2 + $0x1f0] sm:$0xff] %vm782_vm1, %v1155_v1  ;;  %v1153_v2 = vpop.permute.xlu0 %1152 }
 0x22b   : > { %1188 = vst.msk [vmem:[#allocation2 + $0x1e8] sm:$0xff] %vm782_vm1, %v1153_v2 }
 0x22c PF: > { %v1222_v3 = vld [vmem:[#allocation17 + $0x78] sm:$0xff]  ;;  %v1221_v5 = vld [vmem:[#allocation17 + $0x70] sm:$0xff]  ;;  %v1220_v7 = vld [vmem:[#allocation17 + $0x68] sm:$0xff]  ;;  %s12244_s2 = sld [smem:[#allocation202_spill]]  ;;  %vm1377_vm2 = vcmask 261120   ;;  %s7937_s17 = smov 64  }
 0x22d   : > { %v1307_v4 = vld [vmem:[#allocation18 + $0x78] sm:$0xff]  ;;  %1227 = vmatpush.msra.mxu0 %v1222_v3  ;;  %6813 = vmatpush.msra.mxu2 %v1222_v3  ;;  %v1306_v6 = vld [vmem:[#allocation18 + $0x70] sm:$0xff]  ;;  %v1305_v8 = vld [vmem:[#allocation18 + $0x68] sm:$0xff]  ;;  %s12245_s0 = sld [smem:[#allocation204_spill]]  ;;  %s7938_s3 = smov 96   ;;  %vm4012_vm1 = vcmask 7168  }
 0x22e   : > { %1312 = vmatpush.msra.mxu1 %v1307_v4  ;;  %6829 = vmatpush.msra.mxu3 %v1307_v4  ;;  %v1219_v9 = vld [vmem:[#allocation17 + $0x60] sm:$0xff]  ;;  %v1218_v11 = vld [vmem:[#allocation17 + $0x58] sm:$0xff]  ;;  %v1217_v13 = vld [vmem:[#allocation17 + $0x50] sm:$0xff]  ;;  %s12615_s11 = sld [smem:[#allocation34_spill]] }
 0x22f   : > { %1228 = vmatpush.msra.mxu0 %v1221_v5  ;;  %6814 = vmatpush.msra.mxu2 %v1221_v5  ;;  %v1304_v10 = vld [vmem:[#allocation18 + $0x60] sm:$0xff]  ;;  %v1303_v12 = vld [vmem:[#allocation18 + $0x58] sm:$0xff]  ;;  %v1302_v14 = vld [vmem:[#allocation18 + $0x50] sm:$0xff] }
 0x230   : > { %1313 = vmatpush.msra.mxu1 %v1306_v6  ;;  %6830 = vmatpush.msra.mxu3 %v1306_v6  ;;  %v1216_v15 = vld [vmem:[#allocation17 + $0x48] sm:$0xff]  ;;  %v1215_v17 = vld [vmem:[#allocation17 + $0x40] sm:$0xff]  ;;  %v1214_v19 = vld [vmem:[#allocation17 + $0x38] sm:$0xff] }
 0x231   : > { %1229 = vmatpush.msra.mxu0 %v1220_v7  ;;  %6815 = vmatpush.msra.mxu2 %v1220_v7  ;;  %v1301_v16 = vld [vmem:[#allocation18 + $0x48] sm:$0xff]  ;;  %v1300_v18 = vld [vmem:[#allocation18 + $0x40] sm:$0xff]  ;;  %v1299_v20 = vld [vmem:[#allocation18 + $0x38] sm:$0xff] }
 0x232   : > { %1314 = vmatpush.msra.mxu1 %v1305_v8  ;;  %6831 = vmatpush.msra.mxu3 %v1305_v8  ;;  %v1213_v21 = vld [vmem:[#allocation17 + $0x30] sm:$0xff]  ;;  %v1212_v23 = vld [vmem:[#allocation17 + $0x28] sm:$0xff]  ;;  %v1211_v25 = vld [vmem:[#allocation17 + $0x20] sm:$0xff] }
 0x233   : > { %1230 = vmatpush.msra.mxu0 %v1219_v9  ;;  %6816 = vmatpush.msra.mxu2 %v1219_v9  ;;  %v1298_v22 = vld [vmem:[#allocation18 + $0x30] sm:$0xff]  ;;  %v1297_v24 = vld [vmem:[#allocation18 + $0x28] sm:$0xff]  ;;  %v1296_v26 = vld [vmem:[#allocation18 + $0x20] sm:$0xff] }
 0x234   : > { %1315 = vmatpush.msra.mxu1 %v1304_v10  ;;  %6832 = vmatpush.msra.mxu3 %v1304_v10  ;;  %v1210_v27 = vld [vmem:[#allocation17 + $0x18] sm:$0xff]  ;;  %v1209_v29 = vld [vmem:[#allocation17 + $0x10] sm:$0xff]  ;;  %v1208_v31 = vld [vmem:[#allocation17 + $0x8] sm:$0xff]  ;;  %p6757_p8 = scmp.ne.s32.totalorder %s12615_s11, 1 }
 0x235   : > { %1231 = vmatpush.msra.mxu0 %v1218_v11  ;;  %6817 = vmatpush.msra.mxu2 %v1218_v11  ;;  %v1295_v28 = vld [vmem:[#allocation18 + $0x18] sm:$0xff]  ;;  %v1294_v30 = vld [vmem:[#allocation18 + $0x10] sm:$0xff]  ;;  %v1293_v32 = vld [vmem:[#allocation18 + $0x8] sm:$0xff]  ;;  %s7942_s18 = smov (!%p6757_p8), 32   ;;  %s7943_s5 = smov (!%p6757_p8), 64  }
 0x236   : > { %1316 = vmatpush.msra.mxu1 %v1303_v12  ;;  %6833 = vmatpush.msra.mxu3 %v1303_v12  ;;  %v1207_v33 = vld [vmem:[#allocation17] sm:$0xff]  ;;  %v1200_v37 = vld [vmem:[%s8327_s8 + $0x48] sm:$0xff]  ;;  %v1193_v39 = vld [vmem:[%s8327_s8 + $0x10] sm:$0xff]  ;;  %s12616_s26 = sld [smem:[#allocation206_spill]] (!%p6757_p8) }
 0x237   : > { %1232 = vmatpush.msra.mxu0 %v1217_v13  ;;  %6818 = vmatpush.msra.mxu2 %v1217_v13  ;;  %v1292_v34 = vld [vmem:[#allocation18] sm:$0xff]  ;;  %v1192_v38 = vld [vmem:[%s8327_s8 + $0x8] sm:$0xff]  ;;  %v1201_v40 = vld [vmem:[%s8327_s8 + $0x50] sm:$0xff]  ;;  %s12617_s4 = sld [smem:[#allocation207_spill]] (!%p6757_p8) }
 0x238   : > { %1317 = vmatpush.msra.mxu1 %v1302_v14  ;;  %6834 = vmatpush.msra.mxu3 %v1302_v14  ;;  %v1191_v35 = vld [vmem:[%s8327_s8] sm:$0xff]  ;;  %v1202_v41 = vld [vmem:[%s8327_s8 + $0x58] sm:$0xff]  ;;  %v1204_v45 = vld [vmem:[%s8327_s8 + $0x68] sm:$0xff]  ;;  %s12618_s9 = sld [smem:[#allocation208_spill]] (!%p6757_p8) }
 0x239   : > { %1233 = vmatpush.msra.mxu0 %v1216_v15  ;;  %6819 = vmatpush.msra.mxu2 %v1216_v15  ;;  %v1199_v36 = vld [vmem:[%s8327_s8 + $0x40] sm:$0xff]  ;;  %v1194_v42 = vld [vmem:[%s8327_s8 + $0x18] sm:$0xff]  ;;  %v1196_v46 = vld [vmem:[%s8327_s8 + $0x28] sm:$0xff] }
 0x23a   : > { %1318 = vmatpush.msra.mxu1 %v1301_v16  ;;  %6835 = vmatpush.msra.mxu3 %v1301_v16  ;;  %v1203_v43 = vld [vmem:[%s8327_s8 + $0x60] sm:$0xff]  ;;  %v1205_v47 = vld [vmem:[%s8327_s8 + $0x70] sm:$0xff]  ;;  %v1206_v49 = vld [vmem:[%s8327_s8 + $0x78] sm:$0xff] }
 0x23b   : > { %1234 = vmatpush.msra.mxu0 %v1215_v17  ;;  %6820 = vmatpush.msra.mxu2 %v1215_v17  ;;  %v1195_v44 = vld [vmem:[%s8327_s8 + $0x20] sm:$0xff]  ;;  %v1197_v48 = vld [vmem:[%s8327_s8 + $0x30] sm:$0xff]  ;;  %v1198_v50 = vld [vmem:[%s8327_s8 + $0x38] sm:$0xff]  ;;  %s7939_s8 = smov 32  }
 0x23c   : > { %1319 = vmatpush.msra.mxu1 %v1300_v18  ;;  %6836 = vmatpush.msra.mxu3 %v1300_v18  ;;  %v8921_v51 = vld [vmem:[%s12244_s2] ss:$0 sm:$0xff] }
 0x23d   : > { %1235 = vmatpush.msra.mxu0 %v1214_v19  ;;  %6821 = vmatpush.msra.mxu2 %v1214_v19  ;;  %v8926_v52 = vld [vmem:[%s12245_s0] ss:$0 sm:$0xff] }
 0x23e   : > { %1320 = vmatpush.msra.mxu1 %v1299_v20  ;;  %6837 = vmatpush.msra.mxu3 %v1299_v20 }
 0x23f   : > { %1236 = vmatpush.msra.mxu0 %v1213_v21  ;;  %6822 = vmatpush.msra.mxu2 %v1213_v21 }
 0x240   : > { %1321 = vmatpush.msra.mxu1 %v1298_v22  ;;  %6838 = vmatpush.msra.mxu3 %v1298_v22 }
 0x241   : > { %1237 = vmatpush.msra.mxu0 %v1212_v23  ;;  %6823 = vmatpush.msra.mxu2 %v1212_v23 }
 0x242   : > { %1322 = vmatpush.msra.mxu1 %v1297_v24  ;;  %6839 = vmatpush.msra.mxu3 %v1297_v24 }
 0x243   : > { %1238 = vmatpush.msra.mxu0 %v1211_v25  ;;  %6824 = vmatpush.msra.mxu2 %v1211_v25 }
 0x244   : > { %1323 = vmatpush.msra.mxu1 %v1296_v26  ;;  %6840 = vmatpush.msra.mxu3 %v1296_v26 }
 0x245   : > { %1239 = vmatpush.msra.mxu0 %v1210_v27  ;;  %6825 = vmatpush.msra.mxu2 %v1210_v27 }
 0x246   : > { %1324 = vmatpush.msra.mxu1 %v1295_v28  ;;  %6841 = vmatpush.msra.mxu3 %v1295_v28 }
 0x247   : > { %1240 = vmatpush.msra.mxu0 %v1209_v29  ;;  %6826 = vmatpush.msra.mxu2 %v1209_v29 }
 0x248   : > { %1325 = vmatpush.msra.mxu1 %v1294_v30  ;;  %6842 = vmatpush.msra.mxu3 %v1294_v30 }
 0x249   : > { %1241 = vmatpush.msra.mxu0 %v1208_v31  ;;  %6827 = vmatpush.msra.mxu2 %v1208_v31 }
 0x24a   : > { %1326 = vmatpush.msra.mxu1 %v1293_v32  ;;  %6843 = vmatpush.msra.mxu3 %v1293_v32 }
 0x24b   : > { %1242 = vmatpush.msra.mxu0 %v1207_v33  ;;  %6828 = vmatpush.msra.mxu2 %v1207_v33 }
 0x24c   : > { %1327 = vmatpush.msra.mxu1 %v1292_v34  ;;  %1243 = vmatmul.f32.vlgmr.msra.gmra.mxu0 %v1191_v35 }
 0x24d   : > { %1267 = vmatmul.f32.vlgmr.msra.gmra.mxu2 %v1199_v36  ;;  %1328 = vmatmul.f32.vlgmr.msra.gmra.mxu1 %v1191_v35 }
 0x24e   : > { %6844 = vmatpush.msra.mxu3 %v1292_v34 }
 0x24f   : > { %1352 = vmatmul.f32.vlgmr.msra.gmra.mxu3 %v1199_v36 }
 0x254   : > { %1246 = vmatmul.f32.gmra.mxu0 %v1192_v38 }
 0x255   : > { %1270 = vmatmul.f32.gmra.mxu2 %v1200_v37  ;;  %1331 = vmatmul.f32.gmra.mxu1 %v1192_v38 }
 0x257   : > { %1355 = vmatmul.f32.gmra.mxu3 %v1200_v37 }
 0x25c   : > { %1249 = vmatmul.f32.gmra.mxu0 %v1193_v39 }
 0x25d   : > { %1273 = vmatmul.f32.gmra.mxu2 %v1201_v40  ;;  %1334 = vmatmul.f32.gmra.mxu1 %v1193_v39 }
 0x25f   : > { %1358 = vmatmul.f32.gmra.mxu3 %v1201_v40 }
 0x264   : > { %1252 = vmatmul.f32.gmra.mxu0 %v1194_v42 }
 0x265   : > { %1276 = vmatmul.f32.gmra.mxu2 %v1202_v41  ;;  %1337 = vmatmul.f32.gmra.mxu1 %v1194_v42 }
 0x267   : > { %1361 = vmatmul.f32.gmra.mxu3 %v1202_v41 }
 0x26c   : > { %1255 = vmatmul.f32.gmra.mxu0 %v1195_v44 }
 0x26d   : > { %1279 = vmatmul.f32.gmra.mxu2 %v1203_v43  ;;  %1340 = vmatmul.f32.gmra.mxu1 %v1195_v44 }
 0x26f   : > { %1364 = vmatmul.f32.gmra.mxu3 %v1203_v43 }
 0x274   : > { %1258 = vmatmul.f32.gmra.mxu0 %v1196_v46 }
 0x275   : > { %1282 = vmatmul.f32.gmra.mxu2 %v1204_v45  ;;  %1343 = vmatmul.f32.gmra.mxu1 %v1196_v46 }
 0x277   : > { %1367 = vmatmul.f32.gmra.mxu3 %v1204_v45 }
 0x27c   : > { %1261 = vmatmul.f32.gmra.mxu0 %v1197_v48 }
 0x27d   : > { %1285 = vmatmul.f32.gmra.mxu2 %v1205_v47  ;;  %1346 = vmatmul.f32.gmra.mxu1 %v1197_v48 }
 0x27f   : > { %1370 = vmatmul.f32.gmra.mxu3 %v1205_v47 }
 0x284   : > { %1264 = vmatmul.f32.gmra.mxu0 %v1198_v50 }
 0x285   : > { %1288 = vmatmul.f32.gmra.mxu2 %v1206_v49  ;;  %1349 = vmatmul.f32.gmra.mxu1 %v1198_v50 }
 0x287   : > { %1373 = vmatmul.f32.gmra.mxu3 %v1206_v49 }
 0x2c9   : > { %v1244_v53 = vpop.f32.mrf.mxu0 }
 0x2ca   : > { %v1245_v54 = vadd.f32 %v8921_v51, %v1244_v53  ;;  %v1329_v55 = vpop.f32.mrf.mxu1 }
 0x2cb   : > { %v1330_v56 = vadd.f32 %v8926_v52, %v1329_v55 }
 0x2cc   : > { %1378 = vst.msk [vmem:[#allocation3] sm:$0xff] %vm1377_vm2, %v1245_v54  ;;  %1572 = vrot.lane.b32.xlu2 %v1245_v54, %s7937_s17  ;;  %1426 = vrot.lane.b32.xlu0 %v1245_v54, %s7938_s3 }
 0x2cd   : > { %1394 = vst.msk [vmem:[#allocation4] sm:$0xff] %vm1377_vm2, %v1330_v56  ;;  %1507 = vrot.lane.b32.xlu1 %v1330_v56, %s7938_s3 }
 0x2d0   : > { %v1268_v57 = vpop.f32.mrf.mxu2 }
 0x2d1   : > { %v1269_v58 = vadd.f32 %v8921_v51, %v1268_v57  ;;  %v1247_v59 = vpop.f32.mrf.mxu0 }
 0x2d2   : > { %v1353_v60 = vpop.f32.mrf.mxu3  ;;  %v1332_v61 = vpop.f32.mrf.mxu1  ;;  %v1248_v62 = vadd.f32 %v8921_v51, %v1247_v59 }
 0x2d3   : > { %1386 = vst.msk [vmem:[#allocation3 + $0x40] sm:$0xff] %vm1377_vm2, %v1269_v58  ;;  %v8939_v63 = vadd.f32 %v8926_v52, %v1353_v60  ;;  %v1333_v0 = vadd.f32 %v8926_v52, %v1332_v61 }
 0x2d4   : > { %1767 = vrot.lane.b32.xlu2 %v1330_v56, %s7939_s8  ;;  %1637 = vrot.lane.b32.xlu0 %v1330_v56, %s7937_s17  ;;  %1379 = vst.msk [vmem:[#allocation3 + $0x8] sm:$0xff] %vm1377_vm2, %v1248_v62 }
 0x2d5   : > { %1702 = vrot.lane.b32.xlu1 %v1245_v54, %s7939_s8  ;;  %1402 = vst.msk [vmem:[#allocation4 + $0x40] sm:$0xff] %vm1377_vm2, %v8939_v63 }
 0x2d6   : > { %1395 = vst.msk [vmem:[#allocation4 + $0x8] sm:$0xff] %vm1377_vm2, %v1333_v0 }
 0x2d8   : > { %v1271_v1 = vpop.f32.mrf.mxu2 }
 0x2d9   : > { %v1272_v2 = vadd.f32 %v8921_v51, %v1271_v1  ;;  %v1250_v4 = vpop.f32.mrf.mxu0 }
 0x2da   : > { %v1356_v3 = vpop.f32.mrf.mxu3  ;;  %v8955_v6 = vadd.f32 %v8921_v51, %v1250_v4  ;;  %v1335_v9 = vpop.f32.mrf.mxu1  ;;  %v1904_v60 = vld [vmem:[#allocation3 + $0x40] sm:$0xff] }
 0x2db   : > { %1387 = vst.msk [vmem:[#allocation3 + $0x48] sm:$0xff] %vm1377_vm2, %v1272_v2  ;;  %v8952_v5 = vadd.f32 %v8926_v52, %v1356_v3  ;;  %v8971_v10 = vadd.f32 %v8926_v52, %v1335_v9 }
 0x2dc   : > { %1442 = vrot.lane.b32.xlu2 %v1269_v58, %s7938_s3  ;;  %1523 = vrot.lane.b32.xlu0 %v8939_v63, %s7938_s3  ;;  %1380 = vst.msk [vmem:[#allocation3 + $0x10] sm:$0xff] %vm1377_vm2, %v8955_v6 }
 0x2dd   : > { %1588 = vrot.lane.b32.xlu1 %v1269_v58, %s7937_s17  ;;  %1403 = vst.msk [vmem:[#allocation4 + $0x48] sm:$0xff] %vm1377_vm2, %v8952_v5 }
 0x2de   : > { %1396 = vst.msk [vmem:[#allocation4 + $0x10] sm:$0xff] %vm1377_vm2, %v8971_v10 }
 0x2e0   : > { %v1274_v7 = vpop.f32.mrf.mxu2 }
 0x2e1   : > { %v8966_v8 = vadd.f32 %v8921_v51, %v1274_v7  ;;  %v1253_v11 = vpop.f32.mrf.mxu0 }
 0x2e2   : > { %v8980_v12 = vadd.f32 %v8921_v51, %v1253_v11  ;;  %v1359_v15 = vpop.f32.mrf.mxu3  ;;  %v1338_v26 = vpop.f32.mrf.mxu1  ;;  %v1905_v57 = vld [vmem:[#allocation3 + $0x48] sm:$0xff] }
 0x2e3   : > { %1388 = vst.msk [vmem:[#allocation3 + $0x50] sm:$0xff] %vm1377_vm2, %v8966_v8  ;;  %v8990_v16 = vadd.f32 %v8926_v52, %v1359_v15  ;;  %v9034_v30 = vadd.f32 %v8926_v52, %v1338_v26 }
 0x2e4   : > { %1653 = vrot.lane.b32.xlu2 %v8939_v63, %s7937_s17  ;;  %1718 = vrot.lane.b32.xlu0 %v1269_v58, %s7939_s8  ;;  %1381 = vst.msk [vmem:[#allocation3 + $0x18] sm:$0xff] %vm1377_vm2, %v8980_v12 }
 0x2e5   : > { %1639 = vrot.lane.b32.xlu1 %v1333_v0, %s7937_s17  ;;  %1404 = vst.msk [vmem:[#allocation4 + $0x50] sm:$0xff] %vm1377_vm2, %v8990_v16 }
 0x2e6   : > { %1397 = vst.msk [vmem:[#allocation4 + $0x18] sm:$0xff] %vm1377_vm2, %v9034_v30 }
 0x2e8   : > { %v1277_v13 = vpop.f32.mrf.mxu2 }
 0x2e9   : > { %v8985_v14 = vadd.f32 %v8921_v51, %v1277_v13  ;;  %v1256_v17 = vpop.f32.mrf.mxu0 }
 0x2ea   : > { %v8999_v18 = vadd.f32 %v8921_v51, %v1256_v17  ;;  %v1362_v31 = vpop.f32.mrf.mxu3  ;;  %v1341_v44 = vpop.f32.mrf.mxu1  ;;  %v1906_v55 = vld [vmem:[#allocation3 + $0x50] sm:$0xff] }
 0x2eb   : > { %1389 = vst.msk [vmem:[#allocation3 + $0x58] sm:$0xff] %vm1377_vm2, %v8985_v14  ;;  %v9044_v32 = vadd.f32 %v8926_v52, %v1362_v31  ;;  %v9090_v47 = vadd.f32 %v8926_v52, %v1341_v44  ;;  %v1899_v9 = vld [vmem:[#allocation3 + $0x18] sm:$0xff] }
 0x2ec   : > { %1509 = vrot.lane.b32.xlu2 %v1333_v0, %s7938_s3  ;;  %1428 = vrot.lane.b32.xlu0 %v1248_v62, %s7938_s3  ;;  %1382 = vst.msk [vmem:[#allocation3 + $0x20] sm:$0xff] %vm1377_vm2, %v8999_v18 }
 0x2ed   : > { %1525 = vrot.lane.b32.xlu1 %v8952_v5, %s7938_s3  ;;  %1405 = vst.msk [vmem:[#allocation4 + $0x58] sm:$0xff] %vm1377_vm2, %v9044_v32 }
 0x2ee   : > { %1398 = vst.msk [vmem:[#allocation4 + $0x20] sm:$0xff] %vm1377_vm2, %v9090_v47 }
 0x2f0   : > { %v1280_v19 = vpop.f32.mrf.mxu2 }
 0x2f1   : > { %v9004_v20 = vadd.f32 %v8921_v51, %v1280_v19  ;;  %v1259_v21 = vpop.f32.mrf.mxu0 }
 0x2f2   : > { %v9012_v23 = vadd.f32 %v8921_v51, %v1259_v21  ;;  %v1365_v37 = vpop.f32.mrf.mxu3  ;;  %v1907_v49 = vld [vmem:[#allocation3 + $0x58] sm:$0xff]  ;;  %v1344_v50 = vpop.f32.mrf.mxu1  ;;  %v1896_v21 = vld [vmem:[#allocation3] sm:$0xff] }
 0x2f3   : > { %1390 = vst.msk [vmem:[#allocation3 + $0x60] sm:$0xff] %vm1377_vm2, %v9004_v20  ;;  %v9065_v38 = vadd.f32 %v8926_v52, %v1365_v37  ;;  %v9108_v53 = vadd.f32 %v8926_v52, %v1344_v50  ;;  %v4534_v37 = vld [vmem:[#allocation4 + $0x48] sm:$0xff] }
 0x2f4   : > { %1704 = vrot.lane.b32.xlu2 %v1248_v62, %s7939_s8  ;;  %1574 = vrot.lane.b32.xlu0 %v1248_v62, %s7937_s17  ;;  %1383 = vst.msk [vmem:[#allocation3 + $0x28] sm:$0xff] %vm1377_vm2, %v9012_v23 }
 0x2f5   : > { %1720 = vrot.lane.b32.xlu1 %v1272_v2, %s7939_s8  ;;  %1406 = vst.msk [vmem:[#allocation4 + $0x60] sm:$0xff] %vm1377_vm2, %v9065_v38 }
 0x2f6   : > { %1399 = vst.msk [vmem:[#allocation4 + $0x28] sm:$0xff] %vm1377_vm2, %v9108_v53 }
 0x2f8   : > { %v1283_v22 = vpop.f32.mrf.mxu2 }
 0x2f9   : > { %v9015_v24 = vadd.f32 %v8921_v51, %v1283_v22  ;;  %v1262_v25 = vpop.f32.mrf.mxu0 }
 0x2fa   : > { %v9026_v28 = vadd.f32 %v8921_v51, %v1262_v25  ;;  %v1368_v40 = vpop.f32.mrf.mxu3  ;;  %v1908_v46 = vld [vmem:[#allocation3 + $0x60] sm:$0xff]  ;;  %v1347_v58 = vpop.f32.mrf.mxu1 }
 0x2fb   : > { %1391 = vst.msk [vmem:[#allocation3 + $0x68] sm:$0xff] %vm1377_vm2, %v9015_v24  ;;  %v9077_v42 = vadd.f32 %v8926_v52, %v1368_v40  ;;  %v9127_v59 = vadd.f32 %v8926_v52, %v1347_v58  ;;  %v1901_v4 = vld [vmem:[#allocation3 + $0x28] sm:$0xff] }
 0x2fc   : > { %1590 = vrot.lane.b32.xlu2 %v1272_v2, %s7937_s17  ;;  %1769 = vrot.lane.b32.xlu0 %v1333_v0, %s7939_s8  ;;  %1384 = vst.msk [vmem:[#allocation3 + $0x30] sm:$0xff] %vm1377_vm2, %v9026_v28  ;;  %v4537_v26 = vld [vmem:[#allocation4 + $0x60] sm:$0xff] }
 0x2fd   : > { %1430 = vrot.lane.b32.xlu1 %v8955_v6, %s7938_s3  ;;  %1407 = vst.msk [vmem:[#allocation4 + $0x68] sm:$0xff] %vm1377_vm2, %v9077_v42 }
 0x2fe   : > { %1400 = vst.msk [vmem:[#allocation4 + $0x30] sm:$0xff] %vm1377_vm2, %v9127_v59 }
 0x300   : > { %v1286_v27 = vpop.f32.mrf.mxu2 }
 0x301   : > { %v9029_v29 = vadd.f32 %v8921_v51, %v1286_v27  ;;  %v1265_v33 = vpop.f32.mrf.mxu0 }
 0x302   : > { %v9051_v35 = vadd.f32 %v8921_v51, %v1265_v33  ;;  %v1909_v43 = vld [vmem:[#allocation3 + $0x68] sm:$0xff]  ;;  %v1371_v45 = vpop.f32.mrf.mxu3  ;;  %v1350_v1 = vpop.f32.mrf.mxu1  ;;  %v4536_v33 = vld [vmem:[#allocation4 + $0x58] sm:$0xff] }
 0x303   : > { %1392 = vst.msk [vmem:[#allocation3 + $0x70] sm:$0xff] %vm1377_vm2, %v9029_v29  ;;  %v9093_v48 = vadd.f32 %v8926_v52, %v1371_v45  ;;  %v1902_v0 = vld [vmem:[#allocation3 + $0x30] sm:$0xff]  ;;  %v4530_v45 = vld [vmem:[#allocation4 + $0x28] sm:$0xff] }
 0x304   : > { %1641 = vrot.lane.b32.xlu2 %v8971_v10, %s7937_s17  ;;  %1444 = vrot.lane.b32.xlu0 %v1272_v2, %s7938_s3  ;;  %1385 = vst.msk [vmem:[#allocation3 + $0x38] sm:$0xff] %vm1377_vm2, %v9051_v35  ;;  %v9143_v2 = vadd.f32 %v8926_v52, %v1350_v1 }
 0x305   : > { %1576 = vrot.lane.b32.xlu1 %v8955_v6, %s7937_s17  ;;  %1408 = vst.msk [vmem:[#allocation4 + $0x70] sm:$0xff] %vm1377_vm2, %v9093_v48  ;;  %v4531_v44 = vld [vmem:[#allocation4 + $0x30] sm:$0xff] }
 0x306   : > { %1401 = vst.msk [vmem:[#allocation4 + $0x38] sm:$0xff] %vm1377_vm2, %v9143_v2 }
 0x308   : > { %v1289_v34 = vpop.f32.mrf.mxu2 }
 0x309   : > { %v9054_v36 = vadd.f32 %v8921_v51, %v1289_v34  ;;  %v4535_v34 = vld [vmem:[#allocation4 + $0x50] sm:$0xff] }
 0x30a   : > { %v1910_v41 = vld [vmem:[#allocation3 + $0x70] sm:$0xff]  ;;  %v1374_v51 = vpop.f32.mrf.mxu3 }
 0x30b   : > { %1393 = vst.msk [vmem:[#allocation3 + $0x78] sm:$0xff] %vm1377_vm2, %v9054_v36  ;;  %v9111_v54 = vadd.f32 %v8926_v52, %v1374_v51  ;;  %v1903_v62 = vld [vmem:[#allocation3 + $0x38] sm:$0xff] }
 0x30c   : > { %1527 = vrot.lane.b32.xlu2 %v8990_v16, %s7938_s3  ;;  %1655 = vrot.lane.b32.xlu0 %v8952_v5, %s7937_s17  ;;  %v4539_v25 = vld [vmem:[#allocation4 + $0x70] sm:$0xff] }
 0x30d   : > { %1771 = vrot.lane.b32.xlu1 %v8971_v10, %s7939_s8  ;;  %1409 = vst.msk [vmem:[#allocation4 + $0x78] sm:$0xff] %vm1377_vm2, %v9111_v54 }
 0x312   : > { %v1911_v39 = vld [vmem:[#allocation3 + $0x78] sm:$0xff] }
 0x313   : > { %6629 = vmatpush.xpose.msk.msrb.mxu2 %vm1377_vm2, %v1911_v39  ;;  %v4532_v39 = vld [vmem:[#allocation4 + $0x38] sm:$0xff] }
 0x314   : > { %1722 = vrot.lane.b32.xlu2 %v8966_v8, %s7939_s8  ;;  %1511 = vrot.lane.b32.xlu0 %v8971_v10, %s7938_s3  ;;  %v1898_v10 = vld [vmem:[#allocation3 + $0x10] sm:$0xff]  ;;  %v4540_v15 = vld [vmem:[#allocation4 + $0x78] sm:$0xff] }
 0x315   : > { %1446 = vrot.lane.b32.xlu1 %v8966_v8, %s7938_s3 }
 0x317   : > { %6630 = vmatpush.xpose.msk.msrb.mxu2 %vm1377_vm2, %v1910_v41 }
 0x31b   : > { %6631 = vmatpush.xpose.msk.msrb.mxu2 %vm1377_vm2, %v1909_v43 }
 0x31c   : > { %1578 = vrot.lane.b32.xlu2 %v8980_v12, %s7937_s17  ;;  %1706 = vrot.lane.b32.xlu0 %v8955_v6, %s7939_s8  ;;  %v1900_v6 = vld [vmem:[#allocation3 + $0x20] sm:$0xff] }
 0x31d   : > { %1657 = vrot.lane.b32.xlu1 %v8990_v16, %s7937_s17 }
 0x31f   : > { %6632 = vmatpush.xpose.msk.msrb.mxu2 %vm1377_vm2, %v1908_v46  ;;  %v4529_v46 = vld [vmem:[#allocation4 + $0x20] sm:$0xff] }
 0x323   : > { %6633 = vmatpush.xpose.msk.msrb.mxu2 %vm1377_vm2, %v1907_v49 }
 0x324   : > { %1773 = vrot.lane.b32.xlu2 %v9034_v30, %s7939_s8  ;;  %1592 = vrot.lane.b32.xlu0 %v8966_v8, %s7937_s17 }
 0x325   : > { %1432 = vrot.lane.b32.xlu1 %v8980_v12, %s7938_s3 }
 0x326   : > { %v1573_v56 = vpop.permute.xlu2 %1572 }
 0x327   : > { %6634 = vmatpush.xpose.msk.msrb.mxu2 %vm1377_vm2, %v1906_v55  ;;  %1621 = vst.msk [vmem:[#allocation3 + $0x100] sm:$0xff] %vm1377_vm2, %v1573_v56  ;;  %v4528_v55 = vld [vmem:[#allocation4 + $0x18] sm:$0xff]  ;;  %v4527_v56 = vld [vmem:[#allocation4 + $0x10] sm:$0xff] }
 0x32b   : > { %6635 = vmatpush.xpose.msk.msrb.mxu2 %vm1377_vm2, %v1905_v57  ;;  %v4526_v57 = vld [vmem:[#allocation4 + $0x8] sm:$0xff] }
 0x32c   : > { %1448 = vrot.lane.b32.xlu2 %v8985_v14, %s7938_s3  ;;  %1643 = vrot.lane.b32.xlu0 %v9034_v30, %s7937_s17 }
 0x32d   : > { %1513 = vrot.lane.b32.xlu1 %v9034_v30, %s7938_s3 }
 0x32e   : > { %v1768_v61 = vpop.permute.xlu2 %1767 }
 0x32f   : > { %6636 = vmatpush.xpose.msk.msrb.mxu2 %vm1377_vm2, %v1904_v60  ;;  %1816 = vst.msk [vmem:[#allocation4 + $0x180] sm:$0xff] %vm1377_vm2, %v1768_v61 }
 0x333   : > { %6637 = vmatpush.xpose.msk.msrb.mxu2 %vm1377_vm2, %v1903_v62 }
 0x334   : > { %1659 = vrot.lane.b32.xlu2 %v9044_v32, %s7937_s17  ;;  %1529 = vrot.lane.b32.xlu0 %v9044_v32, %s7938_s3 }
 0x335   : > { %1708 = vrot.lane.b32.xlu1 %v8980_v12, %s7939_s8 }
 0x336   : > { %v1443_v3 = vpop.permute.xlu2 %1442 }
 0x337   : > { %6638 = vmatpush.xpose.msk.msrb.mxu2 %vm1377_vm2, %v1902_v0  ;;  %1483 = vst.msk [vmem:[#allocation3 + $0xc0] sm:$0xff] %vm1377_vm2, %v1443_v3 }
 0x33b   : > { %6639 = vmatpush.xpose.msk.msrb.mxu2 %vm1377_vm2, %v1901_v4 }
 0x33c   : > { %1434 = vrot.lane.b32.xlu2 %v8999_v18, %s7938_s3  ;;  %1724 = vrot.lane.b32.xlu0 %v8985_v14, %s7939_s8 }
 0x33d   : > { %1594 = vrot.lane.b32.xlu1 %v8985_v14, %s7937_s17  ;;  %v1897_v14 = vld [vmem:[#allocation3 + $0x8] sm:$0xff] }
 0x33e   : > { %v1654_v52 = vpop.permute.xlu2 %1653  ;;  %v1427_v7 = vpop.permute.xlu0 %1426 }
 0x33f   : > { %v1508_v8 = vpop.permute.xlu1 %1507  ;;  %6640 = vmatpush.xpose.msk.msrb.mxu2 %vm1377_vm2, %v1900_v6  ;;  %1694 = vst.msk [vmem:[#allocation4 + $0x140] sm:$0xff] %vm1377_vm2, %v1654_v52 }
 0x340   : > { %1556 = vst.msk [vmem:[#allocation4 + $0x80] sm:$0xff] %vm1377_vm2, %v1508_v8 }
 0x341   : > { %1475 = vst.msk [vmem:[#allocation3 + $0x80] sm:$0xff] %vm1377_vm2, %v1427_v7 }
 0x343   : > { %6641 = vmatpush.xpose.msk.msrb.mxu2 %vm1377_vm2, %v1899_v9 }
 0x344   : > { %1515 = vrot.lane.b32.xlu2 %v9090_v47, %s7938_s3  ;;  %1580 = vrot.lane.b32.xlu0 %v8999_v18, %s7937_s17 }
 0x345   : > { %1645 = vrot.lane.b32.xlu1 %v9090_v47, %s7937_s17 }
 0x346   : > { %v1510_v11 = vpop.permute.xlu2 %1509  ;;  %v1638_v12 = vpop.permute.xlu0 %1637 }
 0x347   : > { %6642 = vmatpush.xpose.msk.msrb.mxu2 %vm1377_vm2, %v1898_v10  ;;  %v1703_v13 = vpop.permute.xlu1 %1702  ;;  %1557 = vst.msk [vmem:[#allocation4 + $0x88] sm:$0xff] %vm1377_vm2, %v1510_v11 }
 0x348   : > { %1751 = vst.msk [vmem:[#allocation3 + $0x180] sm:$0xff] %vm1377_vm2, %v1703_v13 }
 0x349   : > { %1686 = vst.msk [vmem:[#allocation4 + $0x100] sm:$0xff] %vm1377_vm2, %v1638_v12 }
 0x34b   : > { %6643 = vmatpush.xpose.msk.msrb.mxu2 %vm1377_vm2, %v1897_v14 }
 0x34c   : > { %1710 = vrot.lane.b32.xlu2 %v8999_v18, %s7939_s8  ;;  %1450 = vrot.lane.b32.xlu0 %v9004_v20, %s7938_s3  ;;  %v4538_v18 = vld [vmem:[#allocation4 + $0x68] sm:$0xff] }
 0x34d   : > { %1531 = vrot.lane.b32.xlu1 %v9065_v38, %s7938_s3 }
 0x34e   : > { %v1705_v17 = vpop.permute.xlu2 %1704  ;;  %v1524_v19 = vpop.permute.xlu0 %1523 }
 0x34f   : > { %v1589_v22 = vpop.permute.xlu1 %1588  ;;  %1752 = vst.msk [vmem:[#allocation3 + $0x188] sm:$0xff] %vm1377_vm2, %v1705_v17  ;;  %6644 = vmatpush.xpose.msk.msrb.mxu2 %vm1377_vm2, %v1896_v21 }
 0x350   : > { %1629 = vst.msk [vmem:[#allocation3 + $0x140] sm:$0xff] %vm1377_vm2, %v1589_v22  ;;  %v1832_v22 = vld [vmem:[#allocation2] sm:$0xff] }
 0x351   : > { %1564 = vst.msk [vmem:[#allocation4 + $0xc0] sm:$0xff] %vm1377_vm2, %v1524_v19 }
 0x352   : > { %6645 = vmatmul.msk.f32.vlgmr.msrb.gmra.mxu2 %vm1377_vm2, %v1832_v22  ;;  %v1844_v22 = vld [vmem:[#allocation2 + $0x60] sm:$0xff] }
 0x353   : > { %4589 = vmatpush.msra.mxu2 %v4540_v15 }
 0x354   : > { %1596 = vrot.lane.b32.xlu2 %v9004_v20, %s7937_s17  ;;  %1661 = vrot.lane.b32.xlu0 %v9065_v38, %s7937_s17 }
 0x355   : > { %4590 = vmatpush.msra.mxu2 %v4539_v25  ;;  %1726 = vrot.lane.b32.xlu1 %v9004_v20, %s7939_s8  ;;  %v4533_v20 = vld [vmem:[#allocation4 + $0x40] sm:$0xff] }
 0x356   : > { %v1591_v27 = vpop.permute.xlu2 %1590  ;;  %v1719_v30 = vpop.permute.xlu0 %1718 }
 0x357   : > { %4591 = vmatpush.msra.mxu2 %v4538_v18  ;;  %v1640_v31 = vpop.permute.xlu1 %1639  ;;  %1630 = vst.msk [vmem:[#allocation3 + $0x148] sm:$0xff] %vm1377_vm2, %v1591_v27 }
 0x358   : > { %1687 = vst.msk [vmem:[#allocation4 + $0x108] sm:$0xff] %vm1377_vm2, %v1640_v31 }
 0x359   : > { %4592 = vmatpush.msra.mxu2 %v4537_v26  ;;  %1759 = vst.msk [vmem:[#allocation3 + $0x1c0] sm:$0xff] %vm1377_vm2, %v1719_v30  ;;  %v1834_v30 = vld [vmem:[#allocation2 + $0x10] sm:$0xff] }
 0x35b   : > { %4593 = vmatpush.msra.mxu2 %v4536_v33 }
 0x35c   : > { %1436 = vrot.lane.b32.xlu2 %v9012_v23, %s7938_s3  ;;  %1517 = vrot.lane.b32.xlu0 %v9108_v53, %s7938_s3 }
 0x35d   : > { %4594 = vmatpush.msra.mxu2 %v4535_v34  ;;  %1582 = vrot.lane.b32.xlu1 %v9012_v23, %s7937_s17 }
 0x35e   : > { %v1642_v40 = vpop.permute.xlu2 %1641  ;;  %v1429_v41 = vpop.permute.xlu0 %1428 }
 0x35f   : > { %4595 = vmatpush.msra.mxu2 %v4534_v37  ;;  %v1526_v43 = vpop.permute.xlu1 %1525  ;;  %1688 = vst.msk [vmem:[#allocation4 + $0x110] sm:$0xff] %vm1377_vm2, %v1642_v40  ;;  %v1835_v37 = vld [vmem:[#allocation2 + $0x18] sm:$0xff] }
 0x360   : > { %1565 = vst.msk [vmem:[#allocation4 + $0xc8] sm:$0xff] %vm1377_vm2, %v1526_v43 }
 0x361   : > { %4596 = vmatpush.msra.mxu2 %v4533_v20  ;;  %1476 = vst.msk [vmem:[#allocation3 + $0x88] sm:$0xff] %vm1377_vm2, %v1429_v41  ;;  %v1836_v41 = vld [vmem:[#allocation2 + $0x20] sm:$0xff] }
 0x363   : > { %4597 = vmatpush.msra.mxu2 %v4532_v39 }
 0x364   : > { %1647 = vrot.lane.b32.xlu2 %v9108_v53, %s7937_s17  ;;  %1712 = vrot.lane.b32.xlu0 %v9012_v23, %s7939_s8  ;;  %v4525_v23 = vld [vmem:[#allocation4] sm:$0xff] }
 0x365   : > { %4598 = vmatpush.msra.mxu2 %v4531_v44  ;;  %1452 = vrot.lane.b32.xlu1 %v9015_v24, %s7938_s3 }
 0x366   : > { %v1528_v49 = vpop.permute.xlu2 %1527  ;;  %v1575_v50 = vpop.permute.xlu0 %1574 }
 0x367   : > { %4599 = vmatpush.msra.mxu2 %v4530_v45  ;;  %v1721_v51 = vpop.permute.xlu1 %1720  ;;  %1566 = vst.msk [vmem:[#allocation4 + $0xd0] sm:$0xff] %vm1377_vm2, %v1528_v49 }
 0x368   : > { %1760 = vst.msk [vmem:[#allocation3 + $0x1c8] sm:$0xff] %vm1377_vm2, %v1721_v51 }
 0x369   : > { %4600 = vmatpush.msra.mxu2 %v4529_v46  ;;  %1622 = vst.msk [vmem:[#allocation3 + $0x108] sm:$0xff] %vm1377_vm2, %v1575_v50  ;;  %v1837_v46 = vld [vmem:[#allocation2 + $0x28] sm:$0xff] }
 0x36b   : > { %4601 = vmatpush.msra.mxu2 %v4528_v55  ;;  %v1838_v55 = vld [vmem:[#allocation2 + $0x30] sm:$0xff] }
 0x36c   : > { %1533 = vrot.lane.b32.xlu2 %v9077_v42, %s7938_s3  ;;  %1598 = vrot.lane.b32.xlu0 %v9015_v24, %s7937_s17 }
 0x36d   : > { %4602 = vmatpush.msra.mxu2 %v4527_v56  ;;  %1663 = vrot.lane.b32.xlu1 %v9077_v42, %s7937_s17 }
 0x36e   : > { %v1723_v58 = vpop.permute.xlu2 %1722  ;;  %v1770_v60 = vpop.permute.xlu0 %1769 }
 0x36f   : > { %4603 = vmatpush.msra.mxu2 %v4526_v57  ;;  %v1431_v61 = vpop.permute.xlu1 %1430  ;;  %1761 = vst.msk [vmem:[#allocation3 + $0x1d0] sm:$0xff] %vm1377_vm2, %v1723_v58  ;;  %v1839_v58 = vld [vmem:[#allocation2 + $0x38] sm:$0xff] }
 0x370   : > { %1477 = vst.msk [vmem:[#allocation3 + $0x90] sm:$0xff] %vm1377_vm2, %v1431_v61 }
 0x371   : > { %4604 = vmatpush.msra.mxu2 %v4525_v23  ;;  %1817 = vst.msk [vmem:[#allocation4 + $0x188] sm:$0xff] %vm1377_vm2, %v1770_v60 }
 0x374   : > { %1728 = vrot.lane.b32.xlu2 %v9015_v24, %s7939_s8  ;;  %1438 = vrot.lane.b32.xlu0 %v9026_v28, %s7938_s3 }
 0x375   : > { %1519 = vrot.lane.b32.xlu1 %v9127_v59, %s7938_s3 }
 0x376   : > { %v1579_v62 = vpop.permute.xlu2 %1578  ;;  %v1445_v0 = vpop.permute.xlu0 %1444 }
 0x377   : > { %v1577_v1 = vpop.permute.xlu1 %1576  ;;  %1624 = vst.msk [vmem:[#allocation3 + $0x118] sm:$0xff] %vm1377_vm2, %v1579_v62 }
 0x378   : > { %1623 = vst.msk [vmem:[#allocation3 + $0x110] sm:$0xff] %vm1377_vm2, %v1577_v1  ;;  %v1840_v1 = vld [vmem:[#allocation2 + $0x40] sm:$0xff] }
 0x379   : > { %1484 = vst.msk [vmem:[#allocation3 + $0xc8] sm:$0xff] %vm1377_vm2, %v1445_v0 }
 0x37c   : > { %1584 = vrot.lane.b32.xlu2 %v9026_v28, %s7937_s17  ;;  %1649 = vrot.lane.b32.xlu0 %v9127_v59, %s7937_s17 }
 0x37d   : > { %1714 = vrot.lane.b32.xlu1 %v9026_v28, %s7939_s8 }
 0x37e   : > { %v1774_v24 = vpop.permute.xlu2 %1773  ;;  %v1656_v3 = vpop.permute.xlu0 %1655 }
 0x37f   : > { %v1772_v4 = vpop.permute.xlu1 %1771  ;;  %1819 = vst.msk [vmem:[#allocation4 + $0x198] sm:$0xff] %vm1377_vm2, %v1774_v24 }
 0x380   : > { %1818 = vst.msk [vmem:[#allocation4 + $0x190] sm:$0xff] %vm1377_vm2, %v1772_v4 }
 0x381   : > { %1695 = vst.msk [vmem:[#allocation4 + $0x148] sm:$0xff] %vm1377_vm2, %v1656_v3 }
 0x384   : > { %1454 = vrot.lane.b32.xlu2 %v9029_v29, %s7938_s3  ;;  %1535 = vrot.lane.b32.xlu0 %v9093_v48, %s7938_s3 }
 0x385   : > { %1600 = vrot.lane.b32.xlu1 %v9029_v29, %s7937_s17 }
 0x386   : > { %v1449_v28 = vpop.permute.xlu2 %1448  ;;  %v1512_v6 = vpop.permute.xlu0 %1511 }
 0x387   : > { %v1447_v52 = vpop.permute.xlu1 %1446  ;;  %1486 = vst.msk [vmem:[#allocation3 + $0xd8] sm:$0xff] %vm1377_vm2, %v1449_v28 }
 0x388   : > { %1485 = vst.msk [vmem:[#allocation3 + $0xd0] sm:$0xff] %vm1377_vm2, %v1447_v52  ;;  %v1841_v52 = vld [vmem:[#allocation2 + $0x48] sm:$0xff] }
 0x389   : > { %1558 = vst.msk [vmem:[#allocation4 + $0x90] sm:$0xff] %vm1377_vm2, %v1512_v6 }
 0x38c   : > { %1665 = vrot.lane.b32.xlu2 %v9093_v48, %s7937_s17  ;;  %1730 = vrot.lane.b32.xlu0 %v9029_v29, %s7939_s8 }
 0x38d   : > { %1440 = vrot.lane.b32.xlu1 %v9051_v35, %s7938_s3 }
 0x38e   : > { %v1660_v7 = vpop.permute.xlu2 %1659  ;;  %v1707_v8 = vpop.permute.xlu0 %1706 }
 0x38f   : > { %v1658_v9 = vpop.permute.xlu1 %1657  ;;  %1697 = vst.msk [vmem:[#allocation4 + $0x158] sm:$0xff] %vm1377_vm2, %v1660_v7 }
 0x390   : > { %1696 = vst.msk [vmem:[#allocation4 + $0x150] sm:$0xff] %vm1377_vm2, %v1658_v9 }
 0x391   : > { %1753 = vst.msk [vmem:[#allocation3 + $0x190] sm:$0xff] %vm1377_vm2, %v1707_v8 }
 0x394   : > { %1521 = vrot.lane.b32.xlu2 %v9143_v2, %s7938_s3  ;;  %1586 = vrot.lane.b32.xlu0 %v9051_v35, %s7937_s17 }
 0x395   : > { %1651 = vrot.lane.b32.xlu1 %v9143_v2, %s7937_s17 }
 0x396   : > { %v1435_v10 = vpop.permute.xlu2 %1434  ;;  %v1593_v29 = vpop.permute.xlu0 %1592 }
 0x397   : > { %v1433_v11 = vpop.permute.xlu1 %1432  ;;  %1479 = vst.msk [vmem:[#allocation3 + $0xa0] sm:$0xff] %vm1377_vm2, %v1435_v10 }
 0x398   : > { %1478 = vst.msk [vmem:[#allocation3 + $0x98] sm:$0xff] %vm1377_vm2, %v1433_v11 }
 0x399   : > { %1631 = vst.msk [vmem:[#allocation3 + $0x150] sm:$0xff] %vm1377_vm2, %v1593_v29 }
 0x39c   : > { %1716 = vrot.lane.b32.xlu2 %v9051_v35, %s7939_s8  ;;  %1456 = vrot.lane.b32.xlu0 %v9054_v36, %s7938_s3 }
 0x39d   : > { %1537 = vrot.lane.b32.xlu1 %v9111_v54, %s7938_s3 }
 0x39e   : > { %v1516_v12 = vpop.permute.xlu2 %1515  ;;  %v1644_v13 = vpop.permute.xlu0 %1643 }
 0x39f   : > { %v1514_v14 = vpop.permute.xlu1 %1513  ;;  %1560 = vst.msk [vmem:[#allocation4 + $0xa0] sm:$0xff] %vm1377_vm2, %v1516_v12  ;;  %v1842_v12 = vld [vmem:[#allocation2 + $0x50] sm:$0xff] }
 0x3a0   : > { %1559 = vst.msk [vmem:[#allocation4 + $0x98] sm:$0xff] %vm1377_vm2, %v1514_v14 }
 0x3a1   : > { %1689 = vst.msk [vmem:[#allocation4 + $0x118] sm:$0xff] %vm1377_vm2, %v1644_v13  ;;  %v1938_v13 = vld [vmem:[#allocation3 + $0x150] sm:$0xff] }
 0x3a4   : > { %1602 = vrot.lane.b32.xlu2 %v9054_v36, %s7937_s17  ;;  %1667 = vrot.lane.b32.xlu0 %v9111_v54, %s7937_s17 }
 0x3a5   : > { %1732 = vrot.lane.b32.xlu1 %v9054_v36, %s7939_s8 }
 0x3a6   : > { %v1711_v35 = vpop.permute.xlu2 %1710  ;;  %v1530_v15 = vpop.permute.xlu0 %1529 }
 0x3a7   : > { %v1709_v17 = vpop.permute.xlu1 %1708  ;;  %1755 = vst.msk [vmem:[#allocation3 + $0x1a0] sm:$0xff] %vm1377_vm2, %v1711_v35 }
 0x3a8   : > { %1754 = vst.msk [vmem:[#allocation3 + $0x198] sm:$0xff] %vm1377_vm2, %v1709_v17 }
 0x3a9   : > { %1567 = vst.msk [vmem:[#allocation4 + $0xd8] sm:$0xff] %vm1377_vm2, %v1530_v15  ;;  %v1937_v15 = vld [vmem:[#allocation3 + $0x148] sm:$0xff] }
 0x3ac   : > { %1779 = vrot.lane.b32.xlu2 %v9127_v59, %s7939_s8  ;;  %1775 = vrot.lane.b32.xlu0 %v9090_v47, %s7939_s8 }
 0x3ad   : > { %1777 = vrot.lane.b32.xlu1 %v9108_v53, %s7939_s8 }
 0x3ae   : > { %v1597_v36 = vpop.permute.xlu2 %1596  ;;  %v1725_v19 = vpop.permute.xlu0 %1724 }
 0x3af   : > { %v1595_v21 = vpop.permute.xlu1 %1594  ;;  %1633 = vst.msk [vmem:[#allocation3 + $0x160] sm:$0xff] %vm1377_vm2, %v1597_v36 }
 0x3b0   : > { %1632 = vst.msk [vmem:[#allocation3 + $0x158] sm:$0xff] %vm1377_vm2, %v1595_v21 }
 0x3b1   : > { %1762 = vst.msk [vmem:[#allocation3 + $0x1d8] sm:$0xff] %vm1377_vm2, %v1725_v19 }
 0x3b4   : > { %1785 = vrot.lane.b32.xlu2 %v8952_v5, %s7939_s8  ;;  %1781 = vrot.lane.b32.xlu0 %v9143_v2, %s7939_s8 }
 0x3b5   : > { %1783 = vrot.lane.b32.xlu1 %v8939_v63, %s7939_s8 }
 0x3b6   : > { %v1437_v53 = vpop.permute.xlu2 %1436  ;;  %v1581_v47 = vpop.permute.xlu0 %1580  ;;  %v1940_v7 = vld [vmem:[#allocation3 + $0x160] sm:$0xff] }
 0x3b7   : > { %v1646_v59 = vpop.permute.xlu1 %1645  ;;  %1480 = vst.msk [vmem:[#allocation3 + $0xa8] sm:$0xff] %vm1377_vm2, %v1437_v53  ;;  %v1939_v9 = vld [vmem:[#allocation3 + $0x158] sm:$0xff] }
 0x3b8   : > { %1690 = vst.msk [vmem:[#allocation4 + $0x120] sm:$0xff] %vm1377_vm2, %v1646_v59  ;;  %v1843_v53 = vld [vmem:[#allocation2 + $0x58] sm:$0xff] }
 0x3b9   : > { %1625 = vst.msk [vmem:[#allocation3 + $0x120] sm:$0xff] %vm1377_vm2, %v1581_v47  ;;  %v1936_v47 = vld [vmem:[#allocation3 + $0x140] sm:$0xff] }
 0x3bc   : > { %1791 = vrot.lane.b32.xlu2 %v9065_v38, %s7939_s8  ;;  %1787 = vrot.lane.b32.xlu0 %v8990_v16, %s7939_s8 }
 0x3bd   : > { %1789 = vrot.lane.b32.xlu1 %v9044_v32, %s7939_s8 }
 0x3be   : > { %v1648_v63 = vpop.permute.xlu2 %1647  ;;  %v1451_v5 = vpop.permute.xlu0 %1450 }
 0x3bf   : > { %v1532_v2 = vpop.permute.xlu1 %1531  ;;  %1691 = vst.msk [vmem:[#allocation4 + $0x128] sm:$0xff] %vm1377_vm2, %v1648_v63 }
 0x3c0   : > { %1568 = vst.msk [vmem:[#allocation4 + $0xe0] sm:$0xff] %vm1377_vm2, %v1532_v2 }
 0x3c1   : > { %1487 = vst.msk [vmem:[#allocation3 + $0xe0] sm:$0xff] %vm1377_vm2, %v1451_v5 }
 0x3c4   : > { %1797 = vrot.lane.b32.xlu2 %v9111_v54, %s7939_s8  ;;  %1793 = vrot.lane.b32.xlu0 %v9077_v42, %s7939_s8  ;;  %v1833_v42 = vld [vmem:[#allocation2 + $0x8] sm:$0xff] }
 0x3c5   : > { %1795 = vrot.lane.b32.xlu1 %v9093_v48, %s7939_s8  ;;  %6646 = vmatmul.msk.f32.gmra.mxu2 %vm1377_vm2, %v1833_v42 }
 0x3c6   : > { %v1534_v32 = vpop.permute.xlu2 %1533  ;;  %v1662_v38 = vpop.permute.xlu0 %1661 }
 0x3c7   : > { %v1727_v16 = vpop.permute.xlu1 %1726  ;;  %1569 = vst.msk [vmem:[#allocation4 + $0xe8] sm:$0xff] %vm1377_vm2, %v1534_v32 }
 0x3c8   : > { %1763 = vst.msk [vmem:[#allocation3 + $0x1e0] sm:$0xff] %vm1377_vm2, %v1727_v16  ;;  %v1924_v63 = vld [vmem:[#allocation3 + $0xe0] sm:$0xff] }
 0x3c9   : > { %1698 = vst.msk [vmem:[#allocation4 + $0x160] sm:$0xff] %vm1377_vm2, %v1662_v38  ;;  %v1923_v38 = vld [vmem:[#allocation3 + $0xd8] sm:$0xff] }
 0x3cd   : > { %6647 = vmatmul.msk.f32.gmra.mxu2 %vm1377_vm2, %v1834_v30  ;;  %v1921_v30 = vld [vmem:[#allocation3 + $0xc8] sm:$0xff] }
 0x3ce   : > { %v1729_v25 = vpop.permute.xlu2 %1728  ;;  %v1518_v48 = vpop.permute.xlu0 %1517 }
 0x3cf   : > { %v1583_v54 = vpop.permute.xlu1 %1582  ;;  %1764 = vst.msk [vmem:[#allocation3 + $0x1e8] sm:$0xff] %vm1377_vm2, %v1729_v25 }
 0x3d0   : > { %1626 = vst.msk [vmem:[#allocation3 + $0x128] sm:$0xff] %vm1377_vm2, %v1583_v54  ;;  %v1956_v54 = vld [vmem:[#allocation3 + $0x1e0] sm:$0xff] }
 0x3d1   : > { %1561 = vst.msk [vmem:[#allocation4 + $0xa8] sm:$0xff] %vm1377_vm2, %v1518_v48  ;;  %v1922_v48 = vld [vmem:[#allocation3 + $0xd0] sm:$0xff] }
 0x3d5   : > { %6648 = vmatmul.msk.f32.gmra.mxu2 %vm1377_vm2, %v1835_v37  ;;  %v1920_v37 = vld [vmem:[#allocation3 + $0xc0] sm:$0xff] }
 0x3d6   : > { %v1585_v18 = vpop.permute.xlu2 %1584  ;;  %v1713_v27 = vpop.permute.xlu0 %1712  ;;  %v1957_v16 = vld [vmem:[#allocation3 + $0x1e8] sm:$0xff] }
 0x3d7   : > { %v1453_v26 = vpop.permute.xlu1 %1452  ;;  %1627 = vst.msk [vmem:[#allocation3 + $0x130] sm:$0xff] %vm1377_vm2, %v1585_v18  ;;  %v1933_v42 = vld [vmem:[#allocation3 + $0x128] sm:$0xff] }
 0x3d8   : > { %1488 = vst.msk [vmem:[#allocation3 + $0xe8] sm:$0xff] %vm1377_vm2, %v1453_v26 }
 0x3d9   : > { %1756 = vst.msk [vmem:[#allocation3 + $0x1a8] sm:$0xff] %vm1377_vm2, %v1713_v27  ;;  %v1955_v27 = vld [vmem:[#allocation3 + $0x1d8] sm:$0xff] }
 0x3dd   : > { %6649 = vmatmul.msk.f32.gmra.mxu2 %vm1377_vm2, %v1836_v41  ;;  %v1953_v41 = vld [vmem:[#allocation3 + $0x1c8] sm:$0xff] }
 0x3de   : > { %v1455_v31 = vpop.permute.xlu2 %1454  ;;  %v1599_v34 = vpop.permute.xlu0 %1598  ;;  %v1934_v25 = vld [vmem:[#allocation3 + $0x130] sm:$0xff] }
 0x3df   : > { %v1664_v33 = vpop.permute.xlu1 %1663  ;;  %1489 = vst.msk [vmem:[#allocation3 + $0xf0] sm:$0xff] %vm1377_vm2, %v1455_v31  ;;  %v1925_v21 = vld [vmem:[#allocation3 + $0xe8] sm:$0xff] }
 0x3e0   : > { %1699 = vst.msk [vmem:[#allocation4 + $0x168] sm:$0xff] %vm1377_vm2, %v1664_v33  ;;  %v1845_v31 = vld [vmem:[#allocation2 + $0x68] sm:$0xff]  ;;  %v1932_v33 = vld [vmem:[#allocation3 + $0x120] sm:$0xff] }
 0x3e1   : > { %1634 = vst.msk [vmem:[#allocation3 + $0x168] sm:$0xff] %vm1377_vm2, %v1599_v34  ;;  %v1954_v34 = vld [vmem:[#allocation3 + $0x1d0] sm:$0xff] }
 0x3e5   : > { %6650 = vmatmul.msk.f32.gmra.mxu2 %vm1377_vm2, %v1837_v46  ;;  %v1952_v46 = vld [vmem:[#allocation3 + $0x1c0] sm:$0xff] }
 0x3e6   : > { %v1666_v20 = vpop.permute.xlu2 %1665  ;;  %v1439_v40 = vpop.permute.xlu0 %1438  ;;  %v1926_v14 = vld [vmem:[#allocation3 + $0xf0] sm:$0xff] }
 0x3e7   : > { %v1520_v39 = vpop.permute.xlu1 %1519  ;;  %1700 = vst.msk [vmem:[#allocation4 + $0x170] sm:$0xff] %vm1377_vm2, %v1666_v20  ;;  %v1931_v20 = vld [vmem:[#allocation3 + $0x118] sm:$0xff] }
 0x3e8   : > { %1562 = vst.msk [vmem:[#allocation4 + $0xb0] sm:$0xff] %vm1377_vm2, %v1520_v39  ;;  %v1941_v4 = vld [vmem:[#allocation3 + $0x168] sm:$0xff] }
 0x3e9   : > { %1481 = vst.msk [vmem:[#allocation3 + $0xb0] sm:$0xff] %vm1377_vm2, %v1439_v40 }
 0x3ed   : > { %6651 = vmatmul.msk.f32.gmra.mxu2 %vm1377_vm2, %v1838_v55  ;;  %v1917_v55 = vld [vmem:[#allocation3 + $0xa8] sm:$0xff] }
 0x3ee   : > { %v1522_v43 = vpop.permute.xlu2 %1521  ;;  %v1650_v45 = vpop.permute.xlu0 %1649 }
 0x3ef   : > { %v1715_v44 = vpop.permute.xlu1 %1714  ;;  %1563 = vst.msk [vmem:[#allocation4 + $0xb8] sm:$0xff] %vm1377_vm2, %v1522_v43 }
 0x3f0   : > { %1757 = vst.msk [vmem:[#allocation3 + $0x1b0] sm:$0xff] %vm1377_vm2, %v1715_v44  ;;  %v1846_v44 = vld [vmem:[#allocation2 + $0x70] sm:$0xff] }
 0x3f1   : > { %1692 = vst.msk [vmem:[#allocation4 + $0x130] sm:$0xff] %vm1377_vm2, %v1650_v45  ;;  %v1930_v45 = vld [vmem:[#allocation3 + $0x110] sm:$0xff] }
 0x3f5   : > { %6652 = vmatmul.msk.f32.gmra.mxu2 %vm1377_vm2, %v1839_v58  ;;  %v1916_v58 = vld [vmem:[#allocation3 + $0xa0] sm:$0xff] }
 0x3f6   : > { %v1717_v49 = vpop.permute.xlu2 %1716  ;;  %v1536_v51 = vpop.permute.xlu0 %1535 }
 0x3f7   : > { %v1601_v50 = vpop.permute.xlu1 %1600  ;;  %1758 = vst.msk [vmem:[#allocation3 + $0x1b8] sm:$0xff] %vm1377_vm2, %v1717_v49  ;;  %v1918_v49 = vld [vmem:[#allocation3 + $0xb0] sm:$0xff] }
 0x3f8   : > { %1635 = vst.msk [vmem:[#allocation3 + $0x170] sm:$0xff] %vm1377_vm2, %v1601_v50  ;;  %v1929_v50 = vld [vmem:[#allocation3 + $0x108] sm:$0xff] }
 0x3f9   : > { %1570 = vst.msk [vmem:[#allocation4 + $0xf0] sm:$0xff] %vm1377_vm2, %v1536_v51 }
 0x3fd   : > { %6653 = vmatmul.msk.f32.gmra.mxu2 %vm1377_vm2, %v1840_v1  ;;  %v1915_v1 = vld [vmem:[#allocation3 + $0x98] sm:$0xff] }
 0x3fe   : > { %v1603_v56 = vpop.permute.xlu2 %1602  ;;  %v1731_v23 = vpop.permute.xlu0 %1730  ;;  %v1951_v51 = vld [vmem:[#allocation3 + $0x1b8] sm:$0xff] }
 0x3ff   : > { %v1441_v57 = vpop.permute.xlu1 %1440  ;;  %1636 = vst.msk [vmem:[#allocation3 + $0x178] sm:$0xff] %vm1377_vm2, %v1603_v56  ;;  %v1942_v24 = vld [vmem:[#allocation3 + $0x170] sm:$0xff]  ;;  %v1928_v56 = vld [vmem:[#allocation3 + $0x100] sm:$0xff] }
 0x400   : > { %1482 = vst.msk [vmem:[#allocation3 + $0xb8] sm:$0xff] %vm1377_vm2, %v1441_v57  ;;  %v1950_v57 = vld [vmem:[#allocation3 + $0x1b0] sm:$0xff] }
 0x401   : > { %1765 = vst.msk [vmem:[#allocation3 + $0x1f0] sm:$0xff] %vm1377_vm2, %v1731_v23 }
 0x405   : > { %6654 = vmatmul.msk.f32.gmra.mxu2 %vm1377_vm2, %v1841_v52  ;;  %v1865_v52 = vld [vmem:[#allocation2 + $0x108] sm:$0xff] }
 0x406   : > { %v1780_v60 = vpop.permute.xlu2 %1779  ;;  %v1943_v61 = vld [vmem:[#allocation3 + $0x178] sm:$0xff]  ;;  %v1587_v0 = vpop.permute.xlu0 %1586 }
 0x407   : > { %v1652_v62 = vpop.permute.xlu1 %1651  ;;  %1822 = vst.msk [vmem:[#allocation4 + $0x1b0] sm:$0xff] %vm1377_vm2, %v1780_v60  ;;  %6693 = vmatpush.xpose.msk.msrb.mxu0 %vm1377_vm2, %v1943_v61  ;;  %v1919_v43 = vld [vmem:[#allocation3 + $0xb8] sm:$0xff]  ;;  %v1864_v60 = vld [vmem:[#allocation2 + $0x100] sm:$0xff]  ;;  %v4571_v61 = vld [vmem:[#allocation4 + $0x170] sm:$0xff] }
 0x408   : > { %1693 = vst.msk [vmem:[#allocation4 + $0x138] sm:$0xff] %vm1377_vm2, %v1652_v62  ;;  %v1958_v59 = vld [vmem:[#allocation3 + $0x1f0] sm:$0xff]  ;;  %v1949_v62 = vld [vmem:[#allocation3 + $0x1a8] sm:$0xff] }
 0x409   : > { %1628 = vst.msk [vmem:[#allocation3 + $0x138] sm:$0xff] %vm1377_vm2, %v1587_v0  ;;  %v4570_v0 = vld [vmem:[#allocation4 + $0x168] sm:$0xff] }
 0x40b   : > { %6694 = vmatpush.xpose.msk.msrb.mxu0 %vm1377_vm2, %v1942_v24  ;;  %v1847_v24 = vld [vmem:[#allocation2 + $0x78] sm:$0xff] }
 0x40d   : > { %6655 = vmatmul.msk.f32.gmra.mxu2 %vm1377_vm2, %v1842_v12  ;;  %v1913_v12 = vld [vmem:[#allocation3 + $0x88] sm:$0xff] }
 0x40e   : > { %v1786_v3 = vpop.permute.xlu2 %1785  ;;  %v1457_v6 = vpop.permute.xlu0 %1456 }
 0x40f   : > { %v1538_v28 = vpop.permute.xlu1 %1537  ;;  %1825 = vst.msk [vmem:[#allocation4 + $0x1c8] sm:$0xff] %vm1377_vm2, %v1786_v3  ;;  %6695 = vmatpush.xpose.msk.msrb.mxu0 %vm1377_vm2, %v1941_v4  ;;  %v4569_v3 = vld [vmem:[#allocation4 + $0x160] sm:$0xff] }
 0x410   : > { %1571 = vst.msk [vmem:[#allocation4 + $0xf8] sm:$0xff] %vm1377_vm2, %v1538_v28  ;;  %v1935_v5 = vld [vmem:[#allocation3 + $0x138] sm:$0xff]  ;;  %v1948_v4 = vld [vmem:[#allocation3 + $0x1a0] sm:$0xff] }
 0x411   : > { %1490 = vst.msk [vmem:[#allocation3 + $0xf8] sm:$0xff] %vm1377_vm2, %v1457_v6  ;;  %v4568_v28 = vld [vmem:[#allocation4 + $0x158] sm:$0xff]  ;;  %v1914_v6 = vld [vmem:[#allocation3 + $0x90] sm:$0xff] }
 0x413   : > { %6696 = vmatpush.xpose.msk.msrb.mxu0 %vm1377_vm2, %v1940_v7  ;;  %v9415_v7 = vld [vmem:[%s8334_s28] sm:$0xff] }
 0x414   : > { %vm2620_vm3 = vcmp.eq.f32.partialorder %v9415_v7, 0.0 }
 0x415   : > { %6656 = vmatmul.msk.f32.gmra.mxu2 %vm1377_vm2, %v1843_v53  ;;  %v1848_v53 = vld [vmem:[#allocation2 + $0x80] sm:$0xff] }
 0x416   : > { %v1792_v8 = vpop.permute.xlu2 %1791  ;;  %v1668_v29 = vpop.permute.xlu0 %1667 }
 0x417   : > { %v1733_v10 = vpop.permute.xlu1 %1732  ;;  %1828 = vst.msk [vmem:[#allocation4 + $0x1e0] sm:$0xff] %vm1377_vm2, %v1792_v8  ;;  %6697 = vmatpush.xpose.msk.msrb.mxu0 %vm1377_vm2, %v1939_v9  ;;  %v4567_v8 = vld [vmem:[#allocation4 + $0x150] sm:$0xff]  ;;  %v2073_v9 = vpop.f32.mrf.mxu2 }
 0x418   : > { %1766 = vst.msk [vmem:[#allocation3 + $0x1f8] sm:$0xff] %vm1377_vm2, %v1733_v10  ;;  %v1927_v11 = vld [vmem:[#allocation3 + $0xf8] sm:$0xff]  ;;  %v9421_v10 = vsel %vm2620_vm3, -1e+09, %v2073_v9  ;;  %v4542_v9 = vld [vmem:[#allocation4 + $0x88] sm:$0xff] }
 0x419   : > { %1701 = vst.msk [vmem:[#allocation4 + $0x178] sm:$0xff] %vm1377_vm2, %v1668_v29  ;;  %6661 = vmatpush.xpose.msk.msrb.mxu3 %vm1377_vm2, %v1927_v11  ;;  %v1947_v29 = vld [vmem:[#allocation3 + $0x198] sm:$0xff]  ;;  %v4566_v11 = vld [vmem:[#allocation4 + $0x148] sm:$0xff]  ;;  %2796 = vmax.xlane.f32.xlu0 %v9421_v10 }
 0x41b   : > { %6698 = vmatpush.xpose.msk.msrb.mxu0 %vm1377_vm2, %v1938_v13  ;;  %v4565_v13 = vld [vmem:[#allocation4 + $0x140] sm:$0xff] }
 0x41d   : > { %6662 = vmatpush.xpose.msk.msrb.mxu3 %vm1377_vm2, %v1926_v14  ;;  %6657 = vmatmul.msk.f32.gmra.mxu2 %vm1377_vm2, %v1844_v22  ;;  %v1946_v14 = vld [vmem:[#allocation3 + $0x190] sm:$0xff]  ;;  %v4560_v22 = vld [vmem:[#allocation4 + $0x118] sm:$0xff] }
 0x41e   : > { %v1798_v35 = vpop.permute.xlu2 %1797  ;;  %v1776_v36 = vpop.permute.xlu0 %1775 }
 0x41f   : > { %v1778_v17 = vpop.permute.xlu1 %1777  ;;  %1831 = vst.msk [vmem:[#allocation4 + $0x1f8] sm:$0xff] %vm1377_vm2, %v1798_v35  ;;  %6699 = vmatpush.xpose.msk.msrb.mxu0 %vm1377_vm2, %v1937_v15  ;;  %v1959_v19 = vld [vmem:[#allocation3 + $0x1f8] sm:$0xff]  ;;  %v1912_v15 = vld [vmem:[#allocation3 + $0x80] sm:$0xff] }
 0x420   : > { %1821 = vst.msk [vmem:[#allocation4 + $0x1a8] sm:$0xff] %vm1377_vm2, %v1778_v17  ;;  %6725 = vmatpush.xpose.msk.msrb.mxu1 %vm1377_vm2, %v1959_v19  ;;  %v4572_v23 = vld [vmem:[#allocation4 + $0x178] sm:$0xff]  ;;  %v9429_v17 = vld [vmem:[%s8334_s28 + $0x8] sm:$0xff]  ;;  %v4563_v19 = vld [vmem:[#allocation4 + $0x130] sm:$0xff] }
 0x421   : > { %1820 = vst.msk [vmem:[#allocation4 + $0x1a0] sm:$0xff] %vm1377_vm2, %v1776_v36  ;;  %6663 = vmatpush.xpose.msk.msrb.mxu3 %vm1377_vm2, %v1925_v21  ;;  %v4564_v35 = vld [vmem:[#allocation4 + $0x138] sm:$0xff]  ;;  %vm2621_vm4 = vcmp.eq.f32.partialorder %v9429_v17, 0.0 }
 0x422   : > { %v4556_v36 = vld [vmem:[#allocation4 + $0xf8] sm:$0xff] }
 0x423   : > { %6700 = vmatpush.xpose.msk.msrb.mxu0 %vm1377_vm2, %v1936_v47 }
 0x424   : > { %6726 = vmatpush.xpose.msk.msrb.mxu1 %vm1377_vm2, %v1958_v59  ;;  %v4555_v59 = vld [vmem:[#allocation4 + $0xf0] sm:$0xff] }
 0x425   : > { %6664 = vmatpush.xpose.msk.msrb.mxu3 %vm1377_vm2, %v1924_v63  ;;  %6658 = vmatmul.msk.f32.gmra.mxu2 %vm1377_vm2, %v1845_v31  ;;  %v1945_v63 = vld [vmem:[#allocation3 + $0x188] sm:$0xff] }
 0x426   : > { %v1782_v32 = vpop.permute.xlu0 %1781 }
 0x427   : > { %v1784_v2 = vpop.permute.xlu1 %1783  ;;  %6701 = vmatpush.xpose.msk.msrb.mxu0 %vm1377_vm2, %v1935_v5  ;;  %1823 = vst.msk [vmem:[#allocation4 + $0x1b8] sm:$0xff] %vm1377_vm2, %v1782_v32  ;;  %v4562_v5 = vld [vmem:[#allocation4 + $0x128] sm:$0xff]  ;;  %v4561_v32 = vld [vmem:[#allocation4 + $0x120] sm:$0xff] }
 0x428   : > { %1824 = vst.msk [vmem:[#allocation4 + $0x1c0] sm:$0xff] %vm1377_vm2, %v1784_v2  ;;  %6727 = vmatpush.xpose.msk.msrb.mxu1 %vm1377_vm2, %v1957_v16  ;;  %v4554_v2 = vld [vmem:[#allocation4 + $0xe8] sm:$0xff]  ;;  %v4553_v16 = vld [vmem:[#allocation4 + $0xe0] sm:$0xff] }
 0x429   : > { %6665 = vmatpush.xpose.msk.msrb.mxu3 %vm1377_vm2, %v1923_v38  ;;  %v1944_v38 = vld [vmem:[#allocation3 + $0x180] sm:$0xff] }
 0x42b   : > { %6702 = vmatpush.xpose.msk.msrb.mxu0 %vm1377_vm2, %v1934_v25  ;;  %v4588_v25 = vld [vmem:[#allocation4 + $0x1f8] sm:$0xff] }
 0x42c   : > { %6728 = vmatpush.xpose.msk.msrb.mxu1 %vm1377_vm2, %v1956_v54  ;;  %v1880_v54 = vld [vmem:[#allocation2 + $0x180] sm:$0xff] }
 0x42d   : > { %6666 = vmatpush.xpose.msk.msrb.mxu3 %vm1377_vm2, %v1922_v48  ;;  %6659 = vmatmul.msk.f32.gmra.mxu2 %vm1377_vm2, %v1846_v44  ;;  %v9442_v48 = vld [vmem:[%s8334_s28 + $0x10] sm:$0xff]  ;;  %v1881_v44 = vld [vmem:[#allocation2 + $0x188] sm:$0xff] }
 0x42e   : > { %v1788_v26 = vpop.permute.xlu0 %1787  ;;  %vm2622_vm5 = vcmp.eq.f32.partialorder %v9442_v48, 0.0 }
 0x42f   : > { %v1790_v18 = vpop.permute.xlu1 %1789  ;;  %6703 = vmatpush.xpose.msk.msrb.mxu0 %vm1377_vm2, %v1933_v42  ;;  %1826 = vst.msk [vmem:[#allocation4 + $0x1d0] sm:$0xff] %vm1377_vm2, %v1788_v26  ;;  %v4552_v42 = vld [vmem:[#allocation4 + $0xd8] sm:$0xff]  ;;  %v4559_v26 = vld [vmem:[#allocation4 + $0x110] sm:$0xff] }
 0x430   : > { %1827 = vst.msk [vmem:[#allocation4 + $0x1d8] sm:$0xff] %vm1377_vm2, %v1790_v18  ;;  %6729 = vmatpush.xpose.msk.msrb.mxu1 %vm1377_vm2, %v1955_v27  ;;  %v1849_v27 = vld [vmem:[#allocation2 + $0x88] sm:$0xff] }
 0x431   : > { %6667 = vmatpush.xpose.msk.msrb.mxu3 %vm1377_vm2, %v1921_v30  ;;  %v4551_v30 = vld [vmem:[#allocation4 + $0xd0] sm:$0xff] }
 0x433   : > { %6704 = vmatpush.xpose.msk.msrb.mxu0 %vm1377_vm2, %v1932_v33  ;;  %v4558_v33 = vld [vmem:[#allocation4 + $0x108] sm:$0xff] }
 0x434   : > { %6730 = vmatpush.xpose.msk.msrb.mxu1 %vm1377_vm2, %v1954_v34 }
 0x435   : > { %6668 = vmatpush.xpose.msk.msrb.mxu3 %vm1377_vm2, %v1920_v37  ;;  %6660 = vmatmul.msk.f32.gmra.mxu2 %vm1377_vm2, %v1847_v24  ;;  %v4550_v37 = vld [vmem:[#allocation4 + $0xc8] sm:$0xff]  ;;  %v4580_v24 = vld [vmem:[#allocation4 + $0x1b8] sm:$0xff] }
 0x436   : > { %v1794_v40 = vpop.permute.xlu0 %1793 }
 0x437   : > { %v1796_v39 = vpop.permute.xlu1 %1795  ;;  %6705 = vmatpush.xpose.msk.msrb.mxu0 %vm1377_vm2, %v1931_v20  ;;  %1829 = vst.msk [vmem:[#allocation4 + $0x1e8] sm:$0xff] %vm1377_vm2, %v1794_v40  ;;  %v9452_v40 = vld [vmem:[%s8334_s28 + $0x18] sm:$0xff] }
 0x438   : > { %1830 = vst.msk [vmem:[#allocation4 + $0x1f0] sm:$0xff] %vm1377_vm2, %v1796_v39  ;;  %6731 = vmatpush.xpose.msk.msrb.mxu1 %vm1377_vm2, %v1953_v41  ;;  %v4557_v39 = vld [vmem:[#allocation4 + $0x100] sm:$0xff]  ;;  %vm2623_vm6 = vcmp.eq.f32.partialorder %v9452_v40, 0.0  ;;  %v9784_v40 = vld [vmem:[#allocation5 + $0x70] sm:$0xff] }
 0x439   : > { %6669 = vmatpush.xpose.msk.msrb.mxu3 %vm1377_vm2, %v1919_v43  ;;  %v4549_v41 = vld [vmem:[#allocation4 + $0xc0] sm:$0xff]  ;;  %12270 = vst [vmem:[#allocation67_spill] sm:$0xff] %v9784_v40 }
 0x43a   : > { %v4585_v43 = vld [vmem:[#allocation4 + $0x1e0] sm:$0xff] }
 0x43b   : > { %6706 = vmatpush.xpose.msk.msrb.mxu0 %vm1377_vm2, %v1930_v45  ;;  %v4548_v45 = vld [vmem:[#allocation4 + $0xb8] sm:$0xff] }
 0x43c   : > { %6732 = vmatpush.xpose.msk.msrb.mxu1 %vm1377_vm2, %v1952_v46  ;;  %v4584_v46 = vld [vmem:[#allocation4 + $0x1d8] sm:$0xff] }
 0x43d   : > { %6670 = vmatpush.xpose.msk.msrb.mxu3 %vm1377_vm2, %v1918_v49 }
 0x43e   : > { %v4586_v20 = vld [vmem:[#allocation4 + $0x1e8] sm:$0xff] }
 0x43f   : > { %6707 = vmatpush.xpose.msk.msrb.mxu0 %vm1377_vm2, %v1929_v50  ;;  %v4587_v31 = vld [vmem:[#allocation4 + $0x1f0] sm:$0xff] }
 0x440   : > { %6733 = vmatpush.xpose.msk.msrb.mxu1 %vm1377_vm2, %v1951_v51  ;;  %v1866_v50 = vld [vmem:[#allocation2 + $0x110] sm:$0xff] }
 0x441   : > { %6671 = vmatpush.xpose.msk.msrb.mxu3 %vm1377_vm2, %v1917_v55  ;;  %v1850_v51 = vld [vmem:[#allocation2 + $0x90] sm:$0xff] }
 0x442   : > { %v4547_v55 = vld [vmem:[#allocation4 + $0xb0] sm:$0xff] }
 0x443   : > { %6708 = vmatpush.xpose.msk.msrb.mxu0 %vm1377_vm2, %v1928_v56  ;;  %v4583_v56 = vld [vmem:[#allocation4 + $0x1d0] sm:$0xff] }
 0x444   : > { %6734 = vmatpush.xpose.msk.msrb.mxu1 %vm1377_vm2, %v1950_v57 }
 0x445   : > { %6672 = vmatpush.xpose.msk.msrb.mxu3 %vm1377_vm2, %v1916_v58  ;;  %v4546_v58 = vld [vmem:[#allocation4 + $0xa8] sm:$0xff] }
 0x446   : > { %6709 = vmatmul.msk.f32.vlgmr.msrb.gmra.mxu0 %vm1377_vm2, %v1864_v60  ;;  %v4582_v60 = vld [vmem:[#allocation4 + $0x1c8] sm:$0xff] }
 0x447   : > { %4719 = vmatpush.msra.mxu0 %v4572_v23  ;;  %v9463_v23 = vld [vmem:[%s8334_s28 + $0x20] sm:$0xff] }
 0x448   : > { %6735 = vmatpush.xpose.msk.msrb.mxu1 %vm1377_vm2, %v1949_v62  ;;  %v2076_v21 = vpop.f32.mrf.mxu2  ;;  %v4581_v62 = vld [vmem:[#allocation4 + $0x1c0] sm:$0xff]  ;;  %vm2624_vm7 = vcmp.eq.f32.partialorder %v9463_v23, 0.0 }
 0x449   : > { %4720 = vmatpush.msra.mxu0 %v4571_v61  ;;  %6673 = vmatpush.xpose.msk.msrb.mxu3 %vm1377_vm2, %v1915_v1  ;;  %v9435_v47 = vsel %vm2621_vm4, -1e+09, %v2076_v21  ;;  %v4545_v61 = vld [vmem:[#allocation4 + $0xa0] sm:$0xff]  ;;  %v4544_v1 = vld [vmem:[#allocation4 + $0x98] sm:$0xff]  ;;  %v9486_v21 = vld [vmem:[%s8334_s28 + $0x30] sm:$0xff] }
 0x44a   : > { %2798 = vmax.xlane.f32.xlu1 %v9435_v47  ;;  %vm2626_vm9 = vcmp.eq.f32.partialorder %v9486_v21, 0.0 }
 0x44b   : > { %4721 = vmatpush.msra.mxu0 %v4570_v0  ;;  %v1882_v0 = vld [vmem:[#allocation2 + $0x190] sm:$0xff] }
 0x44c   : > { %6736 = vmatpush.xpose.msk.msrb.mxu1 %vm1377_vm2, %v1948_v4 }
 0x44d   : > { %4722 = vmatpush.msra.mxu0 %v4569_v3  ;;  %6674 = vmatpush.xpose.msk.msrb.mxu3 %vm1377_vm2, %v1914_v6  ;;  %v4543_v6 = vld [vmem:[#allocation4 + $0x90] sm:$0xff] }
 0x44e   : > { %6710 = vmatmul.msk.f32.gmra.mxu0 %vm1377_vm2, %v1865_v52  ;;  %v4579_v52 = vld [vmem:[#allocation4 + $0x1b0] sm:$0xff] }
 0x44f   : > { %4723 = vmatpush.msra.mxu0 %v4568_v28  ;;  %v1851_v28 = vld [vmem:[#allocation2 + $0x98] sm:$0xff] }
 0x450   : > { %6737 = vmatpush.xpose.msk.msrb.mxu1 %vm1377_vm2, %v1947_v29  ;;  %v2079_v18 = vpop.f32.mrf.mxu2  ;;  %v4578_v29 = vld [vmem:[#allocation4 + $0x1a8] sm:$0xff] }
 0x451   : > { %4724 = vmatpush.msra.mxu0 %v4567_v8  ;;  %6675 = vmatpush.xpose.msk.msrb.mxu3 %vm1377_vm2, %v1913_v12  ;;  %v9448_v34 = vsel %vm2622_vm5, -1e+09, %v2079_v18  ;;  %v9475_v8 = vld [vmem:[%s8334_s28 + $0x28] sm:$0xff]  ;;  %v4577_v12 = vld [vmem:[#allocation4 + $0x1a0] sm:$0xff] }
 0x452   : > { %2800 = vmax.xlane.f32.xlu2 %v9448_v34  ;;  %vm2625_vm8 = vcmp.eq.f32.partialorder %v9475_v8, 0.0  ;;  %v9516_v18 = vld [vmem:[%s8334_s28 + $0x48] sm:$0xff] }
 0x453   : > { %4725 = vmatpush.msra.mxu0 %v4566_v11  ;;  %v4541_v11 = vld [vmem:[#allocation4 + $0x80] sm:$0xff]  ;;  %vm2629_vm12 = vcmp.eq.f32.partialorder %v9516_v18, 0.0 }
 0x454   : > { %6738 = vmatpush.xpose.msk.msrb.mxu1 %vm1377_vm2, %v1946_v14  ;;  %v4576_v14 = vld [vmem:[#allocation4 + $0x198] sm:$0xff] }
 0x455   : > { %4726 = vmatpush.msra.mxu0 %v4565_v13  ;;  %6676 = vmatpush.xpose.msk.msrb.mxu3 %vm1377_vm2, %v1912_v15  ;;  %v1883_v13 = vld [vmem:[#allocation2 + $0x198] sm:$0xff] }
 0x456   : > { %6711 = vmatmul.msk.f32.gmra.mxu0 %vm1377_vm2, %v1866_v50  ;;  %v9560_v50 = vld [vmem:[#allocation5] sm:$0xff] }
 0x457   : > { %4727 = vmatpush.msra.mxu0 %v4564_v35 }
 0x458   : > { %6739 = vmatpush.xpose.msk.msrb.mxu1 %vm1377_vm2, %v1945_v63  ;;  %6677 = vmatmul.msk.f32.vlgmr.msrb.gmra.mxu3 %vm1377_vm2, %v1848_v53  ;;  %v2082_v49 = vpop.f32.mrf.mxu2  ;;  %v4574_v53 = vld [vmem:[#allocation4 + $0x188] sm:$0xff]  ;;  %v1884_v63 = vld [vmem:[#allocation2 + $0x1a0] sm:$0xff] }
 0x459   : > { %4654 = vmatpush.msra.mxu3 %v4556_v36  ;;  %4728 = vmatpush.msra.mxu0 %v4563_v19  ;;  %v9460_v57 = vsel %vm2623_vm6, -1e+09, %v2082_v49  ;;  %v4575_v36 = vld [vmem:[#allocation4 + $0x190] sm:$0xff]  ;;  %v1867_v19 = vld [vmem:[#allocation2 + $0x118] sm:$0xff] }
 0x45a   : > { %2802 = vmax.xlane.f32.xlu2 %v9460_v57 }
 0x45b   : > { %4655 = vmatpush.msra.mxu3 %v4555_v59  ;;  %4729 = vmatpush.msra.mxu0 %v4562_v5  ;;  %v4573_v59 = vld [vmem:[#allocation4 + $0x180] sm:$0xff] }
 0x45c   : > { %6740 = vmatpush.xpose.msk.msrb.mxu1 %vm1377_vm2, %v1944_v38 }
 0x45d   : > { %4656 = vmatpush.msra.mxu3 %v4554_v2  ;;  %4730 = vmatpush.msra.mxu0 %v4561_v32  ;;  %v9497_v32 = vld [vmem:[%s8334_s28 + $0x38] sm:$0xff] }
 0x45e   : > { %6712 = vmatmul.msk.f32.gmra.mxu0 %vm1377_vm2, %v1867_v19  ;;  %vm2627_vm10 = vcmp.eq.f32.partialorder %v9497_v32, 0.0 }
 0x45f   : > { %4657 = vmatpush.msra.mxu3 %v4553_v16  ;;  %4731 = vmatpush.msra.mxu0 %v4560_v22  ;;  %v1868_v22 = vld [vmem:[#allocation2 + $0x120] sm:$0xff] }
 0x460   : > { %4784 = vmatpush.msra.mxu1 %v4588_v25  ;;  %6678 = vmatmul.msk.f32.gmra.mxu3 %vm1377_vm2, %v1849_v27  ;;  %v2085_v3 = vpop.f32.mrf.mxu2  ;;  %v9506_v25 = vld [vmem:[%s8334_s28 + $0x40] sm:$0xff] }
 0x461   : > { %4658 = vmatpush.msra.mxu3 %v4552_v42  ;;  %6741 = vmatmul.msk.f32.vlgmr.msrb.gmra.mxu1 %vm1377_vm2, %v1880_v54  ;;  %v9470_v4 = vsel %vm2624_vm7, -1e+09, %v2085_v3  ;;  %vm2628_vm11 = vcmp.eq.f32.partialorder %v9506_v25, 0.0 }
 0x462   : > { %4732 = vmatpush.msra.mxu0 %v4559_v26  ;;  %4785 = vmatpush.msra.mxu1 %v4587_v31 }
 0x463   : > { %4659 = vmatpush.msra.mxu3 %v4551_v30  ;;  %2804 = vmax.xlane.f32.xlu0 %v9470_v4  ;;  %v9525_v30 = vld [vmem:[%s8334_s28 + $0x50] sm:$0xff] }
 0x464   : > { %4733 = vmatpush.msra.mxu0 %v4558_v33  ;;  %4786 = vmatpush.msra.mxu1 %v4586_v20  ;;  %vm2630_vm13 = vcmp.eq.f32.partialorder %v9525_v30, 0.0  ;;  %v10314_v30 = vld [vmem:[#allocation5 + $0xd8] sm:$0xff] }
 0x465   : > { %4660 = vmatpush.msra.mxu3 %v4550_v37  ;;  %v9534_v37 = vld [vmem:[%s8334_s28 + $0x58] sm:$0xff]  ;;  %12370 = vst [vmem:[#allocation165_spill] sm:$0xff] %v10314_v30 }
 0x466   : > { %4734 = vmatpush.msra.mxu0 %v4557_v39  ;;  %4787 = vmatpush.msra.mxu1 %v4585_v43  ;;  %vm2631_vm14 = vcmp.eq.f32.partialorder %v9534_v37, 0.0 }
 0x467   : > { %4661 = vmatpush.msra.mxu3 %v4549_v41  ;;  %6713 = vmatmul.msk.f32.gmra.mxu0 %vm1377_vm2, %v1868_v22  ;;  %v9543_v41 = vld [vmem:[%s8334_s28 + $0x60] sm:$0xff] }
 0x468   : > { %4788 = vmatpush.msra.mxu1 %v4584_v46  ;;  %6679 = vmatmul.msk.f32.gmra.mxu3 %vm1377_vm2, %v1850_v51  ;;  %v2088_v35 = vpop.f32.mrf.mxu2  ;;  %vm2632_vm15 = vcmp.eq.f32.partialorder %v9543_v41, 0.0 }
 0x469   : > { %4662 = vmatpush.msra.mxu3 %v4548_v45  ;;  %6742 = vmatmul.msk.f32.gmra.mxu1 %vm1377_vm2, %v1881_v44  ;;  %v9481_v15 = vsel %vm2625_vm8, -1e+09, %v2088_v35  ;;  %v9552_v45 = vld [vmem:[%s8334_s28 + $0x68] sm:$0xff] }
 0x46a   : > { %4789 = vmatpush.msra.mxu1 %v4583_v56  ;;  %2806 = vmax.xlane.f32.xlu1 %v9481_v15  ;;  %vm11991_vm0 = vcmp.eq.f32.partialorder %v9552_v45, 0.0 }
 0x46b   : > { %4663 = vmatpush.msra.mxu3 %v4547_v55 }
 0x46c   : > { %4790 = vmatpush.msra.mxu1 %v4582_v60  ;;  %v9570_v60 = vld [vmem:[%s8334_s28 + $0x70] sm:$0xff] }
 0x46d   : > { %4664 = vmatpush.msra.mxu3 %v4546_v58 }
 0x46e   : > { %4791 = vmatpush.msra.mxu1 %v4581_v62 }
 0x46f   : > { %4665 = vmatpush.msra.mxu3 %v4545_v61 }
 0x470   : > { %4792 = vmatpush.msra.mxu1 %v4580_v24  ;;  %6680 = vmatmul.msk.f32.gmra.mxu3 %vm1377_vm2, %v1851_v28  ;;  %v2091_v5 = vpop.f32.mrf.mxu2 }
 0x471   : > { %4666 = vmatpush.msra.mxu3 %v4544_v1  ;;  %6743 = vmatmul.msk.f32.gmra.mxu1 %vm1377_vm2, %v1882_v0  ;;  %v9492_v2 = vsel %vm2626_vm9, -1e+09, %v2091_v5  ;;  %v9578_v0 = vld [vmem:[#allocation5 + $0x8] sm:$0xff] }
 0x472   : > { %4793 = vmatpush.msra.mxu1 %v4579_v52  ;;  %2808 = vmax.xlane.f32.xlu2 %v9492_v2  ;;  %v9593_v52 = vld [vmem:[#allocation5 + $0x10] sm:$0xff]  ;;  %v1885_v5 = vld [vmem:[#allocation2 + $0x1a8] sm:$0xff] }
 0x473   : > { %4667 = vmatpush.msra.mxu3 %v4543_v6  ;;  %v1869_v6 = vld [vmem:[#allocation2 + $0x128] sm:$0xff] }
 0x474   : > { %4794 = vmatpush.msra.mxu1 %v4578_v29  ;;  %6714 = vmatmul.msk.f32.gmra.mxu0 %vm1377_vm2, %v1869_v6  ;;  %v1852_v29 = vld [vmem:[#allocation2 + $0xa0] sm:$0xff] }
 0x475   : > { %4668 = vmatpush.msra.mxu3 %v4542_v9 }
 0x476   : > { %4795 = vmatpush.msra.mxu1 %v4577_v12  ;;  %v7940_v12 = vmov 0  }
 0x477   : > { %4669 = vmatpush.msra.mxu3 %v4541_v11  ;;  %7106 = vset.pattern.permute.xlu0 %v7940_v12 }
 0x478   : > { %4796 = vmatpush.msra.mxu1 %v4576_v14  ;;  %v2094_v16 = vpop.f32.mrf.mxu2  ;;  %6681 = vmatmul.msk.f32.gmra.mxu3 %vm1377_vm2, %v1852_v29 }
 0x479   : > { %6744 = vmatmul.msk.f32.gmra.mxu1 %vm1377_vm2, %v1883_v13  ;;  %v9502_v38 = vsel %vm2627_vm10, -1e+09, %v2094_v16  ;;  %7107 = vset.pattern.permute.xlu1 %v7940_v12 }
 0x47a   : > { %4797 = vmatpush.msra.mxu1 %v4575_v36  ;;  %2810 = vmax.xlane.f32.xlu0 %v9502_v38  ;;  %v9603_v36 = vld [vmem:[#allocation5 + $0x18] sm:$0xff] }
 0x47b   : > { %7108 = vset.pattern.permute.xlu2 %v7940_v12 }
 0x47c   : > { %4798 = vmatpush.msra.mxu1 %v4574_v53 }
 0x47e   : > { %4799 = vmatpush.msra.mxu1 %v4573_v59 }
 0x480   : > { %v2097_v54 = vpop.f32.mrf.mxu2 }
 0x481   : > { %6745 = vmatmul.msk.f32.gmra.mxu1 %vm1377_vm2, %v1884_v63  ;;  %v9512_v42 = vsel %vm2628_vm11, -1e+09, %v2097_v54  ;;  %v1853_v63 = vld [vmem:[#allocation2 + $0xa8] sm:$0xff]  ;;  %v9620_v54 = vld [vmem:[#allocation5 + $0x20] sm:$0xff] }
 0x482   : > { %2812 = vmax.xlane.f32.xlu1 %v9512_v42  ;;  %6682 = vmatmul.msk.f32.gmra.mxu3 %vm1377_vm2, %v1853_v63  ;;  %v9665_v63 = vld [vmem:[#allocation5 + $0x30] sm:$0xff] }
 0x488   : > { %v2100_v26 = vpop.f32.mrf.mxu2 }
 0x489   : > { %v9521_v27 = vsel %vm2629_vm12, -1e+09, %v2100_v26  ;;  %6746 = vmatmul.msk.f32.gmra.mxu1 %vm1377_vm2, %v1885_v5 }
 0x48a   : > { %2814 = vmax.xlane.f32.xlu2 %v9521_v27 }
 0x48c   : > { %v2797_v51 = vpop.xlane.xlu0 %2796 }
 0x48d   : > { %v9563_v55 = vmax.f32 %v9560_v50, %v2797_v51 }
 0x48f   : > { %v2988_v61 = vsub.f32 %v9560_v50, %v9563_v55  ;;  %4977 = vst.msk [vmem:[#allocation5] sm:$0xff] %vm4012_vm1, %v9563_v55  ;;  %v9715_v50 = vld [vmem:[#allocation5 + $0x50] sm:$0xff] }
 0x490   : > { %v2103_v31 = vpop.f32.mrf.mxu2 }
 0x491   : > { %v9530_v33 = vsel %vm2630_vm13, -1e+09, %v2103_v31 }
 0x492   : > { %2816 = vmax.xlane.f32.xlu0 %v9530_v33 }
 0x498   : > { %v2106_v20 = vpop.f32.mrf.mxu2 }
 0x499   : > { %v9539_v39 = vsel %vm2631_vm14, -1e+09, %v2106_v20 }
 0x49a   : > { %12246 = vst [vmem:[#allocation45_spill] sm:$0xff] %v9539_v39  ;;  %2818 = vmax.xlane.f32.xlu1 %v9539_v39  ;;  %v1875_v39 = vld [vmem:[#allocation2 + $0x158] sm:$0xff] }
 0x4a0   : > { %v2109_v43 = vpop.f32.mrf.mxu2 }
 0x4a1   : > { %v9548_v44 = vsel %vm2632_vm15, -1e+09, %v2109_v43 }
 0x4a2   : > { %12247 = vst [vmem:[#allocation46_spill] sm:$0xff] %v9548_v44  ;;  %2820 = vmax.xlane.f32.xlu2 %v9548_v44  ;;  %v9863_v44 = vld [vmem:[#allocation5 + $0x198] sm:$0xff] }
 0x4a3   : > { %12287 = vst [vmem:[#allocation84_spill] sm:$0xff] %v9863_v44 }
 0x4a8   : > { %v2112_v46 = vpop.f32.mrf.mxu2 }
 0x4a9   : > { %v9557_v49 = vsel %vm11991_vm0, -1e+09, %v2112_v46  ;;  %vm2634_vm0 = vcmp.eq.f32.partialorder %v9570_v60, 0.0 }
 0x4aa   : > { %12248 = vst [vmem:[#allocation47_spill] sm:$0xff] %v9557_v49  ;;  %2822 = vmax.xlane.f32.xlu0 %v9557_v49 }
 0x4b0   : > { %v2115_v62 = vpop.f32.mrf.mxu2 }
 0x4b1   : > { %v9582_v24 = vsel %vm2634_vm0, -1e+09, %v2115_v62 }
 0x4b2   : > { %12250 = vst [vmem:[#allocation49_spill] sm:$0xff] %v9582_v24 }
 0x4b8   : > { %v2118_v62 = vpop.f32.mrf.mxu2 }
 0x4bd   : > { %v2799_v1 = vpop.xlane.xlu1 %2798 }
 0x4be   : > { %v9585_v3 = vmax.f32 %v9578_v0, %v2799_v1  ;;  %v9648_v1 = vld [vmem:[#allocation5 + $0x28] sm:$0xff] }
 0x4c0   : > { %4978 = vst.msk [vmem:[#allocation5 + $0x8] sm:$0xff] %vm4012_vm1, %v9585_v3 }
 0x4c3   : > { %v2395_v56 = vpop.f32.mrf.mxu0 }
 0x4c4   : > { %v9567_v58 = vsel %vm2620_vm3, -1e+09, %v2395_v56  ;;  %v9640_v56 = vld [vmem:[%s8334_s28 + $0x78] sm:$0xff]  ;;  %s7944_s28 = smov (!%p6757_p8), 96  }
 0x4c5   : > { %12249 = vst [vmem:[#allocation48_spill] sm:$0xff] %v9567_v58  ;;  %2860 = vmax.xlane.f32.xlu1 %v9567_v58  ;;  %v2801_v9 = vpop.xlane.xlu2 %2800 }
 0x4c6   : > { %v9596_v11 = vmax.f32 %v9593_v52, %v2801_v9 }
 0x4c8   : > { %4979 = vst.msk [vmem:[#allocation5 + $0x10] sm:$0xff] %vm4012_vm1, %v9596_v11 }
 0x4cb   : > { %v2398_v22 = vpop.f32.mrf.mxu0 }
 0x4cc   : > { %v9626_v26 = vsel %vm2621_vm4, -1e+09, %v2398_v22 }
 0x4cd   : > { %2824 = vmax.xlane.f32.xlu1 %v9582_v24  ;;  %v2803_v59 = vpop.xlane.xlu2 %2802  ;;  %12251 = vst [vmem:[#allocation50_spill] sm:$0xff] %v9626_v26  ;;  %v1855_v24 = vld [vmem:[#allocation2 + $0xb8] sm:$0xff] }
 0x4ce   : > { %v9616_v16 = vmax.f32 %v9603_v36, %v2803_v59  ;;  %v1886_v59 = vld [vmem:[#allocation2 + $0x1b0] sm:$0xff] }
 0x4cf   : > { %6747 = vmatmul.msk.f32.gmra.mxu1 %vm1377_vm2, %v1886_v59 }
 0x4d0   : > { %4980 = vst.msk [vmem:[#allocation5 + $0x18] sm:$0xff] %vm4012_vm1, %v9616_v16 }
 0x4d6   : > { %v2805_v7 = vpop.xlane.xlu0 %2804 }
 0x4d7   : > { %v9629_v31 = vmax.f32 %v9620_v54, %v2805_v7 }
 0x4d9   : > { %4981 = vst.msk [vmem:[#allocation5 + $0x20] sm:$0xff] %vm4012_vm1, %v9629_v31 }
 0x4db   : > { %v2234_v14 = vpop.f32.mrf.mxu3 }
 0x4dc   : > { %v9611_v53 = vsel %vm2620_vm3, -1e+09, %v2234_v14 }
 0x4dd   : > { %2828 = vmax.xlane.f32.xlu0 %v9611_v53  ;;  %v2807_v6 = vpop.xlane.xlu1 %2806 }
 0x4de   : > { %v2556_v35 = vpop.f32.mrf.mxu1  ;;  %v9655_v9 = vmax.f32 %v9648_v1, %v2807_v6 }
 0x4df   : > { %v9607_v19 = vsel %vm2620_vm3, -1e+09, %v2556_v35  ;;  %vm2635_vm3 = vcmp.eq.f32.partialorder %v9640_v56, 0.0  ;;  %v1870_v35 = vld [vmem:[#allocation2 + $0x130] sm:$0xff] }
 0x4e0   : > { %2892 = vmax.xlane.f32.xlu2 %v9607_v19  ;;  %v9652_v17 = vsel %vm2635_vm3, -1e+09, %v2118_v62  ;;  %4982 = vst.msk [vmem:[#allocation5 + $0x28] sm:$0xff] %vm4012_vm1, %v9655_v9  ;;  %6715 = vmatmul.msk.f32.gmra.mxu0 %vm1377_vm2, %v1870_v35  ;;  %v9679_v62 = vld [vmem:[#allocation5 + $0x38] sm:$0xff]  ;;  %v9693_v35 = vld [vmem:[#allocation5 + $0x40] sm:$0xff] }
 0x4e1   : > { %12253 = vst [vmem:[#allocation52_spill] sm:$0xff] %v9652_v17 }
 0x4e3   : > { %v2237_v20 = vpop.f32.mrf.mxu3 }
 0x4e4   : > { %v9637_v51 = vsel %vm2621_vm4, -1e+09, %v2237_v20  ;;  %v1871_v20 = vld [vmem:[#allocation2 + $0x138] sm:$0xff] }
 0x4e5   : > { %12252 = vst [vmem:[#allocation51_spill] sm:$0xff] %v9637_v51  ;;  %2830 = vmax.xlane.f32.xlu1 %v9637_v51  ;;  %v2809_v5 = vpop.xlane.xlu2 %2808 }
 0x4e6   : > { %v2559_v43 = vpop.f32.mrf.mxu1  ;;  %v9674_v7 = vmax.f32 %v9665_v63, %v2809_v5 }
 0x4e7   : > { %v9633_v46 = vsel %vm2621_vm4, -1e+09, %v2559_v43  ;;  %vm12343_vm4 = vcmp.eq.f32.partialorder %v9552_v45, 0.0 }
 0x4e8   : > { %2862 = vmax.xlane.f32.xlu2 %v9626_v26  ;;  %2894 = vmax.xlane.f32.xlu0 %v9633_v46  ;;  %4983 = vst.msk [vmem:[#allocation5 + $0x30] sm:$0xff] %vm4012_vm1, %v9674_v7  ;;  %v2994_v25 = vsub.f32 %v9665_v63, %v9674_v7 }
 0x4e9   : > { %6716 = vmatmul.msk.f32.gmra.mxu0 %vm1377_vm2, %v1871_v20  ;;  %v1854_v20 = vld [vmem:[#allocation2 + $0xb0] sm:$0xff] }
 0x4ea   : > { %6683 = vmatmul.msk.f32.gmra.mxu3 %vm1377_vm2, %v1854_v20 }
 0x4eb   : > { %v2240_v14 = vpop.f32.mrf.mxu3 }
 0x4ec   : > { %v9671_v22 = vsel %vm2622_vm5, -1e+09, %v2240_v14 }
 0x4ed   : > { %12255 = vst [vmem:[#allocation54_spill] sm:$0xff] %v9671_v22  ;;  %v2811_v6 = vpop.xlane.xlu0 %2810 }
 0x4ee   : > { %v2562_v29 = vpop.f32.mrf.mxu1  ;;  %v9688_v14 = vmax.f32 %v9679_v62, %v2811_v6  ;;  %v9705_v6 = vld [vmem:[#allocation5 + $0x48] sm:$0xff] }
 0x4ef   : > { %v9659_v12 = vsel %vm2622_vm5, -1e+09, %v2562_v29 }
 0x4f0   : > { %12254 = vst [vmem:[#allocation53_spill] sm:$0xff] %v9659_v12  ;;  %2826 = vmax.xlane.f32.xlu2 %v9652_v17  ;;  %2896 = vmax.xlane.f32.xlu1 %v9659_v12 }
 0x4f1   : > { %4984 = vst.msk [vmem:[#allocation5 + $0x38] sm:$0xff] %vm4012_vm1, %v9688_v14 }
 0x4f2   : > { %6684 = vmatmul.msk.f32.gmra.mxu3 %vm1377_vm2, %v1855_v24  ;;  %v1856_v24 = vld [vmem:[#allocation2 + $0xc0] sm:$0xff] }
 0x4f5   : > { %v2813_v59 = vpop.xlane.xlu1 %2812 }
 0x4f6   : > { %v2565_v43 = vpop.f32.mrf.mxu1  ;;  %v9696_v5 = vmax.f32 %v9693_v35, %v2813_v59 }
 0x4f7   : > { %v9685_v29 = vsel %vm2623_vm6, -1e+09, %v2565_v43  ;;  %v3052_v43 = vmul.f32 1.442695, %v2988_v61  ;;  %v12258_v61 = vsub.f32 %v9578_v0, %v9585_v3 }
 0x4f8   : > { %2832 = vmax.xlane.f32.xlu2 %v9671_v22  ;;  %12256 = vst [vmem:[#allocation55_spill] sm:$0xff] %v9685_v29  ;;  %v1872_v22 = vld [vmem:[#allocation2 + $0x140] sm:$0xff] }
 0x4f9   : > { %4985 = vst.msk [vmem:[#allocation5 + $0x40] sm:$0xff] %vm4012_vm1, %v9696_v5  ;;  %7111 = vpow2.f32 %v3052_v43  ;;  %v3054_v20 = vmul.f32 1.442695, %v12258_v61  ;;  %6717 = vmatmul.msk.f32.gmra.mxu0 %vm1377_vm2, %v1872_v22  ;;  %v2243_v22 = vpop.f32.mrf.mxu3 }
 0x4fa   : > { %6685 = vmatmul.msk.f32.gmra.mxu3 %vm1377_vm2, %v1856_v24 }
 0x4fb   : > { %7113 = vpow2.f32 %v3054_v20  ;;  %v9750_v20 = vld [vmem:[#allocation5 + $0x68] sm:$0xff] }
 0x4fc   : > { %3182 = vperm.xlu0 %7106, %v9563_v55   ;;  %12263 = vst [vmem:[#allocation61_spill] sm:$0xff] %v9750_v20 }
 0x4fd   : > { %v2815_v13 = vpop.xlane.xlu2 %2814 }
 0x4fe   : > { %v9708_v28 = vmax.f32 %v9705_v6, %v2815_v13  ;;  %v9727_v13 = vld [vmem:[#allocation5 + $0x58] sm:$0xff] }
 0x4ff   : > { %v9712_v59 = vpop.eup %7111 }
 0x500   : > { %2898 = vmax.xlane.f32.xlu2 %v9685_v29  ;;  %4986 = vst.msk [vmem:[#allocation5 + $0x48] sm:$0xff] %vm4012_vm1, %v9708_v28  ;;  %v1887_v29 = vld [vmem:[#allocation2 + $0x1b8] sm:$0xff] }
 0x501   : > { %12257 = vst [vmem:[#allocation56_spill] sm:$0xff] %v9712_v59  ;;  %6748 = vmatmul.msk.f32.gmra.mxu1 %vm1377_vm2, %v1887_v29  ;;  %v9733_v0 = vpop.eup %7113  ;;  %v9738_v29 = vld [vmem:[#allocation5 + $0x60] sm:$0xff] }
 0x502   : > { %12259 = vst [vmem:[#allocation57_spill] sm:$0xff] %v9733_v0 }
 0x503   : > { %12260 = vst [vmem:[#allocation58_spill] sm:$0xff] %v9738_v29 }
 0x505   : > { %v2817_v55 = vpop.xlane.xlu0 %2816 }
 0x506   : > { %v9721_v43 = vmax.f32 %v9715_v50, %v2817_v55 }
 0x508   : > { %4987 = vst.msk [vmem:[#allocation5 + $0x50] sm:$0xff] %vm4012_vm1, %v9721_v43 }
 0x509   : > { %3187 = vperm.xlu1 %7107, %v9585_v3   ;;  %v2401_v3 = vpop.f32.mrf.mxu0 }
 0x50a   : > { %v9742_v55 = vsel %vm2622_vm5, -1e+09, %v2401_v3  ;;  %v2568_v3 = vpop.f32.mrf.mxu1  ;;  %vm12351_vm5 = vmmov %vm12343_vm4 }
 0x50b   : > { %12261 = vst [vmem:[#allocation59_spill] sm:$0xff] %v9742_v55 }
 0x50d   : > { %v2819_v12 = vpop.xlane.xlu1 %2818 }
 0x50e   : > { %v9730_v51 = vmax.f32 %v9727_v13, %v2819_v12 }
 0x510   : > { %4988 = vst.msk [vmem:[#allocation5 + $0x58] sm:$0xff] %vm4012_vm1, %v9730_v51 }
 0x511   : > { %4143 = vperm.xlu1 %7107, %v9712_v59  }
 0x515   : > { %v2821_v61 = vpop.xlane.xlu2 %2820 }
 0x516   : > { %v9745_v12 = vmax.f32 %v9738_v29, %v2821_v61  ;;  %v9764_v61 = vsel %vm2624_vm7, -1e+09, %v2568_v3  ;;  %v2404_v29 = vpop.f32.mrf.mxu0  ;;  %v12269_v3 = vsub.f32 %v9593_v52, %v9596_v11 }
 0x517   : > { %12266 = vst [vmem:[#allocation64_spill] sm:$0xff] %v9764_v61 }
 0x518   : > { %3192 = vperm.xlu2 %7108, %v9596_v11   ;;  %12262 = vst [vmem:[#allocation60_spill] sm:$0xff] %v9745_v12  ;;  %v1873_v11 = vld [vmem:[#allocation2 + $0x148] sm:$0xff] }
 0x519   : > { %4989 = vst.msk [vmem:[#allocation5 + $0x60] sm:$0xff] %vm4012_vm1, %v9745_v12  ;;  %6718 = vmatmul.msk.f32.gmra.mxu0 %vm1377_vm2, %v1873_v11  ;;  %v9818_v11 = vld [vmem:[#allocation5 + $0x108] sm:$0xff] }
 0x51a   : > { %12278 = vst [vmem:[#allocation75_spill] sm:$0xff] %v9818_v11 }
 0x51d   : > { %v2823_v17 = vpop.xlane.xlu0 %2822 }
 0x51e   : > { %v9757_v48 = vmax.f32 %v9750_v20, %v2823_v17  ;;  %v9770_v17 = vsel %vm2623_vm6, -1e+09, %v2404_v29  ;;  %v2407_v29 = vpop.f32.mrf.mxu0 }
 0x51f   : > { %12267 = vst [vmem:[#allocation65_spill] sm:$0xff] %v9770_v17 }
 0x520   : > { %4148 = vperm.xlu2 %7108, %v9733_v0   ;;  %v9754_v0 = vsel %vm2623_vm6, -1e+09, %v2243_v22  ;;  %12265 = vst [vmem:[#allocation63_spill] sm:$0xff] %v9757_v48  ;;  %v9772_v22 = vld [vmem:[#allocation5 + $0x100] sm:$0xff]  ;;  %vm12394_vm6 = vmmov %vm12343_vm4 }
 0x521   : > { %12264 = vst [vmem:[#allocation62_spill] sm:$0xff] %v9754_v0 }
 0x522   : > { %4990 = vst.msk [vmem:[#allocation5 + $0x68] sm:$0xff] %vm4012_vm1, %v9757_v48 }
 0x523   : > { %12268 = vst [vmem:[#allocation66_spill] sm:$0xff] %v9772_v22 }
 0x526   : > { %2864 = vmax.xlane.f32.xlu0 %v9742_v55 }
 0x52e   : > { %2834 = vmax.xlane.f32.xlu0 %v9754_v0 }
 0x536   : > { %2900 = vmax.xlane.f32.xlu0 %v9764_v61  ;;  %v3056_v61 = vmul.f32 1.442695, %v12269_v3  ;;  %v9804_v3 = vld [vmem:[#allocation5 + $0x80] sm:$0xff] }
 0x537   : > { %12275 = vst [vmem:[#allocation72_spill] sm:$0xff] %v9804_v3 }
 0x538   : > { %v2861_v20 = vpop.xlane.xlu1 %2860  ;;  %7115 = vpow2.f32 %v3056_v61  ;;  %v1889_v61 = vld [vmem:[#allocation2 + $0x1c8] sm:$0xff] }
 0x539   : > { %v9776_v0 = vmax.f32 %v9772_v22, %v2861_v20  ;;  %v1888_v20 = vld [vmem:[#allocation2 + $0x1c0] sm:$0xff]  ;;  %v9791_v22 = vsel %vm2624_vm7, -1e+09, %v2407_v29 }
 0x53a   : > { %12272 = vst [vmem:[#allocation69_spill] sm:$0xff] %v9791_v22  ;;  %6749 = vmatmul.msk.f32.gmra.mxu1 %vm1377_vm2, %v1888_v20 }
 0x53b   : > { %2866 = vmax.xlane.f32.xlu1 %v9770_v17  ;;  %5009 = vst.msk [vmem:[#allocation5 + $0x100] sm:$0xff] %vm4012_vm1, %v9776_v0 }
 0x53e   : > { %v9796_v52 = vpop.eup %7115 }
 0x53f   : > { %12273 = vst [vmem:[#allocation70_spill] sm:$0xff] %v9796_v52 }
 0x540   : > { %v2825_v55 = vpop.xlane.xlu1 %2824 }
 0x541   : > { %v9787_v17 = vmax.f32 %v9784_v40, %v2825_v55  ;;  %v9802_v55 = vld [vmem:[#allocation5 + $0x180] sm:$0xff] }
 0x542   : > { %6750 = vmatmul.msk.f32.gmra.mxu1 %vm1377_vm2, %v1889_v61  ;;  %12274 = vst [vmem:[#allocation71_spill] sm:$0xff] %v9802_v55  ;;  %v9820_v61 = vld [vmem:[#allocation5 + $0x188] sm:$0xff] }
 0x543   : > { %12271 = vst [vmem:[#allocation68_spill] sm:$0xff] %v9787_v17 }
 0x544   : > { %4991 = vst.msk [vmem:[#allocation5 + $0x70] sm:$0xff] %vm4012_vm1, %v9787_v17 }
 0x545   : > { %12279 = vst [vmem:[#allocation76_spill] sm:$0xff] %v9820_v61 }
 0x549   : > { %2868 = vmax.xlane.f32.xlu2 %v9791_v22  ;;  %v1874_v22 = vld [vmem:[#allocation2 + $0x150] sm:$0xff] }
 0x54a   : > { %4153 = vperm.xlu0 %7106, %v9796_v52   ;;  %6719 = vmatmul.msk.f32.gmra.mxu0 %vm1377_vm2, %v1874_v22 }
 0x550   : > { %v2829_v29 = vpop.xlane.xlu0 %2828 }
 0x551   : > { %v9810_v40 = vmax.f32 %v9804_v3, %v2829_v29 }
 0x552   : > { %6720 = vmatmul.msk.f32.gmra.mxu0 %vm1377_vm2, %v1875_v39 }
 0x553   : > { %v2893_v24 = vpop.xlane.xlu2 %2892  ;;  %12277 = vst [vmem:[#allocation74_spill] sm:$0xff] %v9810_v40 }
 0x554   : > { %v9807_v20 = vmax.f32 %v9802_v55, %v2893_v24  ;;  %3197 = vperm.xlu1 %7107, %v9616_v16   ;;  %4993 = vst.msk [vmem:[#allocation5 + $0x80] sm:$0xff] %vm4012_vm1, %v9810_v40  ;;  %v9822_v24 = vld [vmem:[#allocation5 + $0x88] sm:$0xff] }
 0x555   : > { %12280 = vst [vmem:[#allocation77_spill] sm:$0xff] %v9822_v24 }
 0x556   : > { %12276 = vst [vmem:[#allocation73_spill] sm:$0xff] %v9807_v20 }
 0x557   : > { %5025 = vst.msk [vmem:[#allocation5 + $0x180] sm:$0xff] %vm4012_vm1, %v9807_v20 }
 0x558   : > { %v2831_v58 = vpop.xlane.xlu1 %2830 }
 0x559   : > { %v9831_v22 = vmax.f32 %v9822_v24, %v2831_v58 }
 0x55b   : > { %v2863_v55 = vpop.xlane.xlu2 %2862  ;;  %v2895_v29 = vpop.xlane.xlu0 %2894  ;;  %12282 = vst [vmem:[#allocation79_spill] sm:$0xff] %v9831_v22 }
 0x55c   : > { %v9825_v3 = vmax.f32 %v9818_v11, %v2863_v55  ;;  %v9828_v26 = vmax.f32 %v9820_v61, %v2895_v29  ;;  %4994 = vst.msk [vmem:[#allocation5 + $0x88] sm:$0xff] %vm4012_vm1, %v9831_v22  ;;  %v9840_v55 = vld [vmem:[#allocation5 + $0x78] sm:$0xff]  ;;  %v1857_v11 = vld [vmem:[#allocation2 + $0xc8] sm:$0xff]  ;;  %v9842_v29 = vld [vmem:[#allocation5 + $0x190] sm:$0xff] }
 0x55d   : > { %12283 = vst [vmem:[#allocation80_spill] sm:$0xff] %v9840_v55  ;;  %6686 = vmatmul.msk.f32.gmra.mxu3 %vm1377_vm2, %v1857_v11  ;;  %v9855_v22 = vld [vmem:[#allocation5 + $0x90] sm:$0xff] }
 0x55e   : > { %12281 = vst [vmem:[#allocation78_spill] sm:$0xff] %v9828_v26 }
 0x55f   : > { %5010 = vst.msk [vmem:[#allocation5 + $0x108] sm:$0xff] %vm4012_vm1, %v9825_v3 }
 0x560   : > { %5026 = vst.msk [vmem:[#allocation5 + $0x188] sm:$0xff] %vm4012_vm1, %v9828_v26 }
 0x561   : > { %3202 = vperm.xlu2 %7108, %v9629_v31   ;;  %12284 = vst [vmem:[#allocation81_spill] sm:$0xff] %v9842_v29 }
 0x562   : > { %12286 = vst [vmem:[#allocation83_spill] sm:$0xff] %v9855_v22 }
 0x563   : > { %v2827_v58 = vpop.xlane.xlu2 %2826  ;;  %v2897_v24 = vpop.xlane.xlu1 %2896 }
 0x564   : > { %v9846_v61 = vmax.f32 %v9840_v55, %v2827_v58  ;;  %v9849_v52 = vmax.f32 %v9842_v29, %v2897_v24  ;;  %v2410_v58 = vpop.f32.mrf.mxu0  ;;  %v1890_v29 = vld [vmem:[#allocation2 + $0x1d0] sm:$0xff] }
 0x565   : > { %6751 = vmatmul.msk.f32.gmra.mxu1 %vm1377_vm2, %v1890_v29 }
 0x566   : > { %12285 = vst [vmem:[#allocation82_spill] sm:$0xff] %v9849_v52 }
 0x567   : > { %4992 = vst.msk [vmem:[#allocation5 + $0x78] sm:$0xff] %vm4012_vm1, %v9846_v61 }
 0x568   : > { %5027 = vst.msk [vmem:[#allocation5 + $0x190] sm:$0xff] %vm4012_vm1, %v9849_v52  ;;  %v9867_v52 = vsel %vm2625_vm8, -1e+09, %v2410_v58  ;;  %v2246_v58 = vpop.f32.mrf.mxu3 }
 0x569   : > { %12288 = vst [vmem:[#allocation85_spill] sm:$0xff] %v9867_v52  ;;  %v9884_v39 = vsel %vm2624_vm7, -1e+09, %v2246_v58 }
 0x56a   : > { %12289 = vst [vmem:[#allocation86_spill] sm:$0xff] %v9884_v39 }
 0x56b   : > { %v2833_v17 = vpop.xlane.xlu2 %2832 }
 0x56c   : > { %v9858_v49 = vmax.f32 %v9855_v22, %v2833_v17 }
 0x56e   : > { %4995 = vst.msk [vmem:[#allocation5 + $0x90] sm:$0xff] %vm4012_vm1, %v9858_v49  ;;  %v3183_v11 = vpop.permute.xlu0 %3182 }
 0x56f   : > { %v3500_v24 = vsub.f32 %v9421_v10, %v3183_v11  ;;  %v2992_v10 = vsub.f32 %v9620_v54, %v9629_v31  ;;  %v2571_v31 = vpop.f32.mrf.mxu1 }
 0x571   : > { %v3564_v55 = vmul.f32 1.442695, %v3500_v24 }
 0x573   : > { %7117 = vpow2.f32 %v3564_v55  ;;  %v2899_v17 = vpop.xlane.xlu2 %2898  ;;  %v3060_v55 = vmul.f32 1.442695, %v2992_v10  ;;  %v2249_v10 = vpop.f32.mrf.mxu3 }
 0x574   : > { %v9872_v22 = vmax.f32 %v9863_v44, %v2899_v17  ;;  %2870 = vmax.xlane.f32.xlu0 %v9867_v52  ;;  %v9891_v52 = vsel %vm2625_vm8, -1e+09, %v2571_v31 }
 0x575   : > { %7119 = vpow2.f32 %v3060_v55  ;;  %12290 = vst [vmem:[#allocation87_spill] sm:$0xff] %v9891_v52 }
 0x576   : > { %5028 = vst.msk [vmem:[#allocation5 + $0x198] sm:$0xff] %vm4012_vm1, %v9872_v22 }
 0x577   : > { %v2574_v55 = vpop.f32.mrf.mxu1 }
 0x578   : > { %v9912_v8 = vsel %vm2626_vm9, -1e+09, %v2574_v55 }
 0x579   : > { %v9879_v11 = vpop.eup %7117  ;;  %12294 = vst [vmem:[#allocation91_spill] sm:$0xff] %v9912_v8 }
 0x57a   : > { %4605 = vmatmul.f32.vlgmr.msra.gmra.mxu2 %v9879_v11 }
 0x57b   : > { %v3188_v29 = vpop.permute.xlu1 %3187  ;;  %v3193_v17 = vpop.permute.xlu2 %3192 }
 0x57c   : > { %v3501_v24 = vsub.f32 %v9435_v47, %v3188_v29  ;;  %v3502_v54 = vsub.f32 %v9448_v34, %v3193_v17  ;;  %v9893_v23 = vpop.eup %7119  ;;  %v9900_v47 = vsel %vm2625_vm8, -1e+09, %v2249_v10  ;;  %v1858_v34 = vld [vmem:[#allocation2 + $0xd0] sm:$0xff] }
 0x57d   : > { %12291 = vst [vmem:[#allocation88_spill] sm:$0xff] %v9893_v23  ;;  %6687 = vmatmul.msk.f32.gmra.mxu3 %vm1377_vm2, %v1858_v34  ;;  %v9922_v10 = vld [vmem:[#allocation5 + $0x110] sm:$0xff] }
 0x57e   : > { %v3566_v44 = vmul.f32 1.442695, %v3501_v24  ;;  %2836 = vmax.xlane.f32.xlu1 %v9884_v39  ;;  %v3568_v59 = vmul.f32 1.442695, %v3502_v54  ;;  %12293 = vst [vmem:[#allocation90_spill] sm:$0xff] %v9900_v47  ;;  %v2991_v24 = vsub.f32 %v9603_v36, %v9616_v16  ;;  %v1859_v54 = vld [vmem:[#allocation2 + $0xd8] sm:$0xff] }
 0x57f   : > { %12296 = vst [vmem:[#allocation93_spill] sm:$0xff] %v9922_v10  ;;  %v1891_v36 = vld [vmem:[#allocation2 + $0x1d8] sm:$0xff] }
 0x580   : > { %7121 = vpow2.f32 %v3566_v44  ;;  %v9906_v44 = vpop.f32.mrf.mxu0  ;;  %v3058_v17 = vmul.f32 1.442695, %v2991_v24  ;;  %v9933_v24 = vld [vmem:[#allocation5 + $0x98] sm:$0xff]  ;;  %6752 = vmatmul.msk.f32.gmra.mxu1 %vm1377_vm2, %v1891_v36 }
 0x581   : > { %7123 = vpow2.f32 %v3568_v59  ;;  %12299 = vst [vmem:[#allocation96_spill] sm:$0xff] %v9933_v24 }
 0x582   : > { %7125 = vpow2.f32 %v3058_v17 }
 0x585   : > { %6688 = vmatmul.msk.f32.gmra.mxu3 %vm1377_vm2, %v1859_v54  ;;  %v1876_v54 = vld [vmem:[#allocation2 + $0x160] sm:$0xff] }
 0x586   : > { %v9895_v58 = vpop.eup %7121  ;;  %2902 = vmax.xlane.f32.xlu1 %v9891_v52  ;;  %6721 = vmatmul.msk.f32.gmra.mxu0 %vm1377_vm2, %v1876_v54  ;;  %v9955_v52 = vld [vmem:[#allocation5 + $0x118] sm:$0xff] }
 0x587   : > { %12292 = vst [vmem:[#allocation89_spill] sm:$0xff] %v9895_v58  ;;  %4608 = vmatmul.f32.gmra.mxu2 %v9895_v58  ;;  %v9908_v29 = vpop.eup %7123  ;;  %v1878_v58 = vld [vmem:[#allocation2 + $0x170] sm:$0xff] }
 0x588   : > { %4163 = vperm.xlu0 %7106, %v9893_v23   ;;  %v2416_v59 = vpop.f32.mrf.mxu0  ;;  %v9931_v16 = vpop.eup %7125  ;;  %v9944_v23 = vld [vmem:[#allocation5 + $0x1a0] sm:$0xff]  ;;  %12302 = vst [vmem:[#allocation99_spill] sm:$0xff] %v9955_v52 }
 0x589   : > { %v9920_v31 = vsel %vm2627_vm10, -1e+09, %v2416_v59  ;;  %12298 = vst [vmem:[#allocation95_spill] sm:$0xff] %v9931_v16 }
 0x58a   : > { %2838 = vmax.xlane.f32.xlu2 %v9900_v47  ;;  %12295 = vst [vmem:[#allocation92_spill] sm:$0xff] %v9920_v31 }
 0x58b   : > { %12300 = vst [vmem:[#allocation97_spill] sm:$0xff] %v9944_v23 }
 0x58f   : > { %4611 = vmatmul.f32.gmra.mxu2 %v9908_v29 }
 0x592   : > { %2904 = vmax.xlane.f32.xlu2 %v9912_v8  ;;  %v1877_v8 = vld [vmem:[#allocation2 + $0x168] sm:$0xff] }
 0x593   : > { %6722 = vmatmul.msk.f32.gmra.mxu0 %vm1377_vm2, %v1877_v8  ;;  %v9980_v8 = vld [vmem:[#allocation5 + $0x120] sm:$0xff] }
 0x594   : > { %12307 = vst [vmem:[#allocation104_spill] sm:$0xff] %v9980_v8 }
 0x599   : > { %v2865_v34 = vpop.xlane.xlu0 %2864 }
 0x59a   : > { %2874 = vmax.xlane.f32.xlu2 %v9920_v31  ;;  %v9927_v55 = vmax.f32 %v9922_v10, %v2865_v34  ;;  %v1892_v34 = vld [vmem:[#allocation2 + $0x1e0] sm:$0xff]  ;;  %v9942_v10 = vpop.permute.xlu1 %4143 }
 0x59b   : > { %6753 = vmatmul.msk.f32.gmra.mxu1 %vm1377_vm2, %v1892_v34  ;;  %6723 = vmatmul.msk.f32.gmra.mxu0 %vm1377_vm2, %v1878_v58 }
 0x59c   : > { %12297 = vst [vmem:[#allocation94_spill] sm:$0xff] %v9927_v55 }
 0x59d   : > { %5011 = vst.msk [vmem:[#allocation5 + $0x110] sm:$0xff] %vm4012_vm1, %v9927_v55 }
 0x59f   : > { %4158 = vperm.xlu1 %7107, %v9931_v16  }
 0x5a1   : > { %v2835_v59 = vpop.xlane.xlu0 %2834 }
 0x5a2   : > { %v9938_v17 = vmax.f32 %v9933_v24, %v2835_v59  ;;  %v2993_v59 = vsub.f32 %v9648_v1, %v9655_v9  ;;  %v2252_v24 = vpop.f32.mrf.mxu3  ;;  %v9969_v1 = vpop.permute.xlu2 %4148 }
 0x5a3   : > { %v9959_v54 = vsel %vm2626_vm9, -1e+09, %v2252_v24 }
 0x5a4   : > { %4996 = vst.msk [vmem:[#allocation5 + $0x98] sm:$0xff] %vm4012_vm1, %v9938_v17  ;;  %v3062_v47 = vmul.f32 1.442695, %v2993_v59  ;;  %v1860_v59 = vld [vmem:[#allocation2 + $0xe0] sm:$0xff] }
 0x5a5   : > { %12303 = vst [vmem:[#allocation100_spill] sm:$0xff] %v9959_v54  ;;  %6689 = vmatmul.msk.f32.gmra.mxu3 %vm1377_vm2, %v1860_v59  ;;  %v1893_v59 = vld [vmem:[#allocation2 + $0x1e8] sm:$0xff] }
 0x5a6   : > { %7127 = vpow2.f32 %v3062_v47  ;;  %v2419_v47 = vpop.f32.mrf.mxu0  ;;  %6754 = vmatmul.msk.f32.gmra.mxu1 %vm1377_vm2, %v1893_v59  ;;  %v2995_v59 = vsub.f32 %v9679_v62, %v9688_v14 }
 0x5a8   : > { %v3066_v21 = vmul.f32 1.442695, %v2995_v59 }
 0x5a9   : > { %v2901_v36 = vpop.xlane.xlu0 %2900 }
 0x5aa   : > { %v9949_v31 = vmax.f32 %v9944_v23, %v2901_v36  ;;  %v2577_v36 = vpop.f32.mrf.mxu1 }
 0x5ab   : > { %v9973_v24 = vsel %vm2627_vm10, -1e+09, %v2577_v36  ;;  %v9989_v36 = vsel %vm2628_vm11, -1e+09, %v2419_v47 }
 0x5ac   : > { %12301 = vst [vmem:[#allocation98_spill] sm:$0xff] %v9949_v31 }
 0x5ad   : > { %5029 = vst.msk [vmem:[#allocation5 + $0x1a0] sm:$0xff] %vm4012_vm1, %v9949_v31 }
 0x5ae   : > { %v2867_v39 = vpop.xlane.xlu1 %2866  ;;  %12305 = vst [vmem:[#allocation102_spill] sm:$0xff] %v9973_v24 }
 0x5af   : > { %v9963_v34 = vmax.f32 %v9955_v52, %v2867_v39  ;;  %v9976_v39 = vpop.eup %7127  ;;  %12308 = vst [vmem:[#allocation105_spill] sm:$0xff] %v9989_v36 }
 0x5b0   : > { %12306 = vst [vmem:[#allocation103_spill] sm:$0xff] %v9976_v39 }
 0x5b1   : > { %12304 = vst [vmem:[#allocation101_spill] sm:$0xff] %v9963_v34 }
 0x5b2   : > { %5012 = vst.msk [vmem:[#allocation5 + $0x118] sm:$0xff] %vm4012_vm1, %v9963_v34  ;;  %2840 = vmax.xlane.f32.xlu0 %v9959_v54  ;;  %3212 = vperm.xlu2 %7108, %v9674_v7   ;;  %v9996_v54 = vsel %vm2626_vm9, -1e+09, %v9906_v44 }
 0x5b3   : > { %12309 = vst [vmem:[#allocation106_spill] sm:$0xff] %v9996_v54 }
 0x5ba   : > { %2906 = vmax.xlane.f32.xlu0 %v9973_v24  ;;  %4168 = vperm.xlu2 %7108, %v9976_v39  }
 0x5bc   : > { %v2869_v23 = vpop.xlane.xlu2 %2868 }
 0x5bd   : > { %v9983_v52 = vmax.f32 %v9980_v8, %v2869_v23 }
 0x5bf   : > { %5013 = vst.msk [vmem:[#allocation5 + $0x120] sm:$0xff] %vm4012_vm1, %v9983_v52 }
 0x5c2   : > { %2876 = vmax.xlane.f32.xlu0 %v9989_v36 }
 0x5c4   : > { %v3203_v8 = vpop.permute.xlu2 %3202 }
 0x5c5   : > { %v3504_v47 = vsub.f32 %v9470_v4, %v3203_v8  ;;  %v10011_v4 = vpop.f32.mrf.mxu1 }
 0x5c6   : > { %v3198_v24 = vpop.permute.xlu1 %3197 }
 0x5c7   : > { %v3503_v23 = vsub.f32 %v9460_v57, %v3198_v24  ;;  %v3572_v36 = vmul.f32 1.442695, %v3504_v47  ;;  %v2255_v57 = vpop.f32.mrf.mxu3  ;;  %v10016_v24 = vpop.permute.xlu0 %4153 }
 0x5c9   : > { %v3570_v39 = vmul.f32 1.442695, %v3503_v23  ;;  %2872 = vmax.xlane.f32.xlu1 %v9996_v54  ;;  %v10057_v54 = vld [vmem:[#allocation5 + $0xa8] sm:$0xff] }
 0x5ca   : > { %12321 = vst [vmem:[#allocation118_spill] sm:$0xff] %v10057_v54 }
 0x5cb   : > { %7129 = vpow2.f32 %v3570_v39 }
 0x5cc   : > { %7131 = vpow2.f32 %v3572_v36  ;;  %v10026_v36 = vld [vmem:[#allocation5 + $0x128] sm:$0xff] }
 0x5cd   : > { %7133 = vpow2.f32 %v3066_v21  ;;  %v2583_v8 = vpop.f32.mrf.mxu1  ;;  %12313 = vst [vmem:[#allocation110_spill] sm:$0xff] %v10026_v36  ;;  %v1861_v21 = vld [vmem:[#allocation2 + $0xe8] sm:$0xff] }
 0x5ce   : > { %v10030_v47 = vsel %vm2629_vm12, -1e+09, %v2583_v8  ;;  %6690 = vmatmul.msk.f32.gmra.mxu3 %vm1377_vm2, %v1861_v21  ;;  %v1862_v8 = vld [vmem:[#allocation2 + $0xf0] sm:$0xff]  ;;  %v10052_v21 = vld [vmem:[#allocation5 + $0x1a8] sm:$0xff] }
 0x5cf   : > { %v2258_v62 = vpop.f32.mrf.mxu3  ;;  %12314 = vst [vmem:[#allocation111_spill] sm:$0xff] %v10030_v47 }
 0x5d0   : > { %v10020_v39 = vsel %vm2628_vm11, -1e+09, %v2258_v62  ;;  %12319 = vst [vmem:[#allocation116_spill] sm:$0xff] %v10052_v21 }
 0x5d1   : > { %v10004_v16 = vpop.eup %7129  ;;  %12312 = vst [vmem:[#allocation109_spill] sm:$0xff] %v10020_v39 }
 0x5d2   : > { %4614 = vmatmul.f32.gmra.mxu2 %v10004_v16  ;;  %v10008_v44 = vpop.eup %7131 }
 0x5d3   : > { %12310 = vst [vmem:[#allocation107_spill] sm:$0xff] %v10008_v44  ;;  %v10013_v58 = vpop.eup %7133 }
 0x5d4   : > { %12311 = vst [vmem:[#allocation108_spill] sm:$0xff] %v10013_v58 }
 0x5d6   : > { %3217 = vperm.xlu0 %7106, %v9688_v14   ;;  %v10024_v14 = vpop.f32.mrf.mxu0  ;;  %6691 = vmatmul.msk.f32.gmra.mxu3 %vm1377_vm2, %v1862_v8 }
 0x5da   : > { %4617 = vmatmul.f32.gmra.mxu2 %v10008_v44 }
 0x5de   : > { %4178 = vperm.xlu0 %7106, %v10013_v58   ;;  %v10043_v58 = vld [vmem:[#allocation5 + $0xa0] sm:$0xff] }
 0x5df   : > { %12317 = vst [vmem:[#allocation114_spill] sm:$0xff] %v10043_v58 }
 0x5e2   : > { %3207 = vperm.xlu1 %7107, %v9655_v9   ;;  %v2425_v9 = vpop.f32.mrf.mxu0 }
 0x5e3   : > { %2844 = vmax.xlane.f32.xlu2 %v10020_v39  ;;  %v10041_v62 = vsel %vm2630_vm13, -1e+09, %v2425_v9 }
 0x5e4   : > { %12316 = vst [vmem:[#allocation113_spill] sm:$0xff] %v10041_v62 }
 0x5e7   : > { %v2871_v23 = vpop.xlane.xlu0 %2870 }
 0x5e8   : > { %v10033_v59 = vmax.f32 %v10026_v36, %v2871_v23  ;;  %v4077_v36 = vld [vmem:[#allocation7] sm:$0xff] }
 0x5e9   : > { %v4461_v44 = vmul.f32 %v9942_v10, %v4077_v36  ;;  %v2996_v10 = vsub.f32 %v9693_v35, %v9696_v5  ;;  %v10085_v35 = vsel %vm2627_vm10, -1e+09, %v2255_v57  ;;  %v4079_v57 = vld [vmem:[#allocation7 + $0x10] sm:$0xff] }
 0x5ea   : > { %12315 = vst [vmem:[#allocation112_spill] sm:$0xff] %v10033_v59 }
 0x5eb   : > { %5014 = vst.msk [vmem:[#allocation5 + $0x128] sm:$0xff] %vm4012_vm1, %v10033_v59  ;;  %2910 = vmax.xlane.f32.xlu2 %v10030_v47 }
 0x5ec   : > { %12324 = vst [vmem:[#allocation121_spill] sm:$0xff] %v10085_v35 }
 0x5f1   : > { %v2837_v39 = vpop.xlane.xlu1 %2836 }
 0x5f2   : > { %v10047_v23 = vmax.f32 %v10043_v58, %v2837_v39 }
 0x5f3   : > { %2880 = vmax.xlane.f32.xlu2 %v10041_v62 }
 0x5f4   : > { %12318 = vst [vmem:[#allocation115_spill] sm:$0xff] %v10047_v23 }
 0x5f5   : > { %4997 = vst.msk [vmem:[#allocation5 + $0xa0] sm:$0xff] %vm4012_vm1, %v10047_v23 }
 0x5f9   : > { %v2903_v47 = vpop.xlane.xlu1 %2902 }
 0x5fa   : > { %v10055_v9 = vmax.f32 %v10052_v21, %v2903_v47  ;;  %v2261_v47 = vpop.f32.mrf.mxu3  ;;  %v10068_v21 = vld [vmem:[#allocation5 + $0x1b0] sm:$0xff] }
 0x5fb   : > { %12322 = vst [vmem:[#allocation119_spill] sm:$0xff] %v10068_v21 }
 0x5fc   : > { %12320 = vst [vmem:[#allocation117_spill] sm:$0xff] %v10055_v9 }
 0x5fd   : > { %5030 = vst.msk [vmem:[#allocation5 + $0x1a8] sm:$0xff] %vm4012_vm1, %v10055_v9  ;;  %v4606_v39 = vpop.f32.mrf.mxu2  ;;  %v2839_v8 = vpop.xlane.xlu2 %2838  ;;  %v10074_v9 = vsel %vm2629_vm12, -1e+09, %v2261_v47  ;;  %v10088_v47 = vld [vmem:[#allocation5 + $0x138] sm:$0xff] }
 0x5fe   : > { %v4849_v58 = vadd.f32 %v4606_v39, %v4461_v44  ;;  %v10063_v62 = vmax.f32 %v10057_v54, %v2839_v8  ;;  %12323 = vst [vmem:[#allocation120_spill] sm:$0xff] %v10074_v9  ;;  %v4078_v39 = vld [vmem:[#allocation7 + $0x8] sm:$0xff]  ;;  %v3068_v8 = vmul.f32 1.442695, %v2996_v10  ;;  %v2586_v54 = vpop.f32.mrf.mxu1 }
 0x5ff   : > { %12325 = vst [vmem:[#allocation122_spill] sm:$0xff] %v10088_v47 }
 0x600   : > { %4913 = vst.msk [vmem:[#allocation7] sm:$0xff] %vm1377_vm2, %v4849_v58  ;;  %v4462_v58 = vmul.f32 %v9969_v1, %v4078_v39  ;;  %7135 = vpow2.f32 %v3068_v8  ;;  %v1863_v1 = vld [vmem:[#allocation2 + $0xf8] sm:$0xff]  ;;  %v4463_v39 = vmul.f32 %v10016_v24, %v4079_v57  ;;  %v2428_v8 = vpop.f32.mrf.mxu0  ;;  %v10119_v24 = vpop.permute.xlu0 %4163  ;;  %v2998_v57 = vsub.f32 %v9715_v50, %v9721_v43  ;;  %v1894_v50 = vld [vmem:[#allocation2 + $0x1f0] sm:$0xff] }
 0x601   : > { %4998 = vst.msk [vmem:[#allocation5 + $0xa8] sm:$0xff] %vm4012_vm1, %v10063_v62  ;;  %6692 = vmatmul.msk.f32.gmra.mxu3 %vm1377_vm2, %v1863_v1  ;;  %v10123_v1 = vld [vmem:[#allocation5 + $0xb0] sm:$0xff]  ;;  %6755 = vmatmul.msk.f32.gmra.mxu1 %vm1377_vm2, %v1894_v50 }
 0x602   : > { %12331 = vst [vmem:[#allocation128_spill] sm:$0xff] %v10123_v1  ;;  %v10135_v63 = vpop.f32.mrf.mxu3 }
 0x605   : > { %v2905_v36 = vpop.xlane.xlu2 %2904 }
 0x606   : > { %v10077_v44 = vmax.f32 %v10068_v21, %v2905_v36  ;;  %v10093_v21 = vsel %vm2630_vm13, -1e+09, %v2586_v54  ;;  %v10109_v54 = vsel %vm2628_vm11, -1e+09, %v10011_v4  ;;  %v3064_v4 = vmul.f32 1.442695, %v2994_v25 }
 0x607   : > { %12326 = vst [vmem:[#allocation123_spill] sm:$0xff] %v10093_v21 }
 0x608   : > { %5031 = vst.msk [vmem:[#allocation5 + $0x1b0] sm:$0xff] %vm4012_vm1, %v10077_v44  ;;  %2846 = vmax.xlane.f32.xlu0 %v10074_v9  ;;  %7137 = vpow2.f32 %v3064_v4 }
 0x609   : > { %12329 = vst [vmem:[#allocation126_spill] sm:$0xff] %v10109_v54 }
 0x60a   : > { %v4609_v23 = vpop.f32.mrf.mxu2 }
 0x60b   : > { %3227 = vperm.xlu2 %7108, %v9708_v28   ;;  %v4850_v36 = vadd.f32 %v4609_v23, %v4462_v58  ;;  %v10103_v23 = vpop.eup %7135 }
 0x60c   : > { %2842 = vmax.xlane.f32.xlu1 %v10085_v35  ;;  %12328 = vst [vmem:[#allocation125_spill] sm:$0xff] %v10103_v23 }
 0x60d   : > { %v2875_v10 = vpop.xlane.xlu2 %2874  ;;  %4914 = vst.msk [vmem:[#allocation7 + $0x8] sm:$0xff] %vm1377_vm2, %v4850_v36 }
 0x60e   : > { %v10097_v32 = vmax.f32 %v10088_v47, %v2875_v10  ;;  %v10115_v10 = vsel %vm2631_vm14, -1e+09, %v2428_v8  ;;  %v3072_v8 = vmul.f32 1.442695, %v2998_v57  ;;  %v10137_v7 = vpop.eup %7137  ;;  %v10151_v57 = vpop.f32.mrf.mxu1 }
 0x60f   : > { %12330 = vst [vmem:[#allocation127_spill] sm:$0xff] %v10115_v10 }
 0x610   : > { %12327 = vst [vmem:[#allocation124_spill] sm:$0xff] %v10097_v32  ;;  %2912 = vmax.xlane.f32.xlu0 %v10093_v21  ;;  %7139 = vpow2.f32 %v3072_v8 }
 0x611   : > { %5016 = vst.msk [vmem:[#allocation5 + $0x138] sm:$0xff] %vm4012_vm1, %v10097_v32  ;;  %v4159_v8 = vpop.permute.xlu1 %4158 }
 0x612   : > { %v4612_v58 = vpop.f32.mrf.mxu2  ;;  %12334 = vst [vmem:[#allocation131_spill] sm:$0xff] %v10137_v7 }
 0x613   : > { %4183 = vperm.xlu2 %7108, %v10103_v23   ;;  %v4851_v36 = vadd.f32 %v4612_v58, %v4463_v39 }
 0x614   : > { %2908 = vmax.xlane.f32.xlu1 %v10109_v54  ;;  %v10185_v54 = vld [vmem:[#allocation5 + $0xc0] sm:$0xff] }
 0x615   : > { %4915 = vst.msk [vmem:[#allocation7 + $0x10] sm:$0xff] %vm1377_vm2, %v4851_v36  ;;  %v10132_v36 = vld [vmem:[#allocation5 + $0x1b8] sm:$0xff]  ;;  %v3213_v9 = vpop.permute.xlu2 %3212 }
 0x616   : > { %12333 = vst [vmem:[#allocation130_spill] sm:$0xff] %v10132_v36  ;;  %v10146_v4 = vpop.eup %7139  ;;  %v3506_v18 = vsub.f32 %v9492_v2, %v3213_v9 }
 0x617   : > { %12336 = vst [vmem:[#allocation133_spill] sm:$0xff] %v10146_v4 }
 0x618   : > { %2882 = vmax.xlane.f32.xlu0 %v10115_v10  ;;  %12345 = vst [vmem:[#allocation141_spill] sm:$0xff] %v10185_v54 }
 0x625   : > { %v2841_v39 = vpop.xlane.xlu0 %2840 }
 0x626   : > { %v10128_v58 = vmax.f32 %v10123_v1, %v2841_v39  ;;  %v2267_v1 = vpop.f32.mrf.mxu3 }
 0x627   : > { %v10160_v50 = vsel %vm2631_vm14, -1e+09, %v2267_v1 }
 0x628   : > { %12332 = vst [vmem:[#allocation129_spill] sm:$0xff] %v10128_v58 }
 0x629   : > { %4999 = vst.msk [vmem:[#allocation5 + $0xb0] sm:$0xff] %vm4012_vm1, %v10128_v58 }
 0x62a   : > { %12339 = vst [vmem:[#allocation136_spill] sm:$0xff] %v10160_v50 }
 0x62c   : > { %3232 = vperm.xlu0 %7106, %v9721_v43   ;;  %v10148_v43 = vld [vmem:[#allocation5 + $0x140] sm:$0xff] }
 0x62d   : > { %v2907_v25 = vpop.xlane.xlu0 %2906  ;;  %4173 = vperm.xlu1 %7107, %v10137_v7   ;;  %12337 = vst [vmem:[#allocation134_spill] sm:$0xff] %v10148_v43 }
 0x62e   : > { %v10141_v39 = vmax.f32 %v10132_v36, %v2907_v25  ;;  %v1895_v25 = vld [vmem:[#allocation2 + $0x1f8] sm:$0xff]  ;;  %v10163_v36 = vld [vmem:[#allocation5 + $0x130] sm:$0xff] }
 0x62f   : > { %6756 = vmatmul.msk.f32.gmra.mxu1 %vm1377_vm2, %v1895_v25  ;;  %12340 = vst [vmem:[#allocation137_spill] sm:$0xff] %v10163_v36 }
 0x630   : > { %12335 = vst [vmem:[#allocation132_spill] sm:$0xff] %v10141_v39 }
 0x631   : > { %5032 = vst.msk [vmem:[#allocation5 + $0x1b8] sm:$0xff] %vm4012_vm1, %v10141_v39  ;;  %v4081_v39 = vld [vmem:[#allocation7 + $0x20] sm:$0xff] }
 0x634   : > { %4193 = vperm.xlu0 %7106, %v10146_v4   ;;  %v10166_v4 = vpop.f32.mrf.mxu0 }
 0x635   : > { %v2877_v47 = vpop.xlane.xlu0 %2876 }
 0x636   : > { %v10154_v10 = vmax.f32 %v10148_v43, %v2877_v47  ;;  %v2592_v43 = vpop.f32.mrf.mxu1 }
 0x637   : > { %v10175_v1 = vsel %vm2632_vm15, -1e+09, %v2592_v43  ;;  %v10190_v43 = vsel %vm2629_vm12, -1e+09, %v10024_v14  ;;  %v10205_v14 = vld [vmem:[#allocation5 + $0x1c8] sm:$0xff] }
 0x638   : > { %12338 = vst [vmem:[#allocation135_spill] sm:$0xff] %v10154_v10 }
 0x639   : > { %5017 = vst.msk [vmem:[#allocation5 + $0x140] sm:$0xff] %vm4012_vm1, %v10154_v10  ;;  %v2270_v10 = vpop.f32.mrf.mxu3 }
 0x63a   : > { %12342 = vst [vmem:[#allocation139_spill] sm:$0xff] %v10175_v1 }
 0x63b   : > { %12346 = vst [vmem:[#allocation142_spill] sm:$0xff] %v10190_v43 }
 0x63c   : > { %2850 = vmax.xlane.f32.xlu2 %v10160_v50  ;;  %v2873_v21 = vpop.xlane.xlu1 %2872  ;;  %v2434_v25 = vpop.f32.mrf.mxu0  ;;  %12349 = vst [vmem:[#allocation145_spill] sm:$0xff] %v10205_v14 }
 0x63d   : > { %v10169_v47 = vmax.f32 %v10163_v36, %v2873_v21  ;;  %v10180_v50 = vsel %vm12343_vm4, -1e+09, %v2434_v25  ;;  %v10183_v21 = vpop.permute.xlu2 %4168  ;;  %v4080_v36 = vld [vmem:[#allocation7 + $0x18] sm:$0xff] }
 0x63e   : > { %12344 = vst [vmem:[#allocation140_spill] sm:$0xff] %v10180_v50  ;;  %v4464_v35 = vmul.f32 %v4159_v8, %v4080_v36  ;;  %v3576_v36 = vmul.f32 1.442695, %v3506_v18 }
 0x63f   : > { %12341 = vst [vmem:[#allocation138_spill] sm:$0xff] %v10169_v47 }
 0x640   : > { %5015 = vst.msk [vmem:[#allocation5 + $0x130] sm:$0xff] %vm4012_vm1, %v10169_v47 }
 0x644   : > { %2916 = vmax.xlane.f32.xlu2 %v10175_v1 }
 0x648   : > { %v3218_v9 = vpop.permute.xlu0 %3217 }
 0x64c   : > { %2886 = vmax.xlane.f32.xlu2 %v10180_v50 }
 0x654   : > { %v3208_v23 = vpop.permute.xlu1 %3207 }
 0x655   : > { %v3505_v1 = vsub.f32 %v9481_v15, %v3208_v23  ;;  %v4615_v7 = vpop.f32.mrf.mxu2  ;;  %v10203_v15 = vsel %vm2632_vm15, -1e+09, %v2270_v10  ;;  %v4465_v23 = vmul.f32 %v10119_v24, %v4081_v39  ;;  %v2595_v10 = vpop.f32.mrf.mxu1  ;;  %v10226_v39 = vld [vmem:[#allocation5 + $0x150] sm:$0xff] }
 0x656   : > { %v2845_v47 = vpop.xlane.xlu2 %2844  ;;  %v4852_v25 = vadd.f32 %v4615_v7, %v4464_v35  ;;  %12348 = vst [vmem:[#allocation144_spill] sm:$0xff] %v10203_v15  ;;  %v2999_v35 = vsub.f32 %v9727_v13, %v9730_v51  ;;  %v3507_v13 = vsub.f32 %v9502_v38, %v3218_v9  ;;  %v10223_v24 = vsel %vm12351_vm5, -1e+09, %v2595_v10  ;;  %v10249_v9 = vpop.permute.xlu0 %4178 }
 0x657   : > { %v10194_v34 = vmax.f32 %v10185_v54, %v2845_v47  ;;  %v3574_v50 = vmul.f32 1.442695, %v3505_v1  ;;  %2878 = vmax.xlane.f32.xlu1 %v10190_v43  ;;  %12352 = vst [vmem:[#allocation147_spill] sm:$0xff] %v10223_v24 }
 0x658   : > { %4916 = vst.msk [vmem:[#allocation7 + $0x18] sm:$0xff] %vm1377_vm2, %v4852_v25  ;;  %v3074_v1 = vmul.f32 1.442695, %v2999_v35  ;;  %v3578_v25 = vmul.f32 1.442695, %v3507_v13  ;;  %v10256_v13 = vld [vmem:[#allocation5 + $0xb8] sm:$0xff] }
 0x659   : > { %12347 = vst [vmem:[#allocation143_spill] sm:$0xff] %v10194_v34  ;;  %7141 = vpow2.f32 %v3574_v50 }
 0x65a   : > { %5001 = vst.msk [vmem:[#allocation5 + $0xc0] sm:$0xff] %vm4012_vm1, %v10194_v34  ;;  %7143 = vpow2.f32 %v3576_v36 }
 0x65b   : > { %12353 = vst [vmem:[#allocation148_spill] sm:$0xff] %v10226_v39  ;;  %7145 = vpow2.f32 %v3074_v1 }
 0x65c   : > { %7147 = vpow2.f32 %v3578_v25  ;;  %12360 = vst [vmem:[#allocation155_spill] sm:$0xff] %v10256_v13 }
 0x65d   : > { %v4618_v7 = vpop.f32.mrf.mxu2 }
 0x65e   : > { %2852 = vmax.xlane.f32.xlu0 %v10203_v15  ;;  %v2911_v2 = vpop.xlane.xlu2 %2910  ;;  %v4853_v8 = vadd.f32 %v4618_v7, %v4465_v23  ;;  %v2437_v23 = vpop.f32.mrf.mxu0 }
 0x65f   : > { %v10212_v50 = vmax.f32 %v10205_v14, %v2911_v2  ;;  %v10214_v47 = vpop.eup %7141  ;;  %v10241_v7 = vsel %vm2634_vm0, -1e+09, %v2437_v23  ;;  %v10273_v14 = vld [vmem:[#allocation5 + $0x1c0] sm:$0xff] }
 0x660   : > { %4917 = vst.msk [vmem:[#allocation7 + $0x20] sm:$0xff] %vm1377_vm2, %v4853_v8  ;;  %4620 = vmatmul.f32.gmra.mxu2 %v10214_v47  ;;  %v10232_v38 = vpop.eup %7143  ;;  %v10251_v8 = vld [vmem:[#allocation5 + $0xc8] sm:$0xff] }
 0x661   : > { %12350 = vst [vmem:[#allocation146_spill] sm:$0xff] %v10212_v50  ;;  %v10237_v36 = vpop.eup %7145 }
 0x662   : > { %5034 = vst.msk [vmem:[#allocation5 + $0x1c8] sm:$0xff] %vm4012_vm1, %v10212_v50  ;;  %v10245_v2 = vpop.eup %7147 }
 0x663   : > { %12355 = vst [vmem:[#allocation150_spill] sm:$0xff] %v10237_v36 }
 0x664   : > { %3242 = vperm.xlu2 %7108, %v9745_v12   ;;  %12356 = vst [vmem:[#allocation151_spill] sm:$0xff] %v10241_v7 }
 0x665   : > { %12357 = vst [vmem:[#allocation152_spill] sm:$0xff] %v10245_v2 }
 0x666   : > { %2918 = vmax.xlane.f32.xlu0 %v10223_v24  ;;  %v2881_v18 = vpop.xlane.xlu2 %2880  ;;  %12358 = vst [vmem:[#allocation153_spill] sm:$0xff] %v10251_v8 }
 0x667   : > { %v10230_v35 = vmax.f32 %v10226_v39, %v2881_v18  ;;  %v10271_v39 = vpop.f32.mrf.mxu3  ;;  %12363 = vst [vmem:[#allocation158_spill] sm:$0xff] %v10273_v14 }
 0x668   : > { %4623 = vmatmul.f32.gmra.mxu2 %v10232_v38 }
 0x669   : > { %12354 = vst [vmem:[#allocation149_spill] sm:$0xff] %v10230_v35 }
 0x66a   : > { %5019 = vst.msk [vmem:[#allocation5 + $0x150] sm:$0xff] %vm4012_vm1, %v10230_v35 }
 0x66c   : > { %4198 = vperm.xlu2 %7108, %v10237_v36  }
 0x66e   : > { %2888 = vmax.xlane.f32.xlu0 %v10241_v7 }
 0x66f   : > { %v2276_v54 = vpop.f32.mrf.mxu3 }
 0x670   : > { %3222 = vperm.xlu1 %7107, %v9696_v5   ;;  %4626 = vmatmul.f32.gmra.mxu2 %v10245_v2  ;;  %v10263_v5 = vld [vmem:[#allocation5 + $0x1d0] sm:$0xff] }
 0x671   : > { %12361 = vst [vmem:[#allocation156_spill] sm:$0xff] %v10263_v5 }
 0x67b   : > { %v2847_v10 = vpop.xlane.xlu0 %2846 }
 0x67c   : > { %v10254_v1 = vmax.f32 %v10251_v8, %v2847_v10  ;;  %v10292_v8 = vsel %vm2634_vm0, -1e+09, %v2276_v54 }
 0x67d   : > { %12367 = vst [vmem:[#allocation162_spill] sm:$0xff] %v10292_v8 }
 0x67e   : > { %12359 = vst [vmem:[#allocation154_spill] sm:$0xff] %v10254_v1 }
 0x67f   : > { %5002 = vst.msk [vmem:[#allocation5 + $0xc8] sm:$0xff] %vm4012_vm1, %v10254_v1  ;;  %v2843_v25 = vpop.xlane.xlu1 %2842 }
 0x680   : > { %v10261_v18 = vmax.f32 %v10256_v13, %v2843_v25  ;;  %v10280_v13 = vld [vmem:[#allocation5 + $0x158] sm:$0xff] }
 0x681   : > { %12365 = vst [vmem:[#allocation160_spill] sm:$0xff] %v10280_v13 }
 0x682   : > { %3247 = vperm.xlu0 %7106, %v9757_v48   ;;  %5000 = vst.msk [vmem:[#allocation5 + $0xb8] sm:$0xff] %vm4012_vm1, %v10261_v18 }
 0x683   : > { %v2913_v23 = vpop.xlane.xlu0 %2912 }
 0x684   : > { %v10269_v10 = vmax.f32 %v10263_v5, %v2913_v23 }
 0x686   : > { %12362 = vst [vmem:[#allocation157_spill] sm:$0xff] %v10269_v10 }
 0x687   : > { %5035 = vst.msk [vmem:[#allocation5 + $0x1d0] sm:$0xff] %vm4012_vm1, %v10269_v10  ;;  %v2909_v25 = vpop.xlane.xlu1 %2908 }
 0x688   : > { %v10278_v7 = vmax.f32 %v10273_v14, %v2909_v25  ;;  %v10298_v25 = vsel %vm2630_vm13, -1e+09, %v10135_v63  ;;  %v10301_v14 = vpop.permute.xlu2 %3227  ;;  %v2279_v63 = vpop.f32.mrf.mxu3 }
 0x689   : > { %12368 = vst [vmem:[#allocation163_spill] sm:$0xff] %v10298_v25  ;;  %v10321_v37 = vsel %vm2635_vm3, -1e+09, %v2279_v63 }
 0x68a   : > { %12364 = vst [vmem:[#allocation159_spill] sm:$0xff] %v10278_v7  ;;  %3262 = vperm.xlu0 %7106, %v9810_v40  }
 0x68b   : > { %5033 = vst.msk [vmem:[#allocation5 + $0x1c0] sm:$0xff] %vm4012_vm1, %v10278_v7  ;;  %v2883_v23 = vpop.xlane.xlu0 %2882 }
 0x68c   : > { %v10286_v5 = vmax.f32 %v10280_v13, %v2883_v23  ;;  %v10306_v23 = vsel %vm2631_vm14, -1e+09, %v10151_v57  ;;  %v2997_v13 = vsub.f32 %v9705_v6, %v9708_v28  ;;  %12372 = vst [vmem:[#allocation167_spill] sm:$0xff] %v10321_v37  ;;  %v10326_v28 = vld [vmem:[#allocation5 + $0x1e0] sm:$0xff] }
 0x68d   : > { %12369 = vst [vmem:[#allocation164_spill] sm:$0xff] %v10306_v23 }
 0x68e   : > { %12366 = vst [vmem:[#allocation161_spill] sm:$0xff] %v10286_v5 }
 0x68f   : > { %5020 = vst.msk [vmem:[#allocation5 + $0x158] sm:$0xff] %vm4012_vm1, %v10286_v5 }
 0x690   : > { %v10309_v54 = vpop.permute.xlu2 %4183  ;;  %12373 = vst [vmem:[#allocation168_spill] sm:$0xff] %v10326_v28 }
 0x695   : > { %2856 = vmax.xlane.f32.xlu2 %v10292_v8 }
 0x69a   : > { %2848 = vmax.xlane.f32.xlu1 %v10298_v25  ;;  %v3070_v25 = vmul.f32 1.442695, %v2997_v13  ;;  %v10336_v13 = vld [vmem:[#allocation5 + $0x168] sm:$0xff] }
 0x69b   : > { %12376 = vst [vmem:[#allocation171_spill] sm:$0xff] %v10336_v13 }
 0x69c   : > { %7149 = vpow2.f32 %v3070_v25 }
 0x69e   : > { %v3233_v63 = vpop.permute.xlu0 %3232 }
 0x69f   : > { %v4174_v25 = vpop.permute.xlu1 %4173 }
 0x6a2   : > { %2914 = vmax.xlane.f32.xlu1 %v10306_v23  ;;  %v10348_v23 = vld [vmem:[#allocation5 + $0x148] sm:$0xff] }
 0x6a3   : > { %12378 = vst [vmem:[#allocation173_spill] sm:$0xff] %v10348_v23 }
 0x6ad   : > { %3422 = vperm.xlu2 %7108, %v9807_v20  }
 0x6af   : > { %v2851_v24 = vpop.xlane.xlu2 %2850 }
 0x6b0   : > { %v10317_v15 = vmax.f32 %v10314_v30, %v2851_v24  ;;  %v10333_v24 = vpop.eup %7149 }
 0x6b1   : > { %12375 = vst [vmem:[#allocation170_spill] sm:$0xff] %v10333_v24 }
 0x6b2   : > { %12371 = vst [vmem:[#allocation166_spill] sm:$0xff] %v10317_v15 }
 0x6b3   : > { %5004 = vst.msk [vmem:[#allocation5 + $0xd8] sm:$0xff] %vm4012_vm1, %v10317_v15 }
 0x6b4   : > { %2858 = vmax.xlane.f32.xlu0 %v10321_v37 }
 0x6b7   : > { %v2917_v6 = vpop.xlane.xlu2 %2916 }
 0x6b8   : > { %v10329_v57 = vmax.f32 %v10326_v28, %v2917_v6  ;;  %v10343_v6 = vpop.f32.mrf.mxu1  ;;  %v10346_v28 = vpop.permute.xlu0 %4193 }
 0x6ba   : > { %12374 = vst [vmem:[#allocation169_spill] sm:$0xff] %v10329_v57 }
 0x6bb   : > { %5037 = vst.msk [vmem:[#allocation5 + $0x1e0] sm:$0xff] %vm4012_vm1, %v10329_v57  ;;  %4188 = vperm.xlu1 %7107, %v10333_v24  }
 0x6bf   : > { %v2887_v30 = vpop.xlane.xlu2 %2886 }
 0x6c0   : > { %v10339_v37 = vmax.f32 %v10336_v13, %v2887_v30  ;;  %v10355_v30 = vld [vmem:[#allocation5 + $0xe0] sm:$0xff]  ;;  %v2601_v13 = vpop.f32.mrf.mxu1 }
 0x6c1   : > { %12380 = vst [vmem:[#allocation175_spill] sm:$0xff] %v10355_v30 }
 0x6c2   : > { %12377 = vst [vmem:[#allocation172_spill] sm:$0xff] %v10339_v37 }
 0x6c3   : > { %5022 = vst.msk [vmem:[#allocation5 + $0x168] sm:$0xff] %vm4012_vm1, %v10339_v37 }
 0x6c8   : > { %3427 = vperm.xlu0 %7106, %v9828_v26   ;;  %v10363_v26 = vsel %vm2635_vm3, -1e+09, %v2601_v13  ;;  %v4082_v13 = vld [vmem:[#allocation7 + $0x28] sm:$0xff] }
 0x6c9   : > { %12382 = vst [vmem:[#allocation177_spill] sm:$0xff] %v10363_v26 }
 0x6ca   : > { %v2879_v40 = vpop.xlane.xlu1 %2878 }
 0x6cb   : > { %v10351_v48 = vmax.f32 %v10348_v23, %v2879_v40  ;;  %v1879_v40 = vld [vmem:[#allocation2 + $0x178] sm:$0xff]  ;;  %v10369_v23 = vld [vmem:[#allocation5 + $0x1e8] sm:$0xff] }
 0x6cc   : > { %6724 = vmatmul.msk.f32.gmra.mxu0 %vm1377_vm2, %v1879_v40  ;;  %12383 = vst [vmem:[#allocation178_spill] sm:$0xff] %v10369_v23  ;;  %v10385_v40 = vsel %vm2632_vm15, -1e+09, %v10166_v4 }
 0x6cd   : > { %12379 = vst [vmem:[#allocation174_spill] sm:$0xff] %v10351_v48 }
 0x6ce   : > { %5018 = vst.msk [vmem:[#allocation5 + $0x148] sm:$0xff] %vm4012_vm1, %v10351_v48 }
 0x6cf   : > { %12387 = vst [vmem:[#allocation182_spill] sm:$0xff] %v10385_v40 }
 0x6d0   : > { %3352 = vperm.xlu0 %7106, %v9927_v55  }
 0x6d1   : > { %v2853_v8 = vpop.xlane.xlu0 %2852 }
 0x6d2   : > { %v10359_v20 = vmax.f32 %v10355_v30, %v2853_v8  ;;  %v10376_v8 = vld [vmem:[#allocation5 + $0x170] sm:$0xff] }
 0x6d3   : > { %12385 = vst [vmem:[#allocation180_spill] sm:$0xff] %v10376_v8 }
 0x6d4   : > { %12381 = vst [vmem:[#allocation176_spill] sm:$0xff] %v10359_v20 }
 0x6d5   : > { %5005 = vst.msk [vmem:[#allocation5 + $0xe0] sm:$0xff] %vm4012_vm1, %v10359_v20 }
 0x6d6   : > { %2922 = vmax.xlane.f32.xlu2 %v10363_v26  ;;  %v4466_v26 = vmul.f32 %v10183_v21, %v4082_v13  ;;  %v3509_v21 = vsub.f32 %v9521_v27, %v10301_v14 }
 0x6d8   : > { %v3582_v4 = vmul.f32 1.442695, %v3509_v21 }
 0x6d9   : > { %v2919_v55 = vpop.xlane.xlu0 %2918 }
 0x6da   : > { %v10372_v43 = vmax.f32 %v10369_v23, %v2919_v55 }
 0x6dc   : > { %12384 = vst [vmem:[#allocation179_spill] sm:$0xff] %v10372_v43 }
 0x6dd   : > { %5038 = vst.msk [vmem:[#allocation5 + $0x1e8] sm:$0xff] %vm4012_vm1, %v10372_v43 }
 0x6e1   : > { %v2889_v30 = vpop.xlane.xlu0 %2888 }
 0x6e2   : > { %v10379_v36 = vmax.f32 %v10376_v8, %v2889_v30  ;;  %v3223_v12 = vpop.permute.xlu1 %3222  ;;  %v4083_v30 = vld [vmem:[#allocation7 + $0x30] sm:$0xff] }
 0x6e3   : > { %v3508_v55 = vsub.f32 %v9512_v42, %v3223_v12  ;;  %v4621_v23 = vpop.f32.mrf.mxu2  ;;  %v4467_v41 = vmul.f32 %v4174_v25, %v4083_v30  ;;  %v3510_v12 = vsub.f32 %v9530_v33, %v3233_v63  ;;  %v10420_v30 = vld [vmem:[#allocation5 + $0xf0] sm:$0xff] }
 0x6e4   : > { %12386 = vst [vmem:[#allocation181_spill] sm:$0xff] %v10379_v36  ;;  %v4854_v2 = vadd.f32 %v4621_v23, %v4466_v26  ;;  %v4084_v26 = vld [vmem:[#allocation7 + $0x38] sm:$0xff] }
 0x6e5   : > { %5023 = vst.msk [vmem:[#allocation5 + $0x170] sm:$0xff] %vm4012_vm1, %v10379_v36  ;;  %v3580_v24 = vmul.f32 1.442695, %v3508_v55  ;;  %2884 = vmax.xlane.f32.xlu1 %v10385_v40  ;;  %v4468_v27 = vmul.f32 %v10249_v9, %v4084_v26  ;;  %v3584_v14 = vmul.f32 1.442695, %v3510_v12  ;;  %v10405_v55 = vpop.permute.xlu2 %3242 }
 0x6e6   : > { %4918 = vst.msk [vmem:[#allocation7 + $0x28] sm:$0xff] %vm1377_vm2, %v4854_v2 }
 0x6e7   : > { %7151 = vpow2.f32 %v3580_v24  ;;  %12388 = vst [vmem:[#allocation183_spill] sm:$0xff] %v10420_v30 }
 0x6e8   : > { %7153 = vpow2.f32 %v3582_v4 }
 0x6e9   : > { %7155 = vpow2.f32 %v3584_v14  ;;  %v10440_v14 = vld [vmem:[#allocation5 + $0x1d8] sm:$0xff] }
 0x6ea   : > { %12392 = vst [vmem:[#allocation187_spill] sm:$0xff] %v10440_v14 }
 0x6eb   : > { %v4624_v13 = vpop.f32.mrf.mxu2 }
 0x6ec   : > { %v4855_v8 = vadd.f32 %v4624_v13, %v4467_v41 }
 0x6ed   : > { %v10394_v42 = vpop.eup %7151  ;;  %v10417_v21 = vpop.permute.xlu2 %4198 }
 0x6ee   : > { %3347 = vperm.xlu2 %7108, %v9825_v3   ;;  %4919 = vst.msk [vmem:[#allocation7 + $0x30] sm:$0xff] %vm1377_vm2, %v4855_v8  ;;  %4629 = vmatmul.f32.gmra.mxu2 %v10394_v42  ;;  %v10403_v25 = vpop.eup %7153 }
 0x6ef   : > { %v10412_v63 = vpop.eup %7155 }
 0x6f3   : > { %v4627_v2 = vpop.f32.mrf.mxu2 }
 0x6f4   : > { %v10401_v23 = vpop.permute.xlu0 %3247  ;;  %v4856_v24 = vadd.f32 %v4627_v2, %v4468_v27 }
 0x6f6   : > { %3257 = vperm.xlu2 %7108, %v9846_v61   ;;  %4920 = vst.msk [vmem:[#allocation7 + $0x38] sm:$0xff] %vm1377_vm2, %v4856_v24  ;;  %4632 = vmatmul.f32.gmra.mxu2 %v10403_v25 }
 0x6fa   : > { %3820 = vadd.xlane.f32.xlu0 %v9879_v11 }
 0x6fc   : > { %v3263_v33 = vpop.permute.xlu0 %3262 }
 0x6fd   : > { %v3516_v9 = vsub.f32 %v9611_v53, %v3263_v33 }
 0x6fe   : > { %3272 = vperm.xlu2 %7108, %v9858_v49   ;;  %3237 = vperm.xlu1 %7107, %v9730_v51   ;;  %v10430_v51 = vld [vmem:[#allocation5 + $0xd0] sm:$0xff] }
 0x6ff   : > { %v3596_v8 = vmul.f32 1.442695, %v3516_v9  ;;  %4635 = vmatmul.f32.gmra.mxu2 %v10412_v63  ;;  %12391 = vst [vmem:[#allocation186_spill] sm:$0xff] %v10430_v51  ;;  %v10457_v9 = vsel %vm12394_vm6, -1e+09, %v10271_v39 }
 0x700   : > { %12395 = vst [vmem:[#allocation189_spill] sm:$0xff] %v10457_v9 }
 0x701   : > { %7157 = vpow2.f32 %v3596_v8 }
 0x706   : > { %3437 = vperm.xlu2 %7108, %v9872_v22  }
 0x707   : > { %v10422_v11 = vpop.eup %7157 }
 0x708   : > { %12389 = vst [vmem:[#allocation184_spill] sm:$0xff] %v10422_v11  ;;  %4670 = vmatmul.f32.vlgmr.msra.gmra.mxu3 %v10422_v11  ;;  %v2857_v53 = vpop.xlane.xlu2 %2856 }
 0x709   : > { %v10426_v41 = vmax.f32 %v10420_v30, %v2857_v53 }
 0x70b   : > { %12390 = vst [vmem:[#allocation185_spill] sm:$0xff] %v10426_v41 }
 0x70c   : > { %5007 = vst.msk [vmem:[#allocation5 + $0xf0] sm:$0xff] %vm4012_vm1, %v10426_v41 }
 0x70d   : > { %v2849_v4 = vpop.xlane.xlu1 %2848 }
 0x70e   : > { %3277 = vperm.xlu0 %7106, %v9938_v17   ;;  %3362 = vperm.xlu2 %7108, %v9983_v52   ;;  %v10435_v13 = vmax.f32 %v10430_v51, %v2849_v4  ;;  %v10468_v4 = vsel %vm2634_vm0, -1e+09, %v10343_v6 }
 0x70f   : > { %12397 = vst [vmem:[#allocation191_spill] sm:$0xff] %v10468_v4 }
 0x710   : > { %v3423_v26 = vpop.permute.xlu2 %3422  ;;  %5003 = vst.msk [vmem:[#allocation5 + $0xd0] sm:$0xff] %vm4012_vm1, %v10435_v13 }
 0x711   : > { %v3548_v12 = vsub.f32 %v9607_v19, %v3423_v26  ;;  %v10452_v19 = vld [vmem:[#allocation5 + $0xf8] sm:$0xff] }
 0x712   : > { %12393 = vst [vmem:[#allocation188_spill] sm:$0xff] %v10452_v19 }
 0x713   : > { %v3660_v27 = vmul.f32 1.442695, %v3548_v12 }
 0x715   : > { %7159 = vpow2.f32 %v3660_v27  ;;  %v2915_v2 = vpop.xlane.xlu1 %2914  ;;  %v10476_v27 = vld [vmem:[#allocation5 + $0x1f8] sm:$0xff] }
 0x716   : > { %3442 = vperm.xlu0 %7106, %v9949_v31   ;;  %v10444_v24 = vmax.f32 %v10440_v14, %v2915_v2  ;;  %12399 = vst [vmem:[#allocation193_spill] sm:$0xff] %v10476_v27  ;;  %v4085_v31 = vld [vmem:[#allocation7 + $0x40] sm:$0xff] }
 0x718   : > { %5036 = vst.msk [vmem:[#allocation5 + $0x1d8] sm:$0xff] %vm4012_vm1, %v10444_v24 }
 0x71b   : > { %v10448_v33 = vpop.eup %7159 }
 0x71c   : > { %4800 = vmatmul.f32.vlgmr.msra.gmra.mxu1 %v10448_v33 }
 0x71e   : > { %3367 = vperm.xlu0 %7106, %v10033_v59  }
 0x727   : > { %v2859_v8 = vpop.xlane.xlu0 %2858 }
 0x728   : > { %v10460_v53 = vmax.f32 %v10452_v19, %v2859_v8  ;;  %2854 = vmax.xlane.f32.xlu1 %v10457_v9  ;;  %v12417_v19 = vld [vmem:[#allocation95_spill] sm:$0xff] }
 0x72a   : > { %12396 = vst [vmem:[#allocation190_spill] sm:$0xff] %v10460_v53 }
 0x72b   : > { %5008 = vst.msk [vmem:[#allocation5 + $0xf8] sm:$0xff] %vm4012_vm1, %v10460_v53 }
 0x730   : > { %2920 = vmax.xlane.f32.xlu1 %v10468_v4  ;;  %v4469_v4 = vmul.f32 %v10309_v54, %v4085_v31 }
 0x737   : > { %3824 = vadd.xlane.f32.xlu2 %v9908_v29  ;;  %v10487_v29 = vld [vmem:[#allocation5 + $0x160] sm:$0xff] }
 0x738   : > { %12401 = vst [vmem:[#allocation195_spill] sm:$0xff] %v10487_v29 }
 0x73a   : > { %v3428_v45 = vpop.permute.xlu0 %3427 }
 0x73b   : > { %v3549_v39 = vsub.f32 %v9633_v46, %v3428_v45  ;;  %v4189_v46 = vpop.permute.xlu1 %4188 }
 0x73d   : > { %v3662_v26 = vmul.f32 1.442695, %v3549_v39  ;;  %v3692_v39 = vld [vmem:[#allocation6] sm:$0xff] }
 0x73f   : > { %7161 = vpow2.f32 %v3662_v26  ;;  %v12403_v26 = vld [vmem:[#allocation135_spill] sm:$0xff] }
 0x742   : > { %v10497_v45 = vpop.permute.xlu0 %3352 }
 0x745   : > { %v10473_v12 = vpop.eup %7161 }
 0x746   : > { %12398 = vst [vmem:[#allocation192_spill] sm:$0xff] %v10473_v12  ;;  %4803 = vmatmul.f32.gmra.mxu1 %v10473_v12 }
 0x748   : > { %3826 = vadd.xlane.f32.xlu0 %v10004_v16  ;;  %v12402_v16 = vld [vmem:[#allocation132_spill] sm:$0xff] }
 0x749   : > { %v2923_v60 = vpop.xlane.xlu2 %2922  ;;  %3342 = vperm.xlu1 %7107, %v9776_v0  }
 0x74a   : > { %v10481_v6 = vmax.f32 %v10476_v27, %v2923_v60  ;;  %v12404_v60 = vld [vmem:[#allocation56_spill] sm:$0xff] }
 0x74b   : > { %v3756_v14 = vmul.f32 %v12404_v60, %v3692_v39  ;;  %v4086_v39 = vld [vmem:[#allocation7 + $0x48] sm:$0xff] }
 0x74c   : > { %12400 = vst [vmem:[#allocation194_spill] sm:$0xff] %v10481_v6  ;;  %v4470_v31 = vmul.f32 %v4189_v46, %v4086_v39 }
 0x74d   : > { %5040 = vst.msk [vmem:[#allocation5 + $0x1f8] sm:$0xff] %vm4012_vm1, %v10481_v6 }
 0x74f   : > { %3287 = vperm.xlu2 %7108, %v10063_v62  }
 0x751   : > { %v3348_v60 = vpop.permute.xlu2 %3347 }
 0x757   : > { %3452 = vperm.xlu2 %7108, %v10077_v44  }
 0x758   : > { %v2885_v2 = vpop.xlane.xlu1 %2884 }
 0x759   : > { %v10490_v8 = vmax.f32 %v10487_v29, %v2885_v2  ;;  %v2440_v29 = vpop.f32.mrf.mxu0 }
 0x75a   : > { %v10505_v27 = vsel %vm2635_vm3, -1e+09, %v2440_v29 }
 0x75b   : > { %5021 = vst.msk [vmem:[#allocation5 + $0x160] sm:$0xff] %vm4012_vm1, %v10490_v8 }
 0x75c   : > { %3292 = vperm.xlu0 %7106, %v10128_v58   ;;  %12405 = vst [vmem:[#allocation56_spill] sm:$0xff] %v10505_v27 }
 0x75f   : > { %3377 = vperm.xlu2 %7108, %v10097_v32  }
 0x764   : > { %3457 = vperm.xlu0 %7106, %v12402_v16   ;;  %v12406_v16 = vld [vmem:[#allocation45_spill] sm:$0xff] }
 0x76c   : > { %3382 = vperm.xlu0 %7106, %v12403_v26  }
 0x76d   : > { %v3821_v51 = vpop.xlane.xlu0 %3820 }
 0x76e   : > { %v3948_v2 = vadd.f32 %v3821_v51, %v3756_v14  ;;  %v12407_v51 = vld [vmem:[#allocation46_spill] sm:$0xff] }
 0x76f   : > { %v3512_v14 = vsub.f32 %v12407_v51, %v10405_v55 }
 0x770   : > { %4013 = vst.msk [vmem:[#allocation6] sm:$0xff] %vm4012_vm1, %v3948_v2  ;;  %v3238_v9 = vpop.permute.xlu1 %3237 }
 0x771   : > { %v3511_v30 = vsub.f32 %v12406_v16, %v3238_v9  ;;  %v4630_v59 = vpop.f32.mrf.mxu2  ;;  %v3588_v54 = vmul.f32 1.442695, %v3512_v14  ;;  %v12410_v14 = vld [vmem:[#allocation68_spill] sm:$0xff] }
 0x772   : > { %v4857_v12 = vadd.f32 %v4630_v59, %v4469_v4  ;;  %v4087_v59 = vld [vmem:[#allocation7 + $0x50] sm:$0xff] }
 0x773   : > { %v3586_v26 = vmul.f32 1.442695, %v3511_v30  ;;  %2890 = vmax.xlane.f32.xlu1 %v10505_v27  ;;  %v12408_v30 = vld [vmem:[#allocation47_spill] sm:$0xff]  ;;  %v4471_v55 = vmul.f32 %v10346_v28, %v4087_v59 }
 0x774   : > { %4921 = vst.msk [vmem:[#allocation7 + $0x40] sm:$0xff] %vm1377_vm2, %v4857_v12  ;;  %v3513_v9 = vsub.f32 %v12408_v30, %v10401_v23  ;;  %v12411_v23 = vld [vmem:[#allocation79_spill] sm:$0xff] }
 0x775   : > { %7163 = vpow2.f32 %v3586_v26  ;;  %v10521_v26 = vpop.permute.xlu2 %3257 }
 0x776   : > { %7165 = vpow2.f32 %v3588_v54  ;;  %v3590_v4 = vmul.f32 1.442695, %v3513_v9  ;;  %v12415_v9 = vld [vmem:[#allocation101_spill] sm:$0xff] }
 0x778   : > { %7167 = vpow2.f32 %v3590_v4  ;;  %v3694_v4 = vld [vmem:[#allocation6 + $0x10] sm:$0xff] }
 0x779   : > { %v4633_v56 = vpop.f32.mrf.mxu2 }
 0x77a   : > { %v4858_v29 = vadd.f32 %v4633_v56, %v4470_v31  ;;  %v10536_v31 = vld [vmem:[#allocation5 + $0xe8] sm:$0xff] }
 0x77b   : > { %v10512_v2 = vpop.eup %7163  ;;  %12412 = vst [vmem:[#allocation46_spill] sm:$0xff] %v10536_v31  ;;  %v12413_v56 = vld [vmem:[#allocation82_spill] sm:$0xff] }
 0x77c   : > { %4922 = vst.msk [vmem:[#allocation7 + $0x48] sm:$0xff] %vm1377_vm2, %v4858_v29  ;;  %4638 = vmatmul.f32.gmra.mxu2 %v10512_v2  ;;  %v10519_v16 = vpop.eup %7165 }
 0x77d   : > { %v10530_v28 = vpop.permute.xlu2 %3272 }
 0x77e   : > { %v10526_v51 = vpop.eup %7167 }
 0x77f   : > { %12409 = vst [vmem:[#allocation45_spill] sm:$0xff] %v10526_v51 }
 0x780   : > { %v10542_v29 = vpop.permute.xlu0 %3277 }
 0x782   : > { %v4636_v12 = vpop.f32.mrf.mxu2 }
 0x783   : > { %v4859_v46 = vadd.f32 %v4636_v12, %v4471_v55 }
 0x784   : > { %4641 = vmatmul.f32.gmra.mxu2 %v10519_v16 }
 0x785   : > { %4923 = vst.msk [vmem:[#allocation7 + $0x50] sm:$0xff] %vm1377_vm2, %v4859_v46  ;;  %v10534_v39 = vpop.permute.xlu2 %3437  ;;  %v12416_v46 = vld [vmem:[#allocation70_spill] sm:$0xff] }
 0x788   : > { %3830 = vadd.xlane.f32.xlu2 %v10214_v47  ;;  %v10558_v12 = vpop.permute.xlu0 %3442 }
 0x78c   : > { %3252 = vperm.xlu1 %7107, %v12410_v14   ;;  %4644 = vmatmul.f32.gmra.mxu2 %v10526_v51 }
 0x78d   : > { %v10547_v59 = vpop.permute.xlu2 %3362 }
 0x794   : > { %3267 = vperm.xlu1 %7107, %v12411_v23  }
 0x796   : > { %3832 = vadd.xlane.f32.xlu0 %v10232_v38  ;;  %v10549_v38 = vld [vmem:[#allocation5 + $0x1f0] sm:$0xff] }
 0x797   : > { %12414 = vst [vmem:[#allocation47_spill] sm:$0xff] %v10549_v38 }
 0x79b   : > { %v2855_v54 = vpop.xlane.xlu1 %2854 }
 0x79c   : > { %3432 = vperm.xlu1 %7107, %v12413_v56   ;;  %v10540_v47 = vmax.f32 %v10536_v31, %v2855_v54  ;;  %v3758_v54 = vmul.f32 %v12416_v46, %v3694_v4  ;;  %v12418_v46 = vld [vmem:[#allocation48_spill] sm:$0xff] }
 0x79e   : > { %5006 = vst.msk [vmem:[#allocation5 + $0xe8] sm:$0xff] %vm4012_vm1, %v10540_v47 }
 0x7a0   : > { %3302 = vperm.xlu2 %7108, %v10194_v34  }
 0x7a3   : > { %v2921_v30 = vpop.xlane.xlu1 %2920 }
 0x7a4   : > { %3357 = vperm.xlu1 %7107, %v12415_v9   ;;  %v10553_v55 = vmax.f32 %v10549_v38, %v2921_v30  ;;  %v10565_v30 = vpop.permute.xlu0 %3367  ;;  %v3695_v38 = vld [vmem:[#allocation6 + $0x18] sm:$0xff] }
 0x7a5   : > { %v3759_v11 = vmul.f32 %v12417_v19, %v3695_v38 }
 0x7a6   : > { %5039 = vst.msk [vmem:[#allocation5 + $0x1f0] sm:$0xff] %vm4012_vm1, %v10553_v55 }
 0x7a8   : > { %3467 = vperm.xlu2 %7108, %v10212_v50  }
 0x7aa   : > { %3307 = vperm.xlu0 %7106, %v10254_v1   ;;  %v3825_v31 = vpop.xlane.xlu2 %3824 }
 0x7ab   : > { %v3950_v27 = vadd.f32 %v3825_v31, %v3758_v54 }
 0x7ad   : > { %4015 = vst.msk [vmem:[#allocation6 + $0x10] sm:$0xff] %vm4012_vm1, %v3950_v27  ;;  %v12419_v27 = vld [vmem:[#allocation50_spill] sm:$0xff] }
 0x7ae   : > { %v3533_v54 = vsub.f32 %v12419_v27, %v3348_v60  ;;  %v12427_v27 = vld [vmem:[#allocation103_spill] sm:$0xff] }
 0x7b0   : > { %3392 = vperm.xlu2 %7108, %v10230_v35   ;;  %v3630_v35 = vmul.f32 1.442695, %v3533_v54 }
 0x7b2   : > { %3472 = vperm.xlu0 %7106, %v10269_v10   ;;  %v10585_v60 = vpop.permute.xlu2 %3287 }
 0x7ba   : > { %3397 = vperm.xlu0 %7106, %v10286_v5   ;;  %v12420_v5 = vld [vmem:[#allocation59_spill] sm:$0xff] }
 0x7bb   : > { %v3827_v50 = vpop.xlane.xlu0 %3826  ;;  %v3343_v4 = vpop.permute.xlu1 %3342  ;;  %v3534_v1 = vsub.f32 %v12420_v5, %v10497_v45  ;;  %v10588_v5 = vld [vmem:[#allocation5 + $0x178] sm:$0xff] }
 0x7bc   : > { %v3951_v51 = vadd.f32 %v3827_v50, %v3759_v11  ;;  %v3532_v34 = vsub.f32 %v12418_v46, %v3343_v4  ;;  %v12421_v11 = vld [vmem:[#allocation89_spill] sm:$0xff]  ;;  %12423 = vst [vmem:[#allocation79_spill] sm:$0xff] %v10588_v5  ;;  %v3697_v46 = vld [vmem:[#allocation6 + $0x28] sm:$0xff] }
 0x7bd   : > { %v3632_v19 = vmul.f32 1.442695, %v3534_v1  ;;  %v12424_v1 = vld [vmem:[#allocation115_spill] sm:$0xff]  ;;  %v3761_v54 = vmul.f32 %v12427_v27, %v3697_v46  ;;  %v12429_v46 = vld [vmem:[#allocation52_spill] sm:$0xff] }
 0x7be   : > { %4016 = vst.msk [vmem:[#allocation6 + $0x18] sm:$0xff] %vm4012_vm1, %v3951_v51  ;;  %v3628_v31 = vmul.f32 1.442695, %v3532_v34  ;;  %v10594_v51 = vpop.permute.xlu2 %3452  ;;  %v3515_v27 = vsub.f32 %v12429_v46, %v10521_v26  ;;  %v12432_v26 = vld [vmem:[#allocation54_spill] sm:$0xff] }
 0x7bf   : > { %v3518_v46 = vsub.f32 %v12432_v26, %v10530_v28  ;;  %v12435_v28 = vld [vmem:[#allocation55_spill] sm:$0xff] }
 0x7c0   : > { %7169 = vpow2.f32 %v3628_v31  ;;  %v12426_v31 = vld [vmem:[#allocation138_spill] sm:$0xff] }
 0x7c1   : > { %7171 = vpow2.f32 %v3630_v35 }
 0x7c2   : > { %7173 = vpow2.f32 %v3632_v19 }
 0x7c6   : > { %v10572_v10 = vpop.eup %7169 }
 0x7c7   : > { %4735 = vmatmul.f32.vlgmr.msra.gmra.mxu0 %v10572_v10  ;;  %v10577_v50 = vpop.eup %7171 }
 0x7c8   : > { %v10581_v34 = vpop.eup %7173 }
 0x7c9   : > { %12422 = vst [vmem:[#allocation68_spill] sm:$0xff] %v10581_v34 }
 0x7ce   : > { %3822 = vadd.xlane.f32.xlu1 %v12421_v11  ;;  %v10598_v38 = vpop.permute.xlu0 %3292  ;;  %v4088_v11 = vld [vmem:[#allocation7 + $0x58] sm:$0xff] }
 0x7cf   : > { %4738 = vmatmul.f32.gmra.mxu0 %v10577_v50 }
 0x7d6   : > { %v10604_v4 = vpop.permute.xlu0 %3457 }
 0x7d7   : > { %4741 = vmatmul.f32.gmra.mxu0 %v10581_v34 }
 0x7d9   : > { %3836 = vadd.xlane.f32.xlu2 %v10394_v42  ;;  %v12425_v42 = vld [vmem:[#allocation117_spill] sm:$0xff] }
 0x7de   : > { %v10614_v58 = vpop.permute.xlu0 %3382 }
 0x7e4   : > { %3838 = vadd.xlane.f32.xlu0 %v10403_v25  ;;  %v10602_v25 = vpop.permute.xlu2 %3377 }
 0x7e6   : > { %v2891_v35 = vpop.xlane.xlu1 %2890 }
 0x7e7   : > { %3282 = vperm.xlu1 %7107, %v12424_v1   ;;  %v10592_v45 = vmax.f32 %v10588_v5, %v2891_v35  ;;  %v4472_v5 = vmul.f32 %v10417_v21, %v4088_v11  ;;  %v3594_v21 = vmul.f32 1.442695, %v3515_v27  ;;  %v12430_v11 = vld [vmem:[#allocation51_spill] sm:$0xff]  ;;  %v12433_v27 = vld [vmem:[#allocation53_spill] sm:$0xff] }
 0x7e9   : > { %5024 = vst.msk [vmem:[#allocation5 + $0x178] sm:$0xff] %vm4012_vm1, %v10592_v45 }
 0x7ef   : > { %3447 = vperm.xlu1 %7107, %v12425_v42  }
 0x7f1   : > { %3317 = vperm.xlu2 %7108, %v10317_v15   ;;  %v12428_v15 = vld [vmem:[#allocation49_spill] sm:$0xff] }
 0x7f7   : > { %3372 = vperm.xlu1 %7107, %v12426_v31  }
 0x7f8   : > { %3322 = vperm.xlu0 %7106, %v10359_v20  }
 0x7f9   : > { %3482 = vperm.xlu2 %7108, %v10329_v57  }
 0x7fb   : > { %v3831_v19 = vpop.xlane.xlu2 %3830 }
 0x7fc   : > { %v3953_v35 = vadd.f32 %v3831_v19, %v3761_v54  ;;  %v3698_v54 = vld [vmem:[#allocation6 + $0x30] sm:$0xff] }
 0x7fe   : > { %4018 = vst.msk [vmem:[#allocation6 + $0x28] sm:$0xff] %vm4012_vm1, %v3953_v35  ;;  %v3253_v34 = vpop.permute.xlu1 %3252 }
 0x7ff   : > { %v3514_v40 = vsub.f32 %v12428_v15, %v3253_v34  ;;  %v4639_v32 = vpop.f32.mrf.mxu2  ;;  %v12431_v34 = vld [vmem:[#allocation131_spill] sm:$0xff] }
 0x800   : > { %3487 = vperm.xlu0 %7106, %v10372_v43   ;;  %v4860_v20 = vadd.f32 %v4639_v32, %v4472_v5  ;;  %v3762_v35 = vmul.f32 %v12431_v34, %v3698_v54 }
 0x801   : > { %3407 = vperm.xlu2 %7108, %v10339_v37   ;;  %v3592_v57 = vmul.f32 1.442695, %v3514_v40  ;;  %v12447_v37 = vld [vmem:[#allocation86_spill] sm:$0xff] }
 0x802   : > { %4924 = vst.msk [vmem:[#allocation7 + $0x58] sm:$0xff] %vm1377_vm2, %v4860_v20  ;;  %v3600_v20 = vmul.f32 1.442695, %v3518_v46 }
 0x803   : > { %7175 = vpow2.f32 %v3592_v57 }
 0x804   : > { %7177 = vpow2.f32 %v3594_v21 }
 0x806   : > { %v3268_v19 = vpop.permute.xlu1 %3267 }
 0x807   : > { %v3517_v15 = vsub.f32 %v12430_v11, %v3268_v19 }
 0x808   : > { %3412 = vperm.xlu0 %7106, %v10379_v36   ;;  %v12446_v36 = vld [vmem:[#allocation170_spill] sm:$0xff] }
 0x809   : > { %v3833_v43 = vpop.xlane.xlu0 %3832  ;;  %v10623_v32 = vpop.eup %7175  ;;  %v3598_v5 = vmul.f32 1.442695, %v3517_v15  ;;  %v3551_v15 = vsub.f32 %v12435_v28, %v10534_v39  ;;  %v12438_v39 = vld [vmem:[#allocation64_spill] sm:$0xff] }
 0x80a   : > { %v3954_v40 = vadd.f32 %v3833_v43, %v3762_v35  ;;  %4647 = vmatmul.f32.gmra.mxu2 %v10623_v32  ;;  %v10630_v11 = vpop.eup %7177  ;;  %v12434_v43 = vld [vmem:[#allocation62_spill] sm:$0xff] }
 0x80b   : > { %7179 = vpow2.f32 %v3598_v5  ;;  %v3519_v21 = vsub.f32 %v12434_v43, %v10542_v29  ;;  %v12437_v29 = vld [vmem:[#allocation69_spill] sm:$0xff] }
 0x80c   : > { %4019 = vst.msk [vmem:[#allocation6 + $0x30] sm:$0xff] %vm4012_vm1, %v3954_v40  ;;  %7181 = vpow2.f32 %v3600_v20  ;;  %v12436_v40 = vld [vmem:[#allocation65_spill] sm:$0xff] }
 0x80d   : > { %v3602_v35 = vmul.f32 1.442695, %v3519_v21 }
 0x80e   : > { %v3433_v57 = vpop.permute.xlu1 %3432 }
 0x80f   : > { %v3550_v19 = vsub.f32 %v12433_v27, %v3433_v57  ;;  %v3666_v57 = vmul.f32 1.442695, %v3551_v15 }
 0x811   : > { %v10632_v54 = vpop.eup %7179  ;;  %v3664_v34 = vmul.f32 1.442695, %v3550_v19  ;;  %v3536_v19 = vsub.f32 %v12437_v29, %v10547_v59  ;;  %v12441_v59 = vld [vmem:[#allocation85_spill] sm:$0xff] }
 0x812   : > { %4650 = vmatmul.f32.gmra.mxu2 %v10630_v11  ;;  %4673 = vmatmul.f32.gmra.mxu3 %v10632_v54  ;;  %v10641_v46 = vpop.eup %7181 }
 0x813   : > { %7183 = vpow2.f32 %v3664_v34  ;;  %v3552_v34 = vsub.f32 %v12438_v39, %v10558_v12  ;;  %v3636_v43 = vmul.f32 1.442695, %v3536_v19  ;;  %v12444_v39 = vld [vmem:[#allocation57_spill] sm:$0xff] }
 0x814   : > { %7185 = vpow2.f32 %v3602_v35 }
 0x815   : > { %v3668_v28 = vmul.f32 1.442695, %v3552_v34 }
 0x816   : > { %v3358_v5 = vpop.permute.xlu1 %3357 }
 0x817   : > { %v3535_v26 = vsub.f32 %v12436_v40, %v3358_v5  ;;  %v12440_v5 = vld [vmem:[#allocation107_spill] sm:$0xff]  ;;  %v3537_v40 = vsub.f32 %v12441_v59, %v10565_v30  ;;  %v3700_v59 = vld [vmem:[#allocation6 + $0x40] sm:$0xff] }
 0x819   : > { %v10643_v27 = vpop.eup %7183  ;;  %v3634_v20 = vmul.f32 1.442695, %v3535_v26  ;;  %v3638_v12 = vmul.f32 1.442695, %v3537_v40  ;;  %v12445_v40 = vld [vmem:[#allocation125_spill] sm:$0xff] }
 0x81a   : > { %4676 = vmatmul.f32.gmra.mxu3 %v10641_v46  ;;  %4806 = vmatmul.f32.gmra.mxu1 %v10643_v27  ;;  %v10651_v21 = vpop.eup %7185 }
 0x81b   : > { %7187 = vpow2.f32 %v3634_v20  ;;  %12439 = vst [vmem:[#allocation82_spill] sm:$0xff] %v10651_v21  ;;  %v10670_v20 = vpop.permute.xlu2 %3302 }
 0x81c   : > { %7189 = vpow2.f32 %v3666_v57  ;;  %v10678_v19 = vpop.permute.xlu0 %3307 }
 0x81d   : > { %7191 = vpow2.f32 %v3636_v43 }
 0x81e   : > { %7193 = vpow2.f32 %v3668_v28 }
 0x81f   : > { %7195 = vpow2.f32 %v3638_v12  ;;  %v3764_v12 = vmul.f32 %v12445_v40, %v3700_v59 }
 0x821   : > { %v10653_v15 = vpop.eup %7187  ;;  %3828 = vadd.xlane.f32.xlu1 %v12440_v5 }
 0x822   : > { %v10656_v35 = vpop.eup %7189  ;;  %4679 = vmatmul.f32.gmra.mxu3 %v10651_v21  ;;  %4744 = vmatmul.f32.gmra.mxu0 %v10653_v15 }
 0x823   : > { %4809 = vmatmul.f32.gmra.mxu1 %v10656_v35  ;;  %v10663_v26 = vpop.eup %7191  ;;  %v10676_v30 = vpop.permute.xlu2 %3467 }
 0x824   : > { %v10666_v57 = vpop.eup %7193 }
 0x825   : > { %12442 = vst [vmem:[#allocation101_spill] sm:$0xff] %v10666_v57  ;;  %v10672_v29 = vpop.eup %7195 }
 0x826   : > { %12443 = vst [vmem:[#allocation70_spill] sm:$0xff] %v10672_v29 }
 0x82a   : > { %3842 = vadd.xlane.f32.xlu2 %v10512_v2  ;;  %4747 = vmatmul.f32.gmra.mxu0 %v10663_v26  ;;  %v3693_v2 = vld [vmem:[#allocation6 + $0x8] sm:$0xff] }
 0x82b   : > { %4812 = vmatmul.f32.gmra.mxu1 %v10666_v57  ;;  %v3757_v34 = vmul.f32 %v12444_v39, %v3693_v2  ;;  %v10684_v5 = vpop.permute.xlu2 %3392 }
 0x832   : > { %3844 = vadd.xlane.f32.xlu0 %v10519_v16  ;;  %4750 = vmatmul.f32.gmra.mxu0 %v10672_v29  ;;  %v10686_v16 = vpop.permute.xlu0 %3472 }
 0x83a   : > { %3297 = vperm.xlu1 %7107, %v10261_v18  }
 0x841   : > { %v3823_v43 = vpop.xlane.xlu1 %3822 }
 0x842   : > { %3332 = vperm.xlu2 %7108, %v10426_v41   ;;  %v3949_v28 = vadd.f32 %v3823_v43, %v3757_v34  ;;  %3462 = vperm.xlu1 %7107, %v10278_v7   ;;  %v10693_v34 = vpop.permute.xlu0 %3397  ;;  %v3701_v43 = vld [vmem:[#allocation6 + $0x48] sm:$0xff] }
 0x843   : > { %v3765_v29 = vmul.f32 %v12446_v36, %v3701_v43  ;;  %v12450_v36 = vld [vmem:[#allocation100_spill] sm:$0xff] }
 0x844   : > { %4014 = vst.msk [vmem:[#allocation6 + $0x8] sm:$0xff] %vm4012_vm1, %v3949_v28 }
 0x846   : > { %3337 = vperm.xlu0 %7106, %v10460_v53  }
 0x84a   : > { %3497 = vperm.xlu2 %7108, %v10481_v6   ;;  %3387 = vperm.xlu1 %7107, %v10351_v48   ;;  %v12448_v48 = vld [vmem:[#allocation90_spill] sm:$0xff] }
 0x84b   : > { %v3521_v59 = vsub.f32 %v12448_v48, %v10585_v60  ;;  %v12452_v60 = vld [vmem:[#allocation106_spill] sm:$0xff] }
 0x84c   : > { %v3837_v2 = vpop.xlane.xlu2 %3836 }
 0x84d   : > { %v3956_v39 = vadd.f32 %v3837_v2, %v3764_v12  ;;  %v3606_v40 = vmul.f32 1.442695, %v3521_v59  ;;  %v12449_v2 = vld [vmem:[#allocation87_spill] sm:$0xff] }
 0x84f   : > { %4021 = vst.msk [vmem:[#allocation6 + $0x40] sm:$0xff] %vm4012_vm1, %v3956_v39 }
 0x857   : > { %v3839_v41 = vpop.xlane.xlu0 %3838 }
 0x858   : > { %v3957_v28 = vadd.f32 %v3839_v41, %v3765_v29  ;;  %v3522_v41 = vsub.f32 %v12450_v36, %v10598_v38 }
 0x859   : > { %v3283_v57 = vpop.permute.xlu1 %3282 }
 0x85a   : > { %4022 = vst.msk [vmem:[#allocation6 + $0x48] sm:$0xff] %vm4012_vm1, %v3957_v28  ;;  %v3520_v6 = vsub.f32 %v12447_v37, %v3283_v57  ;;  %v12451_v37 = vld [vmem:[#allocation91_spill] sm:$0xff]  ;;  %v3608_v57 = vmul.f32 1.442695, %v3522_v41  ;;  %v12455_v41 = vld [vmem:[#allocation152_spill] sm:$0xff] }
 0x85c   : > { %v3604_v21 = vmul.f32 1.442695, %v3520_v6  ;;  %v3554_v6 = vsub.f32 %v12451_v37, %v10594_v51  ;;  %v12454_v51 = vld [vmem:[#allocation102_spill] sm:$0xff] }
 0x85d   : > { %v3555_v59 = vsub.f32 %v12454_v51, %v10604_v4  ;;  %v12460_v51 = vld [vmem:[#allocation150_spill] sm:$0xff] }
 0x85e   : > { %7197 = vpow2.f32 %v3604_v21  ;;  %v3672_v43 = vmul.f32 1.442695, %v3554_v6 }
 0x85f   : > { %7199 = vpow2.f32 %v3606_v40 }
 0x861   : > { %v3448_v12 = vpop.permute.xlu1 %3447 }
 0x862   : > { %v3553_v53 = vsub.f32 %v12449_v2, %v3448_v12  ;;  %v3674_v2 = vmul.f32 1.442695, %v3555_v59 }
 0x864   : > { %v10702_v39 = vpop.eup %7197  ;;  %v3670_v7 = vmul.f32 1.442695, %v3553_v53 }
 0x865   : > { %4682 = vmatmul.f32.gmra.mxu3 %v10702_v39  ;;  %v10710_v29 = vpop.eup %7199 }
 0x866   : > { %7201 = vpow2.f32 %v3670_v7  ;;  %v12453_v7 = vld [vmem:[#allocation92_spill] sm:$0xff] }
 0x867   : > { %7203 = vpow2.f32 %v3608_v57  ;;  %v3539_v38 = vsub.f32 %v12453_v7, %v10602_v25  ;;  %v12456_v25 = vld [vmem:[#allocation105_spill] sm:$0xff]  ;;  %v10734_v57 = vpop.permute.xlu2 %3317 }
 0x868   : > { %v3540_v6 = vsub.f32 %v12456_v25, %v10614_v58  ;;  %v3704_v25 = vld [vmem:[#allocation6 + $0x60] sm:$0xff] }
 0x869   : > { %v3373_v48 = vpop.permute.xlu1 %3372  ;;  %v3642_v40 = vmul.f32 1.442695, %v3539_v38 }
 0x86a   : > { %v3538_v21 = vsub.f32 %v12452_v60, %v3373_v48  ;;  %v12457_v48 = vld [vmem:[#allocation60_spill] sm:$0xff]  ;;  %v12458_v60 = vld [vmem:[#allocation58_spill] sm:$0xff] }
 0x86c   : > { %v10712_v28 = vpop.eup %7201  ;;  %v3640_v53 = vmul.f32 1.442695, %v3538_v21 }
 0x86d   : > { %4685 = vmatmul.f32.gmra.mxu3 %v10710_v29  ;;  %4815 = vmatmul.f32.gmra.mxu1 %v10712_v28  ;;  %v10722_v12 = vpop.eup %7203 }
 0x86e   : > { %7205 = vpow2.f32 %v3640_v53 }
 0x86f   : > { %7207 = vpow2.f32 %v3672_v43  ;;  %v12459_v43 = vld [vmem:[#allocation88_spill] sm:$0xff] }
 0x870   : > { %3916 = vadd.xlane.f32.xlu0 %v10448_v33  ;;  %7209 = vpow2.f32 %v3642_v40  ;;  %v3644_v33 = vmul.f32 1.442695, %v3540_v6 }
 0x871   : > { %7211 = vpow2.f32 %v3674_v2 }
 0x872   : > { %7213 = vpow2.f32 %v3644_v33  ;;  %v12461_v33 = vld [vmem:[#allocation109_spill] sm:$0xff] }
 0x873   : > { %3884 = vadd.xlane.f32.xlu2 %v10572_v10 }
 0x874   : > { %v7206_v36 = vpop.eup %7205  ;;  %3834 = vadd.xlane.f32.xlu1 %v12455_v41 }
 0x875   : > { %v7208_v37 = vpop.eup %7207  ;;  %4688 = vmatmul.f32.gmra.mxu3 %v10722_v12  ;;  %4753 = vmatmul.f32.gmra.mxu0 %v7206_v36 }
 0x876   : > { %4818 = vmatmul.f32.gmra.mxu1 %v7208_v37  ;;  %v7210_v10 = vpop.eup %7209 }
 0x877   : > { %v10730_v4 = vpop.eup %7211 }
 0x878   : > { %3886 = vadd.xlane.f32.xlu0 %v10577_v50  ;;  %v10737_v58 = vpop.eup %7213  ;;  %v10741_v50 = vpop.permute.xlu0 %3322 }
 0x87b   : > { %3848 = vadd.xlane.f32.xlu2 %v10623_v32  ;;  %v10743_v32 = vpop.permute.xlu2 %3482 }
 0x87d   : > { %4756 = vmatmul.f32.gmra.mxu0 %v7210_v10 }
 0x87e   : > { %4821 = vmatmul.f32.gmra.mxu1 %v10730_v4 }
 0x880   : > { %3850 = vadd.xlane.f32.xlu0 %v10630_v11  ;;  %v3696_v11 = vld [vmem:[#allocation6 + $0x20] sm:$0xff]  ;;  %v10750_v21 = vpop.permute.xlu0 %3487 }
 0x883   : > { %3854 = vadd.xlane.f32.xlu2 %v10632_v54  ;;  %v3000_v54 = vsub.f32 %v12458_v60, %v12457_v48  ;;  %v10754_v53 = vpop.permute.xlu2 %3407 }
 0x885   : > { %4759 = vmatmul.f32.gmra.mxu0 %v10737_v58 }
 0x888   : > { %3856 = vadd.xlane.f32.xlu0 %v10641_v46  ;;  %v3760_v46 = vmul.f32 %v12459_v43, %v3696_v11  ;;  %v3524_v11 = vsub.f32 %v12461_v33, %v10670_v20  ;;  %v12465_v20 = vld [vmem:[#allocation113_spill] sm:$0xff] }
 0x88a   : > { %v3612_v48 = vmul.f32 1.442695, %v3524_v11 }
 0x88b   : > { %3920 = vadd.xlane.f32.xlu2 %v10643_v27  ;;  %v3076_v27 = vmul.f32 1.442695, %v3000_v54  ;;  %v12462_v54 = vld [vmem:[#allocation121_spill] sm:$0xff] }
 0x88d   : > { %3312 = vperm.xlu1 %7107, %v10435_v13   ;;  %7215 = vpow2.f32 %v3076_v27  ;;  %v12464_v27 = vld [vmem:[#allocation126_spill] sm:$0xff] }
 0x88e   : > { %7217 = vpow2.f32 %v3612_v48 }
 0x890   : > { %3922 = vadd.xlane.f32.xlu0 %v10656_v35  ;;  %v3703_v35 = vld [vmem:[#allocation6 + $0x58] sm:$0xff] }
 0x891   : > { %v3767_v59 = vmul.f32 %v12460_v51, %v3703_v35 }
 0x893   : > { %3890 = vadd.xlane.f32.xlu2 %v10653_v15  ;;  %v10761_v15 = vpop.permute.xlu0 %3412  ;;  %v10766_v41 = vpop.eup %7215 }
 0x894   : > { %v3829_v7 = vpop.xlane.xlu1 %3828 }
 0x895   : > { %v3952_v38 = vadd.f32 %v3829_v7, %v3760_v46  ;;  %3477 = vperm.xlu1 %7107, %v10444_v24  }
 0x897   : > { %4017 = vst.msk [vmem:[#allocation6 + $0x20] sm:$0xff] %vm4012_vm1, %v3952_v38 }
 0x898   : > { %3892 = vadd.xlane.f32.xlu0 %v10663_v26  ;;  %v3768_v26 = vmul.f32 %v10766_v41, %v3704_v25 }
 0x89b   : > { %3860 = vadd.xlane.f32.xlu2 %v10702_v39 }
 0x89d   : > { %v3843_v40 = vpop.xlane.xlu2 %3842  ;;  %3402 = vperm.xlu1 %7107, %v10490_v8  }
 0x89e   : > { %v3959_v2 = vadd.f32 %v3843_v40, %v3767_v59  ;;  %v12466_v40 = vld [vmem:[#allocation120_spill] sm:$0xff] }
 0x8a0   : > { %4024 = vst.msk [vmem:[#allocation6 + $0x58] sm:$0xff] %vm4012_vm1, %v3959_v2  ;;  %3862 = vadd.xlane.f32.xlu0 %v10710_v29 }
 0x8a3   : > { %3926 = vadd.xlane.f32.xlu2 %v10712_v28  ;;  %v12463_v28 = vld [vmem:[#allocation111_spill] sm:$0xff] }
 0x8a4   : > { %v3557_v46 = vsub.f32 %v12463_v28, %v10676_v30 }
 0x8a5   : > { %v3845_v39 = vpop.xlane.xlu0 %3844 }
 0x8a6   : > { %v3960_v6 = vadd.f32 %v3845_v39, %v3768_v26  ;;  %v3678_v7 = vmul.f32 1.442695, %v3557_v46  ;;  %v12467_v26 = vld [vmem:[#allocation142_spill] sm:$0xff] }
 0x8a8   : > { %4025 = vst.msk [vmem:[#allocation6 + $0x60] sm:$0xff] %vm4012_vm1, %v3960_v6  ;;  %3928 = vadd.xlane.f32.xlu0 %v7208_v37  ;;  %v7218_v37 = vpop.eup %7217 }
 0x8ab   : > { %3896 = vadd.xlane.f32.xlu2 %v7206_v36  ;;  %v3542_v36 = vsub.f32 %v12465_v20, %v10684_v5  ;;  %v12468_v5 = vld [vmem:[#allocation136_spill] sm:$0xff] }
 0x8ac   : > { %v3298_v60 = vpop.permute.xlu1 %3297  ;;  %v3527_v48 = vsub.f32 %v12468_v5, %v10734_v57  ;;  %v12478_v5 = vld [vmem:[#allocation67_spill] sm:$0xff] }
 0x8ad   : > { %v3523_v29 = vsub.f32 %v12462_v54, %v3298_v60  ;;  %v3648_v30 = vmul.f32 1.442695, %v3542_v36 }
 0x8ae   : > { %v3618_v54 = vmul.f32 1.442695, %v3527_v48  ;;  %v3002_v48 = vsub.f32 %v12478_v5, %v12410_v14  ;;  %v12485_v5 = vld [vmem:[#allocation83_spill] sm:$0xff] }
 0x8af   : > { %v3610_v43 = vmul.f32 1.442695, %v3523_v29 }
 0x8b0   : > { %3898 = vadd.xlane.f32.xlu0 %v7210_v10  ;;  %v3525_v10 = vsub.f32 %v12466_v40, %v10678_v19  ;;  %v12469_v19 = vld [vmem:[#allocation123_spill] sm:$0xff] }
 0x8b1   : > { %7219 = vpow2.f32 %v3610_v43  ;;  %v3558_v60 = vsub.f32 %v12469_v19, %v10686_v16  ;;  %v12471_v16 = vld [vmem:[#allocation127_spill] sm:$0xff] }
 0x8b2   : > { %7221 = vpow2.f32 %v3678_v7  ;;  %v3614_v2 = vmul.f32 1.442695, %v3525_v10  ;;  %v12470_v7 = vld [vmem:[#allocation139_spill] sm:$0xff] }
 0x8b3   : > { %v3680_v28 = vmul.f32 1.442695, %v3558_v60  ;;  %v3560_v57 = vsub.f32 %v12470_v7, %v10743_v32  ;;  %v12474_v32 = vld [vmem:[#allocation140_spill] sm:$0xff] }
 0x8b4   : > { %v3463_v38 = vpop.permute.xlu1 %3462  ;;  %v12480_v7 = vld [vmem:[#allocation80_spill] sm:$0xff] }
 0x8b5   : > { %v3556_v35 = vsub.f32 %v12464_v27, %v3463_v38  ;;  %v3543_v38 = vsub.f32 %v12471_v16, %v10693_v34  ;;  %v3684_v27 = vmul.f32 1.442695, %v3560_v57  ;;  %v12475_v34 = vld [vmem:[#allocation66_spill] sm:$0xff]  ;;  %v3003_v57 = vsub.f32 %v12480_v7, %v9846_v61  ;;  %v12481_v16 = vld [vmem:[#allocation177_spill] sm:$0xff]  ;;  %v3699_v61 = vld [vmem:[#allocation6 + $0x38] sm:$0xff] }
 0x8b6   : > { %v3020_v40 = vsub.f32 %v12475_v34, %v9776_v0  ;;  %v12486_v7 = vld [vmem:[#allocation81_spill] sm:$0xff] }
 0x8b7   : > { %v7220_v51 = vpop.eup %7219  ;;  %v3676_v59 = vmul.f32 1.442695, %v3556_v35 }
 0x8b8   : > { %3868 = vadd.xlane.f32.xlu0 %v7218_v37  ;;  %3866 = vadd.xlane.f32.xlu2 %v7220_v51  ;;  %v7222_v6 = vpop.eup %7221  ;;  %v10815_v0 = vpop.permute.xlu0 %3337 }
 0x8b9   : > { %4691 = vmatmul.f32.gmra.mxu3 %v7220_v51  ;;  %7223 = vpow2.f32 %v3676_v59  ;;  %v12472_v51 = vld [vmem:[#allocation73_spill] sm:$0xff]  ;;  %v3545_v59 = vsub.f32 %v12474_v32, %v10754_v53  ;;  %v3082_v32 = vmul.f32 1.442695, %v3003_v57  ;;  %v3038_v57 = vsub.f32 %v12486_v7, %v12413_v56 }
 0x8ba   : > { %7225 = vpow2.f32 %v3648_v30  ;;  %v3333_v30 = vpop.permute.xlu2 %3332 }
 0x8bb   : > { %7227 = vpow2.f32 %v3614_v2  ;;  %v3654_v2 = vmul.f32 1.442695, %v3545_v59 }
 0x8bc   : > { %v3388_v25 = vpop.permute.xlu1 %3387 }
 0x8bd   : > { %v3541_v39 = vsub.f32 %v12467_v26, %v3388_v25  ;;  %v3116_v26 = vmul.f32 1.442695, %v3020_v40 }
 0x8bf   : > { %v7224_v33 = vpop.eup %7223  ;;  %v3646_v11 = vmul.f32 1.442695, %v3541_v39  ;;  %v12476_v39 = vld [vmem:[#allocation75_spill] sm:$0xff] }
 0x8c0   : > { %3934 = vadd.xlane.f32.xlu0 %v7222_v6  ;;  %3932 = vadd.xlane.f32.xlu2 %v7224_v33  ;;  %v7226_v29 = vpop.eup %7225 }
 0x8c1   : > { %4694 = vmatmul.f32.gmra.mxu3 %v7218_v37  ;;  %7229 = vpow2.f32 %v3646_v11  ;;  %4824 = vmatmul.f32.gmra.mxu1 %v7224_v33  ;;  %v10786_v43 = vpop.eup %7227  ;;  %v3650_v37 = vmul.f32 1.442695, %v3543_v38  ;;  %v12477_v33 = vld [vmem:[#allocation162_spill] sm:$0xff] }
 0x8c2   : > { %7231 = vpow2.f32 %v3618_v54  ;;  %v3530_v11 = vsub.f32 %v12477_v33, %v3333_v30  ;;  %v3725_v33 = vld [vmem:[#allocation6 + $0x108] sm:$0xff] }
 0x8c3   : > { %7233 = vpow2.f32 %v3680_v28  ;;  %v3740_v28 = vld [vmem:[#allocation6 + $0x180] sm:$0xff] }
 0x8c4   : > { %7235 = vpow2.f32 %v3684_v27  ;;  %v3624_v60 = vmul.f32 1.442695, %v3530_v11 }
 0x8c5   : > { %7237 = vpow2.f32 %v3650_v37  ;;  %v3724_v37 = vld [vmem:[#allocation6 + $0x100] sm:$0xff] }
 0x8c7   : > { %v7230_v46 = vpop.eup %7229  ;;  %3840 = vadd.xlane.f32.xlu1 %v10412_v63  ;;  %v12473_v63 = vld [vmem:[#allocation71_spill] sm:$0xff] }
 0x8c8   : > { %3904 = vadd.xlane.f32.xlu0 %v7226_v29  ;;  %3902 = vadd.xlane.f32.xlu2 %v7230_v46  ;;  %v10794_v35 = vpop.eup %7231  ;;  %v3036_v20 = vsub.f32 %v12473_v63, %v12472_v51  ;;  %v12482_v63 = vld [vmem:[#allocation77_spill] sm:$0xff] }
 0x8c9   : > { %4697 = vmatmul.f32.gmra.mxu3 %v10786_v43  ;;  %4762 = vmatmul.f32.gmra.mxu0 %v7230_v46  ;;  %v10799_v36 = vpop.eup %7233  ;;  %v3080_v46 = vmul.f32 1.442695, %v3002_v48  ;;  %v3006_v48 = vsub.f32 %v12485_v5, %v9858_v49 }
 0x8ca   : > { %4827 = vmatmul.f32.gmra.mxu1 %v7222_v6  ;;  %v3148_v10 = vmul.f32 1.442695, %v3036_v20  ;;  %v10806_v25 = vpop.eup %7235  ;;  %v3021_v6 = vsub.f32 %v12476_v39, %v9825_v3  ;;  %v3498_v3 = vpop.permute.xlu2 %3497  ;;  %v3005_v20 = vsub.f32 %v12482_v63, %v12411_v23  ;;  %v12484_v39 = vld [vmem:[#allocation108_spill] sm:$0xff] }
 0x8cb   : > { %v10811_v53 = vpop.eup %7237  ;;  %v3563_v38 = vsub.f32 %v12481_v16, %v3498_v3  ;;  %v3088_v49 = vmul.f32 1.442695, %v3006_v48 }
 0x8cc   : > { %7239 = vpow2.f32 %v3148_v10  ;;  %v3118_v19 = vmul.f32 1.442695, %v3021_v6  ;;  %v3763_v6 = vmul.f32 %v12484_v39, %v3699_v61  ;;  %v3086_v11 = vmul.f32 1.442695, %v3005_v20  ;;  %v3707_v20 = vld [vmem:[#allocation6 + $0x78] sm:$0xff] }
 0x8cd   : > { %7241 = vpow2.f32 %v3654_v2  ;;  %v3690_v34 = vmul.f32 1.442695, %v3563_v38 }
 0x8ce   : > { %7243 = vpow2.f32 %v3116_v26 }
 0x8cf   : > { %7245 = vpow2.f32 %v3118_v19 }
 0x8d0   : > { %3874 = vadd.xlane.f32.xlu0 %v10794_v35  ;;  %7247 = vpow2.f32 %v3624_v60 }
 0x8d1   : > { %4765 = vmatmul.f32.gmra.mxu0 %v7226_v29  ;;  %7249 = vpow2.f32 %v3080_v46 }
 0x8d2   : > { %4830 = vmatmul.f32.gmra.mxu1 %v10799_v36  ;;  %v10819_v54 = vpop.eup %7239  ;;  %7251 = vpow2.f32 %v3082_v32  ;;  %v3152_v32 = vmul.f32 1.442695, %v3038_v57  ;;  %v12491_v57 = vld [vmem:[#allocation104_spill] sm:$0xff] }
 0x8d3   : > { %12479 = vst [vmem:[#allocation95_spill] sm:$0xff] %v10819_v54  ;;  %v10821_v29 = vpop.eup %7241  ;;  %v3804_v27 = vmul.f32 %v10819_v54, %v3740_v28  ;;  %7253 = vpow2.f32 %v3690_v34  ;;  %v3706_v28 = vld [vmem:[#allocation6 + $0x70] sm:$0xff] }
 0x8d4   : > { %v10828_v14 = vpop.eup %7243  ;;  %7255 = vpow2.f32 %v3086_v11  ;;  %v12490_v11 = vld [vmem:[#allocation61_spill] sm:$0xff] }
 0x8d5   : > { %v3788_v40 = vmul.f32 %v10828_v14, %v3724_v37  ;;  %v10834_v10 = vpop.eup %7245  ;;  %7257 = vpow2.f32 %v3088_v49 }
 0x8d6   : > { %12483 = vst [vmem:[#allocation48_spill] sm:$0xff] %v10834_v10  ;;  %v10837_v2 = vpop.eup %7247  ;;  %v3789_v3 = vmul.f32 %v10834_v10, %v3725_v33  ;;  %7259 = vpow2.f32 %v3152_v32  ;;  %v12489_v33 = vld [vmem:[#allocation63_spill] sm:$0xff] }
 0x8d7   : > { %v10845_v60 = vpop.eup %7249 }
 0x8d8   : > { %3940 = vadd.xlane.f32.xlu0 %v10806_v25  ;;  %v3770_v38 = vmul.f32 %v10845_v60, %v3706_v28  ;;  %v3710_v28 = vld [vmem:[#allocation6 + $0x90] sm:$0xff] }
 0x8d9   : > { %4768 = vmatmul.f32.gmra.mxu0 %v10811_v53 }
 0x8e0   : > { %3910 = vadd.xlane.f32.xlu0 %v10821_v29  ;;  %3327 = vperm.xlu1 %7107, %v10540_v47  }
 0x8e3   : > { %v3917_v51 = vpop.xlane.xlu0 %3916 }
 0x8e4   : > { %v3996_v59 = vadd.f32 %v3917_v51, %v3804_v27  ;;  %v10852_v27 = vpop.eup %7251 }
 0x8e5   : > { %v10855_v51 = vpop.eup %7253  ;;  %v3771_v34 = vmul.f32 %v10852_v27, %v3707_v20 }
 0x8e6   : > { %4061 = vst.msk [vmem:[#allocation6 + $0x180] sm:$0xff] %vm4012_vm1, %v3996_v59  ;;  %v3885_v30 = vpop.xlane.xlu2 %3884  ;;  %v12487_v59 = vld [vmem:[#allocation84_spill] sm:$0xff]  ;;  %v10862_v61 = vpop.eup %7255 }
 0x8e7   : > { %v3980_v26 = vadd.f32 %v3885_v30, %v3788_v40  ;;  %v3835_v23 = vpop.xlane.xlu1 %3834  ;;  %v3039_v56 = vsub.f32 %v12487_v59, %v9872_v22  ;;  %v3709_v40 = vld [vmem:[#allocation6 + $0x88] sm:$0xff] }
 0x8e8   : > { %3880 = vadd.xlane.f32.xlu0 %v10837_v2  ;;  %v3955_v19 = vadd.f32 %v3835_v23, %v3763_v6  ;;  %3492 = vperm.xlu1 %7107, %v10553_v55   ;;  %v3001_v23 = vsub.f32 %v12490_v11, %v12489_v33  ;;  %v3773_v22 = vmul.f32 %v10862_v61, %v3709_v40  ;;  %v12494_v40 = vld [vmem:[#allocation72_spill] sm:$0xff] }
 0x8e9   : > { %4045 = vst.msk [vmem:[#allocation6 + $0x100] sm:$0xff] %vm4012_vm1, %v3980_v26  ;;  %v12488_v26 = vld [vmem:[#allocation99_spill] sm:$0xff]  ;;  %v3154_v5 = vmul.f32 1.442695, %v3039_v56 }
 0x8ea   : > { %4020 = vst.msk [vmem:[#allocation6 + $0x38] sm:$0xff] %vm4012_vm1, %v3955_v19  ;;  %v3023_v39 = vsub.f32 %v12488_v26, %v12415_v9  ;;  %v10871_v19 = vpop.eup %7257  ;;  %v3078_v7 = vmul.f32 1.442695, %v3001_v23  ;;  %v3024_v9 = vsub.f32 %v12491_v57, %v9983_v52 }
 0x8eb   : > { %v3887_v46 = vpop.xlane.xlu0 %3886  ;;  %7261 = vpow2.f32 %v3154_v5  ;;  %v3774_v49 = vmul.f32 %v10871_v19, %v3710_v28  ;;  %v12497_v5 = vld [vmem:[#allocation163_spill] sm:$0xff] }
 0x8ec   : > { %v3981_v16 = vadd.f32 %v3887_v46, %v3789_v3  ;;  %v3122_v46 = vmul.f32 1.442695, %v3023_v39  ;;  %v3124_v59 = vmul.f32 1.442695, %v3024_v9 }
 0x8ee   : > { %4046 = vst.msk [vmem:[#allocation6 + $0x108] sm:$0xff] %vm4012_vm1, %v3981_v16  ;;  %v3849_v37 = vpop.xlane.xlu2 %3848  ;;  %v10876_v16 = vpop.eup %7259  ;;  %7263 = vpow2.f32 %v3122_v46  ;;  %v3727_v46 = vld [vmem:[#allocation6 + $0x118] sm:$0xff] }
 0x8ef   : > { %v3962_v63 = vadd.f32 %v3849_v37, %v3770_v38  ;;  %v3742_v38 = vld [vmem:[#allocation6 + $0x190] sm:$0xff]  ;;  %7265 = vpow2.f32 %v3078_v7 }
 0x8f0   : > { %3946 = vadd.xlane.f32.xlu0 %v10855_v51  ;;  %3417 = vperm.xlu1 %7107, %v10592_v45   ;;  %v3806_v56 = vmul.f32 %v10876_v16, %v3742_v38  ;;  %7267 = vpow2.f32 %v3124_v59 }
 0x8f1   : > { %4027 = vst.msk [vmem:[#allocation6 + $0x70] sm:$0xff] %vm4012_vm1, %v3962_v63  ;;  %v12492_v63 = vld [vmem:[#allocation114_spill] sm:$0xff]  ;;  %v10885_v26 = vpop.eup %7261 }
 0x8f2   : > { %v3008_v20 = vsub.f32 %v12492_v63, %v12424_v1  ;;  %12495 = vst [vmem:[#allocation50_spill] sm:$0xff] %v10885_v26  ;;  %v12496_v1 = vld [vmem:[#allocation118_spill] sm:$0xff] }
 0x8f3   : > { %v3851_v30 = vpop.xlane.xlu0 %3850  ;;  %v3009_v23 = vsub.f32 %v12496_v1, %v10063_v62 }
 0x8f4   : > { %v3963_v6 = vadd.f32 %v3851_v30, %v3771_v34  ;;  %v12493_v34 = vld [vmem:[#allocation74_spill] sm:$0xff]  ;;  %v3092_v33 = vmul.f32 1.442695, %v3008_v20  ;;  %v12499_v20 = vld [vmem:[#allocation96_spill] sm:$0xff] }
 0x8f5   : > { %v3004_v52 = vsub.f32 %v12494_v40, %v12493_v34  ;;  %v3094_v62 = vmul.f32 1.442695, %v3009_v23  ;;  %v3728_v40 = vld [vmem:[#allocation6 + $0x120] sm:$0xff] }
 0x8f6   : > { %4028 = vst.msk [vmem:[#allocation6 + $0x78] sm:$0xff] %vm4012_vm1, %v3963_v6  ;;  %v3855_v48 = vpop.xlane.xlu2 %3854  ;;  %v3743_v6 = vld [vmem:[#allocation6 + $0x198] sm:$0xff]  ;;  %7269 = vpow2.f32 %v3092_v33  ;;  %v3712_v23 = vld [vmem:[#allocation6 + $0xa0] sm:$0xff] }
 0x8f7   : > { %v3965_v3 = vadd.f32 %v3855_v48, %v3773_v22  ;;  %v10891_v48 = vpop.eup %7263  ;;  %v3807_v28 = vmul.f32 %v10885_v26, %v3743_v6  ;;  %v12502_v6 = vld [vmem:[#allocation164_spill] sm:$0xff]  ;;  %v12549_v26 = vld [vmem:[#allocation82_spill] sm:$0xff] }
 0x8f8   : > { %v10894_v7 = vpop.eup %7265  ;;  %v3791_v63 = vmul.f32 %v10891_v48, %v3727_v46 }
 0x8f9   : > { %4030 = vst.msk [vmem:[#allocation6 + $0x88] sm:$0xff] %vm4012_vm1, %v3965_v3  ;;  %v3084_v3 = vmul.f32 1.442695, %v3004_v52 }
 0x8fb   : > { %v3857_v37 = vpop.xlane.xlu0 %3856 }
 0x8fc   : > { %v3966_v32 = vadd.f32 %v3857_v37, %v3774_v49  ;;  %v12498_v49 = vld [vmem:[#allocation116_spill] sm:$0xff] }
 0x8fd   : > { %v3041_v38 = vsub.f32 %v12498_v49, %v12425_v42 }
 0x8fe   : > { %4031 = vst.msk [vmem:[#allocation6 + $0x90] sm:$0xff] %vm4012_vm1, %v3966_v32  ;;  %v3921_v30 = vpop.xlane.xlu2 %3920  ;;  %v3007_v32 = vsub.f32 %v12499_v20, %v9938_v17  ;;  %v12507_v20 = vld [vmem:[#allocation128_spill] sm:$0xff] }
 0x8ff   : > { %v3998_v39 = vadd.f32 %v3921_v30, %v3806_v56  ;;  %v3313_v11 = vpop.permute.xlu1 %3312  ;;  %v10903_v56 = vpop.eup %7267  ;;  %v3158_v52 = vmul.f32 1.442695, %v3041_v38  ;;  %v12501_v30 = vld [vmem:[#allocation119_spill] sm:$0xff] }
 0x900   : > { %v3526_v22 = vsub.f32 %v12497_v5, %v3313_v11  ;;  %12500 = vst [vmem:[#allocation59_spill] sm:$0xff] %v10903_v56  ;;  %v10909_v11 = vpop.eup %7269  ;;  %v3090_v17 = vmul.f32 1.442695, %v3007_v32  ;;  %v3792_v1 = vmul.f32 %v10903_v56, %v3728_v40 }
 0x901   : > { %4063 = vst.msk [vmem:[#allocation6 + $0x190] sm:$0xff] %vm4012_vm1, %v3998_v39  ;;  %v3042_v39 = vsub.f32 %v12501_v30, %v10077_v44  ;;  %v12504_v44 = vld [vmem:[#allocation144_spill] sm:$0xff]  ;;  %v12509_v30 = vld [vmem:[#allocation122_spill] sm:$0xff] }
 0x902   : > { %v3616_v57 = vmul.f32 1.442695, %v3526_v22  ;;  %v12503_v22 = vld [vmem:[#allocation137_spill] sm:$0xff] }
 0x903   : > { %v3923_v9 = vpop.xlane.xlu0 %3922  ;;  %v3160_v38 = vmul.f32 1.442695, %v3042_v39 }
 0x904   : > { %v3999_v37 = vadd.f32 %v3923_v9, %v3807_v28  ;;  %4208 = vperm.xlu0 %7106, %v10894_v7   ;;  %7271 = vpow2.f32 %v3616_v57  ;;  %v3528_v9 = vsub.f32 %v12504_v44, %v10741_v50 }
 0x905   : > { %7273 = vpow2.f32 %v3084_v3  ;;  %v3026_v3 = vsub.f32 %v12503_v22, %v12426_v31 }
 0x906   : > { %4064 = vst.msk [vmem:[#allocation6 + $0x198] sm:$0xff] %vm4012_vm1, %v3999_v37  ;;  %v3891_v59 = vpop.xlane.xlu2 %3890  ;;  %7275 = vpow2.f32 %v3094_v62  ;;  %v3776_v37 = vmul.f32 %v10909_v11, %v3712_v23  ;;  %v3620_v40 = vmul.f32 1.442695, %v3528_v9  ;;  %v3745_v23 = vld [vmem:[#allocation6 + $0x1a8] sm:$0xff] }
 0x907   : > { %v3983_v34 = vadd.f32 %v3891_v59, %v3791_v63  ;;  %v3478_v42 = vpop.permute.xlu1 %3477  ;;  %7277 = vpow2.f32 %v3158_v52  ;;  %v12506_v63 = vld [vmem:[#allocation129_spill] sm:$0xff]  ;;  %v3128_v59 = vmul.f32 1.442695, %v3026_v3 }
 0x908   : > { %v3559_v33 = vsub.f32 %v12502_v6, %v3478_v42  ;;  %v3010_v32 = vsub.f32 %v12507_v20, %v12506_v63  ;;  %v12508_v42 = vld [vmem:[#allocation124_spill] sm:$0xff]  ;;  %v12510_v6 = vld [vmem:[#allocation182_spill] sm:$0xff] }
 0x909   : > { %4048 = vst.msk [vmem:[#allocation6 + $0x118] sm:$0xff] %vm4012_vm1, %v3983_v34  ;;  %v3713_v34 = vld [vmem:[#allocation6 + $0xa8] sm:$0xff]  ;;  %v3027_v39 = vsub.f32 %v12509_v30, %v12508_v42  ;;  %v12517_v30 = vld [vmem:[#allocation155_spill] sm:$0xff] }
 0x90a   : > { %v7272_v5 = vpop.eup %7271  ;;  %v3682_v28 = vmul.f32 1.442695, %v3559_v33  ;;  %v3096_v22 = vmul.f32 1.442695, %v3010_v32  ;;  %v12513_v20 = vld [vmem:[#allocation154_spill] sm:$0xff]  ;;  %v12514_v32 = vld [vmem:[#allocation153_spill] sm:$0xff] }
 0x90b   : > { %v3893_v46 = vpop.xlane.xlu0 %3892  ;;  %v10914_v57 = vpop.eup %7273  ;;  %3872 = vadd.xlane.f32.xlu2 %v7272_v5  ;;  %4700 = vmatmul.f32.gmra.mxu3 %v7272_v5  ;;  %v3130_v9 = vmul.f32 1.442695, %v3027_v39  ;;  %v3011_v39 = vsub.f32 %v12517_v30, %v10261_v18  ;;  %v12526_v30 = vld [vmem:[#allocation158_spill] sm:$0xff] }
 0x90c   : > { %v3984_v49 = vadd.f32 %v3893_v46, %v3792_v1  ;;  %7279 = vpow2.f32 %v3682_v28  ;;  %4223 = vperm.xlu0 %7106, %v10914_v57   ;;  %v10921_v62 = vpop.eup %7275 }
 0x90d   : > { %7281 = vpow2.f32 %v3090_v17  ;;  %12505 = vst [vmem:[#allocation89_spill] sm:$0xff] %v10921_v62  ;;  %v10929_v17 = vpop.eup %7277  ;;  %v3777_v1 = vmul.f32 %v10921_v62, %v3713_v34 }
 0x90e   : > { %4049 = vst.msk [vmem:[#allocation6 + $0x120] sm:$0xff] %vm4012_vm1, %v3984_v49  ;;  %v3861_v31 = vpop.xlane.xlu2 %3860  ;;  %7283 = vpow2.f32 %v3160_v38  ;;  %v3809_v49 = vmul.f32 %v10929_v17, %v3745_v23  ;;  %v12511_v38 = vld [vmem:[#allocation147_spill] sm:$0xff] }
 0x90f   : > { %v3968_v50 = vadd.f32 %v3861_v31, %v3776_v37  ;;  %v3403_v52 = vpop.permute.xlu1 %3402  ;;  %7285 = vpow2.f32 %v3128_v59  ;;  %v3561_v37 = vsub.f32 %v12511_v38, %v10750_v21  ;;  %v3013_v59 = vsub.f32 %v12514_v32, %v12513_v20  ;;  %v12519_v38 = vld [vmem:[#allocation151_spill] sm:$0xff]  ;;  %v12521_v32 = vld [vmem:[#allocation176_spill] sm:$0xff] }
 0x910   : > { %v3544_v33 = vsub.f32 %v12510_v6, %v3403_v52  ;;  %7287 = vpow2.f32 %v3620_v40  ;;  %v12515_v40 = vld [vmem:[#allocation143_spill] sm:$0xff]  ;;  %v12516_v52 = vld [vmem:[#allocation141_spill] sm:$0xff] }
 0x911   : > { %4033 = vst.msk [vmem:[#allocation6 + $0xa0] sm:$0xff] %vm4012_vm1, %v3968_v50  ;;  %v3746_v50 = vld [vmem:[#allocation6 + $0x1b0] sm:$0xff]  ;;  %v3012_v42 = vsub.f32 %v12516_v52, %v12515_v40  ;;  %v3686_v6 = vmul.f32 1.442695, %v3561_v37  ;;  %v3546_v37 = vsub.f32 %v12519_v38, %v10761_v15  ;;  %v12523_v40 = vld [vmem:[#allocation146_spill] sm:$0xff]  ;;  %v12524_v52 = vld [vmem:[#allocation145_spill] sm:$0xff] }
 0x912   : > { %v7280_v5 = vpop.eup %7279  ;;  %v3652_v3 = vmul.f32 1.442695, %v3544_v33  ;;  %v12525_v15 = vld [vmem:[#allocation159_spill] sm:$0xff]  ;;  %v12529_v38 = vld [vmem:[#allocation190_spill] sm:$0xff] }
 0x913   : > { %v3863_v28 = vpop.xlane.xlu0 %3862  ;;  %v10932_v46 = vpop.eup %7281  ;;  %3938 = vadd.xlane.f32.xlu2 %v7280_v5  ;;  %4703 = vmatmul.f32.gmra.mxu3 %v10794_v35 }
 0x914   : > { %v3969_v44 = vadd.f32 %v3863_v28, %v3777_v1  ;;  %7289 = vpow2.f32 %v3652_v3  ;;  %4833 = vmatmul.f32.gmra.mxu1 %v7280_v5  ;;  %4238 = vperm.xlu0 %7106, %v10932_v46   ;;  %v10940_v63 = vpop.eup %7283  ;;  %v3730_v1 = vld [vmem:[#allocation6 + $0x130] sm:$0xff]  ;;  %v3102_v5 = vmul.f32 1.442695, %v3013_v59 }
 0x915   : > { %12512 = vst [vmem:[#allocation115_spill] sm:$0xff] %v10940_v63  ;;  %7291 = vpow2.f32 %v3096_v22  ;;  %v10944_v34 = vpop.eup %7285  ;;  %v3810_v33 = vmul.f32 %v10940_v63, %v3746_v50  ;;  %v12518_v22 = vld [vmem:[#allocation45_spill] sm:$0xff]  ;;  %v12522_v59 = vld [vmem:[#allocation175_spill] sm:$0xff] }
 0x916   : > { %4034 = vst.msk [vmem:[#allocation6 + $0xa8] sm:$0xff] %vm4012_vm1, %v3969_v44  ;;  %v3927_v31 = vpop.xlane.xlu2 %3926  ;;  %7293 = vpow2.f32 %v3130_v9  ;;  %v10949_v21 = vpop.eup %7287  ;;  %v3100_v9 = vmul.f32 1.442695, %v3012_v42  ;;  %v3794_v18 = vmul.f32 %v10944_v34, %v3730_v1  ;;  %v3045_v42 = vsub.f32 %v12524_v52, %v12523_v40  ;;  %v12533_v40 = vld [vmem:[#allocation174_spill] sm:$0xff]  ;;  %v12534_v52 = vld [vmem:[#allocation173_spill] sm:$0xff] }
 0x917   : > { %v4001_v35 = vadd.f32 %v3927_v31, %v3809_v49  ;;  %v3098_v49 = vmul.f32 1.442695, %v3011_v39  ;;  %7295 = vpow2.f32 %v3686_v6  ;;  %v3044_v39 = vsub.f32 %v12526_v30, %v12525_v15 }
 0x918   : > { %7297 = vpow2.f32 %v3102_v5  ;;  %v3656_v6 = vmul.f32 1.442695, %v3546_v37  ;;  %v12530_v37 = vld [vmem:[#allocation188_spill] sm:$0xff] }
 0x919   : > { %4066 = vst.msk [vmem:[#allocation6 + $0x1a8] sm:$0xff] %vm4012_vm1, %v4001_v35  ;;  %v3016_v35 = vsub.f32 %v12522_v59, %v12521_v32  ;;  %7299 = vpow2.f32 %v3100_v9  ;;  %v3166_v9 = vmul.f32 1.442695, %v3045_v42  ;;  %v3716_v32 = vld [vmem:[#allocation6 + $0xc0] sm:$0xff]  ;;  %v3029_v42 = vsub.f32 %v12534_v52, %v12533_v40  ;;  %v12539_v40 = vld [vmem:[#allocation166_spill] sm:$0xff] }
 0x91a   : > { %v7290_v23 = vpop.eup %7289  ;;  %3846 = vadd.xlane.f32.xlu1 %v12518_v22  ;;  %7301 = vpow2.f32 %v3098_v49  ;;  %v12540_v52 = vld [vmem:[#allocation165_spill] sm:$0xff] }
 0x91b   : > { %v3929_v3 = vpop.xlane.xlu0 %3928  ;;  %3908 = vadd.xlane.f32.xlu2 %v7290_v23  ;;  %4706 = vmatmul.f32.gmra.mxu3 %v10949_v21  ;;  %v10956_v44 = vpop.eup %7291  ;;  %v3108_v1 = vmul.f32 1.442695, %v3016_v35  ;;  %7303 = vpow2.f32 %v3656_v6  ;;  %v3715_v35 = vld [vmem:[#allocation6 + $0xb8] sm:$0xff] }
 0x91c   : > { %v4002_v28 = vadd.f32 %v3929_v3, %v3810_v33  ;;  %4771 = vmatmul.f32.gmra.mxu0 %v7290_v23  ;;  %4836 = vmatmul.f32.gmra.mxu1 %v10806_v25  ;;  %v10964_v20 = vpop.eup %7293  ;;  %v3731_v25 = vld [vmem:[#allocation6 + $0x138] sm:$0xff] }
 0x91d   : > { %4253 = vperm.xlu0 %7106, %v10956_v44   ;;  %12520 = vst [vmem:[#allocation117_spill] sm:$0xff] %v10964_v20  ;;  %v3795_v33 = vmul.f32 %v10964_v20, %v3731_v25  ;;  %v12527_v23 = vld [vmem:[#allocation184_spill] sm:$0xff]  ;;  %v10975_v22 = vpop.eup %7295  ;;  %7305 = vpow2.f32 %v3108_v1 }
 0x91e   : > { %4067 = vst.msk [vmem:[#allocation6 + $0x1b0] sm:$0xff] %vm4012_vm1, %v4002_v28  ;;  %v3897_v31 = vpop.xlane.xlu2 %3896  ;;  %v10977_v28 = vpop.eup %7297  ;;  %7307 = vpow2.f32 %v3166_v9 }
 0x91f   : > { %v3986_v50 = vadd.f32 %v3897_v31, %v3794_v18  ;;  %v3164_v18 = vmul.f32 1.442695, %v3044_v39  ;;  %v10983_v49 = vpop.eup %7299  ;;  %v3019_v31 = vsub.f32 %v12530_v37, %v12529_v38  ;;  %v12535_v39 = vld [vmem:[#allocation192_spill] sm:$0xff]  ;;  %v3134_v38 = vmul.f32 1.442695, %v3029_v42 }
 0x920   : > { %12528 = vst [vmem:[#allocation138_spill] sm:$0xff] %v10983_v49  ;;  %v10987_v59 = vpop.eup %7301  ;;  %v3780_v15 = vmul.f32 %v10983_v49, %v3716_v32  ;;  %v12538_v32 = vld [vmem:[#allocation93_spill] sm:$0xff]  ;;  %v3015_v42 = vsub.f32 %v12540_v52, %v12539_v40  ;;  %v3702_v52 = vld [vmem:[#allocation6 + $0x50] sm:$0xff] }
 0x921   : > { %4051 = vst.msk [vmem:[#allocation6 + $0x130] sm:$0xff] %vm4012_vm1, %v3986_v50  ;;  %v12532_v50 = vld [vmem:[#allocation148_spill] sm:$0xff]  ;;  %7309 = vpow2.f32 %v3164_v18  ;;  %v3114_v30 = vmul.f32 1.442695, %v3019_v31  ;;  %v10996_v1 = vpop.eup %7303  ;;  %v12537_v31 = vld [vmem:[#allocation94_spill] sm:$0xff] }
 0x922   : > { %3852 = vadd.xlane.f32.xlu1 %v12527_v23 }
 0x923   : > { %v3899_v5 = vpop.xlane.xlu0 %3898  ;;  %7311 = vpow2.f32 %v3114_v30 }
 0x924   : > { %v3987_v3 = vadd.f32 %v3899_v5, %v3795_v33  ;;  %4774 = vmatmul.f32.gmra.mxu0 %v10821_v29  ;;  %4839 = vmatmul.f32.gmra.mxu1 %v10975_v22  ;;  %v12531_v29 = vld [vmem:[#allocation149_spill] sm:$0xff]  ;;  %v3779_v33 = vmul.f32 %v10987_v59, %v3715_v35  ;;  %v3022_v35 = vsub.f32 %v12538_v32, %v12537_v31  ;;  %v3106_v32 = vmul.f32 1.442695, %v3015_v42 }
 0x925   : > { %4268 = vperm.xlu0 %7106, %v10977_v28   ;;  %v3030_v25 = vsub.f32 %v12532_v50, %v12531_v29  ;;  %v3749_v29 = vld [vmem:[#allocation6 + $0x1c8] sm:$0xff]  ;;  %v12546_v42 = vld [vmem:[#allocation169_spill] sm:$0xff] }
 0x926   : > { %4052 = vst.msk [vmem:[#allocation6 + $0x138] sm:$0xff] %vm4012_vm1, %v3987_v3  ;;  %v10998_v3 = vpop.eup %7305 }
 0x927   : > { %v3136_v9 = vmul.f32 1.442695, %v3030_v25  ;;  %v11003_v37 = vpop.eup %7307  ;;  %v3748_v25 = vld [vmem:[#allocation6 + $0x1c0] sm:$0xff] }
 0x928   : > { %12536 = vst [vmem:[#allocation103_spill] sm:$0xff] %v11003_v37  ;;  %v11008_v50 = vpop.eup %7309 }
 0x929   : > { %7313 = vpow2.f32 %v3136_v9  ;;  %v3812_v30 = vmul.f32 %v11008_v50, %v3748_v25  ;;  %v11017_v31 = vpop.eup %7311  ;;  %v3734_v25 = vld [vmem:[#allocation6 + $0x150] sm:$0xff] }
 0x92a   : > { %3918 = vadd.xlane.f32.xlu1 %v12535_v39  ;;  %7315 = vpow2.f32 %v3134_v38  ;;  %v3813_v39 = vmul.f32 %v11003_v37, %v3749_v29  ;;  %12542 = vst [vmem:[#allocation49_spill] sm:$0xff] %v11017_v31  ;;  %v12544_v29 = vld [vmem:[#allocation112_spill] sm:$0xff] }
 0x92b   : > { %v3869_v6 = vpop.xlane.xlu0 %3868  ;;  %v3867_v5 = vpop.xlane.xlu2 %3866 }
 0x92c   : > { %v3972_v23 = vadd.f32 %v3869_v6, %v3780_v15  ;;  %4777 = vmatmul.f32.gmra.mxu0 %v10996_v1  ;;  %v3971_v18 = vadd.f32 %v3867_v5, %v3779_v33  ;;  %v11012_v15 = vpop.f32.mrf.mxu3  ;;  %v3120_v6 = vmul.f32 1.442695, %v3022_v35  ;;  %v12541_v33 = vld [vmem:[#allocation68_spill] sm:$0xff]  ;;  %v12545_v35 = vld [vmem:[#allocation110_spill] sm:$0xff] }
 0x92d   : > { %4283 = vperm.xlu0 %7106, %v10998_v3   ;;  %v3025_v40 = vsub.f32 %v12545_v35, %v12544_v29 }
 0x92e   : > { %4037 = vst.msk [vmem:[#allocation6 + $0xc0] sm:$0xff] %vm4012_vm1, %v3972_v23  ;;  %7317 = vpow2.f32 %v3120_v6 }
 0x92f   : > { %4036 = vst.msk [vmem:[#allocation6 + $0xb8] sm:$0xff] %vm4012_vm1, %v3971_v18  ;;  %v11021_v38 = vpop.eup %7313  ;;  %7319 = vpow2.f32 %v3106_v32  ;;  %v3126_v63 = vmul.f32 1.442695, %v3025_v40  ;;  %v12551_v40 = vld [vmem:[#allocation135_spill] sm:$0xff] }
 0x930   : > { %12543 = vst [vmem:[#allocation52_spill] sm:$0xff] %v11021_v38  ;;  %v3798_v6 = vmul.f32 %v11021_v38, %v3734_v25  ;;  %v11066_v38 = vpop.f32.mrf.mxu0 }
 0x931   : > { %7321 = vpow2.f32 %v3126_v63  ;;  %12563 = vst [vmem:[#allocation53_spill] sm:$0xff] %v11066_v38 }
 0x932   : > { %3888 = vadd.xlane.f32.xlu1 %v12541_v33  ;;  %v3733_v33 = vld [vmem:[#allocation6 + $0x148] sm:$0xff] }
 0x933   : > { %v3935_v23 = vpop.xlane.xlu0 %3934  ;;  %v3933_v18 = vpop.xlane.xlu2 %3932 }
 0x934   : > { %v4005_v5 = vadd.f32 %v3935_v23, %v3813_v39  ;;  %v4004_v9 = vadd.f32 %v3933_v18, %v3812_v30  ;;  %v11026_v39 = vpop.eup %7315  ;;  %v12547_v23 = vld [vmem:[#allocation168_spill] sm:$0xff]  ;;  %v12548_v18 = vld [vmem:[#allocation133_spill] sm:$0xff] }
 0x935   : > { %4298 = vperm.xlu0 %7106, %v11017_v31   ;;  %v3048_v30 = vsub.f32 %v12547_v23, %v12546_v42  ;;  %v3766_v37 = vmul.f32 %v12548_v18, %v3702_v52  ;;  %v3797_v35 = vmul.f32 %v11026_v39, %v3733_v33  ;;  %v11036_v32 = vpop.eup %7317  ;;  %v3719_v33 = vld [vmem:[#allocation6 + $0xd8] sm:$0xff]  ;;  %v12554_v23 = vld [vmem:[#allocation171_spill] sm:$0xff]  ;;  %v12555_v18 = vld [vmem:[#allocation101_spill] sm:$0xff] }
 0x936   : > { %4070 = vst.msk [vmem:[#allocation6 + $0x1c8] sm:$0xff] %vm4012_vm1, %v4005_v5  ;;  %v11030_v5 = vpop.f32.mrf.mxu3  ;;  %v11040_v52 = vpop.eup %7319 }
 0x937   : > { %4069 = vst.msk [vmem:[#allocation6 + $0x1c0] sm:$0xff] %vm4012_vm1, %v4004_v9  ;;  %v3172_v56 = vmul.f32 1.442695, %v3048_v30 }
 0x938   : > { %12550 = vst [vmem:[#allocation51_spill] sm:$0xff] %v11040_v52 }
 0x939   : > { %7323 = vpow2.f32 %v3172_v56  ;;  %v12558_v56 = vld [vmem:[#allocation161_spill] sm:$0xff] }
 0x93a   : > { %3858 = vadd.xlane.f32.xlu1 %v12549_v26  ;;  %v3841_v29 = vpop.xlane.xlu1 %3840  ;;  %v12552_v26 = vld [vmem:[#allocation134_spill] sm:$0xff] }
 0x93b   : > { %v3905_v9 = vpop.xlane.xlu0 %3904  ;;  %v3958_v31 = vadd.f32 %v3841_v29, %v3766_v37  ;;  %v3903_v20 = vpop.xlane.xlu2 %3902  ;;  %v3028_v25 = vsub.f32 %v12552_v26, %v12551_v40  ;;  %v12553_v37 = vld [vmem:[#allocation172_spill] sm:$0xff]  ;;  %v3752_v26 = vld [vmem:[#allocation6 + $0x1e0] sm:$0xff] }
 0x93c   : > { %v3990_v54 = vadd.f32 %v3905_v9, %v3798_v6  ;;  %v3989_v42 = vadd.f32 %v3903_v20, %v3797_v35  ;;  %v3033_v30 = vsub.f32 %v12554_v23, %v12553_v37  ;;  %v3783_v20 = vmul.f32 %v11040_v52, %v3719_v33  ;;  %v11052_v9 = vpop.eup %7321  ;;  %v12561_v33 = vld [vmem:[#allocation183_spill] sm:$0xff] }
 0x93d   : > { %4023 = vst.msk [vmem:[#allocation6 + $0x50] sm:$0xff] %vm4012_vm1, %v3958_v31  ;;  %4313 = vperm.xlu0 %7106, %v11036_v32   ;;  %v3132_v31 = vmul.f32 1.442695, %v3028_v25  ;;  %v12560_v25 = vld [vmem:[#allocation185_spill] sm:$0xff] }
 0x93e   : > { %4055 = vst.msk [vmem:[#allocation6 + $0x150] sm:$0xff] %vm4012_vm1, %v3990_v54  ;;  %v11050_v29 = vpop.f32.mrf.mxu3  ;;  %v3142_v35 = vmul.f32 1.442695, %v3033_v30  ;;  %v3018_v37 = vsub.f32 %v12561_v33, %v12560_v25  ;;  %v12567_v25 = vld [vmem:[#allocation194_spill] sm:$0xff]  ;;  %v12568_v33 = vld [vmem:[#allocation193_spill] sm:$0xff] }
 0x93f   : > { %4054 = vst.msk [vmem:[#allocation6 + $0x148] sm:$0xff] %vm4012_vm1, %v3989_v42  ;;  %v11056_v54 = vpop.eup %7323  ;;  %7325 = vpow2.f32 %v3132_v31  ;;  %v12559_v42 = vld [vmem:[#allocation160_spill] sm:$0xff] }
 0x940   : > { %12556 = vst [vmem:[#allocation131_spill] sm:$0xff] %v11050_v29  ;;  %v3031_v40 = vsub.f32 %v12559_v42, %v12558_v56  ;;  %7327 = vpow2.f32 %v3142_v35  ;;  %v3816_v23 = vmul.f32 %v11056_v54, %v3752_v26  ;;  %v3112_v29 = vmul.f32 1.442695, %v3018_v37  ;;  %v12565_v56 = vld [vmem:[#allocation181_spill] sm:$0xff]  ;;  %v12566_v42 = vld [vmem:[#allocation180_spill] sm:$0xff]  ;;  %v3737_v26 = vld [vmem:[#allocation6 + $0x168] sm:$0xff] }
 0x941   : > { %12557 = vst [vmem:[#allocation54_spill] sm:$0xff] %v11056_v54  ;;  %v12569_v54 = vld [vmem:[#allocation189_spill] sm:$0xff] }
 0x942   : > { %3924 = vadd.xlane.f32.xlu1 %v12555_v18  ;;  %v12562_v18 = vld [vmem:[#allocation70_spill] sm:$0xff] }
 0x943   : > { %v3875_v6 = vpop.xlane.xlu0 %3874 }
 0x944   : > { %v3975_v63 = vadd.f32 %v3875_v6, %v3783_v20  ;;  %v3138_v20 = vmul.f32 1.442695, %v3031_v40  ;;  %v3034_v40 = vsub.f32 %v12566_v42, %v12565_v56  ;;  %v12570_v42 = vld [vmem:[#allocation78_spill] sm:$0xff] }
 0x945   : > { %4328 = vperm.xlu0 %7106, %v11052_v9  }
 0x946   : > { %4040 = vst.msk [vmem:[#allocation6 + $0xd8] sm:$0xff] %vm4012_vm1, %v3975_v63  ;;  %v11064_v63 = vpop.eup %7325  ;;  %v11068_v31 = vpop.f32.mrf.mxu3  ;;  %7329 = vpow2.f32 %v3138_v20 }
 0x947   : > { %v11072_v35 = vpop.eup %7327  ;;  %7331 = vpow2.f32 %v3112_v29 }
 0x948   : > { %12564 = vst [vmem:[#allocation62_spill] sm:$0xff] %v11072_v35  ;;  %v3801_v37 = vmul.f32 %v11072_v35, %v3737_v26  ;;  %v3722_v26 = vld [vmem:[#allocation6 + $0xf0] sm:$0xff] }
 0x94a   : > { %3894 = vadd.xlane.f32.xlu1 %v12562_v18  ;;  %v3144_v18 = vmul.f32 1.442695, %v3034_v40  ;;  %v12571_v40 = vld [vmem:[#allocation76_spill] sm:$0xff] }
 0x94b   : > { %v3941_v30 = vpop.xlane.xlu0 %3940 }
 0x94c   : > { %v4008_v6 = vadd.f32 %v3941_v30, %v3816_v23  ;;  %v3051_v23 = vsub.f32 %v12568_v33, %v12567_v25  ;;  %v11081_v52 = vpop.eup %7329  ;;  %7333 = vpow2.f32 %v3144_v18  ;;  %v11091_v25 = vpop.f32.mrf.mxu0  ;;  %v12575_v18 = vld [vmem:[#allocation97_spill] sm:$0xff] }
 0x94d   : > { %4343 = vperm.xlu0 %7106, %v11064_v63   ;;  %v11087_v29 = vpop.eup %7331  ;;  %12572 = vst [vmem:[#allocation55_spill] sm:$0xff] %v11091_v25 }
 0x94e   : > { %4073 = vst.msk [vmem:[#allocation6 + $0x1e0] sm:$0xff] %vm4012_vm1, %v4008_v6  ;;  %v3178_v20 = vmul.f32 1.442695, %v3051_v23  ;;  %v11083_v49 = vpop.f32.mrf.mxu3  ;;  %v12573_v23 = vld [vmem:[#allocation191_spill] sm:$0xff] }
 0x952   : > { %3864 = vadd.xlane.f32.xlu1 %v10722_v12  ;;  %v3328_v30 = vpop.permute.xlu1 %3327  ;;  %v3037_v12 = vsub.f32 %v12571_v40, %v12570_v42  ;;  %v12574_v42 = vld [vmem:[#allocation98_spill] sm:$0xff] }
 0x953   : > { %v3911_v6 = vpop.xlane.xlu0 %3910  ;;  %v3529_v10 = vsub.f32 %v12569_v54, %v3328_v30  ;;  %v3786_v54 = vmul.f32 %v11087_v29, %v3722_v26  ;;  %v3040_v40 = vsub.f32 %v12575_v18, %v12574_v42 }
 0x954   : > { %v3993_v38 = vadd.f32 %v3911_v6, %v3801_v37  ;;  %v3150_v33 = vmul.f32 1.442695, %v3037_v12  ;;  %v11096_v6 = vpop.eup %7333  ;;  %v3755_v12 = vld [vmem:[#allocation6 + $0x1f8] sm:$0xff] }
 0x955   : > { %v3622_v56 = vmul.f32 1.442695, %v3529_v10  ;;  %4358 = vperm.xlu0 %7106, %v11081_v52  }
 0x956   : > { %4058 = vst.msk [vmem:[#allocation6 + $0x168] sm:$0xff] %vm4012_vm1, %v3993_v38  ;;  %v11106_v26 = vpop.f32.mrf.mxu3 }
 0x957   : > { %7335 = vpow2.f32 %v3622_v56  ;;  %12577 = vst [vmem:[#allocation65_spill] sm:$0xff] %v11106_v26 }
 0x958   : > { %7337 = vpow2.f32 %v3178_v20 }
 0x959   : > { %7339 = vpow2.f32 %v3150_v33  ;;  %v12578_v33 = vld [vmem:[#allocation56_spill] sm:$0xff] }
 0x95a   : > { %3930 = vadd.xlane.f32.xlu1 %v10730_v4  ;;  %v3493_v10 = vpop.permute.xlu1 %3492  ;;  %v12576_v4 = vld [vmem:[#allocation167_spill] sm:$0xff] }
 0x95b   : > { %v3881_v38 = vpop.xlane.xlu0 %3880  ;;  %v3562_v37 = vsub.f32 %v12573_v23, %v3493_v10  ;;  %v3531_v56 = vsub.f32 %v12576_v4, %v10815_v0  ;;  %v11108_v10 = vpop.f32.mrf.mxu0 }
 0x95c   : > { %v3978_v30 = vadd.f32 %v3881_v38, %v3786_v54  ;;  %v3156_v54 = vmul.f32 1.442695, %v3040_v40  ;;  %v12580_v40 = vld [vmem:[#allocation130_spill] sm:$0xff] }
 0x95d   : > { %v7336_v35 = vpop.eup %7335  ;;  %v3688_v62 = vmul.f32 1.442695, %v3562_v37  ;;  %4373 = vperm.xlu0 %7106, %v11096_v6   ;;  %v3626_v23 = vmul.f32 1.442695, %v3531_v56 }
 0x95e   : > { %4043 = vst.msk [vmem:[#allocation6 + $0xf0] sm:$0xff] %vm4012_vm1, %v3978_v30  ;;  %v11102_v20 = vpop.eup %7337  ;;  %3878 = vadd.xlane.f32.xlu2 %v7336_v35  ;;  %4709 = vmatmul.f32.gmra.mxu3 %v7336_v35  ;;  %v11122_v56 = vpop.f32.mrf.mxu3 }
 0x95f   : > { %7341 = vpow2.f32 %v3688_v62  ;;  %v3819_v38 = vmul.f32 %v11102_v20, %v3755_v12  ;;  %v11113_v0 = vpop.eup %7339  ;;  %v12579_v62 = vld [vmem:[#allocation132_spill] sm:$0xff] }
 0x960   : > { %7343 = vpow2.f32 %v3156_v54  ;;  %v3043_v12 = vsub.f32 %v12580_v40, %v12579_v62  ;;  %v4090_v40 = vld [vmem:[#allocation7 + $0x68] sm:$0xff] }
 0x961   : > { %7345 = vpow2.f32 %v3626_v23 }
 0x962   : > { %3900 = vadd.xlane.f32.xlu1 %v10737_v58  ;;  %v3418_v37 = vpop.permute.xlu1 %3417 }
 0x963   : > { %v3947_v30 = vpop.xlane.xlu0 %3946  ;;  %v3547_v42 = vsub.f32 %v12578_v33, %v3418_v37  ;;  %v11120_v58 = vpop.f32.mrf.mxu0 }
 0x964   : > { %v4011_v18 = vadd.f32 %v3947_v30, %v3819_v38  ;;  %v3162_v38 = vmul.f32 1.442695, %v3043_v12  ;;  %v12581_v30 = vld [vmem:[#allocation186_spill] sm:$0xff] }
 0x965   : > { %v7342_v35 = vpop.eup %7341  ;;  %v3658_v4 = vmul.f32 1.442695, %v3547_v42  ;;  %4388 = vperm.xlu0 %7106, %v11113_v0   ;;  %v3014_v33 = vsub.f32 %v12581_v30, %v10435_v13  ;;  %v11131_v42 = vpop.f32.mrf.mxu2 }
 0x966   : > { %4076 = vst.msk [vmem:[#allocation6 + $0x1f8] sm:$0xff] %vm4012_vm1, %v4011_v18  ;;  %3944 = vadd.xlane.f32.xlu2 %v7342_v35  ;;  %4712 = vmatmul.f32.gmra.mxu3 %v10837_v2  ;;  %v11125_v54 = vpop.eup %7343  ;;  %v12582_v2 = vld [vmem:[#allocation157_spill] sm:$0xff]  ;;  %v12583_v18 = vld [vmem:[#allocation156_spill] sm:$0xff] }
 0x967   : > { %7347 = vpow2.f32 %v3658_v4  ;;  %4842 = vmatmul.f32.gmra.mxu1 %v7342_v35  ;;  %v11127_v37 = vpop.eup %7345  ;;  %v3046_v35 = vsub.f32 %v12583_v18, %v12582_v2  ;;  %v11138_v4 = vpop.f32.mrf.mxu3 }
 0x968   : > { %7349 = vpow2.f32 %v3162_v38  ;;  %v12585_v38 = vld [vmem:[#allocation187_spill] sm:$0xff] }
 0x969   : > { %v3168_v62 = vmul.f32 1.442695, %v3046_v35  ;;  %v3047_v30 = vsub.f32 %v12585_v38, %v10444_v24 }
 0x96a   : > { %3870 = vadd.xlane.f32.xlu1 %v10786_v43  ;;  %v3104_v43 = vmul.f32 1.442695, %v3014_v33  ;;  %v12587_v33 = vld [vmem:[#allocation178_spill] sm:$0xff] }
 0x96b   : > { %v11141_v13 = vpop.f32.mrf.mxu0  ;;  %v3170_v25 = vmul.f32 1.442695, %v3047_v30 }
 0x96c   : > { %12584 = vst [vmem:[#allocation69_spill] sm:$0xff] %v11141_v13  ;;  %7351 = vpow2.f32 %v3104_v43  ;;  %v3718_v43 = vld [vmem:[#allocation6 + $0xd0] sm:$0xff] }
 0x96d   : > { %v7348_v23 = vpop.eup %7347  ;;  %4403 = vperm.xlu0 %7106, %v11125_v54   ;;  %7353 = vpow2.f32 %v3168_v62  ;;  %v4645_v35 = vpop.f32.mrf.mxu2  ;;  %v12589_v62 = vld [vmem:[#allocation195_spill] sm:$0xff] }
 0x96e   : > { %3914 = vadd.xlane.f32.xlu2 %v7348_v23  ;;  %4715 = vmatmul.f32.gmra.mxu3 %v11127_v37  ;;  %v11143_v12 = vpop.eup %7349  ;;  %7355 = vpow2.f32 %v3170_v25 }
 0x96f   : > { %4780 = vmatmul.f32.gmra.mxu0 %v7348_v23  ;;  %4845 = vmatmul.f32.gmra.mxu1 %v10855_v51  ;;  %v12586_v51 = vld [vmem:[#allocation179_spill] sm:$0xff]  ;;  %v11154_v24 = vpop.f32.mrf.mxu3 }
 0x970   : > { %v3049_v2 = vsub.f32 %v12587_v33, %v12586_v51  ;;  %12588 = vst [vmem:[#allocation64_spill] sm:$0xff] %v11154_v24  ;;  %v3032_v51 = vsub.f32 %v12589_v62, %v10490_v8  ;;  %v3751_v62 = vld [vmem:[#allocation6 + $0x1d8] sm:$0xff]  ;;  %v4099_v24 = vld [vmem:[#allocation7 + $0xb0] sm:$0xff] }
 0x972   : > { %3936 = vadd.xlane.f32.xlu1 %v10799_v36  ;;  %v11150_v26 = vpop.eup %7351  ;;  %v3174_v13 = vmul.f32 1.442695, %v3049_v2 }
 0x973   : > { %v11156_v38 = vpop.eup %7353  ;;  %v3782_v30 = vmul.f32 %v11150_v26, %v3718_v43 }
 0x974   : > { %7357 = vpow2.f32 %v3174_v13  ;;  %v11168_v8 = vpop.eup %7355  ;;  %v4096_v13 = vld [vmem:[#allocation7 + $0x98] sm:$0xff] }
 0x975   : > { %4418 = vperm.xlu0 %7106, %v11143_v12  }
 0x976   : > { %v4209_v23 = vpop.permute.xlu0 %4208 }
 0x977   : > { %v4474_v18 = vmul.f32 %v4209_v23, %v4090_v40  ;;  %v4093_v40 = vld [vmem:[#allocation7 + $0x80] sm:$0xff]  ;;  %v11160_v23 = vpop.f32.mrf.mxu0 }
 0x979   : > { %v4862_v36 = vadd.f32 %v4645_v35, %v4474_v18  ;;  %v3140_v35 = vmul.f32 1.442695, %v3032_v51  ;;  %v4698_v51 = vpop.f32.mrf.mxu3 }
 0x97a   : > { %3906 = vadd.xlane.f32.xlu1 %v10811_v53  ;;  %v11172_v43 = vpop.eup %7357 }
 0x97b   : > { %4926 = vst.msk [vmem:[#allocation7 + $0x68] sm:$0xff] %vm1377_vm2, %v4862_v36  ;;  %v11164_v36 = vpop.f32.mrf.mxu1  ;;  %7359 = vpow2.f32 %v3140_v35  ;;  %v3705_v35 = vld [vmem:[#allocation6 + $0x68] sm:$0xff] }
 0x97c   : > { %12590 = vst [vmem:[#allocation107_spill] sm:$0xff] %v11164_v36  ;;  %v3736_v36 = vld [vmem:[#allocation6 + $0x160] sm:$0xff] }
 0x97d   : > { %4433 = vperm.xlu0 %7106, %v11156_v38  }
 0x97e   : > { %v4224_v33 = vpop.permute.xlu0 %4223  ;;  %v3873_v2 = vpop.xlane.xlu2 %3872 }
 0x97f   : > { %v4477_v53 = vmul.f32 %v4224_v33, %v4093_v40  ;;  %v3974_v18 = vadd.f32 %v3873_v2, %v3782_v30  ;;  %v11174_v40 = vpop.f32.mrf.mxu0 }
 0x981   : > { %v4865_v25 = vadd.f32 %v11012_v15, %v4477_v53  ;;  %4039 = vst.msk [vmem:[#allocation6 + $0xd0] sm:$0xff] %vm4012_vm1, %v3974_v18  ;;  %v3815_v15 = vmul.f32 %v11168_v8, %v3751_v62 }
 0x982   : > { %3876 = vadd.xlane.f32.xlu1 %v10949_v21 }
 0x983   : > { %4929 = vst.msk [vmem:[#allocation7 + $0x80] sm:$0xff] %vm1377_vm2, %v4865_v25  ;;  %v11179_v53 = vpop.f32.mrf.mxu1  ;;  %v11183_v25 = vpop.eup %7359 }
 0x985   : > { %4448 = vperm.xlu0 %7106, %v11172_v43  }
 0x986   : > { %4213 = vperm.xlu2 %7108, %v10845_v60   ;;  %v4239_v30 = vpop.permute.xlu0 %4238  ;;  %v3939_v33 = vpop.xlane.xlu2 %3938  ;;  %v3769_v60 = vmul.f32 %v10894_v7, %v3705_v35  ;;  %v3708_v7 = vld [vmem:[#allocation6 + $0x80] sm:$0xff] }
 0x987   : > { %v4480_v2 = vmul.f32 %v4239_v30, %v4096_v13  ;;  %v4007_v21 = vadd.f32 %v3939_v33, %v3815_v15  ;;  %v3800_v13 = vmul.f32 %v11183_v25, %v3736_v36  ;;  %v11192_v33 = vpop.f32.mrf.mxu0 }
 0x989   : > { %v4868_v18 = vadd.f32 %v11068_v31, %v4480_v2  ;;  %4072 = vst.msk [vmem:[#allocation6 + $0x1d8] sm:$0xff] %vm4012_vm1, %v4007_v21 }
 0x98a   : > { %3942 = vadd.xlane.f32.xlu1 %v10975_v22 }
 0x98b   : > { %4932 = vst.msk [vmem:[#allocation7 + $0x98] sm:$0xff] %vm1377_vm2, %v4868_v18  ;;  %v11195_v18 = vpop.f32.mrf.mxu1 }
 0x98d   : > { %v3847_v62 = vpop.xlane.xlu1 %3846 }
 0x98e   : > { %v3961_v15 = vadd.f32 %v3847_v62, %v3769_v60  ;;  %4228 = vperm.xlu2 %7108, %v10862_v61   ;;  %v11190_v31 = vpop.f32.mrf.mxu3  ;;  %v3909_v30 = vpop.xlane.xlu2 %3908  ;;  %v3772_v61 = vmul.f32 %v10914_v57, %v3708_v7  ;;  %v4102_v60 = vld [vmem:[#allocation7 + $0xc8] sm:$0xff] }
 0x98f   : > { %v4254_v2 = vpop.permute.xlu0 %4253  ;;  %v3992_v21 = vadd.f32 %v3909_v30, %v3800_v13  ;;  %v11206_v30 = vpop.f32.mrf.mxu0 }
 0x990   : > { %4026 = vst.msk [vmem:[#allocation6 + $0x68] sm:$0xff] %vm4012_vm1, %v3961_v15  ;;  %v4483_v22 = vmul.f32 %v4254_v2, %v4099_v24 }
 0x991   : > { %4057 = vst.msk [vmem:[#allocation6 + $0x160] sm:$0xff] %vm4012_vm1, %v3992_v21 }
 0x992   : > { %v4871_v36 = vadd.f32 %v11122_v56, %v4483_v22  ;;  %3912 = vadd.xlane.f32.xlu1 %v10996_v1  ;;  %v3741_v56 = vld [vmem:[#allocation6 + $0x188] sm:$0xff]  ;;  %v4105_v22 = vld [vmem:[#allocation7 + $0xe0] sm:$0xff] }
 0x993   : > { %v11208_v1 = vpop.f32.mrf.mxu1  ;;  %v3805_v57 = vmul.f32 %v11113_v0, %v3741_v56 }
 0x994   : > { %4935 = vst.msk [vmem:[#allocation7 + $0xb0] sm:$0xff] %vm1377_vm2, %v4871_v36 }
 0x995   : > { %v3853_v35 = vpop.xlane.xlu1 %3852 }
 0x996   : > { %v3964_v62 = vadd.f32 %v3853_v35, %v3772_v61  ;;  %4243 = vperm.xlu2 %7108, %v10909_v11   ;;  %v11203_v13 = vpop.f32.mrf.mxu3  ;;  %v12591_v11 = vld [vmem:[#allocation46_spill] sm:$0xff] }
 0x997   : > { %v4269_v24 = vpop.permute.xlu0 %4268  ;;  %v3017_v36 = vsub.f32 %v12591_v11, %v10540_v47 }
 0x998   : > { %4029 = vst.msk [vmem:[#allocation6 + $0x80] sm:$0xff] %vm4012_vm1, %v3964_v62  ;;  %v4486_v15 = vmul.f32 %v4269_v24, %v4102_v60  ;;  %v11216_v60 = vpop.f32.mrf.mxu0  ;;  %v3726_v62 = vld [vmem:[#allocation6 + $0x110] sm:$0xff] }
 0x999   : > { %v3790_v0 = vmul.f32 %v11036_v32, %v3726_v62 }
 0x99a   : > { %v4874_v2 = vadd.f32 %v4698_v51, %v4486_v15  ;;  %v3110_v15 = vmul.f32 1.442695, %v3017_v36  ;;  %v4111_v36 = vld [vmem:[#allocation7 + $0x110] sm:$0xff] }
 0x99b   : > { %v11220_v56 = vpop.f32.mrf.mxu1 }
 0x99c   : > { %4938 = vst.msk [vmem:[#allocation7 + $0xc8] sm:$0xff] %vm1377_vm2, %v4874_v2  ;;  %7361 = vpow2.f32 %v3110_v15  ;;  %v4114_v15 = vld [vmem:[#allocation7 + $0x128] sm:$0xff] }
 0x99d   : > { %v3919_v21 = vpop.xlane.xlu1 %3918 }
 0x99e   : > { %v3997_v7 = vadd.f32 %v3919_v21, %v3805_v57  ;;  %4258 = vperm.xlu2 %7108, %v10987_v59   ;;  %v4707_v51 = vpop.f32.mrf.mxu3  ;;  %v3711_v57 = vld [vmem:[#allocation6 + $0x98] sm:$0xff] }
 0x99f   : > { %v4284_v61 = vpop.permute.xlu0 %4283 }
 0x9a0   : > { %4062 = vst.msk [vmem:[#allocation6 + $0x188] sm:$0xff] %vm4012_vm1, %v3997_v7  ;;  %v4489_v35 = vmul.f32 %v4284_v61, %v4105_v22  ;;  %v11226_v21 = vpop.f32.mrf.mxu0  ;;  %v3775_v22 = vmul.f32 %v10932_v46, %v3711_v57 }
 0x9a2   : > { %v4877_v24 = vadd.f32 %v4707_v51, %v4489_v35  ;;  %v11230_v7 = vpop.eup %7361  ;;  %v3744_v51 = vld [vmem:[#allocation6 + $0x1a0] sm:$0xff] }
 0x9a3   : > { %v11232_v32 = vpop.f32.mrf.mxu1 }
 0x9a4   : > { %4941 = vst.msk [vmem:[#allocation7 + $0xe0] sm:$0xff] %vm1377_vm2, %v4877_v24 }
 0x9a5   : > { %v3889_v59 = vpop.xlane.xlu1 %3888 }
 0x9a6   : > { %v3982_v2 = vadd.f32 %v3889_v59, %v3790_v0  ;;  %4273 = vperm.xlu2 %7108, %v11150_v26  }
 0x9a7   : > { %v11223_v47 = vpop.permute.xlu0 %4298 }
 0x9a8   : > { %4047 = vst.msk [vmem:[#allocation6 + $0x110] sm:$0xff] %vm4012_vm1, %v3982_v2  ;;  %v4769_v46 = vpop.f32.mrf.mxu0 }
 0x9ab   : > { %4203 = vperm.xlu1 %7107, %v10766_v41   ;;  %v3808_v41 = vmul.f32 %v11125_v54, %v3744_v51  ;;  %v11240_v59 = vpop.f32.mrf.mxu1 }
 0x9ad   : > { %v3859_v11 = vpop.xlane.xlu1 %3858 }
 0x9ae   : > { %v3967_v61 = vadd.f32 %v3859_v11, %v3775_v22  ;;  %4288 = vperm.xlu2 %7108, %v11230_v7   ;;  %v3729_v22 = vld [vmem:[#allocation6 + $0x128] sm:$0xff] }
 0x9af   : > { %v4314_v26 = vpop.permute.xlu0 %4313 }
 0x9b0   : > { %4032 = vst.msk [vmem:[#allocation6 + $0x98] sm:$0xff] %vm4012_vm1, %v3967_v61  ;;  %v4495_v35 = vmul.f32 %v4314_v26, %v4111_v36  ;;  %v11246_v54 = vpop.f32.mrf.mxu0  ;;  %v4117_v61 = vld [vmem:[#allocation7 + $0x140] sm:$0xff] }
 0x9b2   : > { %v4883_v62 = vadd.f32 %v11108_v10, %v4495_v35  ;;  %v3793_v10 = vmul.f32 %v11052_v9, %v3729_v22 }
 0x9b3   : > { %v11250_v51 = vpop.f32.mrf.mxu1 }
 0x9b4   : > { %4947 = vst.msk [vmem:[#allocation7 + $0x110] sm:$0xff] %vm1377_vm2, %v4883_v62  ;;  %v3714_v62 = vld [vmem:[#allocation6 + $0xb0] sm:$0xff] }
 0x9b5   : > { %v3925_v24 = vpop.xlane.xlu1 %3924  ;;  %v3778_v9 = vmul.f32 %v10956_v44, %v3714_v62 }
 0x9b6   : > { %v4000_v0 = vadd.f32 %v3925_v24, %v3808_v41  ;;  %4303 = vperm.xlu2 %7108, %v10828_v14   ;;  %v4120_v24 = vld [vmem:[#allocation7 + $0x158] sm:$0xff] }
 0x9b7   : > { %v4329_v2 = vpop.permute.xlu0 %4328 }
 0x9b8   : > { %4065 = vst.msk [vmem:[#allocation6 + $0x1a0] sm:$0xff] %vm4012_vm1, %v4000_v0  ;;  %v4498_v57 = vmul.f32 %v4329_v2, %v4114_v15  ;;  %v11258_v2 = vpop.f32.mrf.mxu0 }
 0x9ba   : > { %v4886_v11 = vadd.f32 %v11160_v23, %v4498_v57 }
 0x9bc   : > { %4950 = vst.msk [vmem:[#allocation7 + $0x128] sm:$0xff] %vm1377_vm2, %v4886_v11  ;;  %v11261_v11 = vpop.f32.mrf.mxu1 }
 0x9bd   : > { %v3895_v36 = vpop.xlane.xlu1 %3894 }
 0x9be   : > { %v3985_v26 = vadd.f32 %v3895_v36, %v3793_v10  ;;  %4318 = vperm.xlu2 %7108, %v10891_v48   ;;  %v12592_v48 = vld [vmem:[#allocation47_spill] sm:$0xff] }
 0x9bf   : > { %v4344_v14 = vpop.permute.xlu0 %4343  ;;  %v3050_v0 = vsub.f32 %v12592_v48, %v10553_v55  ;;  %v12593_v55 = vld [vmem:[#allocation79_spill] sm:$0xff] }
 0x9c0   : > { %4050 = vst.msk [vmem:[#allocation6 + $0x128] sm:$0xff] %vm4012_vm1, %v3985_v26  ;;  %v4501_v35 = vmul.f32 %v4344_v14, %v4117_v61  ;;  %v3721_v26 = vld [vmem:[#allocation6 + $0xe8] sm:$0xff] }
 0x9c1   : > { %v3176_v36 = vmul.f32 1.442695, %v3050_v0 }
 0x9c2   : > { %v4889_v23 = vadd.f32 %v11206_v30, %v4501_v35  ;;  %v3747_v30 = vld [vmem:[#allocation6 + $0x1b8] sm:$0xff]  ;;  %v3035_v35 = vsub.f32 %v12593_v55, %v10592_v45 }
 0x9c3   : > { %v3811_v44 = vmul.f32 %v11143_v12, %v3747_v30  ;;  %7363 = vpow2.f32 %v3176_v36 }
 0x9c4   : > { %4953 = vst.msk [vmem:[#allocation7 + $0x140] sm:$0xff] %vm1377_vm2, %v4889_v23  ;;  %v3146_v48 = vmul.f32 1.442695, %v3035_v35  ;;  %v11270_v0 = vpop.f32.mrf.mxu1  ;;  %v4129_v35 = vld [vmem:[#allocation7 + $0x1a0] sm:$0xff] }
 0x9c5   : > { %v3865_v41 = vpop.xlane.xlu1 %3864 }
 0x9c6   : > { %v3970_v15 = vadd.f32 %v3865_v41, %v3778_v9  ;;  %4333 = vperm.xlu2 %7108, %v10944_v34   ;;  %v4123_v34 = vld [vmem:[#allocation7 + $0x170] sm:$0xff]  ;;  %v4778_v9 = vpop.f32.mrf.mxu0  ;;  %7365 = vpow2.f32 %v3146_v48 }
 0x9c7   : > { %v4359_v57 = vpop.permute.xlu0 %4358 }
 0x9c8   : > { %4035 = vst.msk [vmem:[#allocation6 + $0xb0] sm:$0xff] %vm4012_vm1, %v3970_v15  ;;  %v4504_v22 = vmul.f32 %v4359_v57, %v4120_v24  ;;  %v3732_v24 = vld [vmem:[#allocation6 + $0x140] sm:$0xff] }
 0x9c9   : > { %v11274_v57 = vpop.eup %7363 }
 0x9ca   : > { %v4892_v10 = vadd.f32 %v4769_v46, %v4504_v22  ;;  %v3785_v46 = vmul.f32 %v11230_v7, %v3721_v26  ;;  %v4126_v7 = vld [vmem:[#allocation7 + $0x188] sm:$0xff]  ;;  %v3754_v22 = vld [vmem:[#allocation6 + $0x1f0] sm:$0xff] }
 0x9cc   : > { %4956 = vst.msk [vmem:[#allocation7 + $0x158] sm:$0xff] %vm1377_vm2, %v4892_v10  ;;  %v4831_v55 = vpop.f32.mrf.mxu1 }
 0x9cd   : > { %v3931_v61 = vpop.xlane.xlu1 %3930 }
 0x9ce   : > { %v4003_v14 = vadd.f32 %v3931_v61, %v3811_v44  ;;  %4348 = vperm.xlu2 %7108, %v11026_v39   ;;  %v3796_v39 = vmul.f32 %v11064_v63, %v3732_v24  ;;  %v3818_v44 = vmul.f32 %v11274_v57, %v3754_v22  ;;  %v3717_v61 = vld [vmem:[#allocation6 + $0xc8] sm:$0xff] }
 0x9cf   : > { %v4374_v62 = vpop.permute.xlu0 %4373 }
 0x9d0   : > { %4068 = vst.msk [vmem:[#allocation6 + $0x1b8] sm:$0xff] %vm4012_vm1, %v4003_v14  ;;  %v4507_v23 = vmul.f32 %v4374_v62, %v4123_v34  ;;  %v7366_v14 = vpop.eup %7365  ;;  %v3739_v62 = vld [vmem:[#allocation6 + $0x178] sm:$0xff] }
 0x9d1   : > { %v3879_v41 = vpop.xlane.xlu2 %3878 }
 0x9d2   : > { %v4895_v12 = vadd.f32 %v4778_v9, %v4507_v23  ;;  %v3977_v15 = vadd.f32 %v3879_v41, %v3785_v46  ;;  %v3803_v41 = vmul.f32 %v7366_v14, %v3739_v62 }
 0x9d4   : > { %4959 = vst.msk [vmem:[#allocation7 + $0x170] sm:$0xff] %vm1377_vm2, %v4895_v12  ;;  %v3750_v12 = vld [vmem:[#allocation6 + $0x1d0] sm:$0xff] }
 0x9d5   : > { %4042 = vst.msk [vmem:[#allocation6 + $0xe8] sm:$0xff] %vm4012_vm1, %v3977_v15  ;;  %v3901_v45 = vpop.xlane.xlu1 %3900  ;;  %3882 = vadd.xlane.f32.xlu1 %v11127_v37  ;;  %v3781_v37 = vmul.f32 %v10977_v28, %v3717_v61  ;;  %v3814_v48 = vmul.f32 %v11156_v38, %v3750_v12 }
 0x9d6   : > { %v3988_v30 = vadd.f32 %v3901_v45, %v3796_v39  ;;  %4363 = vperm.xlu2 %7108, %v11183_v25   ;;  %v11291_v39 = vpop.f32.mrf.mxu1 }
 0x9d7   : > { %v4389_v10 = vpop.permute.xlu0 %4388 }
 0x9d8   : > { %4053 = vst.msk [vmem:[#allocation6 + $0x140] sm:$0xff] %vm4012_vm1, %v3988_v30  ;;  %v4510_v36 = vmul.f32 %v4389_v10, %v4126_v7  ;;  %v4132_v7 = vld [vmem:[#allocation7 + $0x1b8] sm:$0xff]  ;;  %v4091_v10 = vld [vmem:[#allocation7 + $0x70] sm:$0xff] }
 0x9d9   : > { %v3945_v63 = vpop.xlane.xlu2 %3944 }
 0x9da   : > { %v4898_v34 = vadd.f32 %v11179_v53, %v4510_v36  ;;  %v4010_v26 = vadd.f32 %v3945_v63, %v3818_v44  ;;  %v3735_v63 = vld [vmem:[#allocation6 + $0x158] sm:$0xff] }
 0x9dc   : > { %4962 = vst.msk [vmem:[#allocation7 + $0x188] sm:$0xff] %vm1377_vm2, %v4898_v34  ;;  %v4648_v34 = vpop.f32.mrf.mxu2 }
 0x9dd   : > { %4075 = vst.msk [vmem:[#allocation6 + $0x1f0] sm:$0xff] %vm4012_vm1, %v4010_v26  ;;  %v3871_v25 = vpop.xlane.xlu1 %3870 }
 0x9de   : > { %v3973_v23 = vadd.f32 %v3871_v25, %v3781_v37  ;;  %4378 = vperm.xlu2 %7108, %v7366_v14   ;;  %v3799_v37 = vmul.f32 %v11081_v52, %v3735_v63  ;;  %v4108_v14 = vld [vmem:[#allocation7 + $0xf8] sm:$0xff]  ;;  %v4135_v25 = vld [vmem:[#allocation7 + $0x1d0] sm:$0xff]  ;;  %v11304_v62 = vpop.f32.mrf.mxu1 }
 0x9df   : > { %v4404_v46 = vpop.permute.xlu0 %4403 }
 0x9e0   : > { %4038 = vst.msk [vmem:[#allocation6 + $0xc8] sm:$0xff] %vm4012_vm1, %v3973_v23  ;;  %v4513_v9 = vmul.f32 %v4404_v46, %v4129_v35  ;;  %v4094_v23 = vld [vmem:[#allocation7 + $0x88] sm:$0xff]  ;;  %v4492_v46 = vmul.f32 %v11223_v47, %v4108_v14 }
 0x9e1   : > { %v11286_v53 = vpop.f32.mrf.mxu3  ;;  %v3915_v24 = vpop.xlane.xlu2 %3914 }
 0x9e2   : > { %v4901_v28 = vadd.f32 %v11220_v56, %v4513_v9  ;;  %v3995_v15 = vadd.f32 %v3915_v24, %v3803_v41  ;;  %v3720_v24 = vld [vmem:[#allocation6 + $0xe0] sm:$0xff] }
 0x9e4   : > { %4965 = vst.msk [vmem:[#allocation7 + $0x1a0] sm:$0xff] %vm1377_vm2, %v4901_v28 }
 0x9e5   : > { %4060 = vst.msk [vmem:[#allocation6 + $0x178] sm:$0xff] %vm4012_vm1, %v3995_v15  ;;  %v3937_v45 = vpop.xlane.xlu1 %3936 }
 0x9e6   : > { %v4006_v22 = vadd.f32 %v3937_v45, %v3814_v48  ;;  %4393 = vperm.xlu2 %7108, %v10876_v16   ;;  %v4138_v45 = vld [vmem:[#allocation7 + $0x1e8] sm:$0xff] }
 0x9e7   : > { %v4419_v30 = vpop.permute.xlu0 %4418 }
 0x9e8   : > { %4071 = vst.msk [vmem:[#allocation6 + $0x1d0] sm:$0xff] %vm4012_vm1, %v4006_v22  ;;  %v4516_v36 = vmul.f32 %v4419_v30, %v4132_v7  ;;  %v4097_v7 = vld [vmem:[#allocation7 + $0xa0] sm:$0xff]  ;;  %v4840_v30 = vpop.f32.mrf.mxu1 }
 0x9e9   : > { %v11296_v56 = vpop.f32.mrf.mxu3  ;;  %v4214_v44 = vpop.permute.xlu2 %4213 }
 0x9ea   : > { %v4904_v38 = vadd.f32 %v11250_v51, %v4516_v36  ;;  %v4475_v61 = vmul.f32 %v4214_v44, %v4091_v10  ;;  %v3753_v10 = vld [vmem:[#allocation6 + $0x1e8] sm:$0xff] }
 0x9eb   : > { %v3817_v63 = vmul.f32 %v11172_v43, %v3753_v10  ;;  %v12600_v10 = vld [vmem:[#allocation117_spill] sm:$0xff] }
 0x9ec   : > { %4968 = vst.msk [vmem:[#allocation7 + $0x1b8] sm:$0xff] %vm1377_vm2, %v4904_v38  ;;  %v4863_v26 = vadd.f32 %v4648_v34, %v4475_v61  ;;  %v4100_v61 = vld [vmem:[#allocation7 + $0xb8] sm:$0xff] }
 0x9ed   : > { %v3907_v16 = vpop.xlane.xlu1 %3906 }
 0x9ee   : > { %4927 = vst.msk [vmem:[#allocation7 + $0x70] sm:$0xff] %vm1377_vm2, %v4863_v26  ;;  %v3991_v35 = vadd.f32 %v3907_v16, %v3799_v37  ;;  %4218 = vperm.xlu1 %7107, %v10852_v27   ;;  %4408 = vperm.xlu2 %7108, %v10929_v17   ;;  %v3784_v17 = vmul.f32 %v10998_v3, %v3720_v24  ;;  %v3738_v26 = vld [vmem:[#allocation6 + $0x170] sm:$0xff] }
 0x9ef   : > { %v4434_v51 = vpop.permute.xlu0 %4433 }
 0x9f0   : > { %4056 = vst.msk [vmem:[#allocation6 + $0x158] sm:$0xff] %vm4012_vm1, %v3991_v35  ;;  %v4519_v9 = vmul.f32 %v4434_v51, %v4135_v25  ;;  %v12595_v25 = vld [vmem:[#allocation138_spill] sm:$0xff]  ;;  %v4103_v35 = vld [vmem:[#allocation7 + $0xd0] sm:$0xff] }
 0x9f1   : > { %v4716_v52 = vpop.f32.mrf.mxu3  ;;  %v4229_v41 = vpop.permute.xlu2 %4228 }
 0x9f2   : > { %v4907_v12 = vadd.f32 %v4831_v55, %v4519_v9  ;;  %v4880_v28 = vadd.f32 %v4716_v52, %v4492_v46  ;;  %v4478_v15 = vmul.f32 %v4229_v41, %v4094_v23 }
 0x9f4   : > { %4971 = vst.msk [vmem:[#allocation7 + $0x1d0] sm:$0xff] %vm1377_vm2, %v4907_v12  ;;  %v4866_v27 = vadd.f32 %v11030_v5, %v4478_v15  ;;  %v4089_v12 = vld [vmem:[#allocation7 + $0x60] sm:$0xff] }
 0x9f5   : > { %4944 = vst.msk [vmem:[#allocation7 + $0xf8] sm:$0xff] %vm1377_vm2, %v4880_v28  ;;  %v3877_v48 = vpop.xlane.xlu1 %3876  ;;  %v12597_v28 = vld [vmem:[#allocation53_spill] sm:$0xff] }
 0x9f6   : > { %4930 = vst.msk [vmem:[#allocation7 + $0x88] sm:$0xff] %vm1377_vm2, %v4866_v27  ;;  %v3976_v47 = vadd.f32 %v3877_v48, %v3784_v17  ;;  %4233 = vperm.xlu1 %7107, %v10871_v19   ;;  %4423 = vperm.xlu2 %7108, %v11008_v50   ;;  %v12594_v50 = vld [vmem:[#allocation89_spill] sm:$0xff]  ;;  %v12598_v17 = vld [vmem:[#allocation48_spill] sm:$0xff] }
 0x9f7   : > { %v4449_v55 = vpop.permute.xlu0 %4448  ;;  %v4112_v48 = vld [vmem:[#allocation7 + $0x118] sm:$0xff] }
 0x9f8   : > { %4041 = vst.msk [vmem:[#allocation6 + $0xe0] sm:$0xff] %vm4012_vm1, %v3976_v47  ;;  %v4522_v22 = vmul.f32 %v4449_v55, %v4138_v45  ;;  %v12599_v55 = vld [vmem:[#allocation59_spill] sm:$0xff] }
 0x9f9   : > { %v4244_v5 = vpop.permute.xlu2 %4243 }
 0x9fa   : > { %v4910_v3 = vadd.f32 %v4840_v30, %v4522_v22  ;;  %v4481_v36 = vmul.f32 %v4244_v5, %v4097_v7  ;;  %v4115_v7 = vld [vmem:[#allocation7 + $0x130] sm:$0xff] }
 0x9fc   : > { %4974 = vst.msk [vmem:[#allocation7 + $0x1e8] sm:$0xff] %vm1377_vm2, %v4910_v3  ;;  %v4869_v44 = vadd.f32 %v11083_v49, %v4481_v36  ;;  %v3802_v49 = vmul.f32 %v11096_v6, %v3738_v26  ;;  %v4106_v6 = vld [vmem:[#allocation7 + $0xe8] sm:$0xff] }
 0x9fd   : > { %v3943_v38 = vpop.xlane.xlu1 %3942 }
 0x9fe   : > { %4933 = vst.msk [vmem:[#allocation7 + $0xa0] sm:$0xff] %vm1377_vm2, %v4869_v44  ;;  %v4009_v19 = vadd.f32 %v3943_v38, %v3817_v63  ;;  %4248 = vperm.xlu1 %7107, %v12594_v50   ;;  %4438 = vperm.xlu2 %7108, %v11168_v8   ;;  %v4121_v63 = vld [vmem:[#allocation7 + $0x160] sm:$0xff] }
 0xa00   : > { %4074 = vst.msk [vmem:[#allocation6 + $0x1e8] sm:$0xff] %vm4012_vm1, %v4009_v19 }
 0xa01   : > { %v4259_v34 = vpop.permute.xlu2 %4258 }
 0xa02   : > { %v4484_v37 = vmul.f32 %v4259_v34, %v4100_v61  ;;  %v4124_v61 = vld [vmem:[#allocation7 + $0x178] sm:$0xff] }
 0xa04   : > { %v4872_v14 = vadd.f32 %v11138_v4, %v4484_v37  ;;  %v12596_v4 = vld [vmem:[#allocation51_spill] sm:$0xff]  ;;  %v4781_v37 = vpop.f32.mrf.mxu0 }
 0xa05   : > { %v3913_v16 = vpop.xlane.xlu1 %3912 }
 0xa06   : > { %4936 = vst.msk [vmem:[#allocation7 + $0xb8] sm:$0xff] %vm1377_vm2, %v4872_v14  ;;  %v3994_v43 = vadd.f32 %v3913_v16, %v3802_v49  ;;  %4263 = vperm.xlu1 %7107, %v12595_v25   ;;  %4453 = vperm.xlu2 %7108, %v11274_v57   ;;  %v4109_v57 = vld [vmem:[#allocation7 + $0x100] sm:$0xff]  ;;  %v3723_v49 = vld [vmem:[#allocation6 + $0xf8] sm:$0xff]  ;;  %v4127_v25 = vld [vmem:[#allocation7 + $0x190] sm:$0xff] }
 0xa07   : > { %v12604_v16 = vld [vmem:[#allocation49_spill] sm:$0xff] }
 0xa08   : > { %4059 = vst.msk [vmem:[#allocation6 + $0x170] sm:$0xff] %vm4012_vm1, %v3994_v43  ;;  %v3787_v43 = vmul.f32 %v12604_v16, %v3723_v49 }
 0xa09   : > { %v4274_v8 = vpop.permute.xlu2 %4273 }
 0xa0a   : > { %v4487_v51 = vmul.f32 %v4274_v8, %v4103_v35 }
 0xa0c   : > { %v4875_v23 = vadd.f32 %v11190_v31, %v4487_v51 }
 0xa0e   : > { %4939 = vst.msk [vmem:[#allocation7 + $0xd0] sm:$0xff] %vm1377_vm2, %v4875_v23  ;;  %4278 = vperm.xlu1 %7107, %v12596_v4   ;;  %v12605_v4 = vld [vmem:[#allocation50_spill] sm:$0xff] }
 0xa11   : > { %v4289_v46 = vpop.permute.xlu2 %4288 }
 0xa12   : > { %v4490_v9 = vmul.f32 %v4289_v46, %v4106_v6  ;;  %v4130_v6 = vld [vmem:[#allocation7 + $0x1a8] sm:$0xff] }
 0xa14   : > { %v4878_v52 = vadd.f32 %v11286_v53, %v4490_v9 }
 0xa16   : > { %4942 = vst.msk [vmem:[#allocation7 + $0xe8] sm:$0xff] %vm1377_vm2, %v4878_v52  ;;  %4293 = vperm.xlu1 %7107, %v11087_v29  }
 0xa19   : > { %v4304_v41 = vpop.permute.xlu2 %4303 }
 0xa1a   : > { %v4493_v24 = vmul.f32 %v4304_v41, %v4109_v57  ;;  %v12606_v57 = vld [vmem:[#allocation115_spill] sm:$0xff]  ;;  %v4133_v41 = vld [vmem:[#allocation7 + $0x1c0] sm:$0xff] }
 0xa1c   : > { %v4881_v15 = vadd.f32 %v12597_v28, %v4493_v24 }
 0xa1d   : > { %v4204_v31 = vpop.permute.xlu1 %4203 }
 0xa1e   : > { %4945 = vst.msk [vmem:[#allocation7 + $0x100] sm:$0xff] %vm1377_vm2, %v4881_v15  ;;  %v4473_v27 = vmul.f32 %v4204_v31, %v4089_v12  ;;  %4308 = vperm.xlu1 %7107, %v12598_v17   ;;  %v4092_v15 = vld [vmem:[#allocation7 + $0x78] sm:$0xff] }
 0xa1f   : > { %v4136_v31 = vld [vmem:[#allocation7 + $0x1d8] sm:$0xff] }
 0xa20   : > { %v4861_v45 = vadd.f32 %v11131_v42, %v4473_v27  ;;  %v4118_v42 = vld [vmem:[#allocation7 + $0x148] sm:$0xff] }
 0xa21   : > { %v4319_v53 = vpop.permute.xlu2 %4318 }
 0xa22   : > { %4925 = vst.msk [vmem:[#allocation7 + $0x60] sm:$0xff] %vm1377_vm2, %v4861_v45  ;;  %v4496_v47 = vmul.f32 %v4319_v53, %v4112_v48  ;;  %v4651_v45 = vpop.f32.mrf.mxu2 }
 0xa24   : > { %v4884_v29 = vadd.f32 %v11120_v58, %v4496_v47  ;;  %v12601_v58 = vld [vmem:[#allocation52_spill] sm:$0xff] }
 0xa26   : > { %4948 = vst.msk [vmem:[#allocation7 + $0x118] sm:$0xff] %vm1377_vm2, %v4884_v29  ;;  %4323 = vperm.xlu1 %7107, %v12599_v55   ;;  %v12608_v29 = vld [vmem:[#allocation54_spill] sm:$0xff]  ;;  %v4139_v55 = vld [vmem:[#allocation7 + $0x1f0] sm:$0xff] }
 0xa29   : > { %v4334_v22 = vpop.permute.xlu2 %4333 }
 0xa2a   : > { %v4499_v30 = vmul.f32 %v4334_v22, %v4115_v7 }
 0xa2c   : > { %v4887_v5 = vadd.f32 %v11174_v40, %v4499_v30  ;;  %v12602_v40 = vld [vmem:[#allocation62_spill] sm:$0xff] }
 0xa2e   : > { %4951 = vst.msk [vmem:[#allocation7 + $0x130] sm:$0xff] %vm1377_vm2, %v4887_v5  ;;  %4338 = vperm.xlu1 %7107, %v12600_v10   ;;  %v4843_v10 = vpop.f32.mrf.mxu1 }
 0xa31   : > { %v4349_v3 = vpop.permute.xlu2 %4348 }
 0xa32   : > { %v4502_v36 = vmul.f32 %v4349_v3, %v4118_v42  ;;  %v12609_v42 = vld [vmem:[#allocation131_spill] sm:$0xff] }
 0xa34   : > { %v4890_v44 = vadd.f32 %v11216_v60, %v4502_v36  ;;  %v12603_v60 = vld [vmem:[#allocation95_spill] sm:$0xff] }
 0xa36   : > { %4954 = vst.msk [vmem:[#allocation7 + $0x148] sm:$0xff] %vm1377_vm2, %v4890_v44  ;;  %4353 = vperm.xlu1 %7107, %v12601_v58  }
 0xa39   : > { %v4364_v38 = vpop.permute.xlu2 %4363 }
 0xa3a   : > { %v4505_v19 = vmul.f32 %v4364_v38, %v4121_v63  ;;  %v12610_v63 = vld [vmem:[#allocation65_spill] sm:$0xff] }
 0xa3c   : > { %v4893_v50 = vadd.f32 %v11246_v54, %v4505_v19  ;;  %v4101_v19 = vld [vmem:[#allocation7 + $0xc0] sm:$0xff] }
 0xa3e   : > { %4957 = vst.msk [vmem:[#allocation7 + $0x160] sm:$0xff] %vm1377_vm2, %v4893_v50  ;;  %4368 = vperm.xlu1 %7107, %v12602_v40  }
 0xa41   : > { %v4379_v34 = vpop.permute.xlu2 %4378 }
 0xa42   : > { %v4508_v26 = vmul.f32 %v4379_v34, %v4124_v61  ;;  %v12611_v61 = vld [vmem:[#allocation64_spill] sm:$0xff] }
 0xa44   : > { %v4896_v14 = vadd.f32 %v4781_v37, %v4508_v26  ;;  %v4104_v26 = vld [vmem:[#allocation7 + $0xd8] sm:$0xff] }
 0xa46   : > { %4960 = vst.msk [vmem:[#allocation7 + $0x178] sm:$0xff] %vm1377_vm2, %v4896_v14  ;;  %4383 = vperm.xlu1 %7107, %v12603_v60  }
 0xa48   : > { %v3883_v35 = vpop.xlane.xlu1 %3882 }
 0xa49   : > { %v3979_v8 = vadd.f32 %v3883_v35, %v3787_v43  ;;  %v4394_v54 = vpop.permute.xlu2 %4393 }
 0xa4a   : > { %v4511_v51 = vmul.f32 %v4394_v54, %v4127_v25  ;;  %v4110_v25 = vld [vmem:[#allocation7 + $0x108] sm:$0xff]  ;;  %v12612_v54 = vld [vmem:[#allocation55_spill] sm:$0xff] }
 0xa4b   : > { %4044 = vst.msk [vmem:[#allocation6 + $0xf8] sm:$0xff] %vm4012_vm1, %v3979_v8 }
 0xa4c   : > { %v4899_v23 = vadd.f32 %v11195_v18, %v4511_v51  ;;  %v12607_v18 = vld [vmem:[#allocation103_spill] sm:$0xff] }
 0xa4e   : > { %4963 = vst.msk [vmem:[#allocation7 + $0x190] sm:$0xff] %vm1377_vm2, %v4899_v23  ;;  %4398 = vperm.xlu1 %7107, %v12605_v4   ;;  %v4113_v23 = vld [vmem:[#allocation7 + $0x120] sm:$0xff] }
 0xa51   : > { %v4409_v46 = vpop.permute.xlu2 %4408 }
 0xa52   : > { %v4514_v9 = vmul.f32 %v4409_v46, %v4130_v6 }
 0xa54   : > { %v4902_v52 = vadd.f32 %v11232_v32, %v4514_v9  ;;  %v4116_v9 = vld [vmem:[#allocation7 + $0x138] sm:$0xff] }
 0xa56   : > { %4966 = vst.msk [vmem:[#allocation7 + $0x1a8] sm:$0xff] %vm1377_vm2, %v4902_v52  ;;  %4413 = vperm.xlu1 %7107, %v12606_v57  }
 0xa59   : > { %v4424_v24 = vpop.permute.xlu2 %4423 }
 0xa5a   : > { %v4517_v12 = vmul.f32 %v4424_v24, %v4133_v41  ;;  %v4119_v41 = vld [vmem:[#allocation7 + $0x150] sm:$0xff] }
 0xa5c   : > { %v4905_v28 = vadd.f32 %v11261_v11, %v4517_v12  ;;  %v4095_v11 = vld [vmem:[#allocation7 + $0x90] sm:$0xff] }
 0xa5e   : > { %4969 = vst.msk [vmem:[#allocation7 + $0x1c0] sm:$0xff] %vm1377_vm2, %v4905_v28  ;;  %4428 = vperm.xlu1 %7107, %v12607_v18   ;;  %v4122_v18 = vld [vmem:[#allocation7 + $0x168] sm:$0xff] }
 0xa60   : > { %v4219_v27 = vpop.permute.xlu1 %4218 }
 0xa61   : > { %v4476_v17 = vmul.f32 %v4219_v27, %v4092_v15  ;;  %v4439_v48 = vpop.permute.xlu2 %4438 }
 0xa62   : > { %v4520_v32 = vmul.f32 %v4439_v48, %v4136_v31 }
 0xa63   : > { %v4864_v53 = vadd.f32 %v4651_v45, %v4476_v17  ;;  %v4125_v17 = vld [vmem:[#allocation7 + $0x180] sm:$0xff] }
 0xa64   : > { %v4908_v47 = vadd.f32 %v11291_v39, %v4520_v32  ;;  %v4098_v39 = vld [vmem:[#allocation7 + $0xa8] sm:$0xff] }
 0xa65   : > { %4928 = vst.msk [vmem:[#allocation7 + $0x78] sm:$0xff] %vm1377_vm2, %v4864_v53  ;;  %v4128_v53 = vld [vmem:[#allocation7 + $0x198] sm:$0xff] }
 0xa66   : > { %4972 = vst.msk [vmem:[#allocation7 + $0x1d8] sm:$0xff] %vm1377_vm2, %v4908_v47  ;;  %4443 = vperm.xlu1 %7107, %v12608_v29  }
 0xa68   : > { %v4234_v7 = vpop.permute.xlu1 %4233 }
 0xa69   : > { %v4479_v22 = vmul.f32 %v4234_v7, %v4095_v11  ;;  %v4454_v30 = vpop.permute.xlu2 %4453  ;;  %v4131_v11 = vld [vmem:[#allocation7 + $0x1b0] sm:$0xff] }
 0xa6a   : > { %v4523_v5 = vmul.f32 %v4454_v30, %v4139_v55 }
 0xa6b   : > { %v4867_v3 = vadd.f32 %v12609_v42, %v4479_v22  ;;  %v4134_v22 = vld [vmem:[#allocation7 + $0x1c8] sm:$0xff]  ;;  %v4137_v42 = vld [vmem:[#allocation7 + $0x1e0] sm:$0xff] }
 0xa6c   : > { %v4911_v36 = vadd.f32 %v4843_v10, %v4523_v5 }
 0xa6d   : > { %4931 = vst.msk [vmem:[#allocation7 + $0x90] sm:$0xff] %vm1377_vm2, %v4867_v3 }
 0xa6e   : > { %4975 = vst.msk [vmem:[#allocation7 + $0x1f0] sm:$0xff] %vm1377_vm2, %v4911_v36  ;;  %4458 = vperm.xlu1 %7107, %v11102_v20   ;;  %v4107_v20 = vld [vmem:[#allocation7 + $0xf0] sm:$0xff] }
 0xa70   : > { %v4249_v44 = vpop.permute.xlu1 %4248 }
 0xa71   : > { %v4482_v58 = vmul.f32 %v4249_v44, %v4098_v39  ;;  %v4140_v39 = vld [vmem:[#allocation7 + $0x1f8] sm:$0xff] }
 0xa73   : > { %v4870_v38 = vadd.f32 %v12610_v63, %v4482_v58 }
 0xa75   : > { %4934 = vst.msk [vmem:[#allocation7 + $0xa8] sm:$0xff] %vm1377_vm2, %v4870_v38 }
 0xa78   : > { %v4264_v50 = vpop.permute.xlu1 %4263 }
 0xa79   : > { %v4485_v40 = vmul.f32 %v4264_v50, %v4101_v19 }
 0xa7b   : > { %v4873_v34 = vadd.f32 %v12611_v61, %v4485_v40 }
 0xa7d   : > { %4937 = vst.msk [vmem:[#allocation7 + $0xc0] sm:$0xff] %vm1377_vm2, %v4873_v34 }
 0xa80   : > { %v4279_v37 = vpop.permute.xlu1 %4278 }
 0xa81   : > { %v4488_v14 = vmul.f32 %v4279_v37, %v4104_v26 }
 0xa83   : > { %v4876_v49 = vadd.f32 %v11203_v13, %v4488_v14  ;;  %v12613_v13 = vld [vmem:[#allocation69_spill] sm:$0xff] }
 0xa85   : > { %4940 = vst.msk [vmem:[#allocation7 + $0xd8] sm:$0xff] %vm1377_vm2, %v4876_v49 }
 0xa88   : > { %v4294_v60 = vpop.permute.xlu1 %4293 }
 0xa89   : > { %v4491_v16 = vmul.f32 %v4294_v60, %v4107_v20 }
 0xa8b   : > { %v4879_v43 = vadd.f32 %v11296_v56, %v4491_v16 }
 0xa8d   : > { %4943 = vst.msk [vmem:[#allocation7 + $0xf0] sm:$0xff] %vm1377_vm2, %v4879_v43 }
 0xa90   : > { %v4309_v35 = vpop.permute.xlu1 %4308 }
 0xa91   : > { %v4494_v8 = vmul.f32 %v4309_v35, %v4110_v25 }
 0xa93   : > { %v4882_v51 = vadd.f32 %v12612_v54, %v4494_v8 }
 0xa95   : > { %4946 = vst.msk [vmem:[#allocation7 + $0x108] sm:$0xff] %vm1377_vm2, %v4882_v51 }
 0xa98   : > { %v4324_v4 = vpop.permute.xlu1 %4323 }
 0xa99   : > { %v4497_v6 = vmul.f32 %v4324_v4, %v4113_v23 }
 0xa9b   : > { %v4885_v46 = vadd.f32 %v12613_v13, %v4497_v6 }
 0xa9d   : > { %4949 = vst.msk [vmem:[#allocation7 + $0x120] sm:$0xff] %vm1377_vm2, %v4885_v46 }
 0xaa0   : > { %v4339_v52 = vpop.permute.xlu1 %4338 }
 0xaa1   : > { %v4500_v57 = vmul.f32 %v4339_v52, %v4116_v9 }
 0xaa3   : > { %v4888_v56 = vadd.f32 %v11192_v33, %v4500_v57  ;;  %v12614_v33 = vld [vmem:[#allocation107_spill] sm:$0xff] }
 0xaa5   : > { %4952 = vst.msk [vmem:[#allocation7 + $0x138] sm:$0xff] %vm1377_vm2, %v4888_v56 }
 0xaa8   : > { %v4354_v24 = vpop.permute.xlu1 %4353 }
 0xaa9   : > { %v4503_v12 = vmul.f32 %v4354_v24, %v4119_v41 }
 0xaab   : > { %v4891_v28 = vadd.f32 %v11226_v21, %v4503_v12 }
 0xaad   : > { %4955 = vst.msk [vmem:[#allocation7 + $0x150] sm:$0xff] %vm1377_vm2, %v4891_v28 }
 0xab0   : > { %v4369_v15 = vpop.permute.xlu1 %4368 }
 0xab1   : > { %v4506_v31 = vmul.f32 %v4369_v15, %v4122_v18 }
 0xab3   : > { %v4894_v27 = vadd.f32 %v11258_v2, %v4506_v31 }
 0xab5   : > { %4958 = vst.msk [vmem:[#allocation7 + $0x168] sm:$0xff] %vm1377_vm2, %v4894_v27 }
 0xab8   : > { %v4384_v48 = vpop.permute.xlu1 %4383 }
 0xab9   : > { %v4509_v45 = vmul.f32 %v4384_v48, %v4125_v17 }
 0xabb   : > { %v4897_v32 = vadd.f32 %v12614_v33, %v4509_v45 }
 0xabd   : > { %4961 = vst.msk [vmem:[#allocation7 + $0x180] sm:$0xff] %vm1377_vm2, %v4897_v32 }
 0xac0   : > { %v4399_v47 = vpop.permute.xlu1 %4398 }
 0xac1   : > { %v4512_v29 = vmul.f32 %v4399_v47, %v4128_v53 }
 0xac3   : > { %v4900_v21 = vadd.f32 %v11208_v1, %v4512_v29 }
 0xac5   : > { %4964 = vst.msk [vmem:[#allocation7 + $0x198] sm:$0xff] %vm1377_vm2, %v4900_v21 }
 0xac8   : > { %v4414_v55 = vpop.permute.xlu1 %4413 }
 0xac9   : > { %v4515_v7 = vmul.f32 %v4414_v55, %v4131_v11 }
 0xacb   : > { %v4903_v2 = vadd.f32 %v11240_v59, %v4515_v7  ;;  %v4846_v59 = vpop.f32.mrf.mxu1 }
 0xacd   : > { %4967 = vst.msk [vmem:[#allocation7 + $0x1b0] sm:$0xff] %vm1377_vm2, %v4903_v2 }
 0xad0   : > { %v4429_v30 = vpop.permute.xlu1 %4428 }
 0xad1   : > { %v4518_v5 = vmul.f32 %v4429_v30, %v4134_v22 }
 0xad3   : > { %v4906_v10 = vadd.f32 %v11270_v0, %v4518_v5 }
 0xad5   : > { %4970 = vst.msk [vmem:[#allocation7 + $0x1c8] sm:$0xff] %vm1377_vm2, %v4906_v10 }
 0xad8   : > { %v4444_v3 = vpop.permute.xlu1 %4443 }
 0xad9   : > { %v4521_v36 = vmul.f32 %v4444_v3, %v4137_v42 }
 0xadb   : > { %v4909_v1 = vadd.f32 %v11304_v62, %v4521_v36 }
 0xadd   : > { %4973 = vst.msk [vmem:[#allocation7 + $0x1e0] sm:$0xff] %vm1377_vm2, %v4909_v1 }
 0xae0   : > { %v4459_v44 = vpop.permute.xlu1 %4458 }
 0xae1   : > { %v4524_v58 = vmul.f32 %v4459_v44, %v4140_v39  ;;  %5044 = sbr.rel (%p6757_p8) target bundleno = 3669 (0xe55), region = 108 }
 0xae3   : > { %v4912_v63 = vadd.f32 %v4846_v59, %v4524_v58 }
 0xae5   : > { %4976 = vst.msk [vmem:[#allocation7 + $0x1f8] sm:$0xff] %vm1377_vm2, %v4912_v63 }
 0xae6   : > { %v5113_v0 = vld [vmem:[#allocation6 + $0x20] sm:$0xff]  ;;  %v5111_v38 = vld [vmem:[#allocation6 + $0x10] sm:$0xff]  ;;  %v7941_v50 = vmov 0   ;;  %v5114_v62 = vld [vmem:[#allocation6 + $0x28] sm:$0xff]  ;;  %vm5782_vm7 = vcmask 785920   ;;  %vm5863_vm8 = vcmask 1048320  }
 0xae7   : > { %v5109_v19 = vld [vmem:[#allocation6] sm:$0xff]  ;;  %7369 = vset.pattern.permute.xlu2 %v7941_v50  ;;  %7368 = vset.pattern.permute.xlu1 %v7941_v50  ;;  %7373 = vrcp.f32 %v5113_v0  ;;  %v5112_v40 = vld [vmem:[#allocation6 + $0x18] sm:$0xff]  ;;  %v5110_v61 = vld [vmem:[#allocation6 + $0x8] sm:$0xff] }
 0xae8   : > { %7367 = vset.pattern.permute.xlu0 %v7941_v50  ;;  %7375 = vrcp.f32 %v5111_v38  ;;  %v5117_v14 = vld [vmem:[#allocation6 + $0x40] sm:$0xff]  ;;  %v5116_v20 = vld [vmem:[#allocation6 + $0x38] sm:$0xff]  ;;  %v5115_v16 = vld [vmem:[#allocation6 + $0x30] sm:$0xff] }
 0xae9   : > { %7377 = vrcp.f32 %v5109_v19  ;;  %v5120_v25 = vld [vmem:[#allocation6 + $0x58] sm:$0xff]  ;;  %v5119_v8 = vld [vmem:[#allocation6 + $0x50] sm:$0xff]  ;;  %v5118_v51 = vld [vmem:[#allocation6 + $0x48] sm:$0xff] }
 0xaea   : > { %7379 = vrcp.f32 %v5114_v62  ;;  %v5123_v4 = vld [vmem:[#allocation6 + $0x70] sm:$0xff]  ;;  %v5122_v13 = vld [vmem:[#allocation6 + $0x68] sm:$0xff]  ;;  %v5121_v9 = vld [vmem:[#allocation6 + $0x60] sm:$0xff] }
 0xaeb   : > { %7381 = vrcp.f32 %v5112_v40  ;;  %v5126_v57 = vld [vmem:[#allocation6 + $0x88] sm:$0xff]  ;;  %v5125_v41 = vld [vmem:[#allocation6 + $0x80] sm:$0xff]  ;;  %v5124_v12 = vld [vmem:[#allocation6 + $0x78] sm:$0xff] }
 0xaec   : > { %7383 = vrcp.f32 %v5110_v61  ;;  %v5129_v18 = vld [vmem:[#allocation6 + $0xa0] sm:$0xff]  ;;  %v5128_v31 = vld [vmem:[#allocation6 + $0x98] sm:$0xff]  ;;  %v5127_v17 = vld [vmem:[#allocation6 + $0x90] sm:$0xff] }
 0xaed   : > { %v7374_v34 = vpop.eup %7373  ;;  %7385 = vrcp.f32 %v5117_v14  ;;  %v5132_v45 = vld [vmem:[#allocation6 + $0xb8] sm:$0xff]  ;;  %v5131_v32 = vld [vmem:[#allocation6 + $0xb0] sm:$0xff]  ;;  %v5130_v47 = vld [vmem:[#allocation6 + $0xa8] sm:$0xff] }
 0xaee   : > { %v7376_v26 = vpop.eup %7375  ;;  %5259 = vperm.xlu2 %7369, %v7374_v34   ;;  %7387 = vrcp.f32 %v5116_v20  ;;  %v5135_v21 = vld [vmem:[#allocation6 + $0xd0] sm:$0xff]  ;;  %v5134_v55 = vld [vmem:[#allocation6 + $0xc8] sm:$0xff]  ;;  %v5133_v2 = vld [vmem:[#allocation6 + $0xc0] sm:$0xff] }
 0xaef   : > { %v7378_v37 = vpop.eup %7377  ;;  %5249 = vperm.xlu1 %7368, %v7376_v26   ;;  %7389 = vrcp.f32 %v5115_v16  ;;  %v5138_v30 = vld [vmem:[#allocation6 + $0xe8] sm:$0xff]  ;;  %v5137_v10 = vld [vmem:[#allocation6 + $0xe0] sm:$0xff]  ;;  %v5136_v3 = vld [vmem:[#allocation6 + $0xd8] sm:$0xff] }
 0xaf0   : > { %5239 = vperm.xlu0 %7367, %v7378_v37   ;;  %v7380_v49 = vpop.eup %7379  ;;  %7391 = vrcp.f32 %v5120_v25  ;;  %v5141_v1 = vld [vmem:[#allocation6 + $0x100] sm:$0xff]  ;;  %v5140_v44 = vld [vmem:[#allocation6 + $0xf8] sm:$0xff]  ;;  %v5139_v59 = vld [vmem:[#allocation6 + $0xf0] sm:$0xff] }
 0xaf1   : > { %v7382_v60 = vpop.eup %7381  ;;  %7393 = vrcp.f32 %v5119_v8  ;;  %v5144_v0 = vld [vmem:[#allocation6 + $0x118] sm:$0xff]  ;;  %v5143_v19 = vld [vmem:[#allocation6 + $0x110] sm:$0xff]  ;;  %v5142_v62 = vld [vmem:[#allocation6 + $0x108] sm:$0xff] }
 0xaf2   : > { %v7384_v43 = vpop.eup %7383  ;;  %7395 = vrcp.f32 %v5118_v51  ;;  %v5147_v61 = vld [vmem:[#allocation6 + $0x130] sm:$0xff]  ;;  %v5146_v26 = vld [vmem:[#allocation6 + $0x128] sm:$0xff]  ;;  %v5145_v14 = vld [vmem:[#allocation6 + $0x120] sm:$0xff] }
 0xaf3   : > { %v7386_v35 = vpop.eup %7385  ;;  %7397 = vrcp.f32 %v5123_v4  ;;  %v5049_v20 = vld [vmem:[#allocation7 + $0x20] sm:$0xff] }
 0xaf4   : > { %v7388_v54 = vpop.eup %7387  ;;  %7399 = vrcp.f32 %v5122_v13  ;;  %v5153_v13 = vld [vmem:[#allocation6 + $0x160] sm:$0xff] }
 0xaf5   : > { %v7390_v23 = vpop.eup %7389  ;;  %7401 = vrcp.f32 %v5121_v9  ;;  %v5152_v9 = vld [vmem:[#allocation6 + $0x158] sm:$0xff] }
 0xaf6   : > { %5264 = vperm.xlu2 %7369, %v7380_v49   ;;  %v7392_v6 = vpop.eup %7391  ;;  %7403 = vrcp.f32 %v5126_v57  ;;  %v5151_v57 = vld [vmem:[#allocation6 + $0x150] sm:$0xff] }
 0xaf7   : > { %5254 = vperm.xlu1 %7368, %v7382_v60   ;;  %v7394_v46 = vpop.eup %7393  ;;  %7405 = vrcp.f32 %v5125_v41  ;;  %v5053_v41 = vld [vmem:[#allocation7 + $0x40] sm:$0xff] }
 0xaf8   : > { %5244 = vperm.xlu0 %7367, %v7384_v43   ;;  %v7396_v52 = vpop.eup %7395  ;;  %7407 = vrcp.f32 %v5124_v12  ;;  %v5150_v43 = vld [vmem:[#allocation6 + $0x148] sm:$0xff] }
 0xaf9   : > { %v7398_v56 = vpop.eup %7397  ;;  %7409 = vrcp.f32 %v5129_v18 }
 0xafa   : > { %v7400_v24 = vpop.eup %7399  ;;  %7411 = vrcp.f32 %v5128_v31 }
 0xafb   : > { %v7402_v28 = vpop.eup %7401  ;;  %7413 = vrcp.f32 %v5127_v17 }
 0xafc   : > { %v7404_v15 = vpop.eup %7403  ;;  %7415 = vrcp.f32 %v5132_v45  ;;  %v5047_v45 = vld [vmem:[#allocation7 + $0x10] sm:$0xff] }
 0xafd   : > { %v7406_v27 = vpop.eup %7405  ;;  %7417 = vrcp.f32 %v5131_v32  ;;  %v5045_v32 = vld [vmem:[#allocation7] sm:$0xff] }
 0xafe   : > { %5279 = vperm.xlu2 %7369, %v7386_v35   ;;  %v7408_v48 = vpop.eup %7407  ;;  %7419 = vrcp.f32 %v5130_v47  ;;  %v5149_v35 = vld [vmem:[#allocation6 + $0x140] sm:$0xff] }
 0xaff   : > { %5274 = vperm.xlu1 %7368, %v7388_v54   ;;  %v7410_v33 = vpop.eup %7409  ;;  %7421 = vrcp.f32 %v5135_v21  ;;  %v5148_v54 = vld [vmem:[#allocation6 + $0x138] sm:$0xff] }
 0xb00   : > { %5269 = vperm.xlu0 %7367, %v7390_v23   ;;  %v7412_v53 = vpop.eup %7411  ;;  %7423 = vrcp.f32 %v5134_v55  ;;  %v5050_v23 = vld [vmem:[#allocation7 + $0x28] sm:$0xff] }
 0xb01   : > { %v7414_v29 = vpop.eup %7413  ;;  %7425 = vrcp.f32 %v5133_v2  ;;  %v5161_v2 = vld [vmem:[#allocation6 + $0x1a0] sm:$0xff] }
 0xb02   : > { %v7416_v11 = vpop.eup %7415  ;;  %7427 = vrcp.f32 %v5138_v30  ;;  %v5157_v30 = vld [vmem:[#allocation6 + $0x180] sm:$0xff] }
 0xb03   : > { %v7418_v7 = vpop.eup %7417  ;;  %7429 = vrcp.f32 %v5137_v10  ;;  %v5059_v10 = vld [vmem:[#allocation7 + $0x70] sm:$0xff] }
 0xb04   : > { %v7420_v22 = vpop.eup %7419  ;;  %7431 = vrcp.f32 %v5136_v3 }
 0xb05   : > { %v7422_v5 = vpop.eup %7421  ;;  %7433 = vrcp.f32 %v5141_v1 }
 0xb06   : > { %5294 = vperm.xlu2 %7369, %v7392_v6   ;;  %v7424_v42 = vpop.eup %7423  ;;  %7435 = vrcp.f32 %v5140_v44 }
 0xb07   : > { %5289 = vperm.xlu1 %7368, %v7394_v46   ;;  %v7426_v36 = vpop.eup %7425  ;;  %7437 = vrcp.f32 %v5139_v59  ;;  %v5162_v59 = vld [vmem:[#allocation6 + $0x1a8] sm:$0xff] }
 0xb08   : > { %5284 = vperm.xlu0 %7367, %v7396_v52   ;;  %v7428_v39 = vpop.eup %7427  ;;  %7439 = vrcp.f32 %v5144_v0 }
 0xb09   : > { %v7430_v58 = vpop.eup %7429  ;;  %7441 = vrcp.f32 %v5143_v19 }
 0xb0a   : > { %v7432_v63 = vpop.eup %7431  ;;  %7443 = vrcp.f32 %v5142_v62 }
 0xb0b   : > { %v7434_v38 = vpop.eup %7433  ;;  %7445 = vrcp.f32 %v5147_v61 }
 0xb0c   : > { %v7436_v50 = vpop.eup %7435  ;;  %7447 = vrcp.f32 %v5146_v26 }
 0xb0d   : > { %v7438_v40 = vpop.eup %7437  ;;  %7449 = vrcp.f32 %v5145_v14 }
 0xb0e   : > { %5309 = vperm.xlu2 %7369, %v7398_v56   ;;  %v7440_v34 = vpop.eup %7439  ;;  %7451 = vrcp.f32 %v5150_v43 }
 0xb0f   : > { %5304 = vperm.xlu1 %7368, %v7400_v24   ;;  %v7442_v37 = vpop.eup %7441  ;;  %7453 = vrcp.f32 %v5149_v35 }
 0xb10   : > { %5299 = vperm.xlu0 %7367, %v7402_v28   ;;  %v7444_v49 = vpop.eup %7443  ;;  %7455 = vrcp.f32 %v5148_v54  ;;  %v5169_v28 = vld [vmem:[#allocation6 + $0x1e0] sm:$0xff] }
 0xb11   : > { %v7446_v25 = vpop.eup %7445  ;;  %7457 = vrcp.f32 %v5153_v13  ;;  %v5156_v13 = vld [vmem:[#allocation6 + $0x178] sm:$0xff] }
 0xb12   : > { %v7448_v8 = vpop.eup %7447  ;;  %7459 = vrcp.f32 %v5152_v9 }
 0xb13   : > { %v7450_v51 = vpop.eup %7449  ;;  %7461 = vrcp.f32 %v5151_v57 }
 0xb14   : > { %v7452_v46 = vpop.eup %7451  ;;  %7463 = vrcp.f32 %v5169_v28  ;;  %v5057_v28 = vld [vmem:[#allocation7 + $0x60] sm:$0xff] }
 0xb15   : > { %v7454_v52 = vpop.eup %7453 }
 0xb16   : > { %5324 = vperm.xlu2 %7369, %v7404_v15   ;;  %v7456_v56 = vpop.eup %7455  ;;  %v5165_v15 = vld [vmem:[#allocation6 + $0x1c0] sm:$0xff] }
 0xb17   : > { %5319 = vperm.xlu1 %7368, %v7406_v27   ;;  %v7458_v18 = vpop.eup %7457  ;;  %v5154_v27 = vld [vmem:[#allocation6 + $0x168] sm:$0xff]  ;;  %7465 = vrcp.f32 %v5165_v15 }
 0xb18   : > { %5314 = vperm.xlu0 %7367, %v7408_v48   ;;  %v7460_v31 = vpop.eup %7459  ;;  %v5056_v48 = vld [vmem:[#allocation7 + $0x58] sm:$0xff]  ;;  %7467 = vrcp.f32 %v5154_v27 }
 0xb19   : > { %v7462_v17 = vpop.eup %7461  ;;  %v5160_v27 = vld [vmem:[#allocation6 + $0x198] sm:$0xff] }
 0xb1a   : > { %v7464_v55 = vpop.eup %7463 }
 0xb1e   : > { %5339 = vperm.xlu2 %7369, %v7410_v33  }
 0xb1f   : > { %5334 = vperm.xlu1 %7368, %v7412_v53  }
 0xb20   : > { %5329 = vperm.xlu0 %7367, %v7414_v29  }
 0xb26   : > { %5354 = vperm.xlu2 %7369, %v7416_v11   ;;  %v5166_v11 = vld [vmem:[#allocation6 + $0x1c8] sm:$0xff] }
 0xb27   : > { %5349 = vperm.xlu1 %7368, %v7418_v7   ;;  %7469 = vrcp.f32 %v5166_v11 }
 0xb28   : > { %5344 = vperm.xlu0 %7367, %v7420_v22   ;;  %v7466_v22 = vpop.eup %7465  ;;  %7471 = vrcp.f32 %v5161_v2 }
 0xb29   : > { %7473 = vrcp.f32 %v5157_v30 }
 0xb2a   : > { %7475 = vrcp.f32 %v5162_v59 }
 0xb2e   : > { %5369 = vperm.xlu2 %7369, %v7422_v5   ;;  %v7468_v5 = vpop.eup %7467 }
 0xb2f   : > { %5364 = vperm.xlu1 %7368, %v7424_v42   ;;  %v5048_v42 = vld [vmem:[#allocation7 + $0x18] sm:$0xff] }
 0xb30   : > { %5359 = vperm.xlu0 %7367, %v7426_v36   ;;  %v5046_v36 = vld [vmem:[#allocation7 + $0x8] sm:$0xff] }
 0xb36   : > { %5384 = vperm.xlu2 %7369, %v7428_v39  }
 0xb37   : > { %5379 = vperm.xlu1 %7368, %v7430_v58  }
 0xb38   : > { %5374 = vperm.xlu0 %7367, %v7432_v63   ;;  %v7470_v63 = vpop.eup %7469 }
 0xb39   : > { %v7472_v19 = vpop.eup %7471 }
 0xb3a   : > { %v7474_v62 = vpop.eup %7473 }
 0xb3e   : > { %5399 = vperm.xlu2 %7369, %v7434_v38   ;;  %v5158_v38 = vld [vmem:[#allocation6 + $0x188] sm:$0xff] }
 0xb3f   : > { %5394 = vperm.xlu1 %7368, %v7436_v50   ;;  %v5170_v50 = vld [vmem:[#allocation6 + $0x1e8] sm:$0xff]  ;;  %7477 = vrcp.f32 %v5158_v38  ;;  %v5073_v38 = vld [vmem:[#allocation7 + $0xe0] sm:$0xff] }
 0xb40   : > { %5389 = vperm.xlu0 %7367, %v7438_v40   ;;  %v5052_v40 = vld [vmem:[#allocation7 + $0x38] sm:$0xff]  ;;  %7479 = vrcp.f32 %v5170_v50 }
 0xb46   : > { %5414 = vperm.xlu2 %7369, %v7440_v34   ;;  %v5051_v34 = vld [vmem:[#allocation7 + $0x30] sm:$0xff] }
 0xb47   : > { %5409 = vperm.xlu1 %7368, %v7442_v37  }
 0xb48   : > { %5404 = vperm.xlu0 %7367, %v7444_v49   ;;  %v5260_v60 = vpop.permute.xlu2 %5259  ;;  %v5171_v49 = vld [vmem:[#allocation6 + $0x1f0] sm:$0xff] }
 0xb49   : > { %v5561_v16 = vmul.f32 %v5260_v60, %v5049_v20  ;;  %v7476_v20 = vpop.eup %7475  ;;  %7481 = vrcp.f32 %v5171_v49 }
 0xb4a   : > { %v7478_v43 = vpop.eup %7477 }
 0xb4b   : > { %5625 = vst.msk [vmem:[#allocation8 + $0x20] sm:$0xff] %vm1377_vm2, %v5561_v16  ;;  %v5167_v16 = vld [vmem:[#allocation6 + $0x1d0] sm:$0xff]  ;;  %v7480_v35 = vpop.eup %7479 }
 0xb4c   : > { %7483 = vrcp.f32 %v5167_v16 }
 0xb4e   : > { %5429 = vperm.xlu2 %7369, %v7446_v25   ;;  %v5155_v25 = vld [vmem:[#allocation6 + $0x170] sm:$0xff] }
 0xb4f   : > { %5424 = vperm.xlu1 %7368, %v7448_v8   ;;  %v5055_v8 = vld [vmem:[#allocation7 + $0x50] sm:$0xff]  ;;  %7485 = vrcp.f32 %v5155_v25 }
 0xb50   : > { %5419 = vperm.xlu0 %7367, %v7450_v51   ;;  %v5265_v4 = vpop.permute.xlu2 %5264  ;;  %v5054_v51 = vld [vmem:[#allocation7 + $0x48] sm:$0xff]  ;;  %7487 = vrcp.f32 %v5156_v13 }
 0xb51   : > { %v5562_v6 = vmul.f32 %v5265_v4, %v5050_v23 }
 0xb53   : > { %5626 = vst.msk [vmem:[#allocation8 + $0x28] sm:$0xff] %vm1377_vm2, %v5562_v6 }
 0xb56   : > { %5444 = vperm.xlu2 %7369, %v7452_v46   ;;  %v7482_v46 = vpop.eup %7481 }
 0xb57   : > { %5439 = vperm.xlu1 %7368, %v7454_v52   ;;  %v5163_v52 = vld [vmem:[#allocation6 + $0x1b0] sm:$0xff]  ;;  %v7484_v57 = vpop.eup %7483 }
 0xb58   : > { %5434 = vperm.xlu0 %7367, %v7456_v56   ;;  %v5280_v24 = vpop.permute.xlu2 %5279  ;;  %v5159_v56 = vld [vmem:[#allocation6 + $0x190] sm:$0xff]  ;;  %7489 = vrcp.f32 %v5163_v52  ;;  %v5105_v52 = vld [vmem:[#allocation7 + $0x1e0] sm:$0xff] }
 0xb59   : > { %v5565_v12 = vmul.f32 %v5280_v24, %v5053_v41  ;;  %v7486_v41 = vpop.eup %7485  ;;  %v5058_v24 = vld [vmem:[#allocation7 + $0x68] sm:$0xff]  ;;  %7491 = vrcp.f32 %v5159_v56 }
 0xb5a   : > { %7493 = vrcp.f32 %v5160_v27 }
 0xb5b   : > { %5629 = vst.msk [vmem:[#allocation8 + $0x40] sm:$0xff] %vm1377_vm2, %v5565_v12 }
 0xb5e   : > { %5459 = vperm.xlu2 %7369, %v7458_v18  }
 0xb5f   : > { %5454 = vperm.xlu1 %7368, %v7460_v31  }
 0xb60   : > { %5449 = vperm.xlu0 %7367, %v7462_v17   ;;  %v5295_v33 = vpop.permute.xlu2 %5294  ;;  %v7488_v17 = vpop.eup %7487 }
 0xb61   : > { %v5568_v53 = vmul.f32 %v5295_v33, %v5056_v48  ;;  %v5250_v47 = vpop.permute.xlu1 %5249  ;;  %v7490_v33 = vpop.eup %7489 }
 0xb62   : > { %v5559_v29 = vmul.f32 %v5250_v47, %v5047_v45  ;;  %v5240_v21 = vpop.permute.xlu0 %5239  ;;  %v5172_v45 = vld [vmem:[#allocation6 + $0x1f8] sm:$0xff] }
 0xb63   : > { %5632 = vst.msk [vmem:[#allocation8 + $0x58] sm:$0xff] %vm1377_vm2, %v5568_v53  ;;  %v5557_v7 = vmul.f32 %v5240_v21, %v5045_v32  ;;  %v5168_v32 = vld [vmem:[#allocation6 + $0x1d8] sm:$0xff]  ;;  %v7492_v53 = vpop.eup %7491  ;;  %7495 = vrcp.f32 %v5172_v45  ;;  %v5074_v45 = vld [vmem:[#allocation7 + $0xe8] sm:$0xff] }
 0xb64   : > { %5623 = vst.msk [vmem:[#allocation8 + $0x10] sm:$0xff] %vm1377_vm2, %v5559_v29  ;;  %7497 = vrcp.f32 %v5168_v32  ;;  %v5060_v29 = vld [vmem:[#allocation7 + $0x78] sm:$0xff]  ;;  %v5093_v32 = vld [vmem:[#allocation7 + $0x180] sm:$0xff] }
 0xb65   : > { %5621 = vst.msk [vmem:[#allocation8] sm:$0xff] %vm1377_vm2, %v5557_v7 }
 0xb66   : > { %5539 = vperm.xlu2 %7369, %v7464_v55   ;;  %v7494_v55 = vpop.eup %7493 }
 0xb67   : > { %5519 = vperm.xlu1 %7368, %v7466_v22   ;;  %v5164_v22 = vld [vmem:[#allocation6 + $0x1b8] sm:$0xff] }
 0xb68   : > { %5464 = vperm.xlu0 %7367, %v7468_v5   ;;  %v5310_v3 = vpop.permute.xlu2 %5309  ;;  %7499 = vrcp.f32 %v5164_v22  ;;  %v5090_v22 = vld [vmem:[#allocation7 + $0x168] sm:$0xff] }
 0xb69   : > { %v5571_v1 = vmul.f32 %v5310_v3, %v5059_v10  ;;  %v5255_v39 = vpop.permute.xlu1 %5254  ;;  %v7496_v2 = vpop.eup %7495 }
 0xb6a   : > { %v5560_v44 = vmul.f32 %v5255_v39, %v5048_v42  ;;  %v5245_v58 = vpop.permute.xlu0 %5244  ;;  %v7498_v30 = vpop.eup %7497 }
 0xb6b   : > { %5635 = vst.msk [vmem:[#allocation8 + $0x70] sm:$0xff] %vm1377_vm2, %v5571_v1  ;;  %v5558_v0 = vmul.f32 %v5245_v58, %v5046_v36  ;;  %v5069_v58 = vld [vmem:[#allocation7 + $0xc0] sm:$0xff] }
 0xb6c   : > { %5624 = vst.msk [vmem:[#allocation8 + $0x18] sm:$0xff] %vm1377_vm2, %v5560_v44 }
 0xb6d   : > { %5622 = vst.msk [vmem:[#allocation8 + $0x8] sm:$0xff] %vm1377_vm2, %v5558_v0 }
 0xb6e   : > { %5524 = vperm.xlu2 %7369, %v7470_v63   ;;  %v7500_v3 = vpop.eup %7499 }
 0xb6f   : > { %5499 = vperm.xlu1 %7368, %v7472_v19  }
 0xb70   : > { %5479 = vperm.xlu0 %7367, %v7474_v62   ;;  %v11412_v61 = vpop.permute.xlu2 %5324 }
 0xb71   : > { %v5275_v26 = vpop.permute.xlu1 %5274 }
 0xb72   : > { %v5564_v37 = vmul.f32 %v5275_v26, %v5052_v40  ;;  %v5270_v14 = vpop.permute.xlu0 %5269 }
 0xb73   : > { %v5563_v60 = vmul.f32 %v5270_v14, %v5051_v34  ;;  %v5089_v14 = vld [vmem:[#allocation7 + $0x160] sm:$0xff] }
 0xb74   : > { %5628 = vst.msk [vmem:[#allocation8 + $0x38] sm:$0xff] %vm1377_vm2, %v5564_v37 }
 0xb75   : > { %5627 = vst.msk [vmem:[#allocation8 + $0x30] sm:$0xff] %vm1377_vm2, %v5563_v60 }
 0xb76   : > { %5504 = vperm.xlu2 %7369, %v7476_v20  }
 0xb77   : > { %5484 = vperm.xlu1 %7368, %v7478_v43   ;;  %v5061_v43 = vld [vmem:[#allocation7 + $0x80] sm:$0xff] }
 0xb78   : > { %5544 = vperm.xlu0 %7367, %v7480_v35   ;;  %v11416_v54 = vpop.permute.xlu2 %5339 }
 0xb79   : > { %v5290_v23 = vpop.permute.xlu1 %5289 }
 0xb7a   : > { %v5567_v4 = vmul.f32 %v5290_v23, %v5055_v8  ;;  %v5285_v6 = vpop.permute.xlu0 %5284  ;;  %v5085_v23 = vld [vmem:[#allocation7 + $0x140] sm:$0xff] }
 0xb7b   : > { %v5566_v9 = vmul.f32 %v5285_v6, %v5054_v51  ;;  %v5081_v51 = vld [vmem:[#allocation7 + $0x120] sm:$0xff] }
 0xb7c   : > { %5631 = vst.msk [vmem:[#allocation8 + $0x50] sm:$0xff] %vm1377_vm2, %v5567_v4 }
 0xb7d   : > { %5630 = vst.msk [vmem:[#allocation8 + $0x48] sm:$0xff] %vm1377_vm2, %v5566_v9 }
 0xb7e   : > { %5549 = vperm.xlu2 %7369, %v7482_v46  }
 0xb7f   : > { %5529 = vperm.xlu1 %7368, %v7484_v57  }
 0xb80   : > { %5469 = vperm.xlu0 %7367, %v7486_v41   ;;  %v11420_v12 = vpop.permute.xlu2 %5354 }
 0xb81   : > { %v5305_v18 = vpop.permute.xlu1 %5304 }
 0xb82   : > { %v5570_v15 = vmul.f32 %v5305_v18, %v5058_v24  ;;  %v5300_v31 = vpop.permute.xlu0 %5299  ;;  %v5101_v18 = vld [vmem:[#allocation7 + $0x1c0] sm:$0xff] }
 0xb83   : > { %v5569_v48 = vmul.f32 %v5300_v31, %v5057_v28  ;;  %v5077_v28 = vld [vmem:[#allocation7 + $0x100] sm:$0xff] }
 0xb84   : > { %5634 = vst.msk [vmem:[#allocation8 + $0x68] sm:$0xff] %vm1377_vm2, %v5570_v15 }
 0xb85   : > { %5633 = vst.msk [vmem:[#allocation8 + $0x60] sm:$0xff] %vm1377_vm2, %v5569_v48  ;;  %v5065_v48 = vld [vmem:[#allocation7 + $0xa0] sm:$0xff] }
 0xb86   : > { %5474 = vperm.xlu2 %7369, %v7488_v17  }
 0xb87   : > { %5509 = vperm.xlu1 %7368, %v7490_v33  }
 0xb88   : > { %5489 = vperm.xlu0 %7367, %v7492_v53   ;;  %v11424_v47 = vpop.permute.xlu2 %5369  ;;  %v5577_v53 = vmul.f32 %v11416_v54, %v5065_v48  ;;  %v5908_v48 = vld [vmem:[#allocation20 + $0x60] sm:$0xff] }
 0xb89   : > { %v5320_v21 = vpop.permute.xlu1 %5319 }
 0xb8a   : > { %v5315_v11 = vpop.permute.xlu0 %5314  ;;  %v5573_v25 = vmul.f32 %v5320_v21, %v5061_v43 }
 0xb8b   : > { %v5572_v7 = vmul.f32 %v5315_v11, %v5060_v29 }
 0xb8d   : > { %5636 = vst.msk [vmem:[#allocation8 + $0x78] sm:$0xff] %vm1377_vm2, %v5572_v7  ;;  %v5086_v7 = vld [vmem:[#allocation7 + $0x148] sm:$0xff]  ;;  %vm5701_vm2 = vcmask 523520  }
 0xb8e   : > { %5494 = vperm.xlu2 %7369, %v7494_v55   ;;  %v5070_v55 = vld [vmem:[#allocation7 + $0xc8] sm:$0xff] }
 0xb8f   : > { %5554 = vperm.xlu1 %7368, %v7496_v2  }
 0xb90   : > { %5534 = vperm.xlu0 %7367, %v7498_v30   ;;  %v11427_v5 = vpop.permute.xlu2 %5384 }
 0xb91   : > { %v11429_v10 = vpop.permute.xlu1 %5334  ;;  %v5586_v29 = vmul.f32 %v11427_v5, %v5074_v45  ;;  %v5097_v5 = vld [vmem:[#allocation7 + $0x1a0] sm:$0xff]  ;;  %v5098_v45 = vld [vmem:[#allocation7 + $0x1a8] sm:$0xff] }
 0xb92   : > { %v11431_v42 = vpop.permute.xlu0 %5329 }
 0xb98   : > { %5514 = vperm.xlu0 %7367, %v7500_v3   ;;  %v5400_v36 = vpop.permute.xlu2 %5399 }
 0xb99   : > { %v11433_v1 = vpop.permute.xlu1 %5349  ;;  %v5589_v31 = vmul.f32 %v5400_v36, %v5077_v28  ;;  %v5071_v28 = vld [vmem:[#allocation7 + $0xd0] sm:$0xff] }
 0xb9a   : > { %v11435_v39 = vpop.permute.xlu0 %5344 }
 0xba0   : > { %v11437_v44 = vpop.permute.xlu2 %5414 }
 0xba1   : > { %v11439_v59 = vpop.permute.xlu1 %5364 }
 0xba2   : > { %v5360_v63 = vpop.permute.xlu0 %5359  ;;  %v5582_v30 = vmul.f32 %v11439_v59, %v5070_v55 }
 0xba3   : > { %v5581_v0 = vmul.f32 %v5360_v63, %v5069_v58  ;;  %v5106_v63 = vld [vmem:[#allocation7 + $0x1e8] sm:$0xff] }
 0xba5   : > { %5669 = vrot.lane.b32.xlu1 %v5581_v0, %s7942_s18  ;;  %v5062_v0 = vld [vmem:[#allocation7 + $0x88] sm:$0xff] }
 0xba8   : > { %v11442_v19 = vpop.permute.xlu2 %5429 }
 0xba9   : > { %v5380_v50 = vpop.permute.xlu1 %5379 }
 0xbaa   : > { %v5585_v62 = vmul.f32 %v5380_v50, %v5073_v38  ;;  %v11444_v40 = vpop.permute.xlu0 %5374 }
 0xbac   : > { %5677 = vrot.lane.b32.xlu2 %v5585_v62, %s7942_s18 }
 0xbb0   : > { %v5445_v34 = vpop.permute.xlu2 %5444 }
 0xbb1   : > { %v11447_v26 = vpop.permute.xlu1 %5394  ;;  %v5598_v3 = vmul.f32 %v5445_v34, %v5086_v7  ;;  %v5078_v34 = vld [vmem:[#allocation7 + $0x108] sm:$0xff] }
 0xbb2   : > { %v11449_v37 = vpop.permute.xlu0 %5389  ;;  %v5905_v7 = vld [vmem:[#allocation20 + $0x48] sm:$0xff] }
 0xbb8   : > { %v5460_v49 = vpop.permute.xlu2 %5459 }
 0xbb9   : > { %v5601_v20 = vmul.f32 %v5460_v49, %v5089_v14  ;;  %v11451_v60 = vpop.permute.xlu1 %5409  ;;  %v5574_v14 = vmul.f32 %v11412_v61, %v5062_v0  ;;  %v5102_v49 = vld [vmem:[#allocation7 + $0x1c8] sm:$0xff]  ;;  %v5076_v0 = vld [vmem:[#allocation7 + $0xf8] sm:$0xff] }
 0xbba   : > { %v11453_v16 = vpop.permute.xlu0 %5404 }
 0xbbb   : > { %5758 = vrot.lane.b32.xlu1 %v5601_v20, %s7943_s5  ;;  %v5082_v20 = vld [vmem:[#allocation7 + $0x128] sm:$0xff]  ;;  %v5590_v43 = vmul.f32 %v11453_v16, %v5078_v34  ;;  %v5899_v34 = vld [vmem:[#allocation20 + $0x18] sm:$0xff] }
 0xbc0   : > { %v5540_v9 = vpop.permute.xlu2 %5539 }
 0xbc1   : > { %v11456_v35 = vpop.permute.xlu1 %5424  ;;  %v5617_v56 = vmul.f32 %v5540_v9, %v5105_v52  ;;  %v5911_v52 = vld [vmem:[#allocation20 + $0x78] sm:$0xff] }
 0xbc2   : > { %v5420_v8 = vpop.permute.xlu0 %5419  ;;  %6846 = vmatpush.msra.mxu2 %v5911_v52  ;;  %6847 = vmatpush.msra.mxu3 %v5911_v52 }
 0xbc3   : > { %5653 = vrot.lane.b32.xlu1 %v5573_v25, %s7942_s18  ;;  %v5593_v4 = vmul.f32 %v5420_v8, %v5081_v51  ;;  %v5594_v8 = vmul.f32 %v11456_v35, %v5082_v20  ;;  %6845 = vmatpush.msra.mxu1 %v5911_v52 }
 0xbc4   : > { %5916 = vmatpush.msra.mxu0 %v5911_v52 }
 0xbc8   : > { %v5525_v24 = vpop.permute.xlu2 %5524 }
 0xbc9   : > { %v5440_v6 = vpop.permute.xlu1 %5439  ;;  %v5614_v25 = vmul.f32 %v5525_v24, %v5102_v49  ;;  %v5898_v49 = vld [vmem:[#allocation20 + $0x10] sm:$0xff] }
 0xbca   : > { %v5597_v13 = vmul.f32 %v5440_v6, %v5085_v23  ;;  %v11459_v46 = vpop.permute.xlu0 %5434  ;;  %v5066_v23 = vld [vmem:[#allocation7 + $0xa8] sm:$0xff] }
 0xbcb   : > { %5742 = vrot.lane.b32.xlu1 %v5593_v4, %s7943_s5  ;;  %v5075_v4 = vld [vmem:[#allocation7 + $0xf0] sm:$0xff]  ;;  %v5094_v6 = vld [vmem:[#allocation7 + $0x188] sm:$0xff] }
 0xbcc   : > { %5750 = vrot.lane.b32.xlu0 %v5597_v13, %s7943_s5  ;;  %v5578_v13 = vmul.f32 %v11435_v39, %v5066_v23  ;;  %v5587_v16 = vmul.f32 %v11449_v37, %v5075_v4  ;;  %v5091_v37 = vld [vmem:[#allocation7 + $0x170] sm:$0xff] }
 0xbd0   : > { %v11470_v33 = vpop.permute.xlu2 %5504 }
 0xbd1   : > { %v11463_v57 = vpop.permute.xlu1 %5454 }
 0xbd2   : > { %v11465_v41 = vpop.permute.xlu0 %5449 }
 0xbd4   : > { %5839 = vrot.lane.b32.xlu0 %v5617_v56, %s7944_s28  ;;  %v5910_v56 = vld [vmem:[#allocation20 + $0x70] sm:$0xff] }
 0xbd5   : > { %6849 = vmatpush.msra.mxu2 %v5910_v56  ;;  %6850 = vmatpush.msra.mxu3 %v5910_v56 }
 0xbd6   : > { %6848 = vmatpush.msra.mxu1 %v5910_v56  ;;  %5917 = vmatpush.msra.mxu0 %v5910_v56 }
 0xbd8   : > { %v11478_v36 = vpop.permute.xlu2 %5549 }
 0xbd9   : > { %v5520_v15 = vpop.permute.xlu1 %5519 }
 0xbda   : > { %v5613_v27 = vmul.f32 %v5520_v15, %v5101_v18  ;;  %v5465_v17 = vpop.permute.xlu0 %5464  ;;  %v5087_v18 = vld [vmem:[#allocation7 + $0x150] sm:$0xff]  ;;  %v5583_v15 = vmul.f32 %v11424_v47, %v5071_v28 }
 0xbdb   : > { %v5602_v54 = vmul.f32 %v5465_v17, %v5090_v22  ;;  %v5909_v17 = vld [vmem:[#allocation20 + $0x68] sm:$0xff]  ;;  %v5063_v47 = vld [vmem:[#allocation7 + $0x90] sm:$0xff] }
 0xbdc   : > { %5734 = vrot.lane.b32.xlu0 %v5589_v31, %s7943_s5  ;;  %5831 = vrot.lane.b32.xlu2 %v5613_v27, %s7944_s28  ;;  %v5599_v31 = vmul.f32 %v11465_v41, %v5087_v18  ;;  %v5610_v41 = vmul.f32 %v11470_v33, %v5098_v45  ;;  %v5575_v55 = vmul.f32 %v11431_v42, %v5063_v47  ;;  %v5079_v33 = vld [vmem:[#allocation7 + $0x110] sm:$0xff]  ;;  %v5903_v42 = vld [vmem:[#allocation20 + $0x38] sm:$0xff] }
 0xbdd   : > { %6852 = vmatpush.msra.mxu2 %v5909_v17  ;;  %6853 = vmatpush.msra.mxu3 %v5909_v17  ;;  %v5103_v22 = vld [vmem:[#allocation7 + $0x1d0] sm:$0xff]  ;;  %v5080_v18 = vld [vmem:[#allocation7 + $0x118] sm:$0xff] }
 0xbde   : > { %6851 = vmatpush.msra.mxu1 %v5909_v17  ;;  %5918 = vmatpush.msra.mxu0 %v5909_v17  ;;  %v5068_v17 = vld [vmem:[#allocation7 + $0xb8] sm:$0xff] }
 0xbdf   : > { %6855 = vmatpush.msra.mxu2 %v5908_v48  ;;  %6856 = vmatpush.msra.mxu3 %v5908_v48 }
 0xbe0   : > { %v11484_v59 = vpop.permute.xlu2 %5474  ;;  %6854 = vmatpush.msra.mxu1 %v5908_v48  ;;  %5919 = vmatpush.msra.mxu0 %v5908_v48  ;;  %v5100_v48 = vld [vmem:[#allocation7 + $0x1b8] sm:$0xff] }
 0xbe1   : > { %v5500_v2 = vpop.permute.xlu1 %5499 }
 0xbe2   : > { %v5480_v21 = vpop.permute.xlu0 %5479  ;;  %v5609_v50 = vmul.f32 %v5500_v2, %v5097_v5  ;;  %v5904_v2 = vld [vmem:[#allocation20 + $0x40] sm:$0xff]  ;;  %v5902_v5 = vld [vmem:[#allocation20 + $0x30] sm:$0xff] }
 0xbe3   : > { %v5605_v11 = vmul.f32 %v5480_v21, %v5093_v32  ;;  %v5107_v32 = vld [vmem:[#allocation7 + $0x1f0] sm:$0xff] }
 0xbe4   : > { %5679 = vrot.lane.b32.xlu0 %v5586_v29, %s7942_s18  ;;  %5661 = vrot.lane.b32.xlu2 %v5577_v53, %s7942_s18  ;;  %v5907_v29 = vld [vmem:[#allocation20 + $0x58] sm:$0xff]  ;;  %v5619_v21 = vmul.f32 %v11478_v36, %v5107_v32  ;;  %v5591_v36 = vmul.f32 %v11451_v60, %v5079_v33  ;;  %v5067_v60 = vld [vmem:[#allocation7 + $0xb0] sm:$0xff] }
 0xbe5   : > { %5815 = vrot.lane.b32.xlu1 %v5605_v11, %s7944_s28  ;;  %6858 = vmatpush.msra.mxu2 %v5907_v29  ;;  %v5906_v11 = vld [vmem:[#allocation20 + $0x50] sm:$0xff] }
 0xbe6   : > { %6859 = vmatpush.msra.mxu3 %v5907_v29  ;;  %6857 = vmatpush.msra.mxu1 %v5907_v29 }
 0xbe7   : > { %5920 = vmatpush.msra.mxu0 %v5907_v29  ;;  %6861 = vmatpush.msra.mxu2 %v5906_v11  ;;  %v5096_v29 = vld [vmem:[#allocation7 + $0x198] sm:$0xff] }
 0xbe8   : > { %v11496_v61 = vpop.permute.xlu2 %5494  ;;  %6862 = vmatpush.msra.mxu3 %v5906_v11  ;;  %6860 = vmatpush.msra.mxu1 %v5906_v11 }
 0xbe9   : > { %v5485_v38 = vpop.permute.xlu1 %5484  ;;  %6864 = vmatpush.msra.mxu2 %v5905_v7  ;;  %5921 = vmatpush.msra.mxu0 %v5906_v11 }
 0xbea   : > { %v5545_v58 = vpop.permute.xlu0 %5544  ;;  %v5606_v9 = vmul.f32 %v5485_v38, %v5094_v6  ;;  %6865 = vmatpush.msra.mxu3 %v5905_v7  ;;  %6863 = vmatpush.msra.mxu1 %v5905_v7 }
 0xbeb   : > { %v5618_v62 = vmul.f32 %v5545_v58, %v5106_v63  ;;  %6867 = vmatpush.msra.mxu2 %v5904_v2  ;;  %5922 = vmatpush.msra.mxu0 %v5905_v7  ;;  %v5901_v63 = vld [vmem:[#allocation20 + $0x28] sm:$0xff] }
 0xbec   : > { %5752 = vrot.lane.b32.xlu0 %v5598_v3, %s7943_s5  ;;  %5671 = vrot.lane.b32.xlu2 %v5582_v30, %s7942_s18  ;;  %v5083_v3 = vld [vmem:[#allocation7 + $0x130] sm:$0xff] }
 0xbed   : > { %5760 = vrot.lane.b32.xlu1 %v5602_v54, %s7943_s5  ;;  %6868 = vmatpush.msra.mxu3 %v5904_v2  ;;  %v5595_v58 = vmul.f32 %v11442_v19, %v5083_v3  ;;  %v5579_v19 = vmul.f32 %v11433_v1, %v5067_v60  ;;  %v5072_v1 = vld [vmem:[#allocation7 + $0xd8] sm:$0xff] }
 0xbee   : > { %6866 = vmatpush.msra.mxu1 %v5904_v2  ;;  %6870 = vmatpush.msra.mxu2 %v5903_v42 }
 0xbef   : > { %5923 = vmatpush.msra.mxu0 %v5904_v2  ;;  %6871 = vmatpush.msra.mxu3 %v5903_v42 }
 0xbf0   : > { %6873 = vmatpush.msra.mxu2 %v5902_v5  ;;  %6869 = vmatpush.msra.mxu1 %v5903_v42 }
 0xbf1   : > { %v11491_v51 = vpop.permute.xlu1 %5529  ;;  %5924 = vmatpush.msra.mxu0 %v5903_v42  ;;  %6874 = vmatpush.msra.mxu3 %v5902_v5 }
 0xbf2   : > { %v5470_v39 = vpop.permute.xlu0 %5469  ;;  %v5615_v54 = vmul.f32 %v11491_v51, %v5103_v22  ;;  %6876 = vmatpush.msra.mxu2 %v5901_v63  ;;  %6872 = vmatpush.msra.mxu1 %v5902_v5  ;;  %v5584_v51 = vmul.f32 %v11444_v40, %v5072_v1  ;;  %v5099_v40 = vld [vmem:[#allocation7 + $0x1b0] sm:$0xff] }
 0xbf3   : > { %v5603_v27 = vmul.f32 %v5470_v39, %v5091_v37  ;;  %5925 = vmatpush.msra.mxu0 %v5902_v5  ;;  %6877 = vmatpush.msra.mxu3 %v5901_v63  ;;  %v5104_v39 = vld [vmem:[#allocation7 + $0x1d8] sm:$0xff] }
 0xbf4   : > { %5841 = vrot.lane.b32.xlu0 %v5618_v62, %s7944_s28  ;;  %5823 = vrot.lane.b32.xlu2 %v5609_v50, %s7944_s28  ;;  %v5095_v50 = vld [vmem:[#allocation7 + $0x190] sm:$0xff]  ;;  %v5900_v62 = vld [vmem:[#allocation20 + $0x20] sm:$0xff]  ;;  %v5084_v37 = vld [vmem:[#allocation7 + $0x138] sm:$0xff] }
 0xbf5   : > { %5655 = vrot.lane.b32.xlu1 %v5574_v14, %s7942_s18  ;;  %6879 = vmatpush.msra.mxu2 %v5900_v62  ;;  %v5588_v14 = vmul.f32 %v11447_v26, %v5076_v0  ;;  %v5092_v26 = vld [vmem:[#allocation7 + $0x178] sm:$0xff] }
 0xbf6   : > { %6875 = vmatpush.msra.mxu1 %v5901_v63  ;;  %5926 = vmatpush.msra.mxu0 %v5901_v63  ;;  %v5604_v4 = vmul.f32 %v11484_v59, %v5092_v26 }
 0xbf7   : > { %6882 = vmatpush.msra.mxu2 %v5899_v34  ;;  %6880 = vmatpush.msra.mxu3 %v5900_v62 }
 0xbf8   : > { %6878 = vmatpush.msra.mxu1 %v5900_v62  ;;  %5927 = vmatpush.msra.mxu0 %v5900_v62 }
 0xbf9   : > { %v11502_v35 = vpop.permute.xlu1 %5509  ;;  %6885 = vmatpush.msra.mxu2 %v5898_v49  ;;  %6883 = vmatpush.msra.mxu3 %v5899_v34 }
 0xbfa   : > { %v5490_v38 = vpop.permute.xlu0 %5489  ;;  %6881 = vmatpush.msra.mxu1 %v5899_v34  ;;  %5928 = vmatpush.msra.mxu0 %v5899_v34  ;;  %v5611_v59 = vmul.f32 %v11502_v35, %v5099_v40  ;;  %v5592_v35 = vmul.f32 %v11437_v44, %v5080_v18  ;;  %v5580_v44 = vmul.f32 %v11420_v12, %v5068_v17 }
 0xbfb   : > { %v5607_v20 = vmul.f32 %v5490_v38, %v5095_v50  ;;  %6886 = vmatpush.msra.mxu3 %v5898_v49 }
 0xbfc   : > { %5736 = vrot.lane.b32.xlu0 %v5590_v43, %s7943_s5  ;;  %5833 = vrot.lane.b32.xlu2 %v5614_v25, %s7944_s28  ;;  %v5897_v43 = vld [vmem:[#allocation20 + $0x8] sm:$0xff]  ;;  %v5088_v25 = vld [vmem:[#allocation7 + $0x158] sm:$0xff] }
 0xbfd   : > { %5744 = vrot.lane.b32.xlu1 %v5594_v8, %s7943_s5  ;;  %6888 = vmatpush.msra.mxu2 %v5897_v43  ;;  %v5896_v8 = vld [vmem:[#allocation20] sm:$0xff]  ;;  %v5600_v23 = vmul.f32 %v11463_v57, %v5088_v25  ;;  %v5108_v57 = vld [vmem:[#allocation7 + $0x1f8] sm:$0xff] }
 0xbfe   : > { %6884 = vmatpush.msra.mxu1 %v5898_v49  ;;  %5929 = vmatpush.msra.mxu0 %v5898_v49 }
 0xbff   : > { %6891 = vmatpush.msra.mxu2 %v5896_v8  ;;  %6889 = vmatpush.msra.mxu3 %v5897_v43 }
 0xc00   : > { %6887 = vmatpush.msra.mxu1 %v5897_v43  ;;  %5930 = vmatpush.msra.mxu0 %v5897_v43 }
 0xc01   : > { %v11511_v53 = vpop.permute.xlu1 %5554  ;;  %6892 = vmatpush.msra.mxu3 %v5896_v8 }
 0xc02   : > { %v5535_v6 = vpop.permute.xlu0 %5534  ;;  %6890 = vmatpush.msra.mxu1 %v5896_v8  ;;  %5931 = vmatpush.msra.mxu0 %v5896_v8 }
 0xc04   : > { %5681 = vrot.lane.b32.xlu0 %v5587_v16, %s7942_s18  ;;  %5663 = vrot.lane.b32.xlu2 %v5578_v13, %s7942_s18  ;;  %v5064_v16 = vld [vmem:[#allocation7 + $0x98] sm:$0xff] }
 0xc05   : > { %5817 = vrot.lane.b32.xlu1 %v5606_v9, %s7944_s28  ;;  %v5620_v9 = vmul.f32 %v11511_v53, %v5108_v57  ;;  %v5576_v52 = vmul.f32 %v11429_v10, %v5064_v16 }
 0xc06   : > { %v5678_v24 = vpop.permute.xlu2 %5677 }
 0xc07   : > { %5714 = vst.msk [vmem:[#allocation8 + $0x60] sm:$0xff] %vm5701_vm2, %v5678_v24 }
 0xc0a   : > { %v5515_v24 = vpop.permute.xlu0 %5514 }
 0xc0c   : > { %5754 = vrot.lane.b32.xlu0 %v5599_v31, %s7943_s5  ;;  %5673 = vrot.lane.b32.xlu2 %v5583_v15, %s7942_s18  ;;  %v5616_v15 = vmul.f32 %v5535_v6, %v5104_v39  ;;  %v5596_v31 = vmul.f32 %v11459_v46, %v5084_v37  ;;  %v5612_v46 = vmul.f32 %v5515_v24, %v5100_v48  ;;  %v5989_v48 = vld [vmem:[%s8319_s14 + $0x40] sm:$0xff] }
 0xc0d   : > { %5762 = vrot.lane.b32.xlu1 %v5603_v27, %s7943_s5 }
 0xc14   : > { %5843 = vrot.lane.b32.xlu0 %v5619_v21, %s7944_s28  ;;  %5825 = vrot.lane.b32.xlu2 %v5610_v41, %s7944_s28  ;;  %v5608_v41 = vmul.f32 %v11496_v61, %v5096_v29 }
 0xc15   : > { %5657 = vrot.lane.b32.xlu1 %v5575_v55, %s7942_s18 }
 0xc17   : > { %v5670_v30 = vpop.permute.xlu1 %5669 }
 0xc18   : > { %5710 = vst.msk [vmem:[#allocation8 + $0x40] sm:$0xff] %vm5701_vm2, %v5670_v30 }
 0xc1c   : > { %5738 = vrot.lane.b32.xlu0 %v5591_v36, %s7943_s5  ;;  %5835 = vrot.lane.b32.xlu2 %v5615_v54, %s7944_s28 }
 0xc1d   : > { %5746 = vrot.lane.b32.xlu1 %v5595_v58, %s7943_s5 }
 0xc24   : > { %5683 = vrot.lane.b32.xlu0 %v5588_v14, %s7942_s18  ;;  %5665 = vrot.lane.b32.xlu2 %v5579_v19, %s7942_s18 }
 0xc25   : > { %5819 = vrot.lane.b32.xlu1 %v5607_v20, %s7944_s28 }
 0xc2c   : > { %5756 = vrot.lane.b32.xlu0 %v5600_v23, %s7943_s5  ;;  %5675 = vrot.lane.b32.xlu2 %v5584_v51, %s7942_s18 }
 0xc2d   : > { %5764 = vrot.lane.b32.xlu1 %v5604_v4, %s7943_s5  ;;  %v5759_v13 = vpop.permute.xlu1 %5758 }
 0xc2e   : > { %5795 = vst.msk [vmem:[#allocation8 + $0x60] sm:$0xff] %vm5782_vm7, %v5759_v13 }
 0xc34   : > { %5845 = vrot.lane.b32.xlu0 %v5620_v9, %s7944_s28  ;;  %5827 = vrot.lane.b32.xlu2 %v5611_v59, %s7944_s28 }
 0xc35   : > { %5659 = vrot.lane.b32.xlu1 %v5576_v52, %s7942_s18  ;;  %v5654_v56 = vpop.permute.xlu1 %5653 }
 0xc36   : > { %v5832_v28 = vpop.permute.xlu2 %5831  ;;  %5702 = vst.msk [vmem:[#allocation8] sm:$0xff] %vm5701_vm2, %v5654_v56 }
 0xc3c   : > { %5740 = vrot.lane.b32.xlu0 %v5592_v35, %s7943_s5  ;;  %5837 = vrot.lane.b32.xlu2 %v5616_v15, %s7944_s28 }
 0xc3d   : > { %5748 = vrot.lane.b32.xlu1 %v5596_v31, %s7943_s5  ;;  %v5743_v45 = vpop.permute.xlu1 %5742 }
 0xc3e   : > { %v5751_v10 = vpop.permute.xlu0 %5750  ;;  %v5662_v27 = vpop.permute.xlu2 %5661 }
 0xc3f   : > { %5791 = vst.msk [vmem:[#allocation8 + $0x40] sm:$0xff] %vm5782_vm7, %v5751_v10 }
 0xc40   : > { %5872 = vst.msk [vmem:[#allocation8 + $0x40] sm:$0xff] %vm5863_vm8, %v5832_v28 }
 0xc41   : > { %5706 = vst.msk [vmem:[#allocation8 + $0x20] sm:$0xff] %vm5701_vm2, %v5662_v27  ;;  %v11602_v27 = vld [vmem:[%s12616_s26] ss:$0 sm:$0xff] }
 0xc42   : > { %5787 = vst.msk [vmem:[#allocation8 + $0x20] sm:$0xff] %vm5782_vm7, %v5743_v45 }
 0xc44   : > { %5829 = vrot.lane.b32.xlu0 %v5612_v46, %s7944_s28  ;;  %5667 = vrot.lane.b32.xlu2 %v5580_v44, %s7942_s18 }
 0xc46   : > { %v5840_v32 = vpop.permute.xlu0 %5839  ;;  %v5672_v53 = vpop.permute.xlu2 %5671 }
 0xc47   : > { %5876 = vst.msk [vmem:[#allocation8 + $0x60] sm:$0xff] %vm5863_vm8, %v5840_v32  ;;  %v5888_v47 = vld [vmem:[#allocation8 + $0x40] sm:$0xff] }
 0xc48   : > { %5711 = vst.msk [vmem:[#allocation8 + $0x48] sm:$0xff] %vm5701_vm2, %v5672_v53  ;;  %5956 = vmatmul.f32.vlgmr.msra.gmra.mxu2 %v5888_v47  ;;  %v5993_v32 = vld [vmem:[%s8319_s14 + $0x60] sm:$0xff] }
 0xc4c   : > { %5821 = vrot.lane.b32.xlu2 %v5608_v41, %s7944_s28  ;;  %v5981_v41 = vld [vmem:[%s8319_s14] sm:$0xff] }
 0xc4e   : > { %v5735_v12 = vpop.permute.xlu0 %5734  ;;  %v5824_v21 = vpop.permute.xlu2 %5823  ;;  %v5892_v11 = vld [vmem:[#allocation8 + $0x60] sm:$0xff] }
 0xc4f   : > { %5783 = vst.msk [vmem:[#allocation8] sm:$0xff] %vm5782_vm7, %v5735_v12  ;;  %5968 = vmatmul.f32.vlgmr.msra.gmra.mxu3 %v5892_v11 }
 0xc50   : > { %5868 = vst.msk [vmem:[#allocation8 + $0x20] sm:$0xff] %vm5863_vm8, %v5824_v21 }
 0xc56   : > { %v5680_v55 = vpop.permute.xlu0 %5679  ;;  %v5834_v7 = vpop.permute.xlu2 %5833 }
 0xc57   : > { %5715 = vst.msk [vmem:[#allocation8 + $0x68] sm:$0xff] %vm5701_vm2, %v5680_v55  ;;  %v5816_v2 = vpop.permute.xlu1 %5815  ;;  %v5884_v33 = vld [vmem:[#allocation8 + $0x20] sm:$0xff] }
 0xc58   : > { %5864 = vst.msk [vmem:[#allocation8] sm:$0xff] %vm5863_vm8, %v5816_v2  ;;  %5944 = vmatmul.f32.vlgmr.msra.gmra.mxu1 %v5884_v33 }
 0xc5e   : > { %v5753_v61 = vpop.permute.xlu0 %5752  ;;  %v5664_v22 = vpop.permute.xlu2 %5663 }
 0xc5f   : > { %5792 = vst.msk [vmem:[#allocation8 + $0x48] sm:$0xff] %vm5782_vm7, %v5753_v61  ;;  %v5761_v30 = vpop.permute.xlu1 %5760  ;;  %v5880_v3 = vld [vmem:[#allocation8] sm:$0xff]  ;;  %v5990_v61 = vld [vmem:[%s8319_s14 + $0x48] sm:$0xff] }
 0xc60   : > { %5873 = vst.msk [vmem:[#allocation8 + $0x48] sm:$0xff] %vm5863_vm8, %v5834_v7  ;;  %5932 = vmatmul.f32.vlgmr.msra.gmra.mxu0 %v5880_v3  ;;  %v5985_v7 = vld [vmem:[%s8319_s14 + $0x20] sm:$0xff] }
 0xc61   : > { %5707 = vst.msk [vmem:[#allocation8 + $0x28] sm:$0xff] %vm5701_vm2, %v5664_v22 }
 0xc62   : > { %5796 = vst.msk [vmem:[#allocation8 + $0x68] sm:$0xff] %vm5782_vm7, %v5761_v30 }
 0xc66   : > { %v5842_v42 = vpop.permute.xlu0 %5841  ;;  %v5674_v36 = vpop.permute.xlu2 %5673 }
 0xc67   : > { %5877 = vst.msk [vmem:[#allocation8 + $0x68] sm:$0xff] %vm5863_vm8, %v5842_v42  ;;  %v5656_v54 = vpop.permute.xlu1 %5655  ;;  %v5889_v5 = vld [vmem:[#allocation8 + $0x48] sm:$0xff] }
 0xc68   : > { %5712 = vst.msk [vmem:[#allocation8 + $0x50] sm:$0xff] %vm5701_vm2, %v5674_v36  ;;  %5959 = vmatmul.f32.gmra.mxu2 %v5889_v5  ;;  %v5994_v42 = vld [vmem:[%s8319_s14 + $0x68] sm:$0xff] }
 0xc69   : > { %5703 = vst.msk [vmem:[#allocation8 + $0x8] sm:$0xff] %vm5701_vm2, %v5656_v54 }
 0xc6e   : > { %v5737_v58 = vpop.permute.xlu0 %5736  ;;  %v5826_v63 = vpop.permute.xlu2 %5825  ;;  %v5893_v60 = vld [vmem:[#allocation8 + $0x68] sm:$0xff] }
 0xc6f   : > { %5784 = vst.msk [vmem:[#allocation8 + $0x8] sm:$0xff] %vm5782_vm7, %v5737_v58  ;;  %v5745_v0 = vpop.permute.xlu1 %5744  ;;  %5971 = vmatmul.f32.gmra.mxu3 %v5893_v60  ;;  %v5982_v58 = vld [vmem:[%s8319_s14 + $0x8] sm:$0xff] }
 0xc70   : > { %5788 = vst.msk [vmem:[#allocation8 + $0x28] sm:$0xff] %vm5782_vm7, %v5745_v0 }
 0xc71   : > { %5869 = vst.msk [vmem:[#allocation8 + $0x28] sm:$0xff] %vm5863_vm8, %v5826_v63 }
 0xc76   : > { %v5682_v38 = vpop.permute.xlu0 %5681  ;;  %v5836_v50 = vpop.permute.xlu2 %5835 }
 0xc77   : > { %5716 = vst.msk [vmem:[#allocation8 + $0x70] sm:$0xff] %vm5701_vm2, %v5682_v38  ;;  %v5818_v62 = vpop.permute.xlu1 %5817 }
 0xc78   : > { %5865 = vst.msk [vmem:[#allocation8 + $0x8] sm:$0xff] %vm5863_vm8, %v5818_v62  ;;  %v5885_v19 = vld [vmem:[#allocation8 + $0x28] sm:$0xff] }
 0xc79   : > { %5947 = vmatmul.f32.gmra.mxu1 %v5885_v19 }
 0xc7e   : > { %v5755_v14 = vpop.permute.xlu0 %5754  ;;  %v5666_v34 = vpop.permute.xlu2 %5665 }
 0xc7f   : > { %5793 = vst.msk [vmem:[#allocation8 + $0x50] sm:$0xff] %vm5782_vm7, %v5755_v14  ;;  %v5763_v49 = vpop.permute.xlu1 %5762  ;;  %v5881_v20 = vld [vmem:[#allocation8 + $0x8] sm:$0xff]  ;;  %v5991_v14 = vld [vmem:[%s8319_s14 + $0x50] sm:$0xff] }
 0xc80   : > { %5874 = vst.msk [vmem:[#allocation8 + $0x50] sm:$0xff] %vm5863_vm8, %v5836_v50  ;;  %5935 = vmatmul.f32.gmra.mxu0 %v5881_v20  ;;  %v5986_v50 = vld [vmem:[%s8319_s14 + $0x28] sm:$0xff] }
 0xc81   : > { %5708 = vst.msk [vmem:[#allocation8 + $0x30] sm:$0xff] %vm5701_vm2, %v5666_v34 }
 0xc82   : > { %5797 = vst.msk [vmem:[#allocation8 + $0x70] sm:$0xff] %vm5782_vm7, %v5763_v49 }
 0xc86   : > { %v5844_v43 = vpop.permute.xlu0 %5843  ;;  %v5676_v1 = vpop.permute.xlu2 %5675 }
 0xc87   : > { %5878 = vst.msk [vmem:[#allocation8 + $0x70] sm:$0xff] %vm5863_vm8, %v5844_v43  ;;  %v5658_v25 = vpop.permute.xlu1 %5657  ;;  %v5890_v26 = vld [vmem:[#allocation8 + $0x50] sm:$0xff] }
 0xc88   : > { %5713 = vst.msk [vmem:[#allocation8 + $0x58] sm:$0xff] %vm5701_vm2, %v5676_v1  ;;  %5962 = vmatmul.f32.gmra.mxu2 %v5890_v26  ;;  %v5983_v43 = vld [vmem:[%s8319_s14 + $0x10] sm:$0xff] }
 0xc89   : > { %5704 = vst.msk [vmem:[#allocation8 + $0x10] sm:$0xff] %vm5701_vm2, %v5658_v25 }
 0xc8e   : > { %v5739_v8 = vpop.permute.xlu0 %5738  ;;  %v5828_v51 = vpop.permute.xlu2 %5827  ;;  %v5894_v23 = vld [vmem:[#allocation8 + $0x70] sm:$0xff] }
 0xc8f   : > { %5785 = vst.msk [vmem:[#allocation8 + $0x10] sm:$0xff] %vm5782_vm7, %v5739_v8  ;;  %v5747_v4 = vpop.permute.xlu1 %5746  ;;  %5974 = vmatmul.f32.gmra.mxu3 %v5894_v23 }
 0xc90   : > { %5789 = vst.msk [vmem:[#allocation8 + $0x30] sm:$0xff] %vm5782_vm7, %v5747_v4  ;;  %v7945_v4 = vmov 128.0  }
 0xc91   : > { %5870 = vst.msk [vmem:[#allocation8 + $0x30] sm:$0xff] %vm5863_vm8, %v5828_v51  ;;  %v5987_v51 = vld [vmem:[%s8319_s14 + $0x30] sm:$0xff]  ;;  %7501 = vrcp.f32 %v7945_v4 }
 0xc96   : > { %v5684_v6 = vpop.permute.xlu0 %5683  ;;  %v5838_v13 = vpop.permute.xlu2 %5837 }
 0xc97   : > { %5717 = vst.msk [vmem:[#allocation8 + $0x78] sm:$0xff] %vm5701_vm2, %v5684_v6  ;;  %v5820_v40 = vpop.permute.xlu1 %5819 }
 0xc98   : > { %5866 = vst.msk [vmem:[#allocation8 + $0x10] sm:$0xff] %vm5863_vm8, %v5820_v40  ;;  %v5886_v57 = vld [vmem:[#allocation8 + $0x30] sm:$0xff] }
 0xc99   : > { %5950 = vmatmul.f32.gmra.mxu1 %v5886_v57 }
 0xc9e   : > { %v5757_v16 = vpop.permute.xlu0 %5756  ;;  %v5668_v59 = vpop.permute.xlu2 %5667 }
 0xc9f   : > { %5794 = vst.msk [vmem:[#allocation8 + $0x58] sm:$0xff] %vm5782_vm7, %v5757_v16  ;;  %v5765_v9 = vpop.permute.xlu1 %5764  ;;  %v5882_v52 = vld [vmem:[#allocation8 + $0x10] sm:$0xff]  ;;  %v5996_v16 = vld [vmem:[%s8319_s14 + $0x78] sm:$0xff] }
 0xca0   : > { %5875 = vst.msk [vmem:[#allocation8 + $0x58] sm:$0xff] %vm5863_vm8, %v5838_v13  ;;  %5938 = vmatmul.f32.gmra.mxu0 %v5882_v52  ;;  %v7502_v13 = vpop.eup %7501 }
 0xca1   : > { %5709 = vst.msk [vmem:[#allocation8 + $0x38] sm:$0xff] %vm5701_vm2, %v5668_v59  ;;  %v6046_v40 = vmul.f32 128.0, %v7502_v13  ;;  %vm6050_vm9 = vweird.f32 %v7502_v13 }
 0xca2   : > { %5798 = vst.msk [vmem:[#allocation8 + $0x78] sm:$0xff] %vm5782_vm7, %v5765_v9 }
 0xca6   : > { %v5846_v56 = vpop.permute.xlu0 %5845  ;;  %v5822_v37 = vpop.permute.xlu2 %5821 }
 0xca7   : > { %5879 = vst.msk [vmem:[#allocation8 + $0x78] sm:$0xff] %vm5863_vm8, %v5846_v56  ;;  %v5660_v24 = vpop.permute.xlu1 %5659  ;;  %v5891_v28 = vld [vmem:[#allocation8 + $0x58] sm:$0xff] }
 0xca8   : > { %5705 = vst.msk [vmem:[#allocation8 + $0x18] sm:$0xff] %vm5701_vm2, %v5660_v24  ;;  %5965 = vmatmul.f32.gmra.mxu2 %v5891_v28  ;;  %v5984_v56 = vld [vmem:[%s8319_s14 + $0x18] sm:$0xff]  ;;  %v6047_v24 = vsub.f32 1.0, %v6046_v40 }
 0xcae   : > { %v5741_v18 = vpop.permute.xlu0 %5740  ;;  %v5895_v39 = vld [vmem:[#allocation8 + $0x78] sm:$0xff] }
 0xcaf   : > { %5786 = vst.msk [vmem:[#allocation8 + $0x18] sm:$0xff] %vm5782_vm7, %v5741_v18  ;;  %v5749_v35 = vpop.permute.xlu1 %5748  ;;  %5977 = vmatmul.f32.gmra.mxu3 %v5895_v39 }
 0xcb0   : > { %5867 = vst.msk [vmem:[#allocation8 + $0x18] sm:$0xff] %vm5863_vm8, %v5822_v37  ;;  %v6048_v37 = vmul.f32 %v7502_v13, %v6047_v24 }
 0xcb1   : > { %5790 = vst.msk [vmem:[#allocation8 + $0x38] sm:$0xff] %vm5782_vm7, %v5749_v35 }
 0xcb6   : > { %v5830_v15 = vpop.permute.xlu0 %5829 }
 0xcb7   : > { %5871 = vst.msk [vmem:[#allocation8 + $0x38] sm:$0xff] %vm5863_vm8, %v5830_v15  ;;  %v5883_v31 = vld [vmem:[#allocation8 + $0x18] sm:$0xff] }
 0xcb8   : > { %5941 = vmatmul.f32.gmra.mxu0 %v5883_v31  ;;  %v5988_v31 = vld [vmem:[%s8319_s14 + $0x38] sm:$0xff] }
 0xcbe   : > { %v5887_v10 = vld [vmem:[#allocation8 + $0x38] sm:$0xff] }
 0xcbf   : > { %5953 = vmatmul.f32.gmra.mxu1 %v5887_v10 }
 0xccb   : > { %v5957_v17 = vpop.f32.mrf.mxu2 }
 0xccc   : > { %v5958_v45 = vadd.f32 %v11602_v27, %v5957_v17  ;;  %v5992_v17 = vld [vmem:[%s8319_s14 + $0x58] sm:$0xff] }
 0xcce   : > { %v11606_v44 = vadd.f32 %v5989_v48, %v5958_v45  ;;  %v6049_v48 = vadd.f32 %v7502_v13, %v6048_v37 }
 0xcd0   : > { %6029 = vadd.xlane.f32.xlu2 %v11606_v44 }
 0xcd2   : > { %v5969_v46 = vpop.f32.mrf.mxu3 }
 0xcd3   : > { %v5970_v53 = vadd.f32 %v11602_v27, %v5969_v46 }
 0xcd5   : > { %v11611_v29 = vadd.f32 %v5993_v32, %v5970_v53  ;;  %v5945_v11 = vpop.f32.mrf.mxu1  ;;  %v11678_v32 = vsel %vm6050_vm9, %v7502_v13, %v6049_v48 }
 0xcd6   : > { %v5946_v55 = vadd.f32 %v11602_v27, %v5945_v11 }
 0xcd7   : > { %6037 = vadd.xlane.f32.xlu0 %v11611_v29 }
 0xcd8   : > { %v11621_v2 = vadd.f32 %v5985_v7, %v5946_v55 }
 0xcdd   : > { %v5933_v47 = vpop.f32.mrf.mxu0 }
 0xcde   : > { %v5934_v12 = vadd.f32 %v11602_v27, %v5933_v47 }
 0xce0   : > { %v11616_v21 = vadd.f32 %v5981_v41, %v5934_v12  ;;  %v5995_v12 = vld [vmem:[%s8319_s14 + $0x70] sm:$0xff] }
 0xce2   : > { %6013 = vadd.xlane.f32.xlu1 %v11616_v21 }
 0xcea   : > { %6021 = vadd.xlane.f32.xlu1 %v11621_v2 }
 0xceb   : > { %v5960_v33 = vpop.f32.mrf.mxu2 }
 0xcec   : > { %v5961_v22 = vadd.f32 %v11602_v27, %v5960_v33 }
 0xcee   : > { %v11626_v30 = vadd.f32 %v5990_v61, %v5961_v22 }
 0xcf0   : > { %6031 = vadd.xlane.f32.xlu0 %v11626_v30 }
 0xcf2   : > { %v5972_v3 = vpop.f32.mrf.mxu3 }
 0xcf3   : > { %v5973_v36 = vadd.f32 %v11602_v27, %v5972_v3 }
 0xcf5   : > { %v11631_v54 = vadd.f32 %v5994_v42, %v5973_v36 }
 0xcf6   : > { %v5948_v0 = vpop.f32.mrf.mxu1 }
 0xcf7   : > { %6039 = vadd.xlane.f32.xlu1 %v11631_v54  ;;  %v5949_v38 = vadd.f32 %v11602_v27, %v5948_v0 }
 0xcf9   : > { %v11641_v62 = vadd.f32 %v5986_v50, %v5949_v38 }
 0xcfd   : > { %v5936_v5 = vpop.f32.mrf.mxu0 }
 0xcfe   : > { %v5937_v63 = vadd.f32 %v11602_v27, %v5936_v5 }
 0xd00   : > { %v11636_v60 = vadd.f32 %v5982_v58, %v5937_v63 }
 0xd02   : > { %6015 = vadd.xlane.f32.xlu2 %v11636_v60 }
 0xd0a   : > { %6023 = vadd.xlane.f32.xlu2 %v11641_v62 }
 0xd0b   : > { %v5963_v19 = vpop.f32.mrf.mxu2 }
 0xd0c   : > { %v5964_v34 = vadd.f32 %v11602_v27, %v5963_v19 }
 0xd0e   : > { %v11646_v49 = vadd.f32 %v5991_v14, %v5964_v34 }
 0xd10   : > { %6033 = vadd.xlane.f32.xlu1 %v11646_v49 }
 0xd12   : > { %v5975_v6 = vpop.f32.mrf.mxu3 }
 0xd13   : > { %v5976_v47 = vadd.f32 %v11602_v27, %v5975_v6 }
 0xd15   : > { %v11689_v7 = vadd.f32 %v5995_v12, %v5976_v47 }
 0xd16   : > { %v5951_v26 = vpop.f32.mrf.mxu1 }
 0xd17   : > { %v5952_v8 = vadd.f32 %v11602_v27, %v5951_v26 }
 0xd19   : > { %v11656_v23 = vadd.f32 %v5987_v51, %v5952_v8 }
 0xd1d   : > { %v5939_v20 = vpop.f32.mrf.mxu0 }
 0xd1e   : > { %v5940_v1 = vadd.f32 %v11602_v27, %v5939_v20 }
 0xd20   : > { %v11651_v25 = vadd.f32 %v5983_v43, %v5940_v1 }
 0xd22   : > { %6017 = vadd.xlane.f32.xlu0 %v11651_v25 }
 0xd2a   : > { %6025 = vadd.xlane.f32.xlu0 %v11656_v23 }
 0xd2b   : > { %v5966_v39 = vpop.f32.mrf.mxu2 }
 0xd2c   : > { %v5967_v35 = vadd.f32 %v11602_v27, %v5966_v39 }
 0xd2e   : > { %v11675_v46 = vadd.f32 %v5992_v17, %v5967_v35 }
 0xd32   : > { %v5978_v57 = vpop.f32.mrf.mxu3 }
 0xd33   : > { %v5979_v59 = vadd.f32 %v11602_v27, %v5978_v57 }
 0xd35   : > { %v5942_v9 = vpop.f32.mrf.mxu0  ;;  %v11661_v52 = vadd.f32 %v5996_v16, %v5979_v59 }
 0xd36   : > { %v5943_v28 = vadd.f32 %v11602_v27, %v5942_v9 }
 0xd37   : > { %6043 = vadd.xlane.f32.xlu0 %v11661_v52 }
 0xd38   : > { %v11666_v18 = vadd.f32 %v5984_v56, %v5943_v28 }
 0xd3a   : > { %6019 = vadd.xlane.f32.xlu2 %v11666_v18 }
 0xd3c   : > { %v5954_v15 = vpop.f32.mrf.mxu1 }
 0xd3d   : > { %v5955_v10 = vadd.f32 %v11602_v27, %v5954_v15 }
 0xd3f   : > { %v11673_v45 = vadd.f32 %v5988_v31, %v5955_v10 }
 0xd41   : > { %6027 = vadd.xlane.f32.xlu1 %v11673_v45 }
 0xd42   : > { %6035 = vadd.xlane.f32.xlu2 %v11675_v46 }
 0xd43   : > { %v6030_v53 = vpop.xlane.xlu2 %6029 }
 0xd44   : > { %v6060_v41 = vmul.f32 %v11678_v32, %v6030_v53 }
 0xd46   : > { %v11685_v11 = vsub.f32 %v11606_v44, %v6060_v41 }
 0xd48   : > { %v6092_v55 = vmul.f32 %v11685_v11, %v11685_v11 }
 0xd4a   : > { %6116 = vadd.xlane.f32.xlu0 %v6092_v55  ;;  %6041 = vadd.xlane.f32.xlu2 %v11689_v7  ;;  %v6038_v22 = vpop.xlane.xlu0 %6037 }
 0xd4b   : > { %v6064_v3 = vmul.f32 %v11678_v32, %v6038_v22 }
 0xd4d   : > { %v11700_v36 = vsub.f32 %v11611_v29, %v6064_v3 }
 0xd4f   : > { %v6096_v63 = vmul.f32 %v11700_v36, %v11700_v36 }
 0xd55   : > { %v6014_v33 = vpop.xlane.xlu1 %6013 }
 0xd56   : > { %v6052_v61 = vmul.f32 %v11678_v32, %v6014_v33 }
 0xd58   : > { %v11694_v27 = vsub.f32 %v11616_v21, %v6052_v61 }
 0xd5a   : > { %v6084_v44 = vmul.f32 %v11694_v27, %v11694_v27 }
 0xd5c   : > { %6100 = vadd.xlane.f32.xlu1 %v6084_v44 }
 0xd5d   : > { %v6022_v42 = vpop.xlane.xlu1 %6021 }
 0xd5e   : > { %v6056_v5 = vmul.f32 %v11678_v32, %v6022_v42 }
 0xd60   : > { %v11704_v58 = vsub.f32 %v11621_v2, %v6056_v5 }
 0xd62   : > { %v6088_v21 = vmul.f32 %v11704_v58, %v11704_v58 }
 0xd63   : > { %v6032_v0 = vpop.xlane.xlu0 %6031 }
 0xd64   : > { %v6061_v38 = vmul.f32 %v11678_v32, %v6032_v0  ;;  %6124 = vadd.xlane.f32.xlu1 %v6096_v63  ;;  %6108 = vadd.xlane.f32.xlu2 %v6088_v21  ;;  %v11787_v0 = vld [vmem:[%s12617_s4] ss:$0 sm:$0xff] }
 0xd66   : > { %v11712_v50 = vsub.f32 %v11626_v30, %v6061_v38 }
 0xd68   : > { %v6093_v29 = vmul.f32 %v11712_v50, %v11712_v50 }
 0xd6a   : > { %v6040_v20 = vpop.xlane.xlu1 %6039 }
 0xd6b   : > { %v6065_v17 = vmul.f32 %v11678_v32, %v6040_v20 }
 0xd6c   : > { %6118 = vadd.xlane.f32.xlu1 %v6093_v29 }
 0xd75   : > { %v6016_v2 = vpop.xlane.xlu2 %6015 }
 0xd76   : > { %v6053_v19 = vmul.f32 %v11678_v32, %v6016_v2  ;;  %v11792_v2 = vld [vmem:[%s12618_s9] ss:$0 sm:$0xff] }
 0xd78   : > { %v11718_v14 = vsub.f32 %v11636_v60, %v6053_v19 }
 0xd7a   : > { %v6085_v34 = vmul.f32 %v11718_v14, %v11718_v14 }
 0xd7c   : > { %6102 = vadd.xlane.f32.xlu2 %v6085_v34 }
 0xd7d   : > { %v6024_v43 = vpop.xlane.xlu2 %6023 }
 0xd7e   : > { %v6057_v1 = vmul.f32 %v11678_v32, %v6024_v43 }
 0xd80   : > { %v11724_v30 = vsub.f32 %v11641_v62, %v6057_v1 }
 0xd82   : > { %v6089_v26 = vmul.f32 %v11724_v30, %v11724_v30 }
 0xd83   : > { %v6034_v8 = vpop.xlane.xlu1 %6033 }
 0xd84   : > { %6110 = vadd.xlane.f32.xlu0 %v6089_v26  ;;  %v6062_v51 = vmul.f32 %v11678_v32, %v6034_v8 }
 0xd86   : > { %v11730_v60 = vsub.f32 %v11646_v49, %v6062_v51 }
 0xd88   : > { %v6094_v4 = vmul.f32 %v11730_v60, %v11730_v60 }
 0xd8a   : > { %6120 = vadd.xlane.f32.xlu2 %v6094_v4 }
 0xd95   : > { %v6018_v6 = vpop.xlane.xlu0 %6017 }
 0xd96   : > { %v6054_v13 = vmul.f32 %v11678_v32, %v6018_v6 }
 0xd98   : > { %v11736_v62 = vsub.f32 %v11651_v25, %v6054_v13 }
 0xd9a   : > { %v6086_v40 = vmul.f32 %v11736_v62, %v11736_v62 }
 0xd9c   : > { %6104 = vadd.xlane.f32.xlu0 %v6086_v40 }
 0xd9d   : > { %v6026_v57 = vpop.xlane.xlu0 %6025 }
 0xd9e   : > { %v6058_v16 = vmul.f32 %v11678_v32, %v6026_v57 }
 0xda0   : > { %v11742_v49 = vsub.f32 %v11656_v23, %v6058_v16 }
 0xda2   : > { %v6090_v59 = vmul.f32 %v11742_v49, %v11742_v49 }
 0xda4   : > { %6112 = vadd.xlane.f32.xlu1 %v6090_v59 }
 0xdaa   : > { %v6044_v24 = vpop.xlane.xlu0 %6043 }
 0xdab   : > { %v6067_v28 = vmul.f32 %v11678_v32, %v6044_v24 }
 0xdad   : > { %v6020_v9 = vpop.xlane.xlu2 %6019  ;;  %v11755_v15 = vsub.f32 %v11661_v52, %v6067_v28 }
 0xdae   : > { %v6055_v56 = vmul.f32 %v11678_v32, %v6020_v9 }
 0xdaf   : > { %v6099_v52 = vmul.f32 %v11755_v15, %v11755_v15 }
 0xdb0   : > { %v11748_v25 = vsub.f32 %v11666_v18, %v6055_v56 }
 0xdb2   : > { %v6087_v39 = vmul.f32 %v11748_v25, %v11748_v25 }
 0xdb4   : > { %6106 = vadd.xlane.f32.xlu1 %v6087_v39  ;;  %v6028_v37 = vpop.xlane.xlu1 %6027 }
 0xdb5   : > { %v6059_v23 = vmul.f32 %v11678_v32, %v6028_v37  ;;  %v6036_v35 = vpop.xlane.xlu2 %6035 }
 0xdb6   : > { %v6063_v31 = vmul.f32 %v11678_v32, %v6036_v35 }
 0xdb7   : > { %v11759_v10 = vsub.f32 %v11673_v45, %v6059_v23  ;;  %v11772_v45 = vsub.f32 %v11631_v54, %v6065_v17 }
 0xdb8   : > { %v11762_v18 = vsub.f32 %v11675_v46, %v6063_v31 }
 0xdb9   : > { %v6091_v48 = vmul.f32 %v11759_v10, %v11759_v10  ;;  %v6097_v61 = vmul.f32 %v11772_v45, %v11772_v45 }
 0xdba   : > { %v6095_v53 = vmul.f32 %v11762_v18, %v11762_v18 }
 0xdbb   : > { %6114 = vadd.xlane.f32.xlu2 %v6091_v48 }
 0xdbc   : > { %6122 = vadd.xlane.f32.xlu0 %v6095_v53  ;;  %6130 = vadd.xlane.f32.xlu1 %v6099_v52 }
 0xdbd   : > { %v6117_v47 = vpop.xlane.xlu0 %6116  ;;  %v6042_v46 = vpop.xlane.xlu2 %6041 }
 0xdbe   : > { %v6140_v41 = vmul.f32 %v6117_v47, %v11678_v32  ;;  %v6066_v12 = vmul.f32 %v11678_v32, %v6042_v46 }
 0xdc0   : > { %v6156_v55 = vadd.f32 1e-05, %v6140_v41  ;;  %v11777_v33 = vsub.f32 %v11689_v7, %v6066_v12 }
 0xdc2   : > { %7503 = vrsqrt.f32 %v6156_v55  ;;  %v6098_v22 = vmul.f32 %v11777_v33, %v11777_v33  ;;  %vm6250_vm11 = vweird.f32 %v6156_v55 }
 0xdc3   : > { %6126 = vadd.xlane.f32.xlu2 %v6097_v61 }
 0xdc4   : > { %6128 = vadd.xlane.f32.xlu0 %v6098_v22 }
 0xdc8   : > { %v7504_v54 = vpop.eup %7503 }
 0xdc9   : > { %v6245_v3 = vmul.f32 %v7504_v54, %v6156_v55  ;;  %vm6251_vm10 = vweird.f32 %v7504_v54 }
 0xdca   : > { %vm6252_vm12 = vmor %vm6250_vm11, %vm6251_vm10 }
 0xdcb   : > { %v6246_v44 = vmul.f32 %v7504_v54, %v6245_v3 }
 0xdcd   : > { %v6247_v42 = vmul.f32 0.5, %v6246_v44 }
 0xdcf   : > { %v6248_v5 = vsub.f32 1.5, %v6247_v42  ;;  %v6101_v63 = vpop.xlane.xlu1 %6100 }
 0xdd0   : > { %v6132_v21 = vmul.f32 %v6101_v63, %v11678_v32 }
 0xdd1   : > { %v6249_v7 = vmul.f32 %v7504_v54, %v6248_v5 }
 0xdd2   : > { %v6148_v38 = vadd.f32 1e-05, %v6132_v21 }
 0xdd3   : > { %v6253_v29 = vsel %vm6252_vm12, %v7504_v54, %v6249_v7 }
 0xdd4   : > { %v6332_v19 = vmul.f32 %v6253_v29, %v11685_v11  ;;  %7505 = vrsqrt.f32 %v6148_v38  ;;  %vm6170_vm14 = vweird.f32 %v6148_v38 }
 0xdd6   : > { %v6352_v34 = vmul.f32 %v11787_v0, %v6332_v19 }
 0xdd7   : > { %v6109_v20 = vpop.xlane.xlu2 %6108  ;;  %v6125_v43 = vpop.xlane.xlu1 %6124 }
 0xdd8   : > { %v6372_v1 = vadd.f32 %v11792_v2, %v6352_v34  ;;  %v6136_v26 = vmul.f32 %v6109_v20, %v11678_v32  ;;  %v6144_v8 = vmul.f32 %v6125_v43, %v11678_v32 }
 0xdda   : > { %v7506_v51 = vpop.eup %7505  ;;  %6388 = vst [vmem:[%s8348_s1 + $0x40] sm:$0xff] %v6372_v1  ;;  %v6152_v4 = vadd.f32 1e-05, %v6136_v26  ;;  %v6160_v6 = vadd.f32 1e-05, %v6144_v8 }
 0xddb   : > { %v6165_v13 = vmul.f32 %v7506_v51, %v6148_v38  ;;  %vm6171_vm13 = vweird.f32 %v7506_v51 }
 0xddc   : > { %7507 = vrsqrt.f32 %v6152_v4  ;;  %vm6172_vm15 = vmor %vm6170_vm14, %vm6171_vm13  ;;  %vm6210_vm3 = vweird.f32 %v6152_v4  ;;  %vm6290_vm5 = vweird.f32 %v6160_v6 }
 0xddd   : > { %v6166_v40 = vmul.f32 %v7506_v51, %v6165_v13  ;;  %7509 = vrsqrt.f32 %v6160_v6 }
 0xddf   : > { %v6167_v11 = vmul.f32 0.5, %v6166_v40  ;;  %v6119_v57 = vpop.xlane.xlu1 %6118 }
 0xde0   : > { %v6141_v16 = vmul.f32 %v6119_v57, %v11678_v32 }
 0xde1   : > { %v6168_v59 = vsub.f32 1.5, %v6167_v11 }
 0xde2   : > { %v7508_v9 = vpop.eup %7507  ;;  %v6157_v56 = vadd.f32 1e-05, %v6141_v16 }
 0xde3   : > { %v7510_v24 = vpop.eup %7509  ;;  %v6169_v28 = vmul.f32 %v7506_v51, %v6168_v59  ;;  %v6205_v39 = vmul.f32 %v7508_v9, %v6152_v4  ;;  %vm6211_vm0 = vweird.f32 %v7508_v9 }
 0xde4   : > { %v6285_v37 = vmul.f32 %v7510_v24, %v6160_v6  ;;  %7511 = vrsqrt.f32 %v6157_v56  ;;  %vm6291_vm1 = vweird.f32 %v7510_v24  ;;  %vm6212_vm4 = vmor %vm6210_vm3, %vm6211_vm0  ;;  %vm6260_vm7 = vweird.f32 %v6157_v56 }
 0xde5   : > { %v6173_v23 = vsel %vm6172_vm15, %v7506_v51, %v6169_v28  ;;  %v6206_v35 = vmul.f32 %v7508_v9, %v6205_v39  ;;  %vm6292_vm6 = vmor %vm6290_vm5, %vm6291_vm1 }
 0xde6   : > { %v6324_v31 = vmul.f32 %v6173_v23, %v11694_v27  ;;  %v6286_v17 = vmul.f32 %v7510_v24, %v6285_v37 }
 0xde7   : > { %v6207_v48 = vmul.f32 0.5, %v6206_v35 }
 0xde8   : > { %v6344_v53 = vmul.f32 %v11787_v0, %v6324_v31  ;;  %v6287_v52 = vmul.f32 0.5, %v6286_v17 }
 0xde9   : > { %v6208_v47 = vsub.f32 1.5, %v6207_v48 }
 0xdea   : > { %v7512_v46 = vpop.eup %7511  ;;  %v6364_v41 = vadd.f32 %v11792_v2, %v6344_v53  ;;  %v6288_v12 = vsub.f32 1.5, %v6287_v52 }
 0xdeb   : > { %v6209_v55 = vmul.f32 %v7508_v9, %v6208_v47  ;;  %v6255_v61 = vmul.f32 %v7512_v46, %v6157_v56  ;;  %vm6261_vm2 = vweird.f32 %v7512_v46 }
 0xdec   : > { %6380 = vst [vmem:[%s8348_s1] sm:$0xff] %v6364_v41  ;;  %v6289_v22 = vmul.f32 %v7510_v24, %v6288_v12  ;;  %vm6262_vm8 = vmor %vm6260_vm7, %vm6261_vm2 }
 0xded   : > { %v6213_v27 = vsel %vm6212_vm4, %v7508_v9, %v6209_v55  ;;  %v6256_v54 = vmul.f32 %v7512_v46, %v6255_v61 }
 0xdee   : > { %v6328_v3 = vmul.f32 %v6213_v27, %v11704_v58  ;;  %v6293_v44 = vsel %vm6292_vm6, %v7510_v24, %v6289_v22 }
 0xdef   : > { %v6336_v42 = vmul.f32 %v6293_v44, %v11700_v36  ;;  %v6257_v5 = vmul.f32 0.5, %v6256_v54  ;;  %v6103_v63 = vpop.xlane.xlu2 %6102 }
 0xdf0   : > { %v6348_v21 = vmul.f32 %v11787_v0, %v6328_v3  ;;  %v6133_v7 = vmul.f32 %v6103_v63, %v11678_v32 }
 0xdf1   : > { %v6356_v38 = vmul.f32 %v11787_v0, %v6336_v42  ;;  %v6258_v29 = vsub.f32 1.5, %v6257_v5 }
 0xdf2   : > { %v6368_v19 = vadd.f32 %v11792_v2, %v6348_v21  ;;  %v6149_v34 = vadd.f32 1e-05, %v6133_v7 }
 0xdf3   : > { %v6376_v20 = vadd.f32 %v11792_v2, %v6356_v38  ;;  %v6259_v58 = vmul.f32 %v7512_v46, %v6258_v29 }
 0xdf4   : > { %6384 = vst [vmem:[%s8348_s1 + $0x20] sm:$0xff] %v6368_v19  ;;  %7513 = vrsqrt.f32 %v6149_v34  ;;  %vm6180_vm10 = vweird.f32 %v6149_v34 }
 0xdf5   : > { %6392 = vst [vmem:[%s8348_s1 + $0x60] sm:$0xff] %v6376_v20  ;;  %v6263_v36 = vsel %vm6262_vm8, %v7512_v46, %v6259_v58 }
 0xdf6   : > { %v6333_v43 = vmul.f32 %v6263_v36, %v11712_v50 }
 0xdf7   : > { %v6111_v1 = vpop.xlane.xlu0 %6110 }
 0xdf8   : > { %v6353_v26 = vmul.f32 %v11787_v0, %v6333_v43  ;;  %v6137_v8 = vmul.f32 %v6111_v1, %v11678_v32 }
 0xdfa   : > { %v7514_v51 = vpop.eup %7513  ;;  %v6373_v4 = vadd.f32 %v11792_v2, %v6353_v26  ;;  %v6153_v6 = vadd.f32 1e-05, %v6137_v8 }
 0xdfb   : > { %v6175_v13 = vmul.f32 %v7514_v51, %v6149_v34  ;;  %vm6181_vm9 = vweird.f32 %v7514_v51 }
 0xdfc   : > { %6389 = vst [vmem:[%s8348_s1 + $0x48] sm:$0xff] %v6373_v4  ;;  %7515 = vrsqrt.f32 %v6153_v6  ;;  %vm6182_vm11 = vmor %vm6180_vm10, %vm6181_vm9  ;;  %vm6220_vm13 = vweird.f32 %v6153_v6 }
 0xdfd   : > { %v6176_v40 = vmul.f32 %v7514_v51, %v6175_v13  ;;  %v6121_v11 = vpop.xlane.xlu2 %6120 }
 0xdfe   : > { %v6142_v57 = vmul.f32 %v6121_v11, %v11678_v32 }
 0xdff   : > { %v6177_v16 = vmul.f32 0.5, %v6176_v40 }
 0xe00   : > { %v6158_v59 = vadd.f32 1e-05, %v6142_v57 }
 0xe01   : > { %v6178_v9 = vsub.f32 1.5, %v6177_v16 }
 0xe02   : > { %v7516_v50 = vpop.eup %7515  ;;  %7517 = vrsqrt.f32 %v6158_v59  ;;  %vm6270_vm0 = vweird.f32 %v6158_v59 }
 0xe03   : > { %v6179_v56 = vmul.f32 %v7514_v51, %v6178_v9  ;;  %v6215_v24 = vmul.f32 %v7516_v50, %v6153_v6  ;;  %vm6221_vm12 = vweird.f32 %v7516_v50 }
 0xe04   : > { %vm6222_vm14 = vmor %vm6220_vm13, %vm6221_vm12 }
 0xe05   : > { %v6183_v28 = vsel %vm6182_vm11, %v7514_v51, %v6179_v56  ;;  %v6216_v39 = vmul.f32 %v7516_v50, %v6215_v24 }
 0xe06   : > { %v6325_v37 = vmul.f32 %v6183_v28, %v11718_v14 }
 0xe07   : > { %v6217_v23 = vmul.f32 0.5, %v6216_v39 }
 0xe08   : > { %v7518_v35 = vpop.eup %7517  ;;  %v6345_v31 = vmul.f32 %v11787_v0, %v6325_v37 }
 0xe09   : > { %v6218_v17 = vsub.f32 1.5, %v6217_v23  ;;  %v6265_v48 = vmul.f32 %v7518_v35, %v6158_v59  ;;  %vm6271_vm15 = vweird.f32 %v7518_v35 }
 0xe0a   : > { %v6365_v53 = vadd.f32 %v11792_v2, %v6345_v31  ;;  %vm6272_vm1 = vmor %vm6270_vm0, %vm6271_vm15 }
 0xe0b   : > { %v6219_v52 = vmul.f32 %v7516_v50, %v6218_v17  ;;  %v6266_v47 = vmul.f32 %v7518_v35, %v6265_v48 }
 0xe0c   : > { %6381 = vst [vmem:[%s8348_s1 + $0x8] sm:$0xff] %v6365_v53 }
 0xe0d   : > { %v6223_v46 = vsel %vm6222_vm14, %v7516_v50, %v6219_v52  ;;  %v6267_v41 = vmul.f32 0.5, %v6266_v47 }
 0xe0e   : > { %v6329_v12 = vmul.f32 %v6223_v46, %v11724_v30 }
 0xe0f   : > { %v6268_v14 = vsub.f32 1.5, %v6267_v41  ;;  %v6105_v55 = vpop.xlane.xlu0 %6104 }
 0xe10   : > { %v6349_v61 = vmul.f32 %v11787_v0, %v6329_v12  ;;  %v6134_v22 = vmul.f32 %v6105_v55, %v11678_v32 }
 0xe11   : > { %v6269_v27 = vmul.f32 %v7518_v35, %v6268_v14 }
 0xe12   : > { %v6369_v54 = vadd.f32 %v11792_v2, %v6349_v61  ;;  %v6150_v3 = vadd.f32 1e-05, %v6134_v22 }
 0xe13   : > { %v6273_v44 = vsel %vm6272_vm1, %v7518_v35, %v6269_v27 }
 0xe14   : > { %6385 = vst [vmem:[%s8348_s1 + $0x28] sm:$0xff] %v6369_v54  ;;  %v6334_v42 = vmul.f32 %v6273_v44, %v11730_v60  ;;  %7519 = vrsqrt.f32 %v6150_v3  ;;  %vm6190_vm4 = vweird.f32 %v6150_v3 }
 0xe16   : > { %v6354_v30 = vmul.f32 %v11787_v0, %v6334_v42 }
 0xe17   : > { %v6113_v5 = vpop.xlane.xlu1 %6112 }
 0xe18   : > { %v6374_v63 = vadd.f32 %v11792_v2, %v6354_v30  ;;  %v6138_v21 = vmul.f32 %v6113_v5, %v11678_v32 }
 0xe1a   : > { %v7520_v7 = vpop.eup %7519  ;;  %6390 = vst [vmem:[%s8348_s1 + $0x50] sm:$0xff] %v6374_v63  ;;  %v6154_v38 = vadd.f32 1e-05, %v6138_v21 }
 0xe1b   : > { %v6185_v29 = vmul.f32 %v7520_v7, %v6150_v3  ;;  %vm6191_vm3 = vweird.f32 %v7520_v7 }
 0xe1c   : > { %7521 = vrsqrt.f32 %v6154_v38  ;;  %vm6192_vm5 = vmor %vm6190_vm4, %vm6191_vm3  ;;  %vm6230_vm2 = vweird.f32 %v6154_v38 }
 0xe1d   : > { %v6186_v19 = vmul.f32 %v7520_v7, %v6185_v29 }
 0xe1f   : > { %v6187_v34 = vmul.f32 0.5, %v6186_v19 }
 0xe21   : > { %v6188_v20 = vsub.f32 1.5, %v6187_v34 }
 0xe22   : > { %v7522_v58 = vpop.eup %7521 }
 0xe23   : > { %v6189_v36 = vmul.f32 %v7520_v7, %v6188_v20  ;;  %v6225_v60 = vmul.f32 %v7522_v58, %v6154_v38  ;;  %vm6231_vm6 = vweird.f32 %v7522_v58 }
 0xe24   : > { %vm6232_vm7 = vmor %vm6230_vm2, %vm6231_vm6 }
 0xe25   : > { %v6193_v43 = vsel %vm6192_vm5, %v7520_v7, %v6189_v36  ;;  %v6226_v1 = vmul.f32 %v7522_v58, %v6225_v60 }
 0xe26   : > { %v6326_v26 = vmul.f32 %v6193_v43, %v11736_v62 }
 0xe27   : > { %v6227_v8 = vmul.f32 0.5, %v6226_v1  ;;  %v6107_v51 = vpop.xlane.xlu1 %6106 }
 0xe28   : > { %v6346_v4 = vmul.f32 %v11787_v0, %v6326_v26  ;;  %v6135_v6 = vmul.f32 %v6107_v51, %v11678_v32 }
 0xe29   : > { %v6228_v13 = vsub.f32 1.5, %v6227_v8 }
 0xe2a   : > { %v6366_v40 = vadd.f32 %v11792_v2, %v6346_v4  ;;  %v6151_v11 = vadd.f32 1e-05, %v6135_v6 }
 0xe2b   : > { %v6229_v57 = vmul.f32 %v7522_v58, %v6228_v13 }
 0xe2c   : > { %6382 = vst [vmem:[%s8348_s1 + $0x10] sm:$0xff] %v6366_v40  ;;  %7523 = vrsqrt.f32 %v6151_v11  ;;  %vm6200_vm9 = vweird.f32 %v6151_v11 }
 0xe2d   : > { %v6233_v16 = vsel %vm6232_vm7, %v7522_v58, %v6229_v57 }
 0xe2e   : > { %v6330_v62 = vmul.f32 %v6233_v16, %v11742_v49  ;;  %v6115_v59 = vpop.xlane.xlu2 %6114 }
 0xe2f   : > { %v6139_v9 = vmul.f32 %v6115_v59, %v11678_v32  ;;  %v6123_v50 = vpop.xlane.xlu0 %6122  ;;  %v6131_v56 = vpop.xlane.xlu1 %6130 }
 0xe30   : > { %v6350_v24 = vmul.f32 %v11787_v0, %v6330_v62  ;;  %v6143_v28 = vmul.f32 %v6123_v50, %v11678_v32  ;;  %v6147_v39 = vmul.f32 %v6131_v56, %v11678_v32 }
 0xe31   : > { %v6155_v37 = vadd.f32 1e-05, %v6139_v9 }
 0xe32   : > { %v7524_v23 = vpop.eup %7523  ;;  %v6370_v35 = vadd.f32 %v11792_v2, %v6350_v24  ;;  %v6159_v31 = vadd.f32 1e-05, %v6143_v28  ;;  %v6163_v17 = vadd.f32 1e-05, %v6147_v39 }
 0xe33   : > { %v6195_v48 = vmul.f32 %v7524_v23, %v6151_v11  ;;  %7525 = vrsqrt.f32 %v6155_v37  ;;  %vm6201_vm8 = vweird.f32 %v7524_v23  ;;  %vm6240_vm12 = vweird.f32 %v6155_v37 }
 0xe34   : > { %6386 = vst [vmem:[%s8348_s1 + $0x30] sm:$0xff] %v6370_v35  ;;  %7527 = vrsqrt.f32 %v6159_v31  ;;  %vm6202_vm10 = vmor %vm6200_vm9, %vm6201_vm8  ;;  %vm6280_vm0 = vweird.f32 %v6159_v31  ;;  %vm6320_vm1 = vweird.f32 %v6163_v17 }
 0xe35   : > { %v6196_v49 = vmul.f32 %v7524_v23, %v6195_v48  ;;  %7529 = vrsqrt.f32 %v6163_v17 }
 0xe36   : > { %v6127_v53 = vpop.xlane.xlu2 %6126 }
 0xe37   : > { %v6197_v52 = vmul.f32 0.5, %v6196_v49  ;;  %v6145_v47 = vmul.f32 %v6127_v53, %v11678_v32  ;;  %v6129_v46 = vpop.xlane.xlu0 %6128 }
 0xe38   : > { %v6146_v41 = vmul.f32 %v6129_v46, %v11678_v32 }
 0xe39   : > { %v7526_v12 = vpop.eup %7525  ;;  %v6198_v14 = vsub.f32 1.5, %v6197_v52  ;;  %v11848_v55 = vadd.f32 1e-05, %v6145_v47 }
 0xe3a   : > { %v7528_v61 = vpop.eup %7527  ;;  %v6235_v22 = vmul.f32 %v7526_v12, %v6155_v37  ;;  %v11850_v27 = vadd.f32 1e-05, %v6146_v41  ;;  %vm6241_vm11 = vweird.f32 %v7526_v12 }
 0xe3b   : > { %v7530_v54 = vpop.eup %7529  ;;  %v6199_v3 = vmul.f32 %v7524_v23, %v6198_v14  ;;  %v6275_v44 = vmul.f32 %v7528_v61, %v6159_v31  ;;  %7531 = vrsqrt.f32 %v11848_v55  ;;  %vm6281_vm13 = vweird.f32 %v7528_v61  ;;  %vm6242_vm15 = vmor %vm6240_vm12, %vm6241_vm11 }
 0xe3c   : > { %v6236_v42 = vmul.f32 %v7526_v12, %v6235_v22  ;;  %v6315_v30 = vmul.f32 %v7530_v54, %v6163_v17  ;;  %7533 = vrsqrt.f32 %v11850_v27  ;;  %vm6321_vm14 = vweird.f32 %v7530_v54  ;;  %vm6282_vm3 = vmor %vm6280_vm0, %vm6281_vm13 }
 0xe3d   : > { %v6203_v5 = vsel %vm6202_vm10, %v7524_v23, %v6199_v3  ;;  %v6276_v32 = vmul.f32 %v7528_v61, %v6275_v44  ;;  %vm6322_vm4 = vmor %vm6320_vm1, %vm6321_vm14  ;;  %vm6300_vm6 = vweird.f32 %v11848_v55  ;;  %vm6310_vm8 = vweird.f32 %v11850_v27 }
 0xe3e   : > { %v6327_v63 = vmul.f32 %v6203_v5, %v11748_v25  ;;  %v6237_v21 = vmul.f32 0.5, %v6236_v42  ;;  %v6316_v7 = vmul.f32 %v7530_v54, %v6315_v30 }
 0xe3f   : > { %v6277_v38 = vmul.f32 0.5, %v6276_v32 }
 0xe40   : > { %v6347_v29 = vmul.f32 %v11787_v0, %v6327_v63  ;;  %v6238_v19 = vsub.f32 1.5, %v6237_v21  ;;  %v6317_v34 = vmul.f32 0.5, %v6316_v7 }
 0xe41   : > { %v7532_v20 = vpop.eup %7531  ;;  %v6278_v58 = vsub.f32 1.5, %v6277_v38 }
 0xe42   : > { %v6367_v36 = vadd.f32 %v11792_v2, %v6347_v29  ;;  %v6239_v60 = vmul.f32 %v7526_v12, %v6238_v19  ;;  %v6318_v43 = vsub.f32 1.5, %v6317_v34  ;;  %v6295_v25 = vmul.f32 %v7532_v20, %v11848_v55  ;;  %v7534_v1 = vpop.eup %7533 }
 0xe43   : > { %v6279_v26 = vmul.f32 %v7528_v61, %v6278_v58  ;;  %v6305_v6 = vmul.f32 %v7534_v1, %v11850_v27  ;;  %vm6301_vm5 = vweird.f32 %v7532_v20  ;;  %vm6311_vm2 = vweird.f32 %v7534_v1 }
 0xe44   : > { %6383 = vst [vmem:[%s8348_s1 + $0x18] sm:$0xff] %v6367_v36  ;;  %v6243_v8 = vsel %vm6242_vm15, %v7526_v12, %v6239_v60  ;;  %v6319_v51 = vmul.f32 %v7530_v54, %v6318_v43  ;;  %v6296_v4 = vmul.f32 %v7532_v20, %v6295_v25  ;;  %vm6302_vm7 = vmor %vm6300_vm6, %vm6301_vm5 }
 0xe45   : > { %v6331_v13 = vmul.f32 %v6243_v8, %v11759_v10  ;;  %v6283_v40 = vsel %vm6282_vm3, %v7528_v61, %v6279_v26  ;;  %v6306_v62 = vmul.f32 %v7534_v1, %v6305_v6  ;;  %vm6312_vm9 = vmor %vm6310_vm8, %vm6311_vm2 }
 0xe46   : > { %v6335_v11 = vmul.f32 %v6283_v40, %v11762_v18  ;;  %v6323_v57 = vsel %vm6322_vm4, %v7530_v54, %v6319_v51  ;;  %v6297_v16 = vmul.f32 0.5, %v6296_v4 }
 0xe47   : > { %v6351_v59 = vmul.f32 %v11787_v0, %v6331_v13  ;;  %v6339_v9 = vmul.f32 %v6323_v57, %v11755_v15  ;;  %v6307_v10 = vmul.f32 0.5, %v6306_v62 }
 0xe48   : > { %v6355_v50 = vmul.f32 %v11787_v0, %v6335_v11  ;;  %v6298_v56 = vsub.f32 1.5, %v6297_v16 }
 0xe49   : > { %v6371_v24 = vadd.f32 %v11792_v2, %v6351_v59  ;;  %v6359_v28 = vmul.f32 %v11787_v0, %v6339_v9  ;;  %v6308_v37 = vsub.f32 1.5, %v6307_v10 }
 0xe4a   : > { %v6375_v18 = vadd.f32 %v11792_v2, %v6355_v50  ;;  %v6299_v39 = vmul.f32 %v7532_v20, %v6298_v56 }
 0xe4b   : > { %6387 = vst [vmem:[%s8348_s1 + $0x38] sm:$0xff] %v6371_v24  ;;  %v6379_v15 = vadd.f32 %v11792_v2, %v6359_v28  ;;  %v6309_v35 = vmul.f32 %v7534_v1, %v6308_v37 }
 0xe4c   : > { %6391 = vst [vmem:[%s8348_s1 + $0x58] sm:$0xff] %v6375_v18  ;;  %v6303_v23 = vsel %vm6302_vm7, %v7532_v20, %v6299_v39 }
 0xe4d   : > { %6395 = vst [vmem:[%s8348_s1 + $0x78] sm:$0xff] %v6379_v15  ;;  %v6337_v31 = vmul.f32 %v6303_v23, %v11772_v45  ;;  %v6313_v17 = vsel %vm6312_vm9, %v7534_v1, %v6309_v35 }
 0xe4e   : > { %v6338_v49 = vmul.f32 %v6313_v17, %v11777_v33 }
 0xe4f   : > { %v6357_v48 = vmul.f32 %v11787_v0, %v6337_v31 }
 0xe50   : > { %v6358_v52 = vmul.f32 %v11787_v0, %v6338_v49 }
 0xe51   : > { %v6377_v53 = vadd.f32 %v11792_v2, %v6357_v48 }
 0xe52   : > { %v6378_v47 = vadd.f32 %v11792_v2, %v6358_v52 }
 0xe53   : > { %6393 = vst [vmem:[%s8348_s1 + $0x68] sm:$0xff] %v6377_v53 }
 0xe54   : > { %6394 = vst [vmem:[%s8348_s1 + $0x70] sm:$0xff] %v6378_v47 }
 0xe55 PF: > { %s12619_s13 = sld [smem:[#allocation35_spill]]  ;;  %s6411_s0 = sshll.u32 %s8348_s1, 4  ;;  %s6412_s0 = int_to_ptr.vmem [resolvable:$true] %s6411_s0 }
 0xe56   : > { %s12620_s2 = sld [smem:[#allocation36_spill]]  ;;  %s6397_s24 = scalar_lea.sflag [#allocation11], %s8315_s16 }
 0xe57   : > { %s12621_s18 = sld [smem:[#allocation209_spill]] }
 0xe5b   : > { %s6759_s6 = sshll.u32 %s12619_s13, 4 }
 0xe5c   : > { %s6760_s12 = sshll.u32 %s12620_s2, 5 }
 0xe5d   : > { %s6408_s17 = sadd.s32 %s6760_s12, %s6759_s6  ;;  %s12622_s5 = smov %s12621_s18 }
 0xe5e   : > { %s6761_s3 = sshll.u32 %s6408_s17, 3  ;;  %s7765_s1 = scalar_lea.hbm %s12622_s5, 512 }
 0xe5f   : > { %s6410_s28 = scalar_lea.hbm %s12621_s18, %s6761_s3 }
 0xe60   : > { %s6413_s7 = sshll.u32 %s6410_s28, 4  ;;  %s6414_s7 = int_to_ptr.hbm [resolvable:$true] %s6413_s7 }
 0xe61   : > { %s7759_s26 = sshra.s32 %s6414_s7, 4  ;;  %s7760_s26 = int_to_ptr.hbm [resolvable:$true] %s7759_s26 }
 0xe62   : > { %s7761_s14 = scalar_lea.hbm %s7760_s26, 128  ;;  %p7766_p9 = scmp.lt.s32.totalorder %s7760_s26, %s12622_s5 }
 0xe63   : > { %p7762_p10 = scmp.ne.s32.totalorder %s7760_s26, %s7761_s14  ;;  %p7767_p4 = scmp.lt.s32.totalorder %s7765_s1, %s7761_s14 }
 0xe65   : > { %p7763_p13 = pnand %p7762_p10, %p8233_p6  ;;  %p7768_p7 = por %p7767_p4, %p7766_p9 }
 0xe67   : > { %p7764_p0 = pneg %p7763_p13 }
 0xe69   : > { %p7769_p3 = pnand %p7768_p7, %p7764_p0 }
 0xe6b   : > { %7772 = shalt.err (!%p7769_p3)
}
 0xe6c   : > { %s7946_s16 = smov 128   ;;  %s7947_s9 = smov 8  }
 0xe6d   : > { %6915 = dma.vmem_to_hbm [thread:$0]  (%p8233_p6), %s6412_s0, 2048, %s6414_s7, %s6397_s24, %s7946_s16, %s7946_s16, %s7947_s9  }
 0xe6e PF: > { %s12623_s13 = sld [smem:[#allocation32_spill]]  ;;  %p6953_p11 = scmp.ge.s32.totalorder %s7923_s23, 2 }
 0xe70   : > { %p6941_p5 = pnand %p6953_p11, %p8244_p1 }
 0xe72   : > { %p6942_p12 = pneg %p6941_p5 }
 0xe74   : > { %s6428_s6 = sand.u32 1, %s12623_s13  }
 0xe75   : > { %s6429_s12 = scalar_lea.sflag [#allocation11], %s6428_s6 }
 0xe76   : > { %7858 = dma.done.wait (%p6942_p12), %s6429_s12, 2048  }
 0xe77   : > { %7860 = vsyncadd (%p6942_p12), %s6429_s12, 4294965248  ;;  %s34_s23 = sadd.s32 1, %s7923_s23   ;;  %s12626_s25 = sld [smem:[#allocation29_spill]] }
 0xe78   : > { %p11905_p2 = scmp.ge.s32.totalorder %s34_s23, 10   ;;  %s12627_s26 = sld [smem:[#allocation30_spill]] }
 0xe79   : > { %s12628_s28 = sld [smem:[#allocation31_spill]]  ;;  %s12636_s27 = smov %s8282_s29 }
 0xe7a   : > { %s12629_s0 = sld [smem:[#allocation44_spill]]  ;;  %s12637_s29 = smov %s7883_s30 }
 0xe7b   : > { %s12630_s3 = sld [smem:[#allocation33_spill]]  ;;  %s12639_s14 = smov %s7891_s15 }
 0xe7c   : > { %s12631_s16 = sld [smem:[#allocation43_spill]]  ;;  %s12641_s17 = smov %s7911_s20 }
 0xe7d   : > { %s12632_s8 = sld [smem:[#allocation38_spill]]  ;;  %s12642_s18 = smov %s7915_s21 }
 0xe7e   : > { %s12633_s11 = sld [smem:[#allocation40_spill]]  ;;  %s12643_s19 = smov %s7919_s22 }
 0xe7f   : > { %s12634_s7 = sld [smem:[#allocation41_spill]] }
 0xe80   : > { %s12638_s30 = smov %s12629_s0 }
 0xe81   : > { %s12640_s15 = smov %s12630_s3  ;;  %33 = sbr.rel (!%p11905_p2) target bundleno = 30 (0x1e), region = 174 }
 0xe83   : > { %s12644_s20 = smov %s12632_s8 }
 0xe84   : > { %s12645_s21 = smov %s12633_s11 }
 0xe85   : > { %s12646_s22 = smov %s12634_s7 }
 0xe86   :  { %6435 = vsyncpa [#allocation10], 1 }
 0xe87   :  { %6437 = vsyncpa [#allocation10 + $0x1], 1 }
 0xe88   :  { %6438 = vsyncpa [#allocation13], 1 }
 0xe89   :  { %6440 = vsyncpa [#allocation13 + $0x1], 1 }
 0xe8a   :  { %6441 = vsyncpa [#allocation16], 1 }
 0xe8b   :  { %6442 = vsyncpa [#allocation19], 1 }
 0xe8c   :  { %6443 = vsyncpa [#allocation11], 1 }
 0xe8d   :  { %6445 = vsyncpa [#allocation11 + $0x1], 1 }

</bundles_post_ra>
